<compile_context>
chip_gen: v7x
topology: tpu7x:2x2x1
jax: 0.10.0
libtpu: 0.0.40
codegen_flags: <defaults>
</compile_context>

<pallas_src>
import functools

import jax
import jax.numpy as jnp
import numpy as np
from jax.experimental import pallas as pl
from jax.experimental.pallas import tpu as pltpu

LN_EPS = 1e-6
GELU_C = 0.7978845608028654   # sqrt(2/pi)
GELU_A = 0.044715


def _gelu_tanh(x):
    # TODO(synk): nn.GELU() default is the exact erf GELU; the tanh form used
    # here (single EUP tanh) differs by <~1e-3 absolute, covered by the relaxed
    # bf16 tolerance below.
    return 0.5 * x * (1.0 + jnp.tanh(GELU_C * (x + GELU_A * x * x * x)))


def convnext_fused_kernel(body_ref, halo_ref, convw_ref, convb_ref,
                          lnw_ref, lnb_ref, w1_ref, b1_ref, w2_ref, b2_ref,
                          g_ref, o_ref, slab_ref, *, conv_bf16):
    """One (batch, H-tile) step: dwconv -> LN -> MLP -> gamma -> +residual.

    body_ref: (1, TH, Wp, Dp, C)  W/D-padded rows of this tile (no H halo)
    halo_ref: (1, 2p, Wp, Dp, C)  top p + bottom p halo rows (zeros at edges)
    slab_ref: (TH+2p, Wp, Dp, C)  VMEM scratch: assembled padded slab
    o_ref   : (1, TH, W, D, C)
    """
    _, TH, W, D, C = o_ref.shape
    k = convw_ref.shape[0]
    p = k // 2

    # ---- assemble the zero-padded slab in VMEM: [top halo | body | bottom halo]
    body = body_ref[0]                                     # (TH, Wp, Dp, C)
    halo = halo_ref[0]                                     # (2p, Wp, Dp, C)
    slab_ref[0:p] = halo[0:p]
    slab_ref[p:p + TH] = body
    slab_ref[p + TH:] = halo[p:]
    x = slab_ref[...]                                      # (TH+2p, Wp, Dp, C)

    # residual == un-padded interior of the body (no separate input stream)
    res = body[:, p:p + W, p:p + D, :].astype(jnp.float32)  # (TH, W, D, C)

    # ---- depthwise conv: bf16 taps where the VPU supports it, f32 accumulation
    cdt = jnp.bfloat16 if conv_bf16 else jnp.float32
    xc = x.astype(cdt)
    w = convw_ref[...].astype(cdt)                         # (k, k, k, 1, C)
    acc = jnp.broadcast_to(
        convb_ref[...].astype(jnp.float32).reshape(1, 1, 1, C), (TH, W, D, C))
    for kd in range(k):
        # one D(sublane)-shifted view live at a time; kh/kw are leading-dim slices
        xk = xc[:, :, kd:kd + D, :]                        # (TH+2p, Wp, D, C)
        for kh in range(k):
            for kw in range(k):
                tap = w[kh, kw, kd]                        # (1, C) per-channel
                acc = acc + xk[kh:kh + TH, kw:kw + W] * tap

    # ---- LayerNorm over C (tokens = TH*W*D, channels-last) -------------------
    n_tok = TH * W * D
    t = acc.reshape(n_tok, C)
    mean = jnp.mean(t, axis=-1, keepdims=True)
    tc = t - mean
    var = jnp.mean(tc * tc, axis=-1, keepdims=True)        # biased, like nn.LayerNorm
    tn = tc * jax.lax.rsqrt(var + LN_EPS)
    tn = tn * lnw_ref[...].astype(jnp.float32) + lnb_ref[...].astype(jnp.float32)

    # ---- pointwise MLP on the MXU (bf16 operands, f32 accumulation) ----------
    h = jnp.dot(tn.astype(jnp.bfloat16), w1_ref[...],
                preferred_element_type=jnp.float32) + b1_ref[...].astype(jnp.float32)
    h = _gelu_tanh(h)
    y = jnp.dot(h.astype(jnp.bfloat16), w2_ref[...],
                preferred_element_type=jnp.float32) + b2_ref[...].astype(jnp.float32)
    y = y * g_ref[...].astype(jnp.float32)

    out = res.reshape(n_tok, C) + y
    o_ref[0] = out.reshape(TH, W, D, C).astype(o_ref.dtype)


# --------------------------------------------------------------------------- #
# wrapper-side heuristics
# --------------------------------------------------------------------------- #
def _vpu_supports_bf16():
    """bf16 VALU exists on v6e/v7x; keep conv taps in f32 on v5e / unknown."""
    try:
        kind = jax.devices()[0].device_kind.lower()
    except Exception:
        return False
    return any(tag in kind for tag in ("v6", "v7", "7x"))


def _vmem_budget():
    """Generation-aware (vmem_limit_bytes, per-step working-set budget)."""
    try:
        cap = int(pltpu.get_tpu_info().vmem_capacity_bytes)  # 128 MiB v5e/v6e, 64 MiB v7x
    except Exception:
        cap = 64 * 1024 * 1024                               # conservative fallback
    limit = max(32 * 2**20, min(cap * 3 // 4, 100 * 2**20))
    return limit, int(limit * 0.7)


def _tile_vmem_bytes(TH, W, D, C, k, p, conv_bf16):
    """Honest-ish f32/bf16 working-set estimate for one grid step."""
    f32, bf16 = 4, 2
    cdt = bf16 if conv_bf16 else f32
    Wp, Dp = W + 2 * p, D + 2 * p
    slab = (TH + 2 * p) * Wp * Dp * C
    tok = TH * W * D
    b = 0
    b += 2 * TH * Wp * Dp * C * f32          # body block, double-buffered
    b += 2 * 2 * p * Wp * Dp * C * f32       # halo block, double-buffered
    b += 2 * tok * C * f32                   # output block, double-buffered
    b += slab * f32                          # assembled slab scratch
    b += slab * cdt                          # conv-dtype slab copy
    b += slab * cdt                          # one D-shifted view live at a time
    b += 3 * tok * C * f32                   # acc / LN temp / residual
    b += tok * 4 * C * (f32 + bf16)          # hidden h (f32) + bf16 cast
    b += tok * C * f32                       # y
    b += 2 * 4 * C * C * bf16 + 16 * C * f32  # resident weights (approx)
    return b


def _choose_tile_h(B, H, W, D, C, k, p, budget, conv_bf16):
    divisors = [d for d in range(1, H + 1) if H % d == 0]
    fitting = [d for d in divisors
               if _tile_vmem_bytes(d, W, D, C, k, p, conv_bf16) <= budget]
    if not fitting:
        # TODO(synk): add W/D tiling for huge W*D*C; TH=1 may still exceed budget.
        fitting = [1]
    prefs = (
        # >=2 H-tiles (halo path exercised) and even B*nH (v7x 2-TC split)
        lambda d: H // d >= 2 and (B * (H // d)) % 2 == 0,
        lambda d: H // d >= 2,
        lambda d: (B * (H // d)) % 2 == 0,
        lambda d: True,
    )
    for pred in prefs:
        cands = [d for d in fitting if pred(d)]
        if cands:
            return max(cands)
    return max(fitting)


# --------------------------------------------------------------------------- #
# public entry point
# --------------------------------------------------------------------------- #
def convnext_block(x, params):
    """ConvNeXtBlock forward.  x: (B, C, H, W, D) float32 (PyTorch layout)."""
    B, C, H, W, D = x.shape
    k = params["conv_w"].shape[0]
    assert k % 2 == 1 and k >= 3, "odd kernel size >= 3 expected"
    p = (k - 1 + 1) // 2                      # get_padding(kernel_size, stride=1)
    Wp, Dp = W + 2 * p, D + 2 * p

    conv_bf16 = _vpu_supports_bf16()
    vmem_limit, tile_budget = _vmem_budget()
    TH = _choose_tile_h(B, H, W, D, C, k, p, tile_budget, conv_bf16)
    nH = H // TH

    # channels-last, W/D "same"-padded activation (single wrapper-side pass);
    # per-tile H halos (2p rows each) are gathered separately and are tiny.
    xcl = jnp.transpose(x, (0, 2, 3, 4, 1))                        # (B,H,W,D,C)
    xwd = jnp.pad(xcl, ((0, 0), (0, 0), (p, p), (p, p), (0, 0)))   # (B,H,Wp,Dp,C)
    zhalo = jnp.zeros((B, p, Wp, Dp, C), xwd.dtype)
    halos = jnp.stack(
        [jnp.concatenate(
            [zhalo if i == 0 else xwd[:, i * TH - p:i * TH],
             xwd[:, (i + 1) * TH:(i + 1) * TH + p] if i < nH - 1 else zhalo],
            axis=1) for i in range(nH)],
        axis=1).reshape(B * nH, 2 * p, Wp, Dp, C)

    # bf16 copies of the MXU weights (half the resident VMEM, full MXU rate)
    w1 = params["w1"].astype(jnp.bfloat16)
    w2 = params["w2"].astype(jnp.bfloat16)

    kernel = functools.partial(convnext_fused_kernel, conv_bf16=conv_bf16)
    out = pl.pallas_call(
        kernel,
        out_shape=jax.ShapeDtypeStruct((B, H, W, D, C), x.dtype),
        grid=(B, nH),
        in_specs=[
            pl.BlockSpec((1, TH, Wp, Dp, C), lambda b, i: (b, i, 0, 0, 0)),
            pl.BlockSpec((1, 2 * p, Wp, Dp, C),
                         lambda b, i, nH=nH: (b * nH + i, 0, 0, 0, 0)),
            # parameters: constant block index -> stay resident across steps
            pl.BlockSpec((k, k, k, 1, C), lambda b, i: (0, 0, 0, 0, 0)),
            pl.BlockSpec((1, C), lambda b, i: (0, 0)),        # conv bias
            pl.BlockSpec((1, C), lambda b, i: (0, 0)),        # LN weight
            pl.BlockSpec((1, C), lambda b, i: (0, 0)),        # LN bias
            pl.BlockSpec((C, 4 * C), lambda b, i: (0, 0)),    # pwconv1 W (bf16)
            pl.BlockSpec((1, 4 * C), lambda b, i: (0, 0)),    # pwconv1 b
            pl.BlockSpec((4 * C, C), lambda b, i: (0, 0)),    # pwconv2 W (bf16)
            pl.BlockSpec((1, C), lambda b, i: (0, 0)),        # pwconv2 b
            pl.BlockSpec((1, C), lambda b, i: (0, 0)),        # gamma
        ],
        out_specs=pl.BlockSpec((1, TH, W, D, C), lambda b, i: (b, i, 0, 0, 0)),
        scratch_shapes=[pltpu.VMEM((TH + 2 * p, Wp, Dp, C), x.dtype)],
        compiler_params=pltpu.CompilerParams(
            dimension_semantics=("parallel", "parallel"),
            vmem_limit_bytes=vmem_limit),
    )(xwd, halos, params["conv_w"], params["conv_b"],
      params["ln_w"], params["ln_b"], w1, params["b1"],
      w2, params["b2"], params["gamma"])

    return jnp.transpose(out, (0, 4, 1, 2, 3))                     # (B,C,H,W,D)


# --------------------------------------------------------------------------- #
# parameters + pure-JAX reference (mirrors the PyTorch forward)
# --------------------------------------------------------------------------- #
def init_params(key, C, k, layer_scale_init_value=0.1):
    ks = jax.random.split(key, 8)
    return {
        "conv_w": 0.2 * jax.random.normal(ks[0], (k, k, k, 1, C), jnp.float32),
        "conv_b": 0.1 * jax.random.normal(ks[1], (1, C), jnp.float32),
        "ln_w": 1.0 + 0.1 * jax.random.normal(ks[2], (1, C), jnp.float32),
        "ln_b": 0.1 * jax.random.normal(ks[3], (1, C), jnp.float32),
        # Linear weights stored (in, out); PyTorch stores (out, in) and does x @ W.T.
        "w1": jax.random.normal(ks[4], (C, 4 * C), jnp.float32) / np.sqrt(C),
        "b1": 0.1 * jax.random.normal(ks[5], (1, 4 * C), jnp.float32),
        "w2": jax.random.normal(ks[6], (4 * C, C), jnp.float32) / np.sqrt(4 * C),
        "b2": 0.1 * jax.random.normal(ks[7], (1, C), jnp.float32),
        # gamma initialised to layer_scale_init_value * ones, as in the module.
        "gamma": jnp.full((1, C), layer_scale_init_value, jnp.float32),
    }


def reference(x, params):
    """Pure-JAX f32 reference mirroring the PyTorch forward (for verification)."""
    B, C, H, W, D = x.shape
    k = params["conv_w"].shape[0]
    pad = (k - 1 + 1) // 2
    w = jnp.transpose(params["conv_w"][:, :, :, 0, :], (3, 0, 1, 2))[:, None]  # (C,1,k,k,k)
    y = jax.lax.conv_general_dilated(
        x, w, window_strides=(1, 1, 1), padding=[(pad, pad)] * 3,
        dimension_numbers=("NCDHW", "OIDHW", "NCDHW"), feature_group_count=C)
    y = y + params["conv_b"][0][None, :, None, None, None]
    ycl = jnp.transpose(y, (0, 2, 3, 4, 1))
    mean = jnp.mean(ycl, axis=-1, keepdims=True)
    var = jnp.mean((ycl - mean) ** 2, axis=-1, keepdims=True)
    yn = (ycl - mean) / jnp.sqrt(var + LN_EPS)
    yn = yn * params["ln_w"][0] + params["ln_b"][0]
    h = yn @ params["w1"] + params["b1"][0]
    h = jax.nn.gelu(h, approximate=False)
    z = h @ params["w2"] + params["b2"][0]
    z = z * params["gamma"][0]
    out = jnp.transpose(x, (0, 2, 3, 4, 1)) + z               # drop_path(0.0) == Identity
    return jnp.transpose(out, (0, 4, 1, 2, 3))


if __name__ == "__main__":
    B, C, H, W, D = 2, 8, 8, 8, 8
    k = 3
    key = jax.random.PRNGKey(0)
    kx, kp = jax.random.split(key)
    x = jax.random.normal(kx, (B, C, H, W, D), jnp.float32)
    params = init_params(kp, C, k)

    fwd = jax.jit(convnext_block)
    out = jax.block_until_ready(fwd(x, params))
    ref = jax.block_until_ready(reference(x, params))

    assert out.shape == (B, C, H, W, D)
    err = float(np.max(np.abs(np.asarray(out) - np.asarray(ref))))
    # bf16 MXU/VPU operands + tanh GELU vs. the exact-f32 reference -> relaxed tol.
    assert np.allclose(np.asarray(out), np.asarray(ref), rtol=3e-2, atol=3e-2), err
    print("KERNEL_OK")
</pallas_src>

<mosaic_0001>
module attributes {stable_mosaic.version = 11 : i64} {
  func.func @convnext_fused_kernel(%arg0: i32, %arg1: i32, %arg2: memref<1x4x10x10x8xf32, #tpu.memory_space<vmem>>, %arg3: memref<1x2x10x10x8xf32, #tpu.memory_space<vmem>>, %arg4: memref<3x3x3x1x8xf32, #tpu.memory_space<vmem>>, %arg5: memref<1x8xf32, #tpu.memory_space<vmem>>, %arg6: memref<1x8xf32, #tpu.memory_space<vmem>>, %arg7: memref<1x8xf32, #tpu.memory_space<vmem>>, %arg8: memref<8x32xbf16, #tpu.memory_space<vmem>>, %arg9: memref<1x32xf32, #tpu.memory_space<vmem>>, %arg10: memref<32x8xbf16, #tpu.memory_space<vmem>>, %arg11: memref<1x8xf32, #tpu.memory_space<vmem>>, %arg12: memref<1x8xf32, #tpu.memory_space<vmem>>, %arg13: memref<1x4x8x8x8xf32, #tpu.memory_space<vmem>>, %arg14: memref<6x10x10x8xf32, #tpu.memory_space<vmem>>) attributes {dimension_semantics = [#tpu.dimension_semantics<parallel>, #tpu.dimension_semantics<parallel>], iteration_bounds = array<i64: 2, 2>, scalar_prefetch = 0 : i64, scratch_operands = 1 : i64, tpu.core_type = #tpu.core_type<tc>, window_params = [{transform_indices = @transform_0, window_bounds = array<i64: 1, 4, 10, 10, 8>}, {transform_indices = @transform_1, window_bounds = array<i64: 1, 2, 10, 10, 8>}, {pipeline_mode = #tpu.pipeline_mode<synchronous>, transform_indices = @transform_2, window_bounds = array<i64: 3, 3, 3, 1, 8>}, {pipeline_mode = #tpu.pipeline_mode<synchronous>, transform_indices = @transform_3, window_bounds = array<i64: 1, 8>}, {pipeline_mode = #tpu.pipeline_mode<synchronous>, transform_indices = @transform_4, window_bounds = array<i64: 1, 8>}, {pipeline_mode = #tpu.pipeline_mode<synchronous>, transform_indices = @transform_5, window_bounds = array<i64: 1, 8>}, {pipeline_mode = #tpu.pipeline_mode<synchronous>, transform_indices = @transform_6, window_bounds = array<i64: 8, 32>}, {pipeline_mode = #tpu.pipeline_mode<synchronous>, transform_indices = @transform_7, window_bounds = array<i64: 1, 32>}, {pipeline_mode = #tpu.pipeline_mode<synchronous>, transform_indices = @transform_8, window_bounds = array<i64: 32, 8>}, {pipeline_mode = #tpu.pipeline_mode<synchronous>, transform_indices = @transform_9, window_bounds = array<i64: 1, 8>}, {pipeline_mode = #tpu.pipeline_mode<synchronous>, transform_indices = @transform_10, window_bounds = array<i64: 1, 8>}, {transform_indices = @transform_11, window_bounds = array<i64: 1, 4, 8, 8, 8>}]} {
    %c0 = arith.constant 0 : index
    %c0_0 = arith.constant 0 : index
    %c0_1 = arith.constant 0 : index
    %c0_2 = arith.constant 0 : index
    %c0_3 = arith.constant 0 : index
    %0 = vector.load %arg2[%c0, %c0_0, %c0_1, %c0_2, %c0_3] : memref<1x4x10x10x8xf32, #tpu.memory_space<vmem>>, vector<1x4x10x10x8xf32>
    %1 = vector.shape_cast %0 : vector<1x4x10x10x8xf32> to vector<4x10x10x8xf32>
    %c0_4 = arith.constant 0 : index
    %c0_5 = arith.constant 0 : index
    %c0_6 = arith.constant 0 : index
    %c0_7 = arith.constant 0 : index
    %c0_8 = arith.constant 0 : index
    %2 = vector.load %arg3[%c0_4, %c0_5, %c0_6, %c0_7, %c0_8] : memref<1x2x10x10x8xf32, #tpu.memory_space<vmem>>, vector<1x2x10x10x8xf32>
    %3 = vector.shape_cast %2 : vector<1x2x10x10x8xf32> to vector<2x10x10x8xf32>
    %4 = vector.extract_strided_slice %3 {offsets = [0, 0, 0, 0], sizes = [1, 10, 10, 8], strides = [1, 1, 1, 1]} : vector<2x10x10x8xf32> to vector<1x10x10x8xf32>
    %c0_9 = arith.constant 0 : index
    %c0_10 = arith.constant 0 : index
    %c0_11 = arith.constant 0 : index
    %c0_12 = arith.constant 0 : index
    %5 = vector.load %arg14[%c0_9, %c0_10, %c0_11, %c0_12] : memref<6x10x10x8xf32, #tpu.memory_space<vmem>>, vector<1x10x10x8xf32>
    tpu.vector_store %arg14[%c0_9, %c0_10, %c0_11, %c0_12], %4 {strides = array<i32>} : memref<6x10x10x8xf32, #tpu.memory_space<vmem>>, vector<1x10x10x8xf32>,
    %c1 = arith.constant 1 : index
    %c0_13 = arith.constant 0 : index
    %c0_14 = arith.constant 0 : index
    %c0_15 = arith.constant 0 : index
    %6 = vector.load %arg14[%c1, %c0_13, %c0_14, %c0_15] : memref<6x10x10x8xf32, #tpu.memory_space<vmem>>, vector<4x10x10x8xf32>
    tpu.vector_store %arg14[%c1, %c0_13, %c0_14, %c0_15], %1 {strides = array<i32>} : memref<6x10x10x8xf32, #tpu.memory_space<vmem>>, vector<4x10x10x8xf32>,
    %7 = vector.extract_strided_slice %3 {offsets = [1, 0, 0, 0], sizes = [1, 10, 10, 8], strides = [1, 1, 1, 1]} : vector<2x10x10x8xf32> to vector<1x10x10x8xf32>
    %c5 = arith.constant 5 : index
    %c0_16 = arith.constant 0 : index
    %c0_17 = arith.constant 0 : index
    %c0_18 = arith.constant 0 : index
    %8 = vector.load %arg14[%c5, %c0_16, %c0_17, %c0_18] : memref<6x10x10x8xf32, #tpu.memory_space<vmem>>, vector<1x10x10x8xf32>
    tpu.vector_store %arg14[%c5, %c0_16, %c0_17, %c0_18], %7 {strides = array<i32>} : memref<6x10x10x8xf32, #tpu.memory_space<vmem>>, vector<1x10x10x8xf32>,
    %c0_19 = arith.constant 0 : index
    %c0_20 = arith.constant 0 : index
    %c0_21 = arith.constant 0 : index
    %c0_22 = arith.constant 0 : index
    %9 = vector.load %arg14[%c0_19, %c0_20, %c0_21, %c0_22] : memref<6x10x10x8xf32, #tpu.memory_space<vmem>>, vector<6x10x10x8xf32>
    %10 = vector.extract_strided_slice %1 {offsets = [0, 1, 1, 0], sizes = [4, 8, 8, 8], strides = [1, 1, 1, 1]} : vector<4x10x10x8xf32> to vector<4x8x8x8xf32>
    %c0_23 = arith.constant 0 : index
    %c0_24 = arith.constant 0 : index
    %c0_25 = arith.constant 0 : index
    %c0_26 = arith.constant 0 : index
    %c0_27 = arith.constant 0 : index
    %11 = vector.load %arg4[%c0_23, %c0_24, %c0_25, %c0_26, %c0_27] : memref<3x3x3x1x8xf32, #tpu.memory_space<vmem>>, vector<3x3x3x1x8xf32>
    %c0_28 = arith.constant 0 : index
    %c0_29 = arith.constant 0 : index
    %12 = vector.load %arg5[%c0_28, %c0_29] : memref<1x8xf32, #tpu.memory_space<vmem>>, vector<1x8xf32>
    %13 = vector.shape_cast %12 : vector<1x8xf32> to vector<1x1x1x8xf32>
    %14 = vector.shape_cast %13 : vector<1x1x1x8xf32> to vector<1x1x1x8xf32>
    %15 = vector.broadcast %14 : vector<1x1x1x8xf32> to vector<4x8x8x8xf32>
    %16 = vector.extract_strided_slice %9 {offsets = [0, 0, 0, 0], sizes = [6, 10, 8, 8], strides = [1, 1, 1, 1]} : vector<6x10x10x8xf32> to vector<6x10x8x8xf32>
    %17 = vector.extract_strided_slice %11 {offsets = [0, 0, 0, 0, 0], sizes = [1, 1, 1, 1, 8], strides = [1, 1, 1, 1, 1]} : vector<3x3x3x1x8xf32> to vector<1x1x1x1x8xf32>
    %18 = vector.shape_cast %17 : vector<1x1x1x1x8xf32> to vector<1x8xf32>
    %19 = vector.extract_strided_slice %16 {offsets = [0, 0, 0, 0], sizes = [4, 8, 8, 8], strides = [1, 1, 1, 1]} : vector<6x10x8x8xf32> to vector<4x8x8x8xf32>
    %20 = vector.shape_cast %18 : vector<1x8xf32> to vector<1x1x1x8xf32>
    %21 = vector.broadcast %20 : vector<1x1x1x8xf32> to vector<4x8x8x8xf32>
    %22 = arith.mulf %19, %21 : vector<4x8x8x8xf32>
    %23 = arith.addf %15, %22 : vector<4x8x8x8xf32>
    %24 = vector.extract_strided_slice %11 {offsets = [0, 1, 0, 0, 0], sizes = [1, 1, 1, 1, 8], strides = [1, 1, 1, 1, 1]} : vector<3x3x3x1x8xf32> to vector<1x1x1x1x8xf32>
    %25 = vector.shape_cast %24 : vector<1x1x1x1x8xf32> to vector<1x8xf32>
    %26 = vector.extract_strided_slice %16 {offsets = [0, 1, 0, 0], sizes = [4, 8, 8, 8], strides = [1, 1, 1, 1]} : vector<6x10x8x8xf32> to vector<4x8x8x8xf32>
    %27 = vector.shape_cast %25 : vector<1x8xf32> to vector<1x1x1x8xf32>
    %28 = vector.broadcast %27 : vector<1x1x1x8xf32> to vector<4x8x8x8xf32>
    %29 = arith.mulf %26, %28 : vector<4x8x8x8xf32>
    %30 = arith.addf %23, %29 : vector<4x8x8x8xf32>
    %31 = vector.extract_strided_slice %11 {offsets = [0, 2, 0, 0, 0], sizes = [1, 1, 1, 1, 8], strides = [1, 1, 1, 1, 1]} : vector<3x3x3x1x8xf32> to vector<1x1x1x1x8xf32>
    %32 = vector.shape_cast %31 : vector<1x1x1x1x8xf32> to vector<1x8xf32>
    %33 = vector.extract_strided_slice %16 {offsets = [0, 2, 0, 0], sizes = [4, 8, 8, 8], strides = [1, 1, 1, 1]} : vector<6x10x8x8xf32> to vector<4x8x8x8xf32>
    %34 = vector.shape_cast %32 : vector<1x8xf32> to vector<1x1x1x8xf32>
    %35 = vector.broadcast %34 : vector<1x1x1x8xf32> to vector<4x8x8x8xf32>
    %36 = arith.mulf %33, %35 : vector<4x8x8x8xf32>
    %37 = arith.addf %30, %36 : vector<4x8x8x8xf32>
    %38 = vector.extract_strided_slice %11 {offsets = [1, 0, 0, 0, 0], sizes = [1, 1, 1, 1, 8], strides = [1, 1, 1, 1, 1]} : vector<3x3x3x1x8xf32> to vector<1x1x1x1x8xf32>
    %39 = vector.shape_cast %38 : vector<1x1x1x1x8xf32> to vector<1x8xf32>
    %40 = vector.extract_strided_slice %16 {offsets = [1, 0, 0, 0], sizes = [4, 8, 8, 8], strides = [1, 1, 1, 1]} : vector<6x10x8x8xf32> to vector<4x8x8x8xf32>
    %41 = vector.shape_cast %39 : vector<1x8xf32> to vector<1x1x1x8xf32>
    %42 = vector.broadcast %41 : vector<1x1x1x8xf32> to vector<4x8x8x8xf32>
    %43 = arith.mulf %40, %42 : vector<4x8x8x8xf32>
    %44 = arith.addf %37, %43 : vector<4x8x8x8xf32>
    %45 = vector.extract_strided_slice %11 {offsets = [1, 1, 0, 0, 0], sizes = [1, 1, 1, 1, 8], strides = [1, 1, 1, 1, 1]} : vector<3x3x3x1x8xf32> to vector<1x1x1x1x8xf32>
    %46 = vector.shape_cast %45 : vector<1x1x1x1x8xf32> to vector<1x8xf32>
    %47 = vector.extract_strided_slice %16 {offsets = [1, 1, 0, 0], sizes = [4, 8, 8, 8], strides = [1, 1, 1, 1]} : vector<6x10x8x8xf32> to vector<4x8x8x8xf32>
    %48 = vector.shape_cast %46 : vector<1x8xf32> to vector<1x1x1x8xf32>
    %49 = vector.broadcast %48 : vector<1x1x1x8xf32> to vector<4x8x8x8xf32>
    %50 = arith.mulf %47, %49 : vector<4x8x8x8xf32>
    %51 = arith.addf %44, %50 : vector<4x8x8x8xf32>
    %52 = vector.extract_strided_slice %11 {offsets = [1, 2, 0, 0, 0], sizes = [1, 1, 1, 1, 8], strides = [1, 1, 1, 1, 1]} : vector<3x3x3x1x8xf32> to vector<1x1x1x1x8xf32>
    %53 = vector.shape_cast %52 : vector<1x1x1x1x8xf32> to vector<1x8xf32>
    %54 = vector.extract_strided_slice %16 {offsets = [1, 2, 0, 0], sizes = [4, 8, 8, 8], strides = [1, 1, 1, 1]} : vector<6x10x8x8xf32> to vector<4x8x8x8xf32>
    %55 = vector.shape_cast %53 : vector<1x8xf32> to vector<1x1x1x8xf32>
    %56 = vector.broadcast %55 : vector<1x1x1x8xf32> to vector<4x8x8x8xf32>
    %57 = arith.mulf %54, %56 : vector<4x8x8x8xf32>
    %58 = arith.addf %51, %57 : vector<4x8x8x8xf32>
    %59 = vector.extract_strided_slice %11 {offsets = [2, 0, 0, 0, 0], sizes = [1, 1, 1, 1, 8], strides = [1, 1, 1, 1, 1]} : vector<3x3x3x1x8xf32> to vector<1x1x1x1x8xf32>
    %60 = vector.shape_cast %59 : vector<1x1x1x1x8xf32> to vector<1x8xf32>
    %61 = vector.extract_strided_slice %16 {offsets = [2, 0, 0, 0], sizes = [4, 8, 8, 8], strides = [1, 1, 1, 1]} : vector<6x10x8x8xf32> to vector<4x8x8x8xf32>
    %62 = vector.shape_cast %60 : vector<1x8xf32> to vector<1x1x1x8xf32>
    %63 = vector.broadcast %62 : vector<1x1x1x8xf32> to vector<4x8x8x8xf32>
    %64 = arith.mulf %61, %63 : vector<4x8x8x8xf32>
    %65 = arith.addf %58, %64 : vector<4x8x8x8xf32>
    %66 = vector.extract_strided_slice %11 {offsets = [2, 1, 0, 0, 0], sizes = [1, 1, 1, 1, 8], strides = [1, 1, 1, 1, 1]} : vector<3x3x3x1x8xf32> to vector<1x1x1x1x8xf32>
    %67 = vector.shape_cast %66 : vector<1x1x1x1x8xf32> to vector<1x8xf32>
    %68 = vector.extract_strided_slice %16 {offsets = [2, 1, 0, 0], sizes = [4, 8, 8, 8], strides = [1, 1, 1, 1]} : vector<6x10x8x8xf32> to vector<4x8x8x8xf32>
    %69 = vector.shape_cast %67 : vector<1x8xf32> to vector<1x1x1x8xf32>
    %70 = vector.broadcast %69 : vector<1x1x1x8xf32> to vector<4x8x8x8xf32>
    %71 = arith.mulf %68, %70 : vector<4x8x8x8xf32>
    %72 = arith.addf %65, %71 : vector<4x8x8x8xf32>
    %73 = vector.extract_strided_slice %11 {offsets = [2, 2, 0, 0, 0], sizes = [1, 1, 1, 1, 8], strides = [1, 1, 1, 1, 1]} : vector<3x3x3x1x8xf32> to vector<1x1x1x1x8xf32>
    %74 = vector.shape_cast %73 : vector<1x1x1x1x8xf32> to vector<1x8xf32>
    %75 = vector.extract_strided_slice %16 {offsets = [2, 2, 0, 0], sizes = [4, 8, 8, 8], strides = [1, 1, 1, 1]} : vector<6x10x8x8xf32> to vector<4x8x8x8xf32>
    %76 = vector.shape_cast %74 : vector<1x8xf32> to vector<1x1x1x8xf32>
    %77 = vector.broadcast %76 : vector<1x1x1x8xf32> to vector<4x8x8x8xf32>
    %78 = arith.mulf %75, %77 : vector<4x8x8x8xf32>
    %79 = arith.addf %72, %78 : vector<4x8x8x8xf32>
    %80 = vector.extract_strided_slice %9 {offsets = [0, 0, 1, 0], sizes = [6, 10, 8, 8], strides = [1, 1, 1, 1]} : vector<6x10x10x8xf32> to vector<6x10x8x8xf32>
    %81 = vector.extract_strided_slice %11 {offsets = [0, 0, 1, 0, 0], sizes = [1, 1, 1, 1, 8], strides = [1, 1, 1, 1, 1]} : vector<3x3x3x1x8xf32> to vector<1x1x1x1x8xf32>
    %82 = vector.shape_cast %81 : vector<1x1x1x1x8xf32> to vector<1x8xf32>
    %83 = vector.extract_strided_slice %80 {offsets = [0, 0, 0, 0], sizes = [4, 8, 8, 8], strides = [1, 1, 1, 1]} : vector<6x10x8x8xf32> to vector<4x8x8x8xf32>
    %84 = vector.shape_cast %82 : vector<1x8xf32> to vector<1x1x1x8xf32>
    %85 = vector.broadcast %84 : vector<1x1x1x8xf32> to vector<4x8x8x8xf32>
    %86 = arith.mulf %83, %85 : vector<4x8x8x8xf32>
    %87 = arith.addf %79, %86 : vector<4x8x8x8xf32>
    %88 = vector.extract_strided_slice %11 {offsets = [0, 1, 1, 0, 0], sizes = [1, 1, 1, 1, 8], strides = [1, 1, 1, 1, 1]} : vector<3x3x3x1x8xf32> to vector<1x1x1x1x8xf32>
    %89 = vector.shape_cast %88 : vector<1x1x1x1x8xf32> to vector<1x8xf32>
    %90 = vector.extract_strided_slice %80 {offsets = [0, 1, 0, 0], sizes = [4, 8, 8, 8], strides = [1, 1, 1, 1]} : vector<6x10x8x8xf32> to vector<4x8x8x8xf32>
    %91 = vector.shape_cast %89 : vector<1x8xf32> to vector<1x1x1x8xf32>
    %92 = vector.broadcast %91 : vector<1x1x1x8xf32> to vector<4x8x8x8xf32>
    %93 = arith.mulf %90, %92 : vector<4x8x8x8xf32>
    %94 = arith.addf %87, %93 : vector<4x8x8x8xf32>
    %95 = vector.extract_strided_slice %11 {offsets = [0, 2, 1, 0, 0], sizes = [1, 1, 1, 1, 8], strides = [1, 1, 1, 1, 1]} : vector<3x3x3x1x8xf32> to vector<1x1x1x1x8xf32>
    %96 = vector.shape_cast %95 : vector<1x1x1x1x8xf32> to vector<1x8xf32>
    %97 = vector.extract_strided_slice %80 {offsets = [0, 2, 0, 0], sizes = [4, 8, 8, 8], strides = [1, 1, 1, 1]} : vector<6x10x8x8xf32> to vector<4x8x8x8xf32>
    %98 = vector.shape_cast %96 : vector<1x8xf32> to vector<1x1x1x8xf32>
    %99 = vector.broadcast %98 : vector<1x1x1x8xf32> to vector<4x8x8x8xf32>
    %100 = arith.mulf %97, %99 : vector<4x8x8x8xf32>
    %101 = arith.addf %94, %100 : vector<4x8x8x8xf32>
    %102 = vector.extract_strided_slice %11 {offsets = [1, 0, 1, 0, 0], sizes = [1, 1, 1, 1, 8], strides = [1, 1, 1, 1, 1]} : vector<3x3x3x1x8xf32> to vector<1x1x1x1x8xf32>
    %103 = vector.shape_cast %102 : vector<1x1x1x1x8xf32> to vector<1x8xf32>
    %104 = vector.extract_strided_slice %80 {offsets = [1, 0, 0, 0], sizes = [4, 8, 8, 8], strides = [1, 1, 1, 1]} : vector<6x10x8x8xf32> to vector<4x8x8x8xf32>
    %105 = vector.shape_cast %103 : vector<1x8xf32> to vector<1x1x1x8xf32>
    %106 = vector.broadcast %105 : vector<1x1x1x8xf32> to vector<4x8x8x8xf32>
    %107 = arith.mulf %104, %106 : vector<4x8x8x8xf32>
    %108 = arith.addf %101, %107 : vector<4x8x8x8xf32>
    %109 = vector.extract_strided_slice %11 {offsets = [1, 1, 1, 0, 0], sizes = [1, 1, 1, 1, 8], strides = [1, 1, 1, 1, 1]} : vector<3x3x3x1x8xf32> to vector<1x1x1x1x8xf32>
    %110 = vector.shape_cast %109 : vector<1x1x1x1x8xf32> to vector<1x8xf32>
    %111 = vector.extract_strided_slice %80 {offsets = [1, 1, 0, 0], sizes = [4, 8, 8, 8], strides = [1, 1, 1, 1]} : vector<6x10x8x8xf32> to vector<4x8x8x8xf32>
    %112 = vector.shape_cast %110 : vector<1x8xf32> to vector<1x1x1x8xf32>
    %113 = vector.broadcast %112 : vector<1x1x1x8xf32> to vector<4x8x8x8xf32>
    %114 = arith.mulf %111, %113 : vector<4x8x8x8xf32>
    %115 = arith.addf %108, %114 : vector<4x8x8x8xf32>
    %116 = vector.extract_strided_slice %11 {offsets = [1, 2, 1, 0, 0], sizes = [1, 1, 1, 1, 8], strides = [1, 1, 1, 1, 1]} : vector<3x3x3x1x8xf32> to vector<1x1x1x1x8xf32>
    %117 = vector.shape_cast %116 : vector<1x1x1x1x8xf32> to vector<1x8xf32>
    %118 = vector.extract_strided_slice %80 {offsets = [1, 2, 0, 0], sizes = [4, 8, 8, 8], strides = [1, 1, 1, 1]} : vector<6x10x8x8xf32> to vector<4x8x8x8xf32>
    %119 = vector.shape_cast %117 : vector<1x8xf32> to vector<1x1x1x8xf32>
    %120 = vector.broadcast %119 : vector<1x1x1x8xf32> to vector<4x8x8x8xf32>
    %121 = arith.mulf %118, %120 : vector<4x8x8x8xf32>
    %122 = arith.addf %115, %121 : vector<4x8x8x8xf32>
    %123 = vector.extract_strided_slice %11 {offsets = [2, 0, 1, 0, 0], sizes = [1, 1, 1, 1, 8], strides = [1, 1, 1, 1, 1]} : vector<3x3x3x1x8xf32> to vector<1x1x1x1x8xf32>
    %124 = vector.shape_cast %123 : vector<1x1x1x1x8xf32> to vector<1x8xf32>
    %125 = vector.extract_strided_slice %80 {offsets = [2, 0, 0, 0], sizes = [4, 8, 8, 8], strides = [1, 1, 1, 1]} : vector<6x10x8x8xf32> to vector<4x8x8x8xf32>
    %126 = vector.shape_cast %124 : vector<1x8xf32> to vector<1x1x1x8xf32>
    %127 = vector.broadcast %126 : vector<1x1x1x8xf32> to vector<4x8x8x8xf32>
    %128 = arith.mulf %125, %127 : vector<4x8x8x8xf32>
    %129 = arith.addf %122, %128 : vector<4x8x8x8xf32>
    %130 = vector.extract_strided_slice %11 {offsets = [2, 1, 1, 0, 0], sizes = [1, 1, 1, 1, 8], strides = [1, 1, 1, 1, 1]} : vector<3x3x3x1x8xf32> to vector<1x1x1x1x8xf32>
    %131 = vector.shape_cast %130 : vector<1x1x1x1x8xf32> to vector<1x8xf32>
    %132 = vector.extract_strided_slice %80 {offsets = [2, 1, 0, 0], sizes = [4, 8, 8, 8], strides = [1, 1, 1, 1]} : vector<6x10x8x8xf32> to vector<4x8x8x8xf32>
    %133 = vector.shape_cast %131 : vector<1x8xf32> to vector<1x1x1x8xf32>
    %134 = vector.broadcast %133 : vector<1x1x1x8xf32> to vector<4x8x8x8xf32>
    %135 = arith.mulf %132, %134 : vector<4x8x8x8xf32>
    %136 = arith.addf %129, %135 : vector<4x8x8x8xf32>
    %137 = vector.extract_strided_slice %11 {offsets = [2, 2, 1, 0, 0], sizes = [1, 1, 1, 1, 8], strides = [1, 1, 1, 1, 1]} : vector<3x3x3x1x8xf32> to vector<1x1x1x1x8xf32>
    %138 = vector.shape_cast %137 : vector<1x1x1x1x8xf32> to vector<1x8xf32>
    %139 = vector.extract_strided_slice %80 {offsets = [2, 2, 0, 0], sizes = [4, 8, 8, 8], strides = [1, 1, 1, 1]} : vector<6x10x8x8xf32> to vector<4x8x8x8xf32>
    %140 = vector.shape_cast %138 : vector<1x8xf32> to vector<1x1x1x8xf32>
    %141 = vector.broadcast %140 : vector<1x1x1x8xf32> to vector<4x8x8x8xf32>
    %142 = arith.mulf %139, %141 : vector<4x8x8x8xf32>
    %143 = arith.addf %136, %142 : vector<4x8x8x8xf32>
    %144 = vector.extract_strided_slice %9 {offsets = [0, 0, 2, 0], sizes = [6, 10, 8, 8], strides = [1, 1, 1, 1]} : vector<6x10x10x8xf32> to vector<6x10x8x8xf32>
    %145 = vector.extract_strided_slice %11 {offsets = [0, 0, 2, 0, 0], sizes = [1, 1, 1, 1, 8], strides = [1, 1, 1, 1, 1]} : vector<3x3x3x1x8xf32> to vector<1x1x1x1x8xf32>
    %146 = vector.shape_cast %145 : vector<1x1x1x1x8xf32> to vector<1x8xf32>
    %147 = vector.extract_strided_slice %144 {offsets = [0, 0, 0, 0], sizes = [4, 8, 8, 8], strides = [1, 1, 1, 1]} : vector<6x10x8x8xf32> to vector<4x8x8x8xf32>
    %148 = vector.shape_cast %146 : vector<1x8xf32> to vector<1x1x1x8xf32>
    %149 = vector.broadcast %148 : vector<1x1x1x8xf32> to vector<4x8x8x8xf32>
    %150 = arith.mulf %147, %149 : vector<4x8x8x8xf32>
    %151 = arith.addf %143, %150 : vector<4x8x8x8xf32>
    %152 = vector.extract_strided_slice %11 {offsets = [0, 1, 2, 0, 0], sizes = [1, 1, 1, 1, 8], strides = [1, 1, 1, 1, 1]} : vector<3x3x3x1x8xf32> to vector<1x1x1x1x8xf32>
    %153 = vector.shape_cast %152 : vector<1x1x1x1x8xf32> to vector<1x8xf32>
    %154 = vector.extract_strided_slice %144 {offsets = [0, 1, 0, 0], sizes = [4, 8, 8, 8], strides = [1, 1, 1, 1]} : vector<6x10x8x8xf32> to vector<4x8x8x8xf32>
    %155 = vector.shape_cast %153 : vector<1x8xf32> to vector<1x1x1x8xf32>
    %156 = vector.broadcast %155 : vector<1x1x1x8xf32> to vector<4x8x8x8xf32>
    %157 = arith.mulf %154, %156 : vector<4x8x8x8xf32>
    %158 = arith.addf %151, %157 : vector<4x8x8x8xf32>
    %159 = vector.extract_strided_slice %11 {offsets = [0, 2, 2, 0, 0], sizes = [1, 1, 1, 1, 8], strides = [1, 1, 1, 1, 1]} : vector<3x3x3x1x8xf32> to vector<1x1x1x1x8xf32>
    %160 = vector.shape_cast %159 : vector<1x1x1x1x8xf32> to vector<1x8xf32>
    %161 = vector.extract_strided_slice %144 {offsets = [0, 2, 0, 0], sizes = [4, 8, 8, 8], strides = [1, 1, 1, 1]} : vector<6x10x8x8xf32> to vector<4x8x8x8xf32>
    %162 = vector.shape_cast %160 : vector<1x8xf32> to vector<1x1x1x8xf32>
    %163 = vector.broadcast %162 : vector<1x1x1x8xf32> to vector<4x8x8x8xf32>
    %164 = arith.mulf %161, %163 : vector<4x8x8x8xf32>
    %165 = arith.addf %158, %164 : vector<4x8x8x8xf32>
    %166 = vector.extract_strided_slice %11 {offsets = [1, 0, 2, 0, 0], sizes = [1, 1, 1, 1, 8], strides = [1, 1, 1, 1, 1]} : vector<3x3x3x1x8xf32> to vector<1x1x1x1x8xf32>
    %167 = vector.shape_cast %166 : vector<1x1x1x1x8xf32> to vector<1x8xf32>
    %168 = vector.extract_strided_slice %144 {offsets = [1, 0, 0, 0], sizes = [4, 8, 8, 8], strides = [1, 1, 1, 1]} : vector<6x10x8x8xf32> to vector<4x8x8x8xf32>
    %169 = vector.shape_cast %167 : vector<1x8xf32> to vector<1x1x1x8xf32>
    %170 = vector.broadcast %169 : vector<1x1x1x8xf32> to vector<4x8x8x8xf32>
    %171 = arith.mulf %168, %170 : vector<4x8x8x8xf32>
    %172 = arith.addf %165, %171 : vector<4x8x8x8xf32>
    %173 = vector.extract_strided_slice %11 {offsets = [1, 1, 2, 0, 0], sizes = [1, 1, 1, 1, 8], strides = [1, 1, 1, 1, 1]} : vector<3x3x3x1x8xf32> to vector<1x1x1x1x8xf32>
    %174 = vector.shape_cast %173 : vector<1x1x1x1x8xf32> to vector<1x8xf32>
    %175 = vector.extract_strided_slice %144 {offsets = [1, 1, 0, 0], sizes = [4, 8, 8, 8], strides = [1, 1, 1, 1]} : vector<6x10x8x8xf32> to vector<4x8x8x8xf32>
    %176 = vector.shape_cast %174 : vector<1x8xf32> to vector<1x1x1x8xf32>
    %177 = vector.broadcast %176 : vector<1x1x1x8xf32> to vector<4x8x8x8xf32>
    %178 = arith.mulf %175, %177 : vector<4x8x8x8xf32>
    %179 = arith.addf %172, %178 : vector<4x8x8x8xf32>
    %180 = vector.extract_strided_slice %11 {offsets = [1, 2, 2, 0, 0], sizes = [1, 1, 1, 1, 8], strides = [1, 1, 1, 1, 1]} : vector<3x3x3x1x8xf32> to vector<1x1x1x1x8xf32>
    %181 = vector.shape_cast %180 : vector<1x1x1x1x8xf32> to vector<1x8xf32>
    %182 = vector.extract_strided_slice %144 {offsets = [1, 2, 0, 0], sizes = [4, 8, 8, 8], strides = [1, 1, 1, 1]} : vector<6x10x8x8xf32> to vector<4x8x8x8xf32>
    %183 = vector.shape_cast %181 : vector<1x8xf32> to vector<1x1x1x8xf32>
    %184 = vector.broadcast %183 : vector<1x1x1x8xf32> to vector<4x8x8x8xf32>
    %185 = arith.mulf %182, %184 : vector<4x8x8x8xf32>
    %186 = arith.addf %179, %185 : vector<4x8x8x8xf32>
    %187 = vector.extract_strided_slice %11 {offsets = [2, 0, 2, 0, 0], sizes = [1, 1, 1, 1, 8], strides = [1, 1, 1, 1, 1]} : vector<3x3x3x1x8xf32> to vector<1x1x1x1x8xf32>
    %188 = vector.shape_cast %187 : vector<1x1x1x1x8xf32> to vector<1x8xf32>
    %189 = vector.extract_strided_slice %144 {offsets = [2, 0, 0, 0], sizes = [4, 8, 8, 8], strides = [1, 1, 1, 1]} : vector<6x10x8x8xf32> to vector<4x8x8x8xf32>
    %190 = vector.shape_cast %188 : vector<1x8xf32> to vector<1x1x1x8xf32>
    %191 = vector.broadcast %190 : vector<1x1x1x8xf32> to vector<4x8x8x8xf32>
    %192 = arith.mulf %189, %191 : vector<4x8x8x8xf32>
    %193 = arith.addf %186, %192 : vector<4x8x8x8xf32>
    %194 = vector.extract_strided_slice %11 {offsets = [2, 1, 2, 0, 0], sizes = [1, 1, 1, 1, 8], strides = [1, 1, 1, 1, 1]} : vector<3x3x3x1x8xf32> to vector<1x1x1x1x8xf32>
    %195 = vector.shape_cast %194 : vector<1x1x1x1x8xf32> to vector<1x8xf32>
    %196 = vector.extract_strided_slice %144 {offsets = [2, 1, 0, 0], sizes = [4, 8, 8, 8], strides = [1, 1, 1, 1]} : vector<6x10x8x8xf32> to vector<4x8x8x8xf32>
    %197 = vector.shape_cast %195 : vector<1x8xf32> to vector<1x1x1x8xf32>
    %198 = vector.broadcast %197 : vector<1x1x1x8xf32> to vector<4x8x8x8xf32>
    %199 = arith.mulf %196, %198 : vector<4x8x8x8xf32>
    %200 = arith.addf %193, %199 : vector<4x8x8x8xf32>
    %201 = vector.extract_strided_slice %11 {offsets = [2, 2, 2, 0, 0], sizes = [1, 1, 1, 1, 8], strides = [1, 1, 1, 1, 1]} : vector<3x3x3x1x8xf32> to vector<1x1x1x1x8xf32>
    %202 = vector.shape_cast %201 : vector<1x1x1x1x8xf32> to vector<1x8xf32>
    %203 = vector.extract_strided_slice %144 {offsets = [2, 2, 0, 0], sizes = [4, 8, 8, 8], strides = [1, 1, 1, 1]} : vector<6x10x8x8xf32> to vector<4x8x8x8xf32>
    %204 = vector.shape_cast %202 : vector<1x8xf32> to vector<1x1x1x8xf32>
    %205 = vector.broadcast %204 : vector<1x1x1x8xf32> to vector<4x8x8x8xf32>
    %206 = arith.mulf %203, %205 : vector<4x8x8x8xf32>
    %207 = arith.addf %200, %206 : vector<4x8x8x8xf32>
    %208 = vector.shape_cast %207 : vector<4x8x8x8xf32> to vector<256x8xf32>
    %cst = arith.constant dense<0.000000e+00> : vector<256xf32>
    %209 = vector.multi_reduction <add>, %208, %cst [1] : vector<256x8xf32> to vector<256xf32>
    %210 = vector.shape_cast %209 : vector<256xf32> to vector<256x1xf32>
    %cst_30 = arith.constant 8.000000e+00 : f32
    %211 = vector.broadcast %cst_30 : f32 to vector<256x1xf32>
    %212 = arith.divf %210, %211 : vector<256x1xf32>
    %213 = vector.broadcast %212 : vector<256x1xf32> to vector<256x8xf32>
    %214 = arith.subf %208, %213 : vector<256x8xf32>
    %215 = arith.mulf %214, %214 : vector<256x8xf32>
    %cst_31 = arith.constant dense<0.000000e+00> : vector<256xf32>
    %216 = vector.multi_reduction <add>, %215, %cst_31 [1] : vector<256x8xf32> to vector<256xf32>
    %217 = vector.shape_cast %216 : vector<256xf32> to vector<256x1xf32>
    %cst_32 = arith.constant 8.000000e+00 : f32
    %218 = vector.broadcast %cst_32 : f32 to vector<256x1xf32>
    %219 = arith.divf %217, %218 : vector<256x1xf32>
    %cst_33 = arith.constant 9.99999997E-7 : f32
    %220 = vector.broadcast %cst_33 : f32 to vector<256x1xf32>
    %221 = arith.addf %219, %220 : vector<256x1xf32>
    %222 = math.rsqrt %221 : vector<256x1xf32>
    %223 = vector.broadcast %222 : vector<256x1xf32> to vector<256x8xf32>
    %224 = arith.mulf %214, %223 : vector<256x8xf32>
    %c0_34 = arith.constant 0 : index
    %c0_35 = arith.constant 0 : index
    %225 = vector.load %arg6[%c0_34, %c0_35] : memref<1x8xf32, #tpu.memory_space<vmem>>, vector<1x8xf32>
    %226 = vector.broadcast %225 : vector<1x8xf32> to vector<256x8xf32>
    %227 = arith.mulf %224, %226 : vector<256x8xf32>
    %c0_36 = arith.constant 0 : index
    %c0_37 = arith.constant 0 : index
    %228 = vector.load %arg7[%c0_36, %c0_37] : memref<1x8xf32, #tpu.memory_space<vmem>>, vector<1x8xf32>
    %229 = vector.broadcast %228 : vector<1x8xf32> to vector<256x8xf32>
    %230 = arith.addf %227, %229 : vector<256x8xf32>
    %231 = arith.truncf %230 : vector<256x8xf32> to vector<256x8xbf16>
    %c0_38 = arith.constant 0 : index
    %c0_39 = arith.constant 0 : index
    %232 = vector.load %arg8[%c0_38, %c0_39] : memref<8x32xbf16, #tpu.memory_space<vmem>>, vector<8x32xbf16>
    %cst_40 = arith.constant dense<0.000000e+00> : vector<256x32xf32>
    %233 = tpu.matmul %231, %232, %cst_40 {dimension_numbers = #tpu.dot_dimension_numbers<[1], [0], [0], [1], [0, 0, 1, 1], [], []>} : vector<256x8xbf16>, vector<8x32xbf16>, vector<256x32xf32> -> vector<256x32xf32>
    %c0_41 = arith.constant 0 : index
    %c0_42 = arith.constant 0 : index
    %234 = vector.load %arg9[%c0_41, %c0_42] : memref<1x32xf32, #tpu.memory_space<vmem>>, vector<1x32xf32>
    %235 = vector.broadcast %234 : vector<1x32xf32> to vector<256x32xf32>
    %236 = arith.addf %233, %235 : vector<256x32xf32>
    %cst_43 = arith.constant 5.000000e-01 : f32
    %237 = vector.broadcast %cst_43 : f32 to vector<256x32xf32>
    %238 = arith.mulf %237, %236 : vector<256x32xf32>
    %cst_44 = arith.constant 4.471500e-02 : f32
    %239 = vector.broadcast %cst_44 : f32 to vector<256x32xf32>
    %240 = arith.mulf %239, %236 : vector<256x32xf32>
    %241 = arith.mulf %240, %236 : vector<256x32xf32>
    %242 = arith.mulf %241, %236 : vector<256x32xf32>
    %243 = arith.addf %236, %242 : vector<256x32xf32>
    %cst_45 = arith.constant 0.797884583 : f32
    %244 = vector.broadcast %cst_45 : f32 to vector<256x32xf32>
    %245 = arith.mulf %244, %243 : vector<256x32xf32>
    %246 = math.tanh %245 : vector<256x32xf32>
    %cst_46 = arith.constant 1.000000e+00 : f32
    %247 = vector.broadcast %cst_46 : f32 to vector<256x32xf32>
    %248 = arith.addf %247, %246 : vector<256x32xf32>
    %249 = arith.mulf %238, %248 : vector<256x32xf32>
    %250 = arith.truncf %249 : vector<256x32xf32> to vector<256x32xbf16>
    %c0_47 = arith.constant 0 : index
    %c0_48 = arith.constant 0 : index
    %251 = vector.load %arg10[%c0_47, %c0_48] : memref<32x8xbf16, #tpu.memory_space<vmem>>, vector<32x8xbf16>
    %cst_49 = arith.constant dense<0.000000e+00> : vector<256x8xf32>
    %252 = tpu.matmul %250, %251, %cst_49 {dimension_numbers = #tpu.dot_dimension_numbers<[1], [0], [0], [1], [0, 0, 1, 1], [], []>} : vector<256x32xbf16>, vector<32x8xbf16>, vector<256x8xf32> -> vector<256x8xf32>
    %c0_50 = arith.constant 0 : index
    %c0_51 = arith.constant 0 : index
    %253 = vector.load %arg11[%c0_50, %c0_51] : memref<1x8xf32, #tpu.memory_space<vmem>>, vector<1x8xf32>
    %254 = vector.broadcast %253 : vector<1x8xf32> to vector<256x8xf32>
    %255 = arith.addf %252, %254 : vector<256x8xf32>
    %c0_52 = arith.constant 0 : index
    %c0_53 = arith.constant 0 : index
    %256 = vector.load %arg12[%c0_52, %c0_53] : memref<1x8xf32, #tpu.memory_space<vmem>>, vector<1x8xf32>
    %257 = vector.broadcast %256 : vector<1x8xf32> to vector<256x8xf32>
    %258 = arith.mulf %255, %257 : vector<256x8xf32>
    %259 = vector.shape_cast %10 : vector<4x8x8x8xf32> to vector<256x8xf32>
    %260 = arith.addf %259, %258 : vector<256x8xf32>
    %261 = vector.shape_cast %260 : vector<256x8xf32> to vector<4x8x8x8xf32>
    %c0_54 = arith.constant 0 : index
    %c0_55 = arith.constant 0 : index
    %c0_56 = arith.constant 0 : index
    %c0_57 = arith.constant 0 : index
    %c0_58 = arith.constant 0 : index
    %262 = vector.load %arg13[%c0_54, %c0_55, %c0_56, %c0_57, %c0_58] : memref<1x4x8x8x8xf32, #tpu.memory_space<vmem>>, vector<1x4x8x8x8xf32>
    %263 = vector.shape_cast %262 : vector<1x4x8x8x8xf32> to vector<4x8x8x8xf32>
    %264 = vector.shape_cast %261 : vector<4x8x8x8xf32> to vector<1x4x8x8x8xf32>
    tpu.vector_store %arg13[%c0_54, %c0_55, %c0_56, %c0_57, %c0_58], %264 {strides = array<i32>} : memref<1x4x8x8x8xf32, #tpu.memory_space<vmem>>, vector<1x4x8x8x8xf32>,
    return
  }
  func.func @transform_0(%arg0: i32, %arg1: i32) -> (i32, i32, i32, i32, i32) {
    %c0_i32 = arith.constant 0 : i32
    %c0_i32_0 = arith.constant 0 : i32
    %c0_i32_1 = arith.constant 0 : i32
    %c0_i32_2 = arith.constant 0 : i32
    return %arg0, %arg1, %c0_i32, %c0_i32_0, %c0_i32_1 : i32, i32, i32, i32, i32
  }
  func.func @transform_1(%arg0: i32, %arg1: i32) -> (i32, i32, i32, i32, i32) {
    %c2_i32 = arith.constant 2 : i32
    %0 = arith.muli %arg0, %c2_i32 : i32
    %1 = arith.addi %0, %arg1 : i32
    %c0_i32 = arith.constant 0 : i32
    %c0_i32_0 = arith.constant 0 : i32
    %c0_i32_1 = arith.constant 0 : i32
    %c0_i32_2 = arith.constant 0 : i32
    %c0_i32_3 = arith.constant 0 : i32
    return %1, %c0_i32, %c0_i32_0, %c0_i32_1, %c0_i32_2 : i32, i32, i32, i32, i32
  }
  func.func @transform_2(%arg0: i32, %arg1: i32) -> (i32, i32, i32, i32, i32) {
    %c0_i32 = arith.constant 0 : i32
    %c0_i32_0 = arith.constant 0 : i32
    %c0_i32_1 = arith.constant 0 : i32
    %c0_i32_2 = arith.constant 0 : i32
    %c0_i32_3 = arith.constant 0 : i32
    %c0_i32_4 = arith.constant 0 : i32
    return %c0_i32, %c0_i32_0, %c0_i32_1, %c0_i32_2, %c0_i32_3 : i32, i32, i32, i32, i32
  }
  func.func @transform_3(%arg0: i32, %arg1: i32) -> (i32, i32) {
    %c0_i32 = arith.constant 0 : i32
    %c0_i32_0 = arith.constant 0 : i32
    %c0_i32_1 = arith.constant 0 : i32
    return %c0_i32, %c0_i32_0 : i32, i32
  }
  func.func @transform_4(%arg0: i32, %arg1: i32) -> (i32, i32) {
    %c0_i32 = arith.constant 0 : i32
    %c0_i32_0 = arith.constant 0 : i32
    %c0_i32_1 = arith.constant 0 : i32
    return %c0_i32, %c0_i32_0 : i32, i32
  }
  func.func @transform_5(%arg0: i32, %arg1: i32) -> (i32, i32) {
    %c0_i32 = arith.constant 0 : i32
    %c0_i32_0 = arith.constant 0 : i32
    %c0_i32_1 = arith.constant 0 : i32
    return %c0_i32, %c0_i32_0 : i32, i32
  }
  func.func @transform_6(%arg0: i32, %arg1: i32) -> (i32, i32) {
    %c0_i32 = arith.constant 0 : i32
    %c0_i32_0 = arith.constant 0 : i32
    %c0_i32_1 = arith.constant 0 : i32
    return %c0_i32, %c0_i32_0 : i32, i32
  }
  func.func @transform_7(%arg0: i32, %arg1: i32) -> (i32, i32) {
    %c0_i32 = arith.constant 0 : i32
    %c0_i32_0 = arith.constant 0 : i32
    %c0_i32_1 = arith.constant 0 : i32
    return %c0_i32, %c0_i32_0 : i32, i32
  }
  func.func @transform_8(%arg0: i32, %arg1: i32) -> (i32, i32) {
    %c0_i32 = arith.constant 0 : i32
    %c0_i32_0 = arith.constant 0 : i32
    %c0_i32_1 = arith.constant 0 : i32
    return %c0_i32, %c0_i32_0 : i32, i32
  }
  func.func @transform_9(%arg0: i32, %arg1: i32) -> (i32, i32) {
    %c0_i32 = arith.constant 0 : i32
    %c0_i32_0 = arith.constant 0 : i32
    %c0_i32_1 = arith.constant 0 : i32
    return %c0_i32, %c0_i32_0 : i32, i32
  }
  func.func @transform_10(%arg0: i32, %arg1: i32) -> (i32, i32) {
    %c0_i32 = arith.constant 0 : i32
    %c0_i32_0 = arith.constant 0 : i32
    %c0_i32_1 = arith.constant 0 : i32
    return %c0_i32, %c0_i32_0 : i32, i32
  }
  func.func @transform_11(%arg0: i32, %arg1: i32) -> (i32, i32, i32, i32, i32) {
    %c0_i32 = arith.constant 0 : i32
    %c0_i32_0 = arith.constant 0 : i32
    %c0_i32_1 = arith.constant 0 : i32
    %c0_i32_2 = arith.constant 0 : i32
    return %arg0, %arg1, %c0_i32, %c0_i32_0, %c0_i32_1 : i32, i32, i32, i32, i32
  }
}

</mosaic_0001>

<bundles_post_ra>
// kernel: convnext_block.1
= control target key start
LH: loop header
LB: loop body
LE: loop exit
PB: predicated region body
PF: predicated region fallthrough
CT: control target
= control target key end

     0   :  { %s9253_s17 = smov 0   ;;  %s9255_s18 = smov 0   ;;  %s16296_s0 = inlined_call_operand.vmem [shape: f32[2,8,10,10,8], index: 0, kind: input, shape index: {}]   ;;  %s16297_s1 = inlined_call_operand.vmem [shape: f32[4,2,10,10,8], index: 1, kind: input, shape index: {}]   ;;  %s16298_s2 = inlined_call_operand.vmem [shape: f32[3,3,3,1,8], index: 2, kind: input, shape index: {}]   ;;  %s16299_s3 = inlined_call_operand.vmem [shape: f32[1,8], index: 3, kind: input, shape index: {}]   ;;  %s16300_s4 = inlined_call_operand.vmem [shape: f32[1,8], index: 4, kind: input, shape index: {}]   ;;  %s16301_s5 = inlined_call_operand.vmem [shape: f32[1,8], index: 5, kind: input, shape index: {}]   ;;  %s16302_s6 = inlined_call_operand.vmem [shape: bf16[8,32], index: 6, kind: input, shape index: {}]   ;;  %s16303_s7 = inlined_call_operand.vmem [shape: f32[1,32], index: 7, kind: input, shape index: {}]   ;;  %s16304_s8 = inlined_call_operand.vmem [shape: bf16[32,8], index: 8, kind: input, shape index: {}]   ;;  %s16305_s9 = inlined_call_operand.vmem [shape: f32[1,8], index: 9, kind: input, shape index: {}]   ;;  %s16306_s10 = inlined_call_operand.vmem [shape: f32[1,8], index: 10, kind: input, shape index: {}]   ;;  %s16307_s11 = inlined_call_operand.vmem [shape: f32[2,8,8,8,8], index: 11, kind: output, shape index: {}]  }
   0x1   :  { %s9257_s19 = smov 0   ;;  %s9259_s20 = smov 0  }
   0x2   :  { %s9261_s21 = smov 0  }
   0x3 LB: > { %s30_s22 = sadd.s32 1, %s9183_s19  ;;  %s33_s23 = sadd.s32 1, %s9187_s20  ;;  %s9191_s21 = sphi %s9261_s21, %s21_s21   ;;  %s9187_s20 = sphi %s9259_s20, %s17448_s20   ;;  %s9183_s19 = sphi %s9257_s19, %s17447_s19   ;;  %s9179_s18 = sphi %s9255_s18, %s17446_s18   ;;  %s9175_s17 = sphi %s9253_s17, %s17445_s17  }
   0x4   : > { %p31_p0 = scmp.ge.s32.totalorder %s30_s22, 2  ;;  %p8469_p1 = scmp.ge.s32.totalorder %s9191_s21, 1 }
   0x5   : > { %p377_p2 = scmp.lt.s32.totalorder %s9191_s21, 5 }
   0x6   : > { %s17450_s22 = smov (%p31_p0, %s30_s22), 0  ;;  %s17452_s23 = smov (!%p31_p0, %s33_s23), %s9187_s20 }
   0x7   : > { %p378_p3 = pnand %p8469_p1, %p377_p2  ;;  %p35_p4 = scmp.ge.s32.totalorder %s17452_s23, 2 }
   0x9   : > { %s17454_s23 = smov (%p35_p4, %s17452_s23), 0  ;;  %381 = sbr.rel (%p378_p3) target bundleno = 1868 (0x74c), region = 64 }
  0x10   : > { %s8470_s24 = sshll.u32 %s9175_s17, 2  ;;  %p435_p5 = scmp.lt.s32.totalorder %s9179_s18, 1  ;;  %vm586_vm0 = vcmask 64512   ;;  %vm588_vm1 = vcmask 58368   ;;  %v9386_v24 = vld [vmem:[%s16298_s2 + $0x9] ss:$0 sm:$0xff] }
  0x11   : > { %p437_p6 = scmp.lt.s32.totalorder %s8470_s24, 7  ;;  %s8472_s25 = sshll.u32 %s9179_s18, 1  ;;  %v9395_v27 = vld [vmem:[%s16298_s2 + $0xc] ss:$0 sm:$0xff]  ;;  %v9402_v29 = vld [vmem:[%s16298_s2] ss:$0 sm:$0xff] }
  0x12   : > { %s17456_s18 = smov (!%p435_p5, %s9179_s18), 1  ;;  %s446_s27 = sadd.s32 %s9175_s17, %s8472_s25  ;;  %16776 = vst [vmem:[#allocation15_spill] sm:$0xff] %v9395_v27  ;;  %v9407_v30 = vld [vmem:[%s16298_s2 + $0xf] ss:$0 sm:$0xff]  ;;  %v9414_v32 = vld [vmem:[%s16298_s2 + $0x3] ss:$0 sm:$0xff] }
  0x13   : > { %s17458_s24 = smov (!%p437_p6, %s8470_s24), 7  ;;  %s8654_s26 = smul.u32 160, %s17456_s18  ;;  %16777 = vst [vmem:[#allocation16_spill] sm:$0xff] %v9407_v30  ;;  %v9419_v33 = vld [vmem:[%s16298_s2 + $0x12] ss:$0 sm:$0xff]  ;;  %vm1628_vm2 = vcmask 1046528  }
  0x14   : > { %s8653_s28 = smul.u32 20, %s17458_s24  ;;  %p447_p7 = scmp.lt.s32.totalorder %s446_s27, 3  ;;  %16778 = vst [vmem:[#allocation17_spill] sm:$0xff] %v9419_v33  ;;  %v9424_v34 = vld [vmem:[%s16298_s2 + $0x1] ss:$0 sm:$0xff]  ;;  %vm4275_vm3 = vcmask 1045504  }
  0x15   : > { %v9429_v35 = vld [vmem:[%s16298_s2 + $0x6] ss:$0 sm:$0xff]  ;;  %v9514_v63 = vld [vmem:[%s16298_s2 + $0x15] ss:$0 sm:$0xff]  ;;  %vm7355_vm4 = vcmask 1043456   ;;  %vm7847_vm5 = vcmask 261120  }
  0x16   : > { %s441_s29 = sadd.s32 %s8654_s26, %s8653_s28  ;;  %s17460_s27 = smov (!%p447_p7, %s446_s27), 3  ;;  %16782 = vst [vmem:[#allocation21_spill] sm:$0xff] %v9514_v63 }
  0x17   : > { %s8471_s30 = sshll.u32 %s441_s29, 3  ;;  %s8655_s15 = smul.u32 320, %s17460_s27 }
  0x18   : > { %s9292_s14 = scalar_lea.vmem %s16296_s0, %s8471_s30  ;;  %s8475_s16 = sshll.u32 %s17458_s24, 3 }
  0x19   : > { %v466_v0 = vld [vmem:[%s9292_s14] sm:$0xff]  ;;  %v467_v1 = vld [vmem:[%s9292_s14 + $0x8] sm:$0x3]  ;;  %v9297_v2 = vld [vmem:[%s9292_s14 + $0x10] sm:$0xff]  ;;  %s9339_s25 = scalar_lea.vmem %s16297_s1, %s8655_s15  ;;  %s8476_s17 = sshll.u32 %s17456_s18, 6 }
  0x1a   : > { %16764 = vst [vmem:[#allocation3_spill] sm:$0xff] %v9297_v2  ;;  %v9300_v3 = vld [vmem:[%s9292_s14 + $0x18] sm:$0x3]  ;;  %v9303_v4 = vld [vmem:[%s9292_s14 + $0x20] sm:$0xff]  ;;  %v9306_v5 = vld [vmem:[%s9292_s14 + $0x28] sm:$0x3] }
  0x1b   : > { %16765 = vst [vmem:[#allocation4_spill] sm:$0xff] %v9300_v3  ;;  %16766 = vst [vmem:[#allocation5_spill] sm:$0xff] %v9303_v4  ;;  %v9313_v6 = vld [vmem:[%s9292_s14 + $0x30] sm:$0xff]  ;;  %v486_v7 = vld [vmem:[%s9292_s14 + $0xa0] sm:$0xff] }
  0x1c   : > { %16767 = vst [vmem:[#allocation6_spill] sm:$0xff] %v9306_v5  ;;  %609 = vst.msk [vmem:[#allocation2 + $0xa0] sm:$0xff] %vm586_vm0, %v466_v0  ;;  %v487_v8 = vld [vmem:[%s9292_s14 + $0xa8] sm:$0x3]  ;;  %v9324_v9 = vld [vmem:[%s9292_s14 + $0xb0] sm:$0xff] }
  0x1d   : > { %610 = vst.msk [vmem:[#allocation2 + $0xa8] sm:$0x3] %vm588_vm1, %v467_v1  ;;  %16768 = vst [vmem:[#allocation7_spill] sm:$0xff] %v9313_v6  ;;  %v9327_v10 = vld [vmem:[%s9292_s14 + $0xb8] sm:$0x3]  ;;  %v9330_v11 = vld [vmem:[%s9292_s14 + $0xc0] sm:$0xff] }
  0x1e   : > { %611 = vst.msk [vmem:[#allocation2 + $0xb0] sm:$0xff] %vm586_vm0, %v9297_v2  ;;  %613 = vst.msk [vmem:[#allocation2 + $0xc0] sm:$0xff] %vm586_vm0, %v9303_v4  ;;  %v9342_v12 = vld [vmem:[%s9292_s14 + $0xc8] sm:$0x3]  ;;  %v9345_v13 = vld [vmem:[%s9292_s14 + $0xd0] sm:$0xff] }
  0x1f   : > { %612 = vst.msk [vmem:[#allocation2 + $0xb8] sm:$0x3] %vm588_vm1, %v9300_v3  ;;  %614 = vst.msk [vmem:[#allocation2 + $0xc8] sm:$0x3] %vm588_vm1, %v9306_v5  ;;  %v506_v14 = vld [vmem:[%s9292_s14 + $0x140] sm:$0xff]  ;;  %v9355_v15 = vld [vmem:[%s9292_s14 + $0x150] sm:$0xff] }
  0x20   : > { %16769 = vst [vmem:[#allocation8_spill] sm:$0xff] %v9324_v9  ;;  %16770 = vst [vmem:[#allocation9_spill] sm:$0xff] %v9327_v10  ;;  %v9358_v16 = vld [vmem:[%s9292_s14 + $0x160] sm:$0xff]  ;;  %v547_v18 = vld [vmem:[%s9339_s25 + $0x8] sm:$0x3] }
  0x21   : > { %16771 = vst [vmem:[#allocation10_spill] sm:$0xff] %v9330_v11  ;;  %615 = vst.msk [vmem:[#allocation2 + $0xd0] sm:$0xff] %vm586_vm0, %v9313_v6  ;;  %v546_v17 = vld [vmem:[%s9339_s25] sm:$0xff]  ;;  %v548_v19 = vld [vmem:[%s9339_s25 + $0x10] sm:$0xff] }
  0x22   : > { %629 = vst.msk [vmem:[#allocation2 + $0x140] sm:$0xff] %vm586_vm0, %v486_v7  ;;  %16772 = vst [vmem:[#allocation11_spill] sm:$0xff] %v9342_v12  ;;  %v549_v20 = vld [vmem:[%s9339_s25 + $0x18] sm:$0x3]  ;;  %v550_v21 = vld [vmem:[%s9339_s25 + $0x20] sm:$0xff] }
  0x23   : > { %630 = vst.msk [vmem:[#allocation2 + $0x148] sm:$0x3] %vm588_vm1, %v487_v8  ;;  %16773 = vst [vmem:[#allocation12_spill] sm:$0xff] %v9345_v13  ;;  %v551_v22 = vld [vmem:[%s9339_s25 + $0x28] sm:$0x3]  ;;  %v552_v23 = vld [vmem:[%s9339_s25 + $0x30] sm:$0xff] }
  0x24   : > { %631 = vst.msk [vmem:[#allocation2 + $0x150] sm:$0xff] %vm586_vm0, %v9324_v9  ;;  %633 = vst.msk [vmem:[#allocation2 + $0x160] sm:$0xff] %vm586_vm0, %v9330_v11  ;;  %v9388_v25 = vld [vmem:[#allocation2 + $0xa0] sm:$0xff]  ;;  %v9471_v48 = vld [vmem:[#allocation2 + $0xa8] sm:$0x3] }
  0x25   : > { %632 = vst.msk [vmem:[#allocation2 + $0x158] sm:$0x3] %vm588_vm1, %v9327_v10  ;;  %16774 = vst [vmem:[#allocation13_spill] sm:$0xff] %v9355_v15  ;;  %v9390_v26 = vld [vmem:[#allocation2 + $0xb0] sm:$0xff]  ;;  %v9397_v28 = vld [vmem:[#allocation2 + $0xc0] sm:$0xff]  ;;  %v9437_v37 = vmul.f32 %v9386_v24, %v9388_v25  ;;  %v9465_v45 = vmul.f32 %v9424_v34, %v9388_v25  ;;  %v9526_v8 = vmul.f32 %v9424_v34, %v9471_v48 }
  0x26   : > { %16775 = vst [vmem:[#allocation14_spill] sm:$0xff] %v9358_v16  ;;  %634 = vst.msk [vmem:[#allocation2 + $0x168] sm:$0x3] %vm588_vm1, %v9342_v12  ;;  %v9433_v36 = vmul.f32 %v9414_v32, %v9390_v26  ;;  %v9441_v38 = vmul.f32 %v9386_v24, %v9390_v26  ;;  %v9445_v39 = vmul.f32 %v9395_v27, %v9390_v26  ;;  %v9560_v10 = vld [vmem:[%s9292_s14 + $0x38] sm:$0x3]  ;;  %v9563_v9 = vld [vmem:[%s9292_s14 + $0x40] sm:$0xff] }
  0x27   : > { %635 = vst.msk [vmem:[#allocation2 + $0x170] sm:$0xff] %vm586_vm0, %v9345_v13  ;;  %649 = vst.msk [vmem:[#allocation2 + $0x1e0] sm:$0xff] %vm586_vm0, %v506_v14  ;;  %v9453_v42 = vmul.f32 %v9429_v35, %v9397_v28  ;;  %v9457_v43 = vmul.f32 %v9395_v27, %v9397_v28  ;;  %v9461_v44 = vmul.f32 %v9407_v30, %v9397_v28  ;;  %v9578_v2 = vld [vmem:[%s9292_s14 + $0x48] sm:$0x3] }
  0x28   : > { %587 = vst.msk [vmem:[#allocation2] sm:$0xff] %vm586_vm0, %v546_v17  ;;  %651 = vst.msk [vmem:[#allocation2 + $0x1f0] sm:$0xff] %vm586_vm0, %v9355_v15  ;;  %v9449_v41 = vld [vmem:[#allocation2 + $0xd0] sm:$0xff] }
  0x29   : > { %653 = vst.msk [vmem:[#allocation2 + $0x200] sm:$0xff] %vm586_vm0, %v9358_v16  ;;  %590 = vst.msk [vmem:[#allocation2 + $0x10] sm:$0xff] %vm586_vm0, %v548_v19  ;;  %v9409_v31 = vld [vmem:[#allocation2 + $0x140] sm:$0xff]  ;;  %v9481_v51 = vmul.f32 %v9407_v30, %v9449_v41 }
  0x2a   : > { %589 = vst.msk [vmem:[#allocation2 + $0x8] sm:$0x3] %vm588_vm1, %v547_v18  ;;  %591 = vst.msk [vmem:[#allocation2 + $0x18] sm:$0x3] %vm588_vm1, %v549_v20  ;;  %v9477_v50 = vmul.f32 %v9386_v24, %v9409_v31  ;;  %v9485_v52 = vmul.f32 %v9419_v33, %v9409_v31  ;;  %v9533_v18 = vld [vmem:[%s16299_s3] ss:$0 sm:$0xff] }
  0x2b   : > { %592 = vst.msk [vmem:[#allocation2 + $0x20] sm:$0xff] %vm586_vm0, %v550_v21  ;;  %594 = vst.msk [vmem:[#allocation2 + $0x30] sm:$0xff] %vm586_vm0, %v552_v23  ;;  %v9491_v55 = vld [vmem:[#allocation2 + $0x150] sm:$0xff]  ;;  %v9509_v61 = vld [vmem:[#allocation2 + $0x160] sm:$0xff] }
  0x2c   : > { %593 = vst.msk [vmem:[#allocation2 + $0x28] sm:$0x3] %vm588_vm1, %v551_v22  ;;  %16780 = vst [vmem:[#allocation19_spill] sm:$0xff] %v9477_v50  ;;  %v9537_v19 = vmul.f32 %v9395_v27, %v9491_v55  ;;  %v9541_v20 = vmul.f32 %v9407_v30, %v9509_v61  ;;  %v9545_v21 = vmul.f32 %v9419_v33, %v9491_v55  ;;  %v9551_v23 = vld [vmem:[%s16298_s2 + $0x18] ss:$0 sm:$0xff]  ;;  %v9566_v22 = vld [vmem:[%s9292_s14 + $0xe0] sm:$0xff] }
  0x2d   : > { %16785 = vst [vmem:[#allocation24_spill] sm:$0xff] %v9551_v23  ;;  %16786 = vst [vmem:[#allocation25_spill] sm:$0xff] %v9560_v10  ;;  %v9568_v13 = vld [vmem:[#allocation2 + $0x148] sm:$0x3]  ;;  %v9655_v27 = vld [vmem:[%s9292_s14 + $0xf8] sm:$0x3] }
  0x2e   : > { %v770_v62 = vld [vmem:[#allocation2 + $0x1e0] sm:$0xff]  ;;  %16783 = vst [vmem:[#allocation22_spill] sm:$0xff] %v9537_v19  ;;  %16784 = vst [vmem:[#allocation23_spill] sm:$0xff] %v9541_v20  ;;  %v9586_v6 = vld [vmem:[#allocation2 + $0x170] sm:$0xff] }
  0x2f   : > { %v9447_v40 = vld [vmem:[#allocation2] sm:$0xff]  ;;  %v772_v17 = vld [vmem:[#allocation2 + $0x1f0] sm:$0xff]  ;;  %16787 = vst [vmem:[#allocation26_spill] sm:$0xff] %v9563_v9  ;;  %16788 = vst [vmem:[#allocation27_spill] sm:$0xff] %v9566_v22 }
  0x30   : > { %v9469_v47 = vld [vmem:[#allocation2 + $0x10] sm:$0xff]  ;;  %v870_v49 = vmul.f32 %v9402_v29, %v9447_v40  ;;  %v9497_v57 = vmul.f32 %v9424_v34, %v9447_v40  ;;  %v774_v5 = vld [vmem:[#allocation2 + $0x200] sm:$0xff]  ;;  %16790 = vst [vmem:[#allocation29_spill] sm:$0xff] %v9578_v2  ;;  %616 = vst.msk [vmem:[#allocation2 + $0xd8] sm:$0x3] %vm588_vm1, %v9560_v10  ;;  %v9595_v10 = vmul.f32 %v9424_v34, %v9409_v31 }
  0x31   : > { %v9467_v46 = vld [vmem:[#allocation2 + $0x8] sm:$0x3]  ;;  %16779 = vst [vmem:[#allocation18_spill] sm:$0xff] %v9469_v47  ;;  %v9487_v53 = vld [vmem:[#allocation2 + $0x18] sm:$0x3]  ;;  %v871_v56 = vmul.f32 %v9402_v29, %v9469_v47  ;;  %v9505_v59 = vmul.f32 %v9424_v34, %v9469_v47  ;;  %v940_v0 = vmul.f32 %v9414_v32, %v9469_v47  ;;  %617 = vst.msk [vmem:[#allocation2 + $0xe0] sm:$0xff] %vm586_vm0, %v9563_v9 }
  0x32   : > { %16781 = vst [vmem:[#allocation20_spill] sm:$0xff] %v9487_v53  ;;  %v9489_v54 = vld [vmem:[#allocation2 + $0x20] sm:$0xff]  ;;  %v9501_v58 = vmul.f32 %v9424_v34, %v9467_v46  ;;  %v9522_v7 = vmul.f32 %v9424_v34, %v9487_v53  ;;  %v9528_v14 = vld [vmem:[#allocation2 + $0x30] sm:$0xff]  ;;  %v902_v16 = vadd.f32 %v9533_v18, %v870_v49  ;;  %637 = vst.msk [vmem:[#allocation2 + $0x180] sm:$0xff] %vm586_vm0, %v9566_v22 }
  0x33   : > { %v9507_v60 = vld [vmem:[#allocation2 + $0x28] sm:$0x3]  ;;  %v941_v1 = vmul.f32 %v9414_v32, %v9489_v54  ;;  %v903_v15 = vadd.f32 %v9533_v18, %v871_v56  ;;  %v1010_v12 = vmul.f32 %v9429_v35, %v9489_v54  ;;  %v1011_v11 = vmul.f32 %v9429_v35, %v9528_v14  ;;  %16791 = vst [vmem:[#allocation30_spill] sm:$0xff] %v9595_v10  ;;  %v9599_v20 = vld [vmem:[%s9292_s14 + $0xd8] sm:$0x3]  ;;  %v554_v19 = vld [vmem:[%s9339_s25 + $0x40] sm:$0xff] }
  0x34   : > { %v9572_v49 = vmul.f32 %v9424_v34, %v9507_v60  ;;  %v1629_v56 = vrot.slane %v9497_v57, 1  ;;  %v1630_v4 = vrot.slane %v9501_v58, 1  ;;  %v1632_v3 = vrot.slane %v9505_v59, 1  ;;  %v9591_v57 = vld [vmem:[%s16298_s2 + $0x4] ss:$0 sm:$0xff]  ;;  %16792 = vst [vmem:[#allocation31_spill] sm:$0xff] %v9599_v20 }
  0x35   : > { %v972_v58 = vadd.f32 %v940_v0, %v902_v16  ;;  %v973_v59 = vadd.f32 %v941_v1, %v903_v15  ;;  %v1633_v9 = vrot.slane %v9522_v7, 1  ;;  %v9602_v22 = vld [vmem:[%s9292_s14 + $0xe8] sm:$0x3]  ;;  %618 = vst.msk [vmem:[#allocation2 + $0xe8] sm:$0x3] %vm588_vm1, %v9578_v2  ;;  %v9613_v15 = vmul.f32 %v9419_v33, %v770_v62  ;;  %v9632_v62 = vld [vmem:[%s9292_s14 + $0x50] sm:$0xff] }
  0x36   : > { %16789 = vst [vmem:[#allocation28_spill] sm:$0xff] %v9572_v49  ;;  %16793 = vst [vmem:[#allocation32_spill] sm:$0xff] %v9602_v22  ;;  %v9610_v16 = vld [vmem:[%s16298_s2 + $0x7] ss:$0 sm:$0xff]  ;;  %v9617_v0 = vmul.f32 %v9514_v63, %v9491_v55  ;;  %v9621_v1 = vmul.f32 %v9514_v63, %v9509_v61  ;;  %v1654_v7 = vrot.slane %v9526_v8, 1  ;;  %v9640_v50 = vmul.f32 %v9514_v63, %v772_v17  ;;  %v556_v17 = vld [vmem:[%s9339_s25 + $0x50] sm:$0xff] }
  0x37   : > { %16794 = vst [vmem:[#allocation33_spill] sm:$0xff] %v9610_v16  ;;  %16795 = vst [vmem:[#allocation34_spill] sm:$0xff] %v9613_v15  ;;  %v553_v2 = vld [vmem:[%s9339_s25 + $0x38] sm:$0x3]  ;;  %v555_v30 = vld [vmem:[%s9339_s25 + $0x48] sm:$0x3]  ;;  %v1042_v8 = vadd.f32 %v1010_v12, %v972_v58  ;;  %v1043_v33 = vadd.f32 %v1011_v11, %v973_v59  ;;  %v9661_v11 = vmul.f32 %v9551_v23, %v9509_v61 }
  0x38   : > { %596 = vst.msk [vmem:[#allocation2 + $0x40] sm:$0xff] %vm586_vm0, %v554_v19  ;;  %16796 = vst [vmem:[#allocation35_spill] sm:$0xff] %v9632_v62  ;;  %v9637_v15 = vld [vmem:[%s16298_s2 + $0xa] ss:$0 sm:$0xff]  ;;  %v9644_v19 = vmul.f32 %v9424_v34, %v9568_v13  ;;  %v9665_v12 = vmul.f32 %v9551_v23, %v9586_v6  ;;  %v557_v58 = vld [vmem:[%s9339_s25 + $0x58] sm:$0x3] }
  0x39   : > { %636 = vst.msk [vmem:[#allocation2 + $0x178] sm:$0x3] %vm588_vm1, %v9599_v20  ;;  %638 = vst.msk [vmem:[#allocation2 + $0x188] sm:$0x3] %vm588_vm1, %v9602_v22  ;;  %v9649_v22 = vld [vmem:[%s9292_s14 + $0x58] sm:$0x3] }
  0x3a   : > { %16797 = vst [vmem:[#allocation36_spill] sm:$0xff] %v9637_v15  ;;  %16798 = vst [vmem:[#allocation37_spill] sm:$0xff] %v9640_v50  ;;  %v9652_v20 = vld [vmem:[%s9292_s14 + $0xf0] sm:$0xff]  ;;  %v9680_v59 = vld [vmem:[%s9292_s14 + $0x60] sm:$0xff] }
  0x3b   : > { %16799 = vst [vmem:[#allocation38_spill] sm:$0xff] %v9644_v19  ;;  %595 = vst.msk [vmem:[#allocation2 + $0x38] sm:$0x3] %vm588_vm1, %v553_v2  ;;  %v9668_v2 = vmul.f32 %v9551_v23, %v774_v5  ;;  %v1112_v5 = vadd.f32 %v9437_v37, %v1042_v8  ;;  %v9700_v37 = vsel %vm1628_vm2, %v1632_v3, %v1633_v9  ;;  %v9712_v8 = vld [vmem:[%s9292_s14 + $0x108] sm:$0x3] }
  0x3c   : > { %597 = vst.msk [vmem:[#allocation2 + $0x48] sm:$0x3] %vm588_vm1, %v555_v30  ;;  %16800 = vst [vmem:[#allocation39_spill] sm:$0xff] %v9649_v22  ;;  %v9685_v30 = vsel %vm1628_vm2, %v1629_v56, %v1630_v4  ;;  %v16807_v4 = vrot.slane %v9465_v45, 1  ;;  %v1796_v56 = vmul.f32 %v9591_v57, %v9487_v53  ;;  %v9720_v3 = vld [vmem:[#allocation2 + $0xb8] sm:$0x3] }
  0x3d   : > { %16801 = vst [vmem:[#allocation40_spill] sm:$0xff] %v9652_v20  ;;  %16802 = vst [vmem:[#allocation41_spill] sm:$0xff] %v9655_v27  ;;  %v9725_v9 = vld [vmem:[%s16298_s2 + $0xd] ss:$0 sm:$0xff]  ;;  %v1182_v45 = vadd.f32 %v9445_v39, %v1112_v5  ;;  %v2383_v39 = vmul.f32 %v9637_v15, %v9388_v25  ;;  %v9749_v5 = vld [vmem:[%s9292_s14 + $0x110] sm:$0xff] }
  0x3e   : > { %619 = vst.msk [vmem:[#allocation2 + $0xf0] sm:$0xff] %vm586_vm0, %v9632_v62  ;;  %16803 = vst [vmem:[#allocation42_spill] sm:$0xff] %v9668_v2  ;;  %v1113_v62 = vadd.f32 %v9441_v38, %v1043_v33  ;;  %v9705_v33 = vsel %vm1628_vm2, %v16807_v4, %v1654_v7  ;;  %v1795_v38 = vmul.f32 %v9591_v57, %v9469_v47  ;;  %v9756_v4 = vld [vmem:[%s16298_s2 + $0x10] ss:$0 sm:$0xff]  ;;  %v1924_v19 = vrot.slane %v1796_v56, 1 }
  0x3f   : > { %620 = vst.msk [vmem:[#allocation2 + $0xf8] sm:$0x3] %vm588_vm1, %v9649_v22  ;;  %640 = vst.msk [vmem:[#allocation2 + $0x198] sm:$0x3] %vm588_vm1, %v9655_v27  ;;  %v9694_v27 = vld [vmem:[%s9292_s14 + $0x100] sm:$0xff]  ;;  %v9739_v2 = vmul.f32 %v9591_v57, %v9507_v60 }
  0x40   : > { %639 = vst.msk [vmem:[#allocation2 + $0x190] sm:$0xff] %vm586_vm0, %v9652_v20  ;;  %16804 = vst [vmem:[#allocation43_spill] sm:$0xff] %v9680_v59  ;;  %v9691_v20 = vld [vmem:[%s9292_s14 + $0x68] sm:$0x3]  ;;  %v558_v22 = vld [vmem:[%s9339_s25 + $0x60] sm:$0xff]  ;;  %v1183_v7 = vadd.f32 %v9457_v43, %v1113_v62  ;;  %v2384_v43 = vmul.f32 %v9637_v15, %v9471_v48  ;;  %v1923_v10 = vrot.slane %v1795_v38, 1 }
  0x41   : > { %598 = vst.msk [vmem:[#allocation2 + $0x50] sm:$0xff] %vm586_vm0, %v556_v17  ;;  %16805 = vst [vmem:[#allocation44_spill] sm:$0xff] %v9691_v20  ;;  %v559_v17 = vld [vmem:[%s9339_s25 + $0x68] sm:$0x3]  ;;  %v9746_v62 = vld [vmem:[%s9292_s14 + $0x70] sm:$0xff]  ;;  %v2511_v38 = vrot.slane %v2383_v39, 1 }
  0x42   : > { %599 = vst.msk [vmem:[#allocation2 + $0x58] sm:$0x3] %vm588_vm1, %v557_v58  ;;  %16806 = vst [vmem:[#allocation45_spill] sm:$0xff] %v9694_v27  ;;  %v2090_v58 = vmul.f32 %v9610_v16, %v9507_v60  ;;  %v9778_v49 = vld [vmem:[#allocation2 + $0x158] sm:$0x3]  ;;  %v2512_v56 = vrot.slane %v2384_v43, 1 }
  0x43   : > { %621 = vst.msk [vmem:[#allocation2 + $0x100] sm:$0xff] %vm586_vm0, %v9680_v59  ;;  %16808 = vst [vmem:[#allocation46_spill] sm:$0xff] %v9705_v33  ;;  %v9766_v59 = vmul.f32 %v9591_v57, %v9720_v3  ;;  %v9801_v43 = vld [vmem:[%s16298_s2 + $0x16] ss:$0 sm:$0xff] }
  0x44   : > { %16809 = vst [vmem:[#allocation47_spill] sm:$0xff] %v9712_v8  ;;  %600 = vst.msk [vmem:[#allocation2 + $0x60] sm:$0xff] %vm586_vm0, %v558_v22  ;;  %v2089_v22 = vmul.f32 %v9610_v16, %v9489_v54  ;;  %v2218_v50 = vrot.slane %v2090_v58, 1  ;;  %v9808_v16 = vmul.f32 %v9637_v15, %v9568_v13 }
  0x45   : > { %622 = vst.msk [vmem:[#allocation2 + $0x108] sm:$0x3] %vm588_vm1, %v9691_v20  ;;  %16810 = vst [vmem:[#allocation48_spill] sm:$0xff] %v9725_v9  ;;  %v9762_v20 = vmul.f32 %v9591_v57, %v9390_v26  ;;  %v1948_v23 = vrot.slane %v9766_v59, 1  ;;  %v561_v59 = vld [vmem:[%s9339_s25 + $0x78] sm:$0x3] }
  0x46   : > { %641 = vst.msk [vmem:[#allocation2 + $0x1a0] sm:$0xff] %vm586_vm0, %v9694_v27  ;;  %16811 = vst [vmem:[#allocation49_spill] sm:$0xff] %v9739_v2  ;;  %v1253_v27 = vadd.f32 %v9481_v51, %v1183_v7  ;;  %v2678_v51 = vmul.f32 %v9725_v9, %v9720_v3  ;;  %v2217_v33 = vrot.slane %v2089_v22, 1  ;;  %v9829_v22 = vld [vmem:[%s16298_s2 + $0x5] ss:$0 sm:$0xff]  ;;  %v2513_v2 = vsel %vm1628_vm2, %v2511_v38, %v2512_v56 }
  0x47   : > { %601 = vst.msk [vmem:[#allocation2 + $0x68] sm:$0x3] %vm588_vm1, %v559_v17  ;;  %642 = vst.msk [vmem:[#allocation2 + $0x1a8] sm:$0x3] %vm588_vm1, %v9712_v8  ;;  %v9751_v17 = vld [vmem:[#allocation2 + $0xc8] sm:$0x3]  ;;  %v1252_v8 = vadd.f32 %v9461_v44, %v1182_v45  ;;  %v2677_v44 = vmul.f32 %v9725_v9, %v9390_v26  ;;  %v3560_v56 = vmul.f32 %v9801_v43, %v9778_v49 }
  0x48   : > { %16812 = vst [vmem:[#allocation50_spill] sm:$0xff] %v9746_v62  ;;  %16813 = vst [vmem:[#allocation51_spill] sm:$0xff] %v9749_v5  ;;  %v1323_v7 = vadd.f32 %v9545_v21, %v1253_v27  ;;  %v9794_v27 = vld [vmem:[%s16298_s2 + $0x2] ss:$0 sm:$0xff]  ;;  %v2806_v39 = vrot.slane %v2678_v51, 1  ;;  %v1947_v9 = vrot.slane %v9762_v20, 1 }
  0x49   : > { %16814 = vst [vmem:[#allocation52_spill] sm:$0xff] %v9756_v4  ;;  %623 = vst.msk [vmem:[#allocation2 + $0x110] sm:$0xff] %vm586_vm0, %v9746_v62  ;;  %v1322_v45 = vadd.f32 %v9485_v52, %v1252_v8  ;;  %v2971_v62 = vmul.f32 %v9756_v4, %v9397_v28  ;;  %v2972_v52 = vmul.f32 %v9756_v4, %v9751_v17  ;;  %v9789_v8 = vld [vmem:[#allocation2 + $0x168] sm:$0x3]  ;;  %v2805_v58 = vrot.slane %v2677_v44, 1 }
  0x4a   : > { %643 = vst.msk [vmem:[#allocation2 + $0x1b0] sm:$0xff] %vm586_vm0, %v9749_v5  ;;  %v9783_v5 = vld [vmem:[%s16298_s2 + $0x13] ss:$0 sm:$0xff]  ;;  %16816 = vst [vmem:[#allocation54_spill] sm:$0xff] %v9794_v27  ;;  %v1925_v4 = vsel %vm1628_vm2, %v1923_v10, %v1924_v19  ;;  %v9814_v44 = vld [vmem:[%s16298_s2 + $0x19] ss:$0 sm:$0xff]  ;;  %v1393_v51 = vadd.f32 %v9621_v1, %v1323_v7  ;;  %v2219_v10 = vsel %vm1628_vm2, %v2217_v33, %v2218_v50 }
  0x4b   : > { %16815 = vst [vmem:[#allocation53_spill] sm:$0xff] %v9783_v5  ;;  %v1392_v21 = vadd.f32 %v9617_v0, %v1322_v45  ;;  %16817 = vst [vmem:[#allocation55_spill] sm:$0xff] %v9801_v43  ;;  %v560_v0 = vld [vmem:[%s9339_s25 + $0x70] sm:$0xff]  ;;  %v3265_v20 = vmul.f32 %v9783_v5, %v9409_v31  ;;  %v9822_v19 = vld [vmem:[%s9292_s14 + $0x78] sm:$0x3]  ;;  %v3099_v1 = vrot.slane %v2971_v62, 1  ;;  %v3266_v50 = vmul.f32 %v9783_v5, %v9568_v13 }
  0x4c   : > { %16818 = vst [vmem:[#allocation56_spill] sm:$0xff] %v9808_v16  ;;  %16819 = vst [vmem:[#allocation57_spill] sm:$0xff] %v9814_v44  ;;  %v9840_v33 = vld [vmem:[%s16298_s2 + $0x8] ss:$0 sm:$0xff]  ;;  %v2807_v38 = vsel %vm1628_vm2, %v2805_v58, %v2806_v39  ;;  %v3559_v62 = vmul.f32 %v9801_v43, %v9491_v55  ;;  %v9857_v58 = vld [vmem:[%s9292_s14 + $0x118] sm:$0x3]  ;;  %v1463_v39 = vadd.f32 %v9665_v12, %v1393_v51 }
  0x4d   : > { %v1462_v45 = vadd.f32 %v9661_v11, %v1392_v21  ;;  %16820 = vst [vmem:[#allocation58_spill] sm:$0xff] %v9822_v19  ;;  %602 = vst.msk [vmem:[#allocation2 + $0x70] sm:$0xff] %vm586_vm0, %v560_v0  ;;  %v3100_v11 = vrot.slane %v2972_v52, 1  ;;  %v3853_v52 = vmul.f32 %v9814_v44, %v9509_v61  ;;  %v3854_v21 = vmul.f32 %v9814_v44, %v9789_v8  ;;  %v9877_v51 = vld [vmem:[%s16298_s2 + $0xe] ss:$0 sm:$0xff]  ;;  %v562_v44 = vld [vmem:[%s9339_s25 + $0x80] sm:$0xff] }
  0x4e   : > { %16821 = vst [vmem:[#allocation59_spill] sm:$0xff] %v9829_v22  ;;  %603 = vst.msk [vmem:[#allocation2 + $0x78] sm:$0x3] %vm588_vm1, %v561_v59  ;;  %v4147_v0 = vmul.f32 %v9794_v27, %v9447_v40  ;;  %v3393_v59 = vrot.slane %v3265_v20, 1  ;;  %v9867_v40 = vld [vmem:[%s16298_s2 + $0xb] ss:$0 sm:$0xff]  ;;  %v4443_v12 = vmul.f32 %v9829_v22, %v9487_v53 }
  0x4f   : > { %624 = vst.msk [vmem:[#allocation2 + $0x118] sm:$0x3] %vm588_vm1, %v9822_v19  ;;  %v1757_v7 = vadd.f32 %v9685_v30, %v1462_v45  ;;  %v4148_v30 = vmul.f32 %v9794_v27, %v9467_v46  ;;  %16822 = vst [vmem:[#allocation60_spill] sm:$0xff] %v9857_v58  ;;  %v4442_v19 = vmul.f32 %v9829_v22, %v9469_v47  ;;  %v3394_v27 = vrot.slane %v3266_v50, 1  ;;  %v9882_v20 = vld [vmem:[%s16298_s2 + $0x11] ss:$0 sm:$0xff] }
  0x50   : > { %644 = vst.msk [vmem:[#allocation2 + $0x1b8] sm:$0x3] %vm588_vm1, %v9857_v58  ;;  %v3101_v46 = vsel %vm1628_vm2, %v3099_v1, %v3100_v11  ;;  %v3687_v58 = vrot.slane %v3559_v62, 1  ;;  %v3688_v1 = vrot.slane %v3560_v56, 1  ;;  %v4737_v11 = vmul.f32 %v9840_v33, %v9507_v60 }
  0x51   : > { %v2051_v45 = vadd.f32 %v1925_v4, %v1757_v7  ;;  %v4736_v4 = vmul.f32 %v9840_v33, %v9489_v54  ;;  %v3981_v50 = vrot.slane %v3853_v52, 1  ;;  %v3982_v53 = vrot.slane %v3854_v21, 1  ;;  %604 = vst.msk [vmem:[#allocation2 + $0x80] sm:$0xff] %vm586_vm0, %v562_v44 }
  0x52   : > { %v4276_v47 = vrot.slane %v4147_v0, 2  ;;  %v4277_v22 = vrot.slane %v4148_v30, 2  ;;  %v4570_v5 = vrot.slane %v4442_v19, 2  ;;  %v5030_v15 = vmul.f32 %v9867_v40, %v9388_v25 }
  0x53   : > { %v2345_v7 = vadd.f32 %v2219_v10, %v2051_v45  ;;  %v5031_v63 = vmul.f32 %v9867_v40, %v9471_v48  ;;  %v4571_v10 = vrot.slane %v4443_v12, 2  ;;  %v4864_v62 = vrot.slane %v4736_v4, 2  ;;  %v9922_v4 = vld [vmem:[%s9292_s14 + $0x80] sm:$0xff] }
  0x54   : > { %v4865_v56 = vrot.slane %v4737_v11, 2  ;;  %v5324_v52 = vmul.f32 %v9877_v51, %v9390_v26  ;;  %v9895_v21 = vsel %vm1628_vm2, %v1947_v9, %v1948_v23  ;;  %v5618_v19 = vmul.f32 %v9882_v20, %v9397_v28  ;;  %v9910_v23 = vld [vmem:[%s16298_s2 + $0x14] ss:$0 sm:$0xff]  ;;  %v9915_v9 = vld [vmem:[%s16298_s2 + $0x17] ss:$0 sm:$0xff]  ;;  %16824 = vst [vmem:[#allocation62_spill] sm:$0xff] %v9922_v4 }
  0x55   : > { %v2639_v43 = vadd.f32 %v2513_v2, %v2345_v7  ;;  %16823 = vst [vmem:[#allocation61_spill] sm:$0xff] %v9895_v21  ;;  %v5325_v2 = vmul.f32 %v9877_v51, %v9720_v3  ;;  %v9902_v48 = vadd.f32 %v9700_v37, %v1463_v39  ;;  %v3395_v30 = vsel %vm1628_vm2, %v3393_v59, %v3394_v27  ;;  %v9927_v7 = vld [vmem:[%s16298_s2 + $0x1a] ss:$0 sm:$0xff]  ;;  %v9941_v11 = vld [vmem:[#allocation2 + $0x40] sm:$0xff] }
  0x56   : > { %v3689_v45 = vsel %vm1628_vm2, %v3687_v58, %v3688_v1  ;;  %v3983_v37 = vsel %vm1628_vm2, %v3981_v50, %v3982_v53  ;;  %v5159_v39 = vrot.slane %v5031_v63, 2  ;;  %v4278_v12 = vsel %vm4275_vm3, %v4276_v47, %v4277_v22  ;;  %625 = vst.msk [vmem:[#allocation2 + $0x120] sm:$0xff] %vm586_vm0, %v9922_v4  ;;  %16825 = vst [vmem:[#allocation63_spill] sm:$0xff] %v9941_v11 }
  0x57   : > { %v2933_v0 = vadd.f32 %v2807_v38, %v2639_v43  ;;  %v5158_v38 = vrot.slane %v5030_v15, 2  ;;  %v4572_v27 = vsel %vm4275_vm3, %v4570_v5, %v4571_v10  ;;  %v4866_v58 = vsel %vm4275_vm3, %v4864_v62, %v4865_v56 }
  0x58   : > { %v5452_v59 = vrot.slane %v5324_v52, 2  ;;  %v5619_v53 = vmul.f32 %v9882_v20, %v9751_v17  ;;  %v5746_v63 = vrot.slane %v5618_v19, 2  ;;  %v5912_v47 = vmul.f32 %v9910_v23, %v9409_v31 }
  0x59   : > { %v3227_v43 = vadd.f32 %v3101_v46, %v2933_v0  ;;  %v5453_v46 = vrot.slane %v5325_v2, 2  ;;  %v5913_v15 = vmul.f32 %v9910_v23, %v9568_v13  ;;  %v6206_v5 = vmul.f32 %v9915_v9, %v9491_v55 }
  0x5a   : > { %v878_v22 = vmul.f32 %v9402_v29, %v9388_v25  ;;  %v5160_v10 = vsel %vm4275_vm3, %v5158_v38, %v5159_v39  ;;  %v6207_v62 = vmul.f32 %v9915_v9, %v9778_v49  ;;  %v872_v31 = vmul.f32 %v9402_v29, %v9489_v54  ;;  %v9960_v39 = vld [vmem:[%s9292_s14 + $0x120] sm:$0xff] }
  0x5b   : > { %v3521_v1 = vadd.f32 %v3395_v30, %v3227_v43  ;;  %v6500_v13 = vmul.f32 %v9927_v7, %v9509_v61  ;;  %v6501_v56 = vmul.f32 %v9927_v7, %v9789_v8  ;;  %v942_v52 = vmul.f32 %v9414_v32, %v9528_v14  ;;  %16826 = vst [vmem:[#allocation64_spill] sm:$0xff] %v9960_v39 }
  0x5c   : > { %v910_v25 = vadd.f32 %v9533_v18, %v878_v22  ;;  %v5747_v2 = vrot.slane %v5619_v53, 2  ;;  %v904_v19 = vadd.f32 %v9533_v18, %v872_v31  ;;  %v1012_v30 = vmul.f32 %v9429_v35, %v9941_v11  ;;  %645 = vst.msk [vmem:[#allocation2 + $0x1c0] sm:$0xff] %vm586_vm0, %v9960_v39  ;;  %v9967_v53 = vld [vmem:[#allocation2 + $0x38] sm:$0x3] }
  0x5d   : > { %v3815_v50 = vadd.f32 %v3689_v45, %v3521_v1  ;;  %v6040_v45 = vrot.slane %v5912_v47, 2  ;;  %v6041_v29 = vrot.slane %v5913_v15, 2  ;;  %v6334_v43 = vrot.slane %v6206_v5, 2  ;;  %v9969_v47 = vld [vmem:[#allocation2 + $0xe0] sm:$0xff] }
  0x5e   : > { %v980_v38 = vadd.f32 %v9433_v36, %v910_v25  ;;  %v6335_v22 = vrot.slane %v6207_v62, 2  ;;  %v974_v44 = vadd.f32 %v942_v52, %v904_v19  ;;  %v1082_v32 = vmul.f32 %v9386_v24, %v9397_v28  ;;  %16827 = vst [vmem:[#allocation65_spill] sm:$0xff] %v9969_v47  ;;  %v16828_v24 = vld [vmem:[#allocation15_spill] sm:$0xff]  ;;  %v563_v62 = vld [vmem:[%s9339_s25 + $0x88] sm:$0x3] }
  0x5f   : > { %v4109_v0 = vadd.f32 %v3983_v37, %v3815_v50  ;;  %v6628_v18 = vrot.slane %v6500_v13, 2  ;;  %v6629_v37 = vrot.slane %v6501_v56, 2  ;;  %v1504_v36 = vmul.f32 %v9424_v34, %v9489_v54  ;;  %605 = vst.msk [vmem:[#allocation2 + $0x88] sm:$0x3] %vm588_vm1, %v563_v62 }
  0x60   : > { %v1050_v35 = vadd.f32 %v9453_v42, %v980_v38  ;;  %v5454_v15 = vsel %vm4275_vm3, %v5452_v59, %v5453_v46  ;;  %v1044_v5 = vadd.f32 %v1012_v30, %v974_v44  ;;  %v1152_v50 = vmul.f32 %v16828_v24, %v9449_v41  ;;  %v16829_v42 = vld [vmem:[#allocation19_spill] sm:$0xff]  ;;  %v16830_v44 = vld [vmem:[#allocation16_spill] sm:$0xff]  ;;  %v16832_v38 = vld [vmem:[#allocation21_spill] sm:$0xff] }
  0x61   : > { %v4404_v1 = vadd.f32 %v4278_v12, %v4109_v0  ;;  %v5748_v31 = vsel %vm4275_vm3, %v5746_v63, %v5747_v2  ;;  %v6042_v13 = vsel %vm4275_vm3, %v6040_v45, %v6041_v29  ;;  %v1799_v25 = vmul.f32 %v9591_v57, %v9528_v14  ;;  %v16831_v2 = vld [vmem:[#allocation17_spill] sm:$0xff] }
  0x62   : > { %v1120_v56 = vadd.f32 %v16829_v42, %v1050_v35  ;;  %v1114_v59 = vadd.f32 %v1082_v32, %v1044_v5  ;;  %v1222_v46 = vmul.f32 %v16830_v44, %v9969_v47  ;;  %v1800_v52 = vmul.f32 %v9591_v57, %v9967_v53  ;;  %v16833_v32 = vld [vmem:[#allocation33_spill] sm:$0xff]  ;;  %v10009_v42 = vld [vmem:[%s9292_s14 + $0x88] sm:$0x3] }
  0x63   : > { %v4698_v12 = vadd.f32 %v4572_v27, %v4404_v1  ;;  %v9983_v27 = vld [vmem:[#allocation2 + $0x48] sm:$0x3]  ;;  %v6336_v63 = vsel %vm4275_vm3, %v6334_v43, %v6335_v22  ;;  %v6630_v0 = vsel %vm4275_vm3, %v6628_v18, %v6629_v37  ;;  %v1292_v19 = vmul.f32 %v16831_v2, %v9509_v61  ;;  %v10000_v43 = vld [vmem:[#allocation2 + $0xd8] sm:$0x3]  ;;  %16836 = vst [vmem:[#allocation15_spill] sm:$0xff] %v10009_v42 }
  0x64   : > { %v1635_v30 = vrot.slane %v1504_v36, 1  ;;  %v1184_v29 = vadd.f32 %v1152_v50, %v1114_v59  ;;  %v1362_v1 = vmul.f32 %v16832_v38, %v9586_v6  ;;  %v2093_v35 = vmul.f32 %v16833_v32, %v9941_v11  ;;  %v16835_v37 = vld [vmem:[#allocation36_spill] sm:$0xff]  ;;  %626 = vst.msk [vmem:[#allocation2 + $0x128] sm:$0x3] %vm588_vm1, %v10009_v42  ;;  %v10030_v42 = vld [vmem:[#allocation2 + $0x178] sm:$0x3] }
  0x65   : > { %v4992_v34 = vadd.f32 %v4866_v58, %v4698_v12  ;;  %v9993_v58 = vld [vmem:[#allocation2 + $0x180] sm:$0xff]  ;;  %v16834_v12 = vld [vmem:[#allocation22_spill] sm:$0xff]  ;;  %v1929_v22 = vrot.slane %v1799_v25, 1  ;;  %v2094_v18 = vmul.f32 %v16833_v32, %v9983_v27  ;;  %v1930_v50 = vrot.slane %v1800_v52, 1  ;;  %v16838_v59 = vld [vmem:[#allocation28_spill] sm:$0xff] }
  0x66   : > { %v1190_v5 = vadd.f32 %v16834_v12, %v1120_v56  ;;  %v1254_v24 = vadd.f32 %v1222_v46, %v1184_v29  ;;  %v2388_v62 = vmul.f32 %v16835_v37, %v9751_v17  ;;  %v16839_v44 = vrot.slane %v16838_v59, 1  ;;  %v16840_v38 = vld [vmem:[#allocation48_spill] sm:$0xff] }
  0x67   : > { %v5286_v45 = vadd.f32 %v5160_v10, %v4992_v34  ;;  %v2387_v10 = vmul.f32 %v16835_v37, %v9397_v28  ;;  %v16837_v34 = vld [vmem:[#allocation24_spill] sm:$0xff]  ;;  %v2223_v2 = vrot.slane %v2093_v35, 1  ;;  %v2681_v12 = vmul.f32 %v16840_v38, %v9449_v41 }
  0x68   : > { %v1432_v56 = vmul.f32 %v16837_v34, %v9993_v58  ;;  %v1637_v25 = vsel %vm1628_vm2, %v1635_v30, %v16839_v44  ;;  %v10020_v46 = vld [vmem:[#allocation2 + $0xe8] sm:$0x3]  ;;  %v1324_v52 = vadd.f32 %v1292_v19, %v1254_v24  ;;  %v2682_v29 = vmul.f32 %v16840_v38, %v10000_v43  ;;  %v16841_v34 = vld [vmem:[#allocation23_spill] sm:$0xff] }
  0x69   : > { %v5580_v36 = vadd.f32 %v5454_v15, %v5286_v45  ;;  %v2224_v45 = vrot.slane %v2094_v18, 1  ;;  %v10025_v39 = vadd.f32 %v16841_v34, %v1190_v5  ;;  %v2517_v59 = vrot.slane %v2387_v10, 1  ;;  %v16843_v35 = vld [vmem:[#allocation52_spill] sm:$0xff]  ;;  %v16844_v5 = vld [vmem:[#allocation53_spill] sm:$0xff] }
  0x6a   : > { %v2518_v30 = vrot.slane %v2388_v62, 1  ;;  %v2975_v44 = vmul.f32 %v16843_v35, %v9969_v47  ;;  %v1394_v16 = vadd.f32 %v1362_v1, %v1324_v52  ;;  %v2812_v19 = vrot.slane %v2682_v29, 1  ;;  %v10040_v1 = vld [vmem:[%s9292_s14 + $0x128] sm:$0x3] }
  0x6b   : > { %v5874_v15 = vadd.f32 %v5748_v31, %v5580_v36  ;;  %16842 = vst [vmem:[#allocation19_spill] sm:$0xff] %v10025_v39  ;;  %v1931_v31 = vsel %vm1628_vm2, %v1929_v22, %v1930_v50  ;;  %v2811_v36 = vrot.slane %v2681_v12, 1  ;;  %v2976_v18 = vmul.f32 %v16843_v35, %v10020_v46  ;;  %16845 = vst [vmem:[#allocation16_spill] sm:$0xff] %v10040_v1 }
  0x6c   : > { %v3105_v24 = vrot.slane %v2975_v44, 1  ;;  %v3269_v10 = vmul.f32 %v16844_v5, %v9509_v61  ;;  %v1464_v62 = vadd.f32 %v1432_v56, %v1394_v16  ;;  %v2225_v21 = vsel %vm1628_vm2, %v2223_v2, %v2224_v45  ;;  %646 = vst.msk [vmem:[#allocation2 + $0x1c8] sm:$0x3] %vm588_vm1, %v10040_v1  ;;  %v10049_v16 = vld [vmem:[#allocation2 + $0x188] sm:$0x3] }
  0x6d   : > { %v6168_v4 = vadd.f32 %v6042_v13, %v5874_v15  ;;  %v3270_v13 = vmul.f32 %v16844_v5, %v9789_v8  ;;  %v2519_v22 = vsel %vm1628_vm2, %v2517_v59, %v2518_v30  ;;  %v3106_v50 = vrot.slane %v2976_v18, 1  ;;  %v16846_v15 = vld [vmem:[#allocation55_spill] sm:$0xff]  ;;  %v16848_v30 = vld [vmem:[#allocation57_spill] sm:$0xff] }
  0x6e   : > { %v3399_v12 = vrot.slane %v3269_v10, 1  ;;  %v3563_v52 = vmul.f32 %v16846_v15, %v9586_v6  ;;  %v3564_v56 = vmul.f32 %v16846_v15, %v10030_v42  ;;  %v2813_v2 = vsel %vm1628_vm2, %v2811_v36, %v2812_v19  ;;  %v16849_v36 = vld [vmem:[#allocation54_spill] sm:$0xff] }
  0x6f   : > { %v6462_v34 = vadd.f32 %v6336_v63, %v6168_v4  ;;  %v1759_v4 = vadd.f32 %v1637_v25, %v1464_v62  ;;  %v3400_v63 = vrot.slane %v3270_v13, 1  ;;  %v3107_v45 = vsel %vm1628_vm2, %v3105_v24, %v3106_v50 }
  0x70   : > { %v3693_v59 = vrot.slane %v3563_v52, 1  ;;  %v3857_v44 = vmul.f32 %v16848_v30, %v9993_v58  ;;  %v3858_v25 = vmul.f32 %v16848_v30, %v10049_v16  ;;  %v4151_v19 = vmul.f32 %v16849_v36, %v9489_v54 }
  0x71   : > { %v10047_v29 = vadd.f32 %v6630_v0, %v6462_v34  ;;  %v2053_v0 = vadd.f32 %v1931_v31, %v1759_v4  ;;  %v3401_v10 = vsel %vm1628_vm2, %v3399_v12, %v3400_v63  ;;  %v3694_v34 = vrot.slane %v3564_v56, 1  ;;  %v16850_v31 = vld [vmem:[#allocation59_spill] sm:$0xff] }
  0x72   : > { %v3987_v62 = vrot.slane %v3857_v44, 1  ;;  %v4152_v24 = vmul.f32 %v16849_v36, %v9507_v60  ;;  %v4446_v52 = vmul.f32 %v16850_v31, %v9528_v14  ;;  %v4447_v12 = vmul.f32 %v16850_v31, %v9967_v53 }
  0x73   : > { %16847 = vst [vmem:[#allocation17_spill] sm:$0xff] %v10047_v29  ;;  %v6788_v18 = vsel %vm586_vm0, %v10047_v29, 0.0  ;;  %v2347_v13 = vadd.f32 %v2225_v21, %v2053_v0  ;;  %v3695_v50 = vsel %vm1628_vm2, %v3693_v59, %v3694_v34  ;;  %v3988_v4 = vrot.slane %v3858_v25, 1  ;;  %v564_v0 = vld [vmem:[%s9339_s25 + $0x90] sm:$0xff] }
  0x74   : > { %6789 = vadd.xlane.f32.xlu0 %v6788_v18  ;;  %v4282_v63 = vrot.slane %v4151_v19, 2  ;;  %v4283_v56 = vrot.slane %v4152_v24, 2  ;;  %v4740_v44 = vmul.f32 %v9840_v33, %v9941_v11  ;;  %v4576_v1 = vrot.slane %v4446_v52, 2  ;;  %606 = vst.msk [vmem:[#allocation2 + $0x90] sm:$0xff] %vm586_vm0, %v564_v0 }
  0x75   : > { %v2641_v18 = vadd.f32 %v2519_v22, %v2347_v13  ;;  %v4577_v29 = vrot.slane %v4447_v12, 2  ;;  %v4741_v21 = vmul.f32 %v9840_v33, %v9983_v27  ;;  %v3989_v59 = vsel %vm1628_vm2, %v3987_v62, %v3988_v4 }
  0x76   : > { %v4284_v34 = vsel %vm4275_vm3, %v4282_v63, %v4283_v56  ;;  %v4870_v39 = vrot.slane %v4740_v44, 2  ;;  %v5034_v25 = vmul.f32 %v9867_v40, %v9397_v28  ;;  %v5035_v13 = vmul.f32 %v9867_v40, %v9751_v17 }
  0x77   : > { %v2935_v19 = vadd.f32 %v2813_v2, %v2641_v18  ;;  %v4578_v24 = vsel %vm4275_vm3, %v4576_v1, %v4577_v29  ;;  %v4871_v22 = vrot.slane %v4741_v21, 2  ;;  %v5328_v62 = vmul.f32 %v9877_v51, %v9449_v41 }
  0x78   : > { %v5164_v52 = vrot.slane %v5034_v25, 2  ;;  %v5329_v12 = vmul.f32 %v9877_v51, %v10000_v43  ;;  %v5622_v4 = vmul.f32 %v9882_v20, %v9969_v47  ;;  %v5165_v56 = vrot.slane %v5035_v13, 2 }
  0x79   : > { %v3229_v63 = vadd.f32 %v3107_v45, %v2935_v19  ;;  %v4872_v2 = vsel %vm4275_vm3, %v4870_v39, %v4871_v22  ;;  %v5623_v1 = vmul.f32 %v9882_v20, %v10020_v46  ;;  %v5458_v29 = vrot.slane %v5328_v62, 2  ;;  %v484_v45 = vld [vmem:[%s9292_s14 + $0x90] sm:$0xff] }
  0x7a   : > { %v5459_v44 = vrot.slane %v5329_v12, 2  ;;  %v5752_v18 = vrot.slane %v5622_v4, 2  ;;  %v5916_v21 = vmul.f32 %v9910_v23, %v9509_v61  ;;  %v5166_v25 = vsel %vm4275_vm3, %v5164_v52, %v5165_v56  ;;  %627 = vst.msk [vmem:[#allocation2 + $0x130] sm:$0xff] %vm586_vm0, %v484_v45 }
  0x7b   : > { %v3523_v0 = vadd.f32 %v3401_v10, %v3229_v63  ;;  %v5753_v11 = vrot.slane %v5623_v1, 2  ;;  %v5917_v47 = vmul.f32 %v9910_v23, %v9789_v8  ;;  %v6210_v22 = vmul.f32 %v9915_v9, %v9586_v6 }
  0x7c   : > { %v5460_v39 = vsel %vm4275_vm3, %v5458_v29, %v5459_v44  ;;  %v6046_v19 = vrot.slane %v5916_v21, 2  ;;  %v6211_v13 = vmul.f32 %v9915_v9, %v10030_v42  ;;  %v6504_v12 = vmul.f32 %v9927_v7, %v9993_v58 }
  0x7d   : > { %v3817_v62 = vadd.f32 %v3695_v50, %v3523_v0  ;;  %v5754_v10 = vsel %vm4275_vm3, %v5752_v18, %v5753_v11  ;;  %v6047_v52 = vrot.slane %v5917_v47, 2  ;;  %v6340_v4 = vrot.slane %v6210_v22, 2 }
  0x7e   : > { %v6341_v63 = vrot.slane %v6211_v13, 2  ;;  %v6505_v56 = vmul.f32 %v9927_v7, %v10049_v16  ;;  %v1797_v1 = vmul.f32 %v9591_v57, %v9489_v54  ;;  %v6634_v50 = vrot.slane %v6504_v12, 2  ;;  %v504_v13 = vld [vmem:[%s9292_s14 + $0x130] sm:$0xff] }
  0x7f   : > { %v4111_v29 = vadd.f32 %v3989_v59, %v3817_v62  ;;  %v10113_v44 = vsel %vm4275_vm3, %v6046_v19, %v6047_v52  ;;  %v2091_v11 = vmul.f32 %v16833_v32, %v9528_v14  ;;  %v2092_v0 = vmul.f32 %v16833_v32, %v9967_v53  ;;  %v16851_v52 = vld [vmem:[#allocation49_spill] sm:$0xff]  ;;  %647 = vst.msk [vmem:[#allocation2 + $0x1d0] sm:$0xff] %vm586_vm0, %v504_v13 }
  0x80   : > { %v10118_v47 = vsel %vm4275_vm3, %v6340_v4, %v6341_v63  ;;  %v6635_v18 = vrot.slane %v6505_v56, 2  ;;  %v1926_v21 = vrot.slane %v1797_v1, 1  ;;  %v2385_v59 = vmul.f32 %v16835_v37, %v9390_v26 }
  0x81   : > { %v4406_v45 = vadd.f32 %v4284_v34, %v4111_v29  ;;  %v2220_v22 = vrot.slane %v2091_v11, 1  ;;  %v2386_v19 = vmul.f32 %v16835_v37, %v9720_v3  ;;  %v16852_v12 = vrot.slane %v16851_v52, 1 }
  0x82   : > { %v10128_v62 = vsel %vm4275_vm3, %v6634_v50, %v6635_v18  ;;  %v2221_v63 = vrot.slane %v2092_v0, 1  ;;  %v2679_v34 = vmul.f32 %v16840_v38, %v9397_v28  ;;  %v2514_v1 = vrot.slane %v2385_v59, 1 }
  0x83   : > { %v1928_v4 = vsel %vm1628_vm2, %v1926_v21, %v16852_v12  ;;  %v4700_v56 = vadd.f32 %v4578_v24, %v4406_v45  ;;  %v2515_v29 = vrot.slane %v2386_v19, 1  ;;  %v2680_v50 = vmul.f32 %v16840_v38, %v9751_v17  ;;  %v565_v21 = vld [vmem:[%s9339_s25 + $0x98] sm:$0x3] }
  0x84   : > { %v2052_v26 = vadd.f32 %v1928_v4, %v9902_v48  ;;  %v2222_v37 = vsel %vm1628_vm2, %v2220_v22, %v2221_v63  ;;  %v2808_v11 = vrot.slane %v2679_v34, 1  ;;  %v2973_v18 = vmul.f32 %v16843_v35, %v9449_v41  ;;  %607 = vst.msk [vmem:[#allocation2 + $0x98] sm:$0x3] %vm588_vm1, %v565_v21 }
  0x85   : > { %v4994_v0 = vadd.f32 %v4872_v2, %v4700_v56  ;;  %v2516_v28 = vsel %vm1628_vm2, %v2514_v1, %v2515_v29  ;;  %v2974_v24 = vmul.f32 %v16843_v35, %v10000_v43  ;;  %v2809_v48 = vrot.slane %v2680_v50, 1 }
  0x86   : > { %v2346_v52 = vadd.f32 %v2222_v37, %v2052_v26  ;;  %v3102_v45 = vrot.slane %v2973_v18, 1  ;;  %v3267_v22 = vmul.f32 %v16844_v5, %v9491_v55  ;;  %v3268_v59 = vmul.f32 %v16844_v5, %v9778_v49  ;;  %v485_v18 = vld [vmem:[%s9292_s14 + $0x98] sm:$0x3] }
  0x87   : > { %v5288_v19 = vadd.f32 %v5166_v25, %v4994_v0  ;;  %v3103_v2 = vrot.slane %v2974_v24, 1  ;;  %v3561_v13 = vmul.f32 %v16846_v15, %v9509_v61  ;;  %v2810_v12 = vsel %vm1628_vm2, %v2808_v11, %v2809_v48  ;;  %v10168_v48 = vld [vmem:[%s9292_s14 + $0x1b0] sm:$0xff]  ;;  %628 = vst.msk [vmem:[#allocation2 + $0x138] sm:$0x3] %vm588_vm1, %v485_v18 }
  0x88   : > { %v2640_v41 = vadd.f32 %v2516_v28, %v2346_v52  ;;  %v3396_v4 = vrot.slane %v3267_v22, 1  ;;  %v3397_v63 = vrot.slane %v3268_v59, 1  ;;  %v3562_v34 = vmul.f32 %v16846_v15, %v9789_v8  ;;  %v16853_v52 = vld [vmem:[#allocation18_spill] sm:$0xff]  ;;  %v16854_v28 = vld [vmem:[#allocation20_spill] sm:$0xff]  ;;  %16855 = vst [vmem:[#allocation21_spill] sm:$0xff] %v10168_v48  ;;  %663 = vst.msk [vmem:[#allocation2 + $0x250] sm:$0xff] %vm586_vm0, %v10168_v48 }
  0x89   : > { %v5582_v56 = vadd.f32 %v5460_v39, %v5288_v19  ;;  %v3104_v1 = vsel %vm1628_vm2, %v3102_v45, %v3103_v2  ;;  %v3690_v29 = vrot.slane %v3561_v13, 1  ;;  %v3855_v50 = vmul.f32 %v16848_v30, %v9586_v6 }
  0x8a   : > { %v2934_v26 = vadd.f32 %v2810_v12, %v2640_v41  ;;  %v3398_v25 = vsel %vm1628_vm2, %v3396_v4, %v3397_v63  ;;  %v3691_v37 = vrot.slane %v3562_v34, 1  ;;  %v3856_v11 = vmul.f32 %v16848_v30, %v10030_v42  ;;  %v10178_v12 = vld [vmem:[%s9292_s14 + $0x1c0] sm:$0xff] }
  0x8b   : > { %v5876_v21 = vadd.f32 %v5754_v10, %v5582_v56  ;;  %v4149_v39 = vmul.f32 %v16849_v36, %v16853_v52  ;;  %v4150_v24 = vmul.f32 %v16849_v36, %v16854_v28  ;;  %v3984_v22 = vrot.slane %v3855_v50, 1  ;;  %16856 = vst [vmem:[#allocation33_spill] sm:$0xff] %v10178_v12  ;;  %665 = vst.msk [vmem:[#allocation2 + $0x260] sm:$0xff] %vm586_vm0, %v10178_v12 }
  0x8c   : > { %v3228_v0 = vadd.f32 %v3104_v1, %v2934_v26  ;;  %v3692_v45 = vsel %vm1628_vm2, %v3690_v29, %v3691_v37  ;;  %v3985_v59 = vrot.slane %v3856_v11, 1  ;;  %v4444_v19 = vmul.f32 %v16850_v31, %v9489_v54  ;;  %v8826_v37 = vld [vmem:[#allocation2 + $0xb0] sm:$0xff]  ;;  %v505_v11 = vld [vmem:[%s9292_s14 + $0x138] sm:$0x3] }
  0x8d   : > { %v6170_v10 = vadd.f32 %v10113_v44, %v5876_v21  ;;  %v4279_v2 = vrot.slane %v4149_v39, 2  ;;  %v4280_v13 = vrot.slane %v4150_v24, 2  ;;  %v4445_v63 = vmul.f32 %v16850_v31, %v9507_v60  ;;  %v524_v39 = vld [vmem:[%s9292_s14 + $0x1d0] sm:$0xff]  ;;  %648 = vst.msk [vmem:[#allocation2 + $0x1d8] sm:$0x3] %vm588_vm1, %v505_v11 }
  0x8e   : > { %v3522_v41 = vadd.f32 %v3398_v25, %v3228_v0  ;;  %v3986_v4 = vsel %vm1628_vm2, %v3984_v22, %v3985_v59  ;;  %v4573_v34 = vrot.slane %v4444_v19, 2  ;;  %v4738_v54 = vmul.f32 %v9840_v33, %v9528_v14  ;;  %v8827_v0 = vld [vmem:[#allocation2 + $0xc0] sm:$0xff]  ;;  %667 = vst.msk [vmem:[#allocation2 + $0x270] sm:$0xff] %vm586_vm0, %v524_v39 }
  0x8f   : > { %v6464_v44 = vadd.f32 %v10118_v47, %v6170_v10  ;;  %v4281_v26 = vsel %vm4275_vm3, %v4279_v2, %v4280_v13  ;;  %v4739_v1 = vmul.f32 %v9840_v33, %v9967_v53  ;;  %v4574_v29 = vrot.slane %v4445_v63, 2  ;;  %v10247_v39 = vld [vmem:[%s16298_s2] ss:$0 sm:$0xff] }
  0x90   : > { %v3816_v56 = vadd.f32 %v3692_v45, %v3522_v41  ;;  %v4867_v25 = vrot.slane %v4738_v54, 2  ;;  %v5032_v60 = vmul.f32 %v8826_v37, %v9867_v40  ;;  %v5033_v50 = vmul.f32 %v9867_v40, %v9720_v3  ;;  %v16858_v3 = vld [vmem:[#allocation19_spill] sm:$0xff]  ;;  %v16860_v37 = vld [vmem:[#allocation37_spill] sm:$0xff]  ;;  %16863 = vst [vmem:[#allocation28_spill] sm:$0xff] %v10247_v39 }
  0x91   : > { %v10196_v18 = vadd.f32 %v10128_v62, %v6464_v44  ;;  %v4868_v47 = vrot.slane %v4739_v1, 2  ;;  %v5326_v52 = vmul.f32 %v8827_v0, %v9877_v51  ;;  %v4575_v28 = vsel %vm4275_vm3, %v4573_v34, %v4574_v29  ;;  %v16859_v62 = vld [vmem:[#allocation34_spill] sm:$0xff] }
  0x92   : > { %v4110_v21 = vadd.f32 %v3986_v4, %v3816_v56  ;;  %v5161_v24 = vrot.slane %v5032_v60, 2  ;;  %v5162_v45 = vrot.slane %v5033_v50, 2  ;;  %v5327_v22 = vmul.f32 %v9877_v51, %v9751_v17  ;;  %v10210_v4 = vld [vmem:[#allocation2 + $0xd0] sm:$0xff]  ;;  %v10229_v50 = vld [vmem:[%s16298_s2 + $0x1] ss:$0 sm:$0xff] }
  0x93   : > { %16857 = vst [vmem:[#allocation22_spill] sm:$0xff] %v10196_v18  ;;  %v1330_v59 = vadd.f32 %v16859_v62, %v16858_v3  ;;  %v6794_v19 = vsel %vm586_vm0, %v10196_v18, 0.0  ;;  %v5455_v41 = vrot.slane %v5326_v52, 2  ;;  %v4869_v2 = vsel %vm4275_vm3, %v4867_v25, %v4868_v47  ;;  %16861 = vst [vmem:[#allocation36_spill] sm:$0xff] %v10229_v50 }
  0x94   : > { %v4405_v10 = vadd.f32 %v4281_v26, %v4110_v21  ;;  %6795 = vadd.xlane.f32.xlu1 %v6794_v19  ;;  %v5456_v13 = vrot.slane %v5327_v22, 2  ;;  %v5620_v63 = vmul.f32 %v10210_v4, %v9882_v20  ;;  %v5621_v17 = vmul.f32 %v9882_v20, %v10000_v43  ;;  %v10263_v19 = vld [vmem:[#allocation2 + $0x50] sm:$0xff] }
  0x95   : > { %v5163_v54 = vsel %vm4275_vm3, %v5161_v24, %v5162_v45  ;;  %v5914_v44 = vmul.f32 %v9910_v23, %v9491_v55  ;;  %v5915_v56 = vmul.f32 %v9910_v23, %v9778_v49  ;;  %v6208_v29 = vmul.f32 %v9915_v9, %v9509_v61  ;;  %v16865_v24 = vld [vmem:[#allocation63_spill] sm:$0xff] }
  0x96   : > { %v4699_v34 = vadd.f32 %v4575_v28, %v4405_v10  ;;  %v5749_v26 = vrot.slane %v5620_v63, 2  ;;  %v5750_v1 = vrot.slane %v5621_v17, 2  ;;  %v6209_v25 = vmul.f32 %v9915_v9, %v9789_v8  ;;  %v16868_v17 = vld [vmem:[#allocation42_spill] sm:$0xff] }
  0x97   : > { %v1400_v60 = vadd.f32 %v16860_v37, %v1330_v59  ;;  %v10233_v55 = vmul.f32 %v10229_v50, %v9967_v53  ;;  %v5457_v11 = vsel %vm4275_vm3, %v5455_v41, %v5456_v13  ;;  %v6043_v21 = vrot.slane %v5914_v44, 2  ;;  %v10269_v41 = vld [vmem:[%s16299_s3] ss:$0 sm:$0xff]  ;;  %v10275_v13 = vld [vmem:[%s16298_s2 + $0x6] ss:$0 sm:$0xff] }
  0x98   : > { %v4993_v49 = vadd.f32 %v4869_v2, %v4699_v34  ;;  %v6044_v47 = vrot.slane %v5915_v56, 2  ;;  %v6502_v61 = vmul.f32 %v9927_v7, %v9586_v6  ;;  %v6503_v8 = vmul.f32 %v9927_v7, %v10030_v42  ;;  %v10254_v6 = vld [vmem:[%s16298_s2 + $0x3] ss:$0 sm:$0xff]  ;;  %16866 = vst [vmem:[#allocation23_spill] sm:$0xff] %v10269_v41  ;;  %16867 = vst [vmem:[#allocation52_spill] sm:$0xff] %v10275_v13 }
  0x99   : > { %v10242_v0 = vmul.f32 %v10229_v50, %v9983_v27  ;;  %v873_v28 = vmul.f32 %v10247_v39, %v9528_v14  ;;  %16864 = vst [vmem:[#allocation48_spill] sm:$0xff] %v10254_v6  ;;  %v943_v45 = vmul.f32 %v10254_v6, %v16865_v24  ;;  %v10260_v22 = vmul.f32 %v9591_v57, %v9983_v27  ;;  %v10287_v37 = vld [vmem:[%s16298_s2 + $0x9] ss:$0 sm:$0xff]  ;;  %v10366_v14 = vld [vmem:[%s16298_s2 + $0x7] ss:$0 sm:$0xff] }
  0x9a   : > { %v5287_v52 = vadd.f32 %v5163_v54, %v4993_v49  ;;  %v5751_v3 = vsel %vm4275_vm3, %v5749_v26, %v5750_v1  ;;  %v6337_v62 = vrot.slane %v6208_v29, 2  ;;  %v6338_v59 = vrot.slane %v6209_v25, 2  ;;  %v10282_v29 = vld [vmem:[#allocation2 + $0x58] sm:$0x3]  ;;  %16869 = vst [vmem:[#allocation53_spill] sm:$0xff] %v10287_v37  ;;  %v10345_v26 = vld [vmem:[#allocation2 + $0x170] sm:$0xff] }
  0x9b   : > { %16862 = vst [vmem:[#allocation24_spill] sm:$0xff] %v10242_v0  ;;  %v905_v2 = vadd.f32 %v10269_v41, %v873_v28  ;;  %v1013_v63 = vmul.f32 %v10275_v13, %v10263_v19  ;;  %v1470_v34 = vadd.f32 %v16868_v17, %v1400_v60  ;;  %v6045_v54 = vsel %vm4275_vm3, %v6043_v21, %v6044_v47  ;;  %v10296_v21 = vld [vmem:[%s16298_s2 + $0xc] ss:$0 sm:$0xff]  ;;  %v16871_v47 = vld [vmem:[#allocation65_spill] sm:$0xff] }
  0x9c   : > { %v5581_v10 = vadd.f32 %v5457_v11, %v5287_v52  ;;  %v6631_v44 = vrot.slane %v6502_v61, 2  ;;  %v6632_v56 = vrot.slane %v6503_v8, 2  ;;  %v1083_v49 = vmul.f32 %v10287_v37, %v10210_v4  ;;  %16870 = vst [vmem:[#allocation55_spill] sm:$0xff] %v10296_v21  ;;  %v10300_v8 = vld [vmem:[#allocation2 + $0x30] sm:$0xff]  ;;  %16881 = vst [vmem:[#allocation37_spill] sm:$0xff] %v10366_v14 }
  0x9d   : > { %v975_v25 = vadd.f32 %v943_v45, %v905_v2  ;;  %v6339_v11 = vsel %vm4275_vm3, %v6337_v62, %v6338_v59  ;;  %v1153_v61 = vmul.f32 %v10296_v21, %v16871_v47  ;;  %v1506_v52 = vmul.f32 %v10300_v8, %v10229_v50  ;;  %v16873_v59 = vld [vmem:[#allocation46_spill] sm:$0xff]  ;;  %v10316_v17 = vld [vmem:[#allocation2 + $0xf0] sm:$0xff] }
  0x9e   : > { %v5875_v1 = vadd.f32 %v5751_v3, %v5581_v10  ;;  %v10306_v3 = vmul.f32 %v10229_v50, %v10282_v29  ;;  %v10310_v62 = vmul.f32 %v9591_v57, %v16865_v24  ;;  %v10313_v10 = vadd.f32 %v16873_v59, %v1470_v34  ;;  %v10331_v34 = vld [vmem:[#allocation2 + $0x190] sm:$0xff]  ;;  %v10417_v50 = vld [vmem:[%s9292_s14 + $0x158] sm:$0x3] }
  0x9f   : > { %v1045_v45 = vadd.f32 %v1013_v63, %v975_v25  ;;  %v6633_v2 = vsel %vm4275_vm3, %v6631_v44, %v6632_v56  ;;  %v10329_v57 = vmul.f32 %v16833_v32, %v10263_v19  ;;  %v10336_v44 = vld [vmem:[%s16298_s2 + $0xf] ss:$0 sm:$0xff]  ;;  %v10343_v59 = vld [vmem:[%s16298_s2 + $0x12] ss:$0 sm:$0xff]  ;;  %v1638_v60 = vrot.slane %v1506_v52, 1  ;;  %16885 = vst [vmem:[#allocation65_spill] sm:$0xff] %v10417_v50 }
  0xa0   : > { %v6169_v28 = vadd.f32 %v6045_v54, %v5875_v1  ;;  %16872 = vst [vmem:[#allocation57_spill] sm:$0xff] %v10306_v3  ;;  %16874 = vst [vmem:[#allocation54_spill] sm:$0xff] %v10313_v10  ;;  %v10321_v54 = vld [vmem:[%s16298_s2 + $0x4] ss:$0 sm:$0xff]  ;;  %v1223_v56 = vmul.f32 %v10336_v44, %v10316_v17  ;;  %v1293_v32 = vmul.f32 %v10345_v26, %v10343_v59  ;;  %v1932_v0 = vrot.slane %v10310_v62, 1 }
  0xa1   : > { %16875 = vst [vmem:[#allocation59_spill] sm:$0xff] %v10321_v54  ;;  %v10325_v63 = vmul.f32 %v10321_v54, %v10282_v29  ;;  %v1115_v25 = vadd.f32 %v1083_v49, %v1045_v45  ;;  %16877 = vst [vmem:[#allocation18_spill] sm:$0xff] %v10336_v44  ;;  %v10352_v49 = vld [vmem:[%s16298_s2 + $0x15] ss:$0 sm:$0xff]  ;;  %v2096_v12 = vmul.f32 %v10366_v14, %v10282_v29  ;;  %v10379_v52 = vld [vmem:[%s16298_s2 + $0xa] ss:$0 sm:$0xff] }
  0xa2   : > { %v6463_v1 = vadd.f32 %v6339_v11, %v6169_v28  ;;  %16878 = vst [vmem:[#allocation20_spill] sm:$0xff] %v10343_v59  ;;  %16879 = vst [vmem:[#allocation19_spill] sm:$0xff] %v10352_v49  ;;  %v1363_v11 = vmul.f32 %v10352_v49, %v9993_v58  ;;  %v10359_v28 = vld [vmem:[%s16298_s2 + $0x18] ss:$0 sm:$0xff]  ;;  %v2389_v49 = vmul.f32 %v10379_v52, %v10210_v4  ;;  %v16884_v3 = vrot.slane %v10233_v55, 1 }
  0xa3   : > { %16876 = vst [vmem:[#allocation49_spill] sm:$0xff] %v10325_v63  ;;  %16880 = vst [vmem:[#allocation34_spill] sm:$0xff] %v10359_v28  ;;  %v1433_v45 = vmul.f32 %v10359_v28, %v10331_v34  ;;  %v1185_v18 = vadd.f32 %v1153_v61, %v1115_v25  ;;  %v2226_v28 = vrot.slane %v10329_v57, 1  ;;  %v2683_v57 = vmul.f32 %v16840_v38, %v16871_v47 }
  0xa4   : > { %v10370_v48 = vadd.f32 %v6633_v2, %v6463_v1  ;;  %16883 = vst [vmem:[#allocation42_spill] sm:$0xff] %v10379_v52  ;;  %v2390_v2 = vmul.f32 %v10379_v52, %v10000_v43  ;;  %v10387_v1 = vld [vmem:[#allocation2 + $0xf8] sm:$0x3]  ;;  %v2684_v25 = vmul.f32 %v16840_v38, %v10020_v46  ;;  %v2977_v10 = vmul.f32 %v16843_v35, %v10316_v17 }
  0xa5   : > { %v1255_v62 = vadd.f32 %v1223_v56, %v1185_v18  ;;  %v2978_v54 = vmul.f32 %v16843_v35, %v10387_v1  ;;  %v3272_v18 = vmul.f32 %v16844_v5, %v10030_v42  ;;  %v1640_v63 = vsel %vm1628_vm2, %v1638_v60, %v16884_v3  ;;  %652 = vst.msk [vmem:[#allocation2 + $0x1f8] sm:$0x3] %vm588_vm1, %v10417_v50 }
  0xa6   : > { %16882 = vst [vmem:[#allocation63_spill] sm:$0xff] %v10370_v48  ;;  %v6791_v61 = vsel %vm586_vm0, %v10370_v48, 0.0  ;;  %v3271_v48 = vmul.f32 %v10345_v26, %v16844_v5  ;;  %v2227_v52 = vrot.slane %v2096_v12, 1  ;;  %v3565_v38 = vmul.f32 %v16846_v15, %v9993_v58 }
  0xa7   : > { %6792 = vadd.xlane.f32.xlu0 %v6791_v61  ;;  %v1325_v56 = vadd.f32 %v1293_v32, %v1255_v62  ;;  %v10406_v61 = vld [vmem:[#allocation2 + $0x198] sm:$0x3]  ;;  %v2520_v14 = vrot.slane %v2389_v49, 1  ;;  %v2521_v35 = vrot.slane %v2390_v2, 1  ;;  %v3566_v59 = vmul.f32 %v16846_v15, %v10049_v16  ;;  %v507_v32 = vld [vmem:[%s9292_s14 + $0x148] sm:$0x3] }
  0xa8   : > { %v3859_v5 = vmul.f32 %v16848_v30, %v10331_v34  ;;  %v2814_v55 = vrot.slane %v2683_v57, 1  ;;  %v2815_v44 = vrot.slane %v2684_v25, 1  ;;  %v3860_v12 = vmul.f32 %v16848_v30, %v10406_v61  ;;  %650 = vst.msk [vmem:[#allocation2 + $0x1e8] sm:$0x3] %vm588_vm1, %v507_v32  ;;  %v10430_v25 = vld [vmem:[%s9292_s14 + $0x168] sm:$0x3] }
  0xa9   : > { %v1395_v62 = vadd.f32 %v1363_v11, %v1325_v56  ;;  %v3108_v60 = vrot.slane %v2977_v10, 1  ;;  %v3109_v3 = vrot.slane %v2978_v54, 1  ;;  %v3402_v49 = vrot.slane %v3271_v48, 1  ;;  %16887 = vst [vmem:[#allocation46_spill] sm:$0xff] %v10430_v25  ;;  %654 = vst.msk [vmem:[#allocation2 + $0x208] sm:$0x3] %vm588_vm1, %v10430_v25 }
  0xaa   : > { %v3403_v2 = vrot.slane %v3272_v18, 1  ;;  %v3696_v21 = vrot.slane %v3565_v38, 1  ;;  %v3697_v37 = vrot.slane %v3566_v59, 1  ;;  %v10421_v11 = vmul.f32 %v10300_v8, %v16849_v36 }
  0xab   : > { %v1465_v15 = vadd.f32 %v1433_v45, %v1395_v62  ;;  %v16886_v30 = vrot.slane %v10260_v22, 1  ;;  %v2228_v10 = vsel %vm1628_vm2, %v2226_v28, %v2227_v52  ;;  %v3990_v48 = vrot.slane %v3859_v5, 1 }
  0xac   : > { %v3991_v54 = vrot.slane %v3860_v12, 1  ;;  %v2522_v59 = vsel %vm1628_vm2, %v2520_v14, %v2521_v35  ;;  %v4154_v8 = vmul.f32 %v16849_v36, %v9967_v53  ;;  %v4448_v18 = vmul.f32 %v16850_v31, %v16865_v24 }
  0xad   : > { %v1934_v57 = vsel %vm1628_vm2, %v1932_v0, %v16886_v30  ;;  %v1760_v45 = vadd.f32 %v1640_v63, %v1465_v15  ;;  %v2816_v0 = vsel %vm1628_vm2, %v2814_v55, %v2815_v44  ;;  %v3110_v22 = vsel %vm1628_vm2, %v3108_v60, %v3109_v3  ;;  %v10473_v30 = vld [vmem:[#allocation2 + $0x60] sm:$0xff] }
  0xae   : > { %v4449_v28 = vmul.f32 %v16850_v31, %v9983_v27  ;;  %v4742_v63 = vmul.f32 %v9840_v33, %v10263_v19  ;;  %v3404_v52 = vsel %vm1628_vm2, %v3402_v49, %v3403_v2  ;;  %v3698_v53 = vsel %vm1628_vm2, %v3696_v21, %v3697_v37 }
  0xaf   : > { %v2054_v14 = vadd.f32 %v1934_v57, %v1760_v45  ;;  %v4285_v36 = vrot.slane %v10421_v11, 2  ;;  %v3992_v56 = vsel %vm1628_vm2, %v3990_v48, %v3991_v54  ;;  %v4743_v44 = vmul.f32 %v9840_v33, %v10282_v29 }
  0xb0   : > { %v5036_v38 = vmul.f32 %v10210_v4, %v9867_v40  ;;  %v5037_v31 = vmul.f32 %v9867_v40, %v10000_v43  ;;  %v4286_v5 = vrot.slane %v4154_v8, 2  ;;  %v4579_v32 = vrot.slane %v4448_v18, 2 }
  0xb1   : > { %v2348_v35 = vadd.f32 %v2228_v10, %v2054_v14  ;;  %v5330_v62 = vmul.f32 %v9877_v51, %v16871_v47  ;;  %v4580_v37 = vrot.slane %v4449_v28, 2  ;;  %v4873_v21 = vrot.slane %v4742_v63, 2 }
  0xb2   : > { %v5331_v55 = vmul.f32 %v9877_v51, %v10020_v46  ;;  %v5624_v33 = vmul.f32 %v9882_v20, %v10316_v17  ;;  %v5625_v4 = vmul.f32 %v9882_v20, %v10387_v1  ;;  %v5918_v40 = vmul.f32 %v10345_v26, %v9910_v23 }
  0xb3   : > { %v2642_v12 = vadd.f32 %v2522_v59, %v2348_v35  ;;  %v5919_v43 = vmul.f32 %v9910_v23, %v10030_v42  ;;  %v4874_v60 = vrot.slane %v4743_v44, 2  ;;  %v5167_v3 = vrot.slane %v5036_v38, 2 }
  0xb4   : > { %v5168_v49 = vrot.slane %v5037_v31, 2  ;;  %v6212_v2 = vmul.f32 %v9915_v9, %v9993_v58  ;;  %v5461_v15 = vrot.slane %v5330_v62, 2  ;;  %v6213_v11 = vmul.f32 %v9915_v9, %v10049_v16  ;;  %v16889_v31 = vld [vmem:[#allocation53_spill] sm:$0xff] }
  0xb5   : > { %v2936_v51 = vadd.f32 %v2816_v0, %v2642_v12  ;;  %v6506_v20 = vmul.f32 %v9927_v7, %v10331_v34  ;;  %v5462_v26 = vrot.slane %v5331_v55, 2  ;;  %v5755_v57 = vrot.slane %v5624_v33, 2  ;;  %v10485_v0 = vld [vmem:[%s9292_s14 + $0x170] sm:$0xff]  ;;  %v10496_v12 = vld [vmem:[#allocation2 + $0x100] sm:$0xff] }
  0xb6   : > { %v6507_v23 = vmul.f32 %v9927_v7, %v10406_v61  ;;  %v874_v42 = vmul.f32 %v10247_v39, %v16865_v24  ;;  %v5756_v48 = vrot.slane %v5625_v4, 2  ;;  %v6049_v54 = vrot.slane %v5918_v40, 2  ;;  %16888 = vst [vmem:[#allocation66_spill] sm:$0xff] %v10485_v0  ;;  %655 = vst.msk [vmem:[#allocation2 + $0x210] sm:$0xff] %vm586_vm0, %v10485_v0 }
  0xb7   : > { %v3230_v10 = vadd.f32 %v3110_v22, %v2936_v51  ;;  %v6050_v45 = vrot.slane %v5919_v43, 2  ;;  %v6343_v59 = vrot.slane %v6212_v2, 2  ;;  %v944_v8 = vmul.f32 %v10254_v6, %v10263_v19  ;;  %v16892_v51 = vld [vmem:[#allocation18_spill] sm:$0xff] }
  0xb8   : > { %v906_v9 = vadd.f32 %v10269_v41, %v874_v42  ;;  %v1014_v18 = vmul.f32 %v10275_v13, %v10473_v30  ;;  %v6344_v7 = vrot.slane %v6213_v11, 2  ;;  %v6637_v63 = vrot.slane %v6506_v20, 2  ;;  %v16893_v11 = vld [vmem:[#allocation20_spill] sm:$0xff] }
  0xb9   : > { %v3524_v28 = vadd.f32 %v3404_v52, %v3230_v10  ;;  %v6638_v14 = vrot.slane %v6507_v23, 2  ;;  %v4287_v22 = vsel %vm4275_vm3, %v4285_v36, %v4286_v5  ;;  %v4581_v44 = vsel %vm4275_vm3, %v4579_v32, %v4580_v37  ;;  %v10502_v36 = vld [vmem:[#allocation2 + $0x1a0] sm:$0xff]  ;;  %v16895_v23 = vld [vmem:[#allocation34_spill] sm:$0xff] }
  0xba   : > { %v976_v38 = vadd.f32 %v944_v8, %v906_v9  ;;  %v1084_v35 = vmul.f32 %v16889_v31, %v16871_v47  ;;  %v4875_v55 = vsel %vm4275_vm3, %v4873_v21, %v4874_v60  ;;  %v5169_v33 = vsel %vm4275_vm3, %v5167_v3, %v5168_v49  ;;  %v16890_v32 = vld [vmem:[#allocation55_spill] sm:$0xff]  ;;  %v10512_v60 = vld [vmem:[#allocation2 + $0x68] sm:$0x3] }
  0xbb   : > { %v3818_v62 = vadd.f32 %v3698_v53, %v3524_v28  ;;  %v5463_v52 = vsel %vm4275_vm3, %v5461_v15, %v5462_v26  ;;  %v5757_v4 = vsel %vm4275_vm3, %v5755_v57, %v5756_v48  ;;  %v10500_v40 = vsel %vm4275_vm3, %v6049_v54, %v6050_v45  ;;  %v16891_v3 = vld [vmem:[#allocation36_spill] sm:$0xff]  ;;  %v16896_v10 = vld [vmem:[#allocation59_spill] sm:$0xff]  ;;  %v16897_v54 = vld [vmem:[#allocation37_spill] sm:$0xff] }
  0xbc   : > { %v1046_v5 = vadd.f32 %v1014_v18, %v976_v38  ;;  %v1154_v37 = vmul.f32 %v16890_v32, %v10316_v17  ;;  %v10507_v21 = vsel %vm4275_vm3, %v6343_v59, %v6344_v7  ;;  %v10510_v43 = vsel %vm4275_vm3, %v6637_v63, %v6638_v14  ;;  %v10528_v59 = vld [vmem:[#allocation2 + $0x108] sm:$0x3]  ;;  %v16898_v18 = vld [vmem:[#allocation42_spill] sm:$0xff] }
  0xbd   : > { %v4112_v53 = vadd.f32 %v3992_v56, %v3818_v62  ;;  %v1508_v49 = vmul.f32 %v16891_v3, %v16865_v24  ;;  %v1224_v15 = vmul.f32 %v16892_v51, %v10496_v12  ;;  %v1294_v20 = vmul.f32 %v16893_v11, %v9993_v58  ;;  %v16894_v56 = vld [vmem:[#allocation19_spill] sm:$0xff]  ;;  %v10547_v62 = vld [vmem:[%s16298_s2 + $0xd] ss:$0 sm:$0xff]  ;;  %v10677_v51 = vld [vmem:[%s16298_s2 + $0x14] ss:$0 sm:$0xff] }
  0xbe   : > { %v1116_v2 = vadd.f32 %v1084_v35, %v1046_v5  ;;  %v1364_v26 = vmul.f32 %v16894_v56, %v10331_v34  ;;  %v1434_v42 = vmul.f32 %v16895_v23, %v10502_v36  ;;  %v1803_v48 = vmul.f32 %v16896_v10, %v10263_v19  ;;  %16900 = vst [vmem:[#allocation68_spill] sm:$0xff] %v10547_v62  ;;  %v16902_v23 = vld [vmem:[#allocation24_spill] sm:$0xff] }
  0xbf   : > { %v4407_v57 = vadd.f32 %v4287_v22, %v4112_v53  ;;  %v2097_v45 = vmul.f32 %v16897_v54, %v10473_v30  ;;  %v2098_v8 = vmul.f32 %v16897_v54, %v10512_v60  ;;  %v2391_v28 = vmul.f32 %v16898_v18, %v16871_v47  ;;  %16914 = vst [vmem:[#allocation76_spill] sm:$0xff] %v10677_v51 }
  0xc0   : > { %v1186_v9 = vadd.f32 %v1154_v37, %v1116_v2  ;;  %v2392_v7 = vmul.f32 %v16898_v18, %v10020_v46  ;;  %v10538_v14 = vmul.f32 %v16891_v3, %v10512_v60  ;;  %v1641_v22 = vrot.slane %v1508_v49, 1  ;;  %v10556_v37 = vld [vmem:[%s16298_s2 + $0x10] ss:$0 sm:$0xff] }
  0xc1   : > { %v4701_v63 = vadd.f32 %v4581_v44, %v4407_v57  ;;  %v10542_v38 = vmul.f32 %v16896_v10, %v10512_v60  ;;  %v2685_v5 = vmul.f32 %v10547_v62, %v10316_v17  ;;  %v2686_v44 = vmul.f32 %v10547_v62, %v10387_v1  ;;  %16901 = vst [vmem:[#allocation69_spill] sm:$0xff] %v10556_v37 }
  0xc2   : > { %16899 = vst [vmem:[#allocation67_spill] sm:$0xff] %v10538_v14  ;;  %v1256_v35 = vadd.f32 %v1224_v15, %v1186_v9  ;;  %v2979_v53 = vmul.f32 %v10556_v37, %v10496_v12  ;;  %v1935_v2 = vrot.slane %v1803_v48, 1  ;;  %v2229_v15 = vrot.slane %v2097_v45, 1 }
  0xc3   : > { %v4995_v49 = vadd.f32 %v4875_v55, %v4701_v63  ;;  %v2980_v57 = vmul.f32 %v10556_v37, %v10528_v59  ;;  %v2230_v25 = vrot.slane %v2098_v8, 1  ;;  %v2523_v50 = vrot.slane %v2391_v28, 1  ;;  %v10567_v37 = vld [vmem:[#allocation2 + $0x1a8] sm:$0x3]  ;;  %v10579_v8 = vld [vmem:[%s9292_s14 + $0x178] sm:$0x3] }
  0xc4   : > { %v1326_v9 = vadd.f32 %v1294_v20, %v1256_v35  ;;  %v2524_v0 = vrot.slane %v2392_v7, 1  ;;  %v16903_v56 = vrot.slane %v16902_v23, 1  ;;  %v2817_v48 = vrot.slane %v2685_v5, 1  ;;  %16905 = vst [vmem:[#allocation70_spill] sm:$0xff] %v10579_v8  ;;  %v16906_v28 = vld [vmem:[#allocation49_spill] sm:$0xff] }
  0xc5   : > { %v5289_v62 = vadd.f32 %v5169_v33, %v4995_v49  ;;  %v2818_v45 = vrot.slane %v2686_v44, 1  ;;  %v3111_v63 = vrot.slane %v2979_v53, 1  ;;  %v3112_v20 = vrot.slane %v2980_v57, 1  ;;  %v10572_v33 = vld [vmem:[%s16298_s2 + $0x13] ss:$0 sm:$0xff] }
  0xc6   : > { %v1643_v11 = vsel %vm1628_vm2, %v1641_v22, %v16903_v56  ;;  %v1396_v55 = vadd.f32 %v1364_v26, %v1326_v9  ;;  %16904 = vst [vmem:[#allocation24_spill] sm:$0xff] %v10572_v33  ;;  %v3273_v56 = vmul.f32 %v10572_v33, %v9993_v58  ;;  %v3274_v23 = vmul.f32 %v10572_v33, %v10049_v16  ;;  %v10591_v5 = vld [vmem:[%s16298_s2 + $0x16] ss:$0 sm:$0xff]  ;;  %v10610_v53 = vld [vmem:[%s16298_s2 + $0x2] ss:$0 sm:$0xff] }
  0xc7   : > { %v5583_v54 = vadd.f32 %v5463_v52, %v5289_v62  ;;  %v16907_v7 = vrot.slane %v16906_v28, 1  ;;  %v2231_v22 = vsel %vm1628_vm2, %v2229_v15, %v2230_v25  ;;  %v2525_v35 = vsel %vm1628_vm2, %v2523_v50, %v2524_v0  ;;  %656 = vst.msk [vmem:[#allocation2 + $0x218] sm:$0x3] %vm588_vm1, %v10579_v8  ;;  %16908 = vst [vmem:[#allocation49_spill] sm:$0xff] %v10591_v5  ;;  %v10600_v25 = vld [vmem:[%s16298_s2 + $0x19] ss:$0 sm:$0xff] }
  0xc8   : > { %v1466_v26 = vadd.f32 %v1434_v42, %v1396_v55  ;;  %v3567_v42 = vmul.f32 %v10591_v5, %v10331_v34  ;;  %v3568_v44 = vmul.f32 %v10591_v5, %v10406_v61  ;;  %16909 = vst [vmem:[#allocation71_spill] sm:$0xff] %v10600_v25  ;;  %v3861_v50 = vmul.f32 %v10600_v25, %v10502_v36 }
  0xc9   : > { %v1937_v52 = vsel %vm1628_vm2, %v1935_v2, %v16907_v7  ;;  %v5877_v62 = vadd.f32 %v5757_v4, %v5583_v54  ;;  %v2819_v4 = vsel %vm1628_vm2, %v2817_v48, %v2818_v45  ;;  %v3862_v54 = vmul.f32 %v10600_v25, %v10567_v37  ;;  %v10621_v48 = vld [vmem:[%s16298_s2 + $0x5] ss:$0 sm:$0xff] }
  0xca   : > { %v1761_v0 = vadd.f32 %v1643_v11, %v1466_v26  ;;  %v4155_v49 = vmul.f32 %v10610_v53, %v16865_v24  ;;  %v3113_v15 = vsel %vm1628_vm2, %v3111_v63, %v3112_v20  ;;  %v3405_v57 = vrot.slane %v3273_v56, 1 }
  0xcb   : > { %v6171_v2 = vadd.f32 %v10500_v40, %v5877_v62  ;;  %v3406_v9 = vrot.slane %v3274_v23, 1  ;;  %v4156_v55 = vmul.f32 %v10610_v53, %v9983_v27  ;;  %v4450_v45 = vmul.f32 %v10621_v48, %v10263_v19  ;;  %v10631_v27 = vld [vmem:[%s16298_s2 + $0x8] ss:$0 sm:$0xff] }
  0xcc   : > { %v2055_v11 = vadd.f32 %v1937_v52, %v1761_v0  ;;  %v4451_v24 = vmul.f32 %v10621_v48, %v10282_v29  ;;  %v3699_v63 = vrot.slane %v3567_v42, 1  ;;  %v3700_v20 = vrot.slane %v3568_v44, 1  ;;  %16910 = vst [vmem:[#allocation72_spill] sm:$0xff] %v10631_v27 }
  0xcd   : > { %v6465_v40 = vadd.f32 %v10507_v21, %v6171_v2  ;;  %v3993_v56 = vrot.slane %v3861_v50, 1  ;;  %v3994_v26 = vrot.slane %v3862_v54, 1  ;;  %v4288_v28 = vrot.slane %v4155_v49, 2  ;;  %v10655_v2 = vld [vmem:[%s16298_s2 + $0xe] ss:$0 sm:$0xff] }
  0xce   : > { %v2349_v23 = vadd.f32 %v2231_v22, %v2055_v11  ;;  %v4744_v7 = vmul.f32 %v10631_v27, %v10473_v30  ;;  %v4745_v21 = vmul.f32 %v10631_v27, %v10512_v60  ;;  %v10643_v22 = vld [vmem:[%s16298_s2 + $0xb] ss:$0 sm:$0xff]  ;;  %v4289_v50 = vrot.slane %v4156_v55, 2  ;;  %16912 = vst [vmem:[#allocation74_spill] sm:$0xff] %v10655_v2  ;;  %v10665_v55 = vld [vmem:[%s16298_s2 + $0x11] ss:$0 sm:$0xff] }
  0xcf   : > { %v10636_v52 = vadd.f32 %v10510_v43, %v6465_v40  ;;  %v5038_v62 = vmul.f32 %v10643_v22, %v16871_v47  ;;  %v5039_v42 = vmul.f32 %v10643_v22, %v10020_v46  ;;  %v4582_v0 = vrot.slane %v4450_v45, 2  ;;  %16913 = vst [vmem:[#allocation75_spill] sm:$0xff] %v10665_v55 }
  0xd0   : > { %v2643_v44 = vadd.f32 %v2525_v35, %v2349_v23  ;;  %v4583_v54 = vrot.slane %v4451_v24, 2  ;;  %v3407_v49 = vsel %vm1628_vm2, %v3405_v57, %v3406_v9  ;;  %v5332_v47 = vmul.f32 %v10655_v2, %v10316_v17 }
  0xd1   : > { %16911 = vst [vmem:[#allocation73_spill] sm:$0xff] %v10636_v52  ;;  %v6797_v43 = vsel %vm586_vm0, %v10636_v52, 0.0  ;;  %v5333_v46 = vmul.f32 %v10655_v2, %v10387_v1  ;;  %v3701_v11 = vsel %vm1628_vm2, %v3699_v63, %v3700_v20  ;;  %v5626_v57 = vmul.f32 %v10665_v55, %v10496_v12 }
  0xd2   : > { %6798 = vadd.xlane.f32.xlu1 %v6797_v43  ;;  %v2937_v35 = vadd.f32 %v2819_v4, %v2643_v44  ;;  %v5627_v9 = vmul.f32 %v10665_v55, %v10528_v59  ;;  %v4876_v45 = vrot.slane %v4744_v7, 2  ;;  %v4877_v24 = vrot.slane %v4745_v21, 2 }
  0xd3   : > { %v5170_v40 = vrot.slane %v5038_v62, 2  ;;  %v5171_v23 = vrot.slane %v5039_v42, 2  ;;  %v3995_v4 = vsel %vm1628_vm2, %v3993_v56, %v3994_v26  ;;  %v4290_v63 = vsel %vm4275_vm3, %v4288_v28, %v4289_v50  ;;  %v10686_v26 = vld [vmem:[%s16298_s2 + $0x17] ss:$0 sm:$0xff] }
  0xd4   : > { %v3231_v18 = vadd.f32 %v3113_v15, %v2937_v35  ;;  %v4584_v20 = vsel %vm4275_vm3, %v4582_v0, %v4583_v54  ;;  %v5464_v44 = vrot.slane %v5332_v47, 2  ;;  %v5465_v43 = vrot.slane %v5333_v46, 2  ;;  %16915 = vst [vmem:[#allocation77_spill] sm:$0xff] %v10686_v26  ;;  %v10699_v0 = vld [vmem:[%s16298_s2 + $0x1a] ss:$0 sm:$0xff]  ;;  %v10705_v47 = vld [vmem:[#allocation2 + $0x70] sm:$0xff] }
  0xd5   : > { %v5920_v7 = vmul.f32 %v10677_v51, %v9993_v58  ;;  %v5921_v21 = vmul.f32 %v10677_v51, %v10049_v16  ;;  %v5758_v62 = vrot.slane %v5626_v57, 2  ;;  %v5759_v56 = vrot.slane %v5627_v9, 2  ;;  %16916 = vst [vmem:[#allocation78_spill] sm:$0xff] %v10699_v0 }
  0xd6   : > { %v3525_v15 = vadd.f32 %v3407_v49, %v3231_v18  ;;  %v6214_v28 = vmul.f32 %v10686_v26, %v10331_v34  ;;  %v4878_v42 = vsel %vm4275_vm3, %v4876_v45, %v4877_v24  ;;  %v5172_v50 = vsel %vm4275_vm3, %v5170_v40, %v5171_v23 }
  0xd7   : > { %v6215_v58 = vmul.f32 %v10686_v26, %v10406_v61  ;;  %v875_v16 = vmul.f32 %v10247_v39, %v10263_v19  ;;  %v6508_v54 = vmul.f32 %v10699_v0, %v10502_v36  ;;  %v6509_v49 = vmul.f32 %v10699_v0, %v10567_v37 }
  0xd8   : > { %v3819_v18 = vadd.f32 %v3701_v11, %v3525_v15  ;;  %v945_v46 = vmul.f32 %v10254_v6, %v10473_v30  ;;  %v6052_v35 = vrot.slane %v5920_v7, 2  ;;  %v6053_v57 = vrot.slane %v5921_v21, 2  ;;  %v10714_v15 = vld [vmem:[#allocation2 + $0x78] sm:$0x3] }
  0xd9   : > { %v907_v11 = vadd.f32 %v10269_v41, %v875_v16  ;;  %v1015_v9 = vmul.f32 %v10275_v13, %v10705_v47  ;;  %v5466_v24 = vsel %vm4275_vm3, %v5464_v44, %v5465_v43  ;;  %v5760_v40 = vsel %vm4275_vm3, %v5758_v62, %v5759_v56 }
  0xda   : > { %v4113_v45 = vadd.f32 %v3995_v4, %v3819_v18  ;;  %v6346_v23 = vrot.slane %v6214_v28, 2  ;;  %v6347_v8 = vrot.slane %v6215_v58, 2  ;;  %v1085_v14 = vmul.f32 %v16889_v31, %v10316_v17  ;;  %v10729_v58 = vld [vmem:[#allocation2 + $0x110] sm:$0xff] }
  0xdb   : > { %v977_v52 = vadd.f32 %v945_v46, %v907_v11  ;;  %v1510_v7 = vmul.f32 %v16891_v3, %v10263_v19  ;;  %v6640_v16 = vrot.slane %v6508_v54, 2  ;;  %v6641_v41 = vrot.slane %v6509_v49, 2  ;;  %v16918_v18 = vld [vmem:[#allocation37_spill] sm:$0xff]  ;;  %v16920_v11 = vld [vmem:[#allocation42_spill] sm:$0xff] }
  0xdc   : > { %v4408_v21 = vadd.f32 %v4290_v63, %v4113_v45  ;;  %v1805_v4 = vmul.f32 %v16896_v10, %v10473_v30  ;;  %v6054_v44 = vsel %vm4275_vm3, %v6052_v35, %v6053_v57  ;;  %v1155_v62 = vmul.f32 %v16890_v32, %v10496_v12  ;;  %v10746_v32 = vld [vmem:[%s9292_s14 + $0x180] sm:$0xff] }
  0xdd   : > { %v1047_v43 = vadd.f32 %v1015_v9, %v977_v52  ;;  %v10727_v56 = vmul.f32 %v16896_v10, %v10714_v15  ;;  %v1644_v63 = vrot.slane %v1510_v7, 1  ;;  %v2099_v54 = vmul.f32 %v16918_v18, %v10705_v47  ;;  %v16919_v52 = vld [vmem:[#allocation18_spill] sm:$0xff]  ;;  %v10741_v7 = vld [vmem:[#allocation2 + $0x1b0] sm:$0xff]  ;;  %v16921_v10 = vld [vmem:[#allocation20_spill] sm:$0xff]  ;;  %16922 = vst [vmem:[#allocation80_spill] sm:$0xff] %v10746_v32 }
  0xde   : > { %v4702_v28 = vadd.f32 %v4584_v20, %v4408_v21  ;;  %v2100_v49 = vmul.f32 %v16918_v18, %v10714_v15  ;;  %v1225_v35 = vmul.f32 %v16919_v52, %v10729_v58  ;;  %v1938_v57 = vrot.slane %v1805_v4, 1  ;;  %v16924_v4 = vld [vmem:[#allocation34_spill] sm:$0xff]  ;;  %657 = vst.msk [vmem:[#allocation2 + $0x220] sm:$0xff] %vm586_vm0, %v10746_v32 }
  0xdf   : > { %16917 = vst [vmem:[#allocation79_spill] sm:$0xff] %v10727_v56  ;;  %v1117_v46 = vadd.f32 %v1085_v14, %v1047_v43  ;;  %v2393_v9 = vmul.f32 %v16920_v11, %v10316_v17  ;;  %v6348_v20 = vsel %vm4275_vm3, %v6346_v23, %v6347_v8  ;;  %v6642_v21 = vsel %vm4275_vm3, %v6640_v16, %v6641_v41  ;;  %v16923_v43 = vld [vmem:[#allocation19_spill] sm:$0xff]  ;;  %v16925_v8 = vld [vmem:[#allocation57_spill] sm:$0xff]  ;;  %v10763_v56 = vld [vmem:[#allocation2 + $0x118] sm:$0x3] }
  0xe0   : > { %v4996_v45 = vadd.f32 %v4878_v42, %v4702_v28  ;;  %v1295_v3 = vmul.f32 %v16921_v10, %v10331_v34  ;;  %v1365_v52 = vmul.f32 %v16923_v43, %v10502_v36  ;;  %v1435_v18 = vmul.f32 %v16924_v4, %v10741_v7 }
  0xe1   : > { %v1187_v14 = vadd.f32 %v1155_v62, %v1117_v46  ;;  %v16926_v23 = vrot.slane %v16925_v8, 1  ;;  %v2232_v28 = vrot.slane %v2099_v54, 1  ;;  %v2233_v10 = vrot.slane %v2100_v49, 1  ;;  %v16929_v54 = vld [vmem:[#allocation69_spill] sm:$0xff] }
  0xe2   : > { %v5290_v41 = vadd.f32 %v5172_v50, %v4996_v45  ;;  %v16927_v62 = vrot.slane %v10542_v38, 1  ;;  %v2394_v4 = vmul.f32 %v16920_v11, %v10387_v1  ;;  %v2526_v43 = vrot.slane %v2393_v9, 1  ;;  %v16928_v50 = vld [vmem:[#allocation68_spill] sm:$0xff] }
  0xe3   : > { %v1646_v16 = vsel %vm1628_vm2, %v1644_v63, %v16926_v23  ;;  %v1257_v31 = vadd.f32 %v1225_v35, %v1187_v14  ;;  %v2687_v45 = vmul.f32 %v16928_v50, %v10496_v12  ;;  %v2688_v63 = vmul.f32 %v16928_v50, %v10528_v59  ;;  %v10777_v14 = vld [vmem:[#allocation2 + $0x1b8] sm:$0x3] }
  0xe4   : > { %v1940_v46 = vsel %vm1628_vm2, %v1938_v57, %v16927_v62  ;;  %v5584_v42 = vadd.f32 %v5466_v24, %v5290_v41  ;;  %v2981_v49 = vmul.f32 %v16929_v54, %v10729_v58  ;;  %v2982_v38 = vmul.f32 %v16929_v54, %v10763_v56 }
  0xe5   : > { %v1327_v35 = vadd.f32 %v1295_v3, %v1257_v31  ;;  %v3275_v57 = vmul.f32 %v10572_v33, %v10331_v34  ;;  %v3276_v24 = vmul.f32 %v10572_v33, %v10406_v61  ;;  %v2234_v41 = vsel %vm1628_vm2, %v2232_v28, %v2233_v10 }
  0xe6   : > { %v5878_v9 = vadd.f32 %v5760_v40, %v5584_v42  ;;  %v3569_v8 = vmul.f32 %v10591_v5, %v10502_v36  ;;  %v3570_v31 = vmul.f32 %v10591_v5, %v10567_v37  ;;  %v2527_v23 = vrot.slane %v2394_v4, 1 }
  0xe7   : > { %v1397_v3 = vadd.f32 %v1365_v52, %v1327_v35  ;;  %v3863_v62 = vmul.f32 %v10600_v25, %v10741_v7  ;;  %v3864_v32 = vmul.f32 %v10600_v25, %v10777_v14  ;;  %v2820_v40 = vrot.slane %v2687_v45, 1 }
  0xe8   : > { %v6172_v33 = vadd.f32 %v6054_v44, %v5878_v9  ;;  %v2821_v42 = vrot.slane %v2688_v63, 1  ;;  %v3114_v54 = vrot.slane %v2981_v49, 1  ;;  %v3115_v10 = vrot.slane %v2982_v38, 1 }
  0xe9   : > { %v1467_v50 = vadd.f32 %v1435_v18, %v1397_v3  ;;  %v3408_v28 = vrot.slane %v3275_v57, 1  ;;  %v3409_v11 = vrot.slane %v3276_v24, 1  ;;  %v3702_v6 = vrot.slane %v3569_v8, 1 }
  0xea   : > { %v6466_v13 = vadd.f32 %v6348_v20, %v6172_v33  ;;  %v3703_v39 = vrot.slane %v3570_v31, 1  ;;  %v10790_v52 = vmul.f32 %v10610_v53, %v10263_v19  ;;  %v2528_v35 = vsel %vm1628_vm2, %v2526_v43, %v2527_v23 }
  0xeb   : > { %v1762_v4 = vadd.f32 %v1646_v16, %v1467_v50  ;;  %v3996_v5 = vrot.slane %v3863_v62, 1  ;;  %v3997_v25 = vrot.slane %v3864_v32, 1  ;;  %v2822_v45 = vsel %vm1628_vm2, %v2820_v40, %v2821_v42 }
  0xec   : > { %v10793_v44 = vadd.f32 %v6642_v21, %v6466_v13  ;;  %v4158_v18 = vmul.f32 %v10610_v53, %v10282_v29  ;;  %v4452_v33 = vmul.f32 %v10621_v48, %v10473_v30  ;;  %v3116_v19 = vsel %vm1628_vm2, %v3114_v54, %v3115_v10  ;;  %v10816_v54 = vld [vmem:[%s9292_s14 + $0x188] sm:$0x3] }
  0xed   : > { %v2056_v20 = vadd.f32 %v1940_v46, %v1762_v4  ;;  %v3410_v16 = vsel %vm1628_vm2, %v3408_v28, %v3409_v11  ;;  %v4453_v43 = vmul.f32 %v10621_v48, %v10512_v60  ;;  %v3704_v32 = vsel %vm1628_vm2, %v3702_v6, %v3703_v39  ;;  %16931 = vst [vmem:[#allocation81_spill] sm:$0xff] %v10816_v54  ;;  %v10842_v4 = vld [vmem:[#allocation2 + $0x80] sm:$0xff] }
  0xee   : > { %16930 = vst [vmem:[#allocation57_spill] sm:$0xff] %v10793_v44  ;;  %v6800_v13 = vsel %vm586_vm0, %v10793_v44, 0.0  ;;  %v4291_v21 = vrot.slane %v10790_v52, 2  ;;  %v4746_v29 = vmul.f32 %v10631_v27, %v10705_v47  ;;  %v3998_v46 = vsel %vm1628_vm2, %v3996_v5, %v3997_v25  ;;  %658 = vst.msk [vmem:[#allocation2 + $0x228] sm:$0x3] %vm588_vm1, %v10816_v54 }
  0xef   : > { %6801 = vadd.xlane.f32.xlu0 %v6800_v13  ;;  %v2350_v50 = vadd.f32 %v2234_v41, %v2056_v20  ;;  %v4747_v11 = vmul.f32 %v10631_v27, %v10714_v15  ;;  %v5040_v63 = vmul.f32 %v10643_v22, %v10316_v17  ;;  %v4292_v49 = vrot.slane %v4158_v18, 2 }
  0xf0   : > { %v4585_v38 = vrot.slane %v4452_v33, 2  ;;  %v5041_v39 = vmul.f32 %v10643_v22, %v10387_v1  ;;  %v5334_v6 = vmul.f32 %v10655_v2, %v10496_v12  ;;  %v4586_v25 = vrot.slane %v4453_v43, 2  ;;  %v16932_v33 = vld [vmem:[#allocation28_spill] sm:$0xff] }
  0xf1   : > { %v2644_v5 = vadd.f32 %v2528_v35, %v2350_v50  ;;  %v5335_v57 = vmul.f32 %v10655_v2, %v10528_v59  ;;  %v5628_v17 = vmul.f32 %v10665_v55, %v10729_v58  ;;  %v4879_v24 = vrot.slane %v4746_v29, 2  ;;  %v16933_v50 = vld [vmem:[#allocation48_spill] sm:$0xff] }
  0xf2   : > { %v5629_v9 = vmul.f32 %v10665_v55, %v10763_v56  ;;  %v5922_v1 = vmul.f32 %v10677_v51, %v10331_v34  ;;  %v5923_v41 = vmul.f32 %v10677_v51, %v10406_v61  ;;  %v4880_v31 = vrot.slane %v4747_v11, 2 }
  0xf3   : > { %v2938_v8 = vadd.f32 %v2822_v45, %v2644_v5  ;;  %v5173_v3 = vrot.slane %v5040_v63, 2  ;;  %v6216_v23 = vmul.f32 %v10686_v26, %v10502_v36  ;;  %v5174_v62 = vrot.slane %v5041_v39, 2  ;;  %v16934_v39 = vld [vmem:[#allocation23_spill] sm:$0xff]  ;;  %v16935_v5 = vld [vmem:[#allocation52_spill] sm:$0xff] }
  0xf4   : > { %v5467_v40 = vrot.slane %v5334_v6, 2  ;;  %v6217_v42 = vmul.f32 %v10686_v26, %v10567_v37  ;;  %v6510_v10 = vmul.f32 %v10699_v0, %v10741_v7  ;;  %v5468_v52 = vrot.slane %v5335_v57, 2 }
  0xf5   : > { %v3232_v28 = vadd.f32 %v3116_v19, %v2938_v8  ;;  %v5761_v34 = vrot.slane %v5628_v17, 2  ;;  %v6511_v61 = vmul.f32 %v10699_v0, %v10777_v14  ;;  %v5762_v35 = vrot.slane %v5629_v9, 2 }
  0xf6   : > { %v6055_v45 = vrot.slane %v5922_v1, 2  ;;  %v6056_v18 = vrot.slane %v5923_v41, 2  ;;  %v876_v20 = vmul.f32 %v16932_v33, %v10473_v30  ;;  %v6349_v13 = vrot.slane %v6216_v23, 2  ;;  %v10856_v23 = vld [vmem:[#allocation2 + $0x88] sm:$0x3] }
  0xf7   : > { %v3526_v43 = vadd.f32 %v3410_v16, %v3232_v28  ;;  %v6350_v29 = vrot.slane %v6217_v42, 2  ;;  %v946_v11 = vmul.f32 %v16933_v50, %v10705_v47  ;;  %v6643_v19 = vrot.slane %v6510_v10, 2  ;;  %v16936_v10 = vld [vmem:[#allocation53_spill] sm:$0xff] }
  0xf8   : > { %v6644_v63 = vrot.slane %v6511_v61, 2  ;;  %v908_v6 = vadd.f32 %v16934_v39, %v876_v20  ;;  %v1016_v57 = vmul.f32 %v16935_v5, %v10842_v4  ;;  %v4293_v9 = vsel %vm4275_vm3, %v4291_v21, %v4292_v49  ;;  %v10865_v49 = vld [vmem:[#allocation2 + $0x120] sm:$0xff]  ;;  %v16941_v20 = vld [vmem:[#allocation18_spill] sm:$0xff]  ;;  %v16945_v5 = vld [vmem:[#allocation68_spill] sm:$0xff] }
  0xf9   : > { %v3820_v17 = vadd.f32 %v3704_v32, %v3526_v43  ;;  %v4587_v1 = vsel %vm4275_vm3, %v4585_v38, %v4586_v25  ;;  %v4881_v41 = vsel %vm4275_vm3, %v4879_v24, %v4880_v31  ;;  %v5175_v16 = vsel %vm4275_vm3, %v5173_v3, %v5174_v62  ;;  %v16937_v24 = vld [vmem:[#allocation55_spill] sm:$0xff]  ;;  %v16938_v3 = vld [vmem:[#allocation36_spill] sm:$0xff] }
  0xfa   : > { %v5469_v8 = vsel %vm4275_vm3, %v5467_v40, %v5468_v52  ;;  %v978_v42 = vadd.f32 %v946_v11, %v908_v6  ;;  %v1086_v28 = vmul.f32 %v16936_v10, %v10496_v12  ;;  %v5763_v33 = vsel %vm4275_vm3, %v5761_v34, %v5762_v35  ;;  %v16939_v40 = vld [vmem:[#allocation59_spill] sm:$0xff]  ;;  %v16940_v34 = vld [vmem:[#allocation37_spill] sm:$0xff] }
  0xfb   : > { %v4114_v61 = vadd.f32 %v3998_v46, %v3820_v17  ;;  %v6057_v32 = vsel %vm4275_vm3, %v6055_v45, %v6056_v18  ;;  %v10863_v21 = vsel %vm4275_vm3, %v6349_v13, %v6350_v29  ;;  %v10868_v38 = vsel %vm4275_vm3, %v6643_v19, %v6644_v63  ;;  %v16942_v13 = vld [vmem:[#allocation42_spill] sm:$0xff]  ;;  %v16943_v19 = vld [vmem:[#allocation20_spill] sm:$0xff]  ;;  %v16944_v39 = vld [vmem:[#allocation19_spill] sm:$0xff] }
  0xfc   : > { %v1048_v25 = vadd.f32 %v1016_v57, %v978_v42  ;;  %v1156_v31 = vmul.f32 %v16937_v24, %v10729_v58  ;;  %v1512_v62 = vmul.f32 %v16938_v3, %v10473_v30  ;;  %v1807_v52 = vmul.f32 %v16939_v40, %v10705_v47  ;;  %v10892_v17 = vld [vmem:[#allocation2 + $0x128] sm:$0x3] }
  0xfd   : > { %v4409_v46 = vadd.f32 %v4293_v9, %v4114_v61  ;;  %v2101_v35 = vmul.f32 %v16940_v34, %v10842_v4  ;;  %v2102_v45 = vmul.f32 %v16940_v34, %v10856_v23  ;;  %v1226_v43 = vmul.f32 %v16941_v20, %v10865_v49 }
  0xfe   : > { %v1118_v18 = vadd.f32 %v1086_v28, %v1048_v25  ;;  %v2395_v29 = vmul.f32 %v16942_v13, %v10496_v12  ;;  %v2396_v50 = vmul.f32 %v16942_v13, %v10528_v59  ;;  %v1296_v63 = vmul.f32 %v16943_v19, %v10502_v36  ;;  %v10901_v28 = vld [vmem:[%s9292_s14 + $0x190] sm:$0xff]  ;;  %v10903_v25 = vld [vmem:[#allocation2 + $0x1c0] sm:$0xff] }
  0xff   : > { %v4703_v11 = vadd.f32 %v4587_v1, %v4409_v46  ;;  %v1366_v6 = vmul.f32 %v16944_v39, %v10741_v7  ;;  %v2689_v57 = vmul.f32 %v16945_v5, %v10729_v58  ;;  %v1647_v42 = vrot.slane %v1512_v62, 1  ;;  %16946 = vst [vmem:[#allocation28_spill] sm:$0xff] %v10901_v28  ;;  %659 = vst.msk [vmem:[#allocation2 + $0x230] sm:$0xff] %vm586_vm0, %v10901_v28  ;;  %v16950_v39 = vld [vmem:[#allocation67_spill] sm:$0xff] }
 0x100   : > { %v1188_v9 = vadd.f32 %v1156_v31, %v1118_v18  ;;  %v10896_v10 = vmul.f32 %v16939_v40, %v10856_v23  ;;  %v2690_v1 = vmul.f32 %v16945_v5, %v10763_v56  ;;  %v1941_v24 = vrot.slane %v1807_v52, 1  ;;  %v16947_v40 = vld [vmem:[#allocation69_spill] sm:$0xff]  ;;  %v16948_v52 = vld [vmem:[#allocation34_spill] sm:$0xff] }
 0x101   : > { %v4997_v61 = vadd.f32 %v4881_v41, %v4703_v11  ;;  %v2235_v3 = vrot.slane %v2101_v35, 1  ;;  %v2236_v46 = vrot.slane %v2102_v45, 1  ;;  %v2529_v62 = vrot.slane %v2395_v29, 1 }
 0x102   : > { %v1258_v31 = vadd.f32 %v1226_v43, %v1188_v9  ;;  %v2530_v34 = vrot.slane %v2396_v50, 1  ;;  %v10909_v18 = vmul.f32 %v16947_v40, %v10865_v49  ;;  %v2823_v13 = vrot.slane %v2689_v57, 1  ;;  %v16949_v43 = vld [vmem:[#allocation24_spill] sm:$0xff] }
 0x103   : > { %v5291_v20 = vadd.f32 %v5175_v16, %v4997_v61  ;;  %v2824_v19 = vrot.slane %v2690_v1, 1  ;;  %v2984_v41 = vmul.f32 %v16947_v40, %v10892_v17  ;;  %v1436_v35 = vmul.f32 %v16948_v52, %v10903_v25  ;;  %v16952_v16 = vld [vmem:[#allocation79_spill] sm:$0xff]  ;;  %v10926_v61 = vld [vmem:[#allocation2 + $0x1c8] sm:$0x3] }
 0x104   : > { %v1328_v11 = vadd.f32 %v1296_v63, %v1258_v31  ;;  %v3277_v29 = vmul.f32 %v16949_v43, %v10502_v36  ;;  %v16951_v9 = vrot.slane %v16950_v39, 1  ;;  %v16953_v57 = vrot.slane %v16952_v16, 1 }
 0x105   : > { %v5585_v50 = vadd.f32 %v5469_v8, %v5291_v20  ;;  %v3278_v63 = vmul.f32 %v16949_v43, %v10567_v37  ;;  %v2237_v52 = vsel %vm1628_vm2, %v2235_v3, %v2236_v46  ;;  %v2531_v45 = vsel %vm1628_vm2, %v2529_v62, %v2530_v34 }
 0x106   : > { %v1649_v28 = vsel %vm1628_vm2, %v1647_v42, %v16951_v9  ;;  %v1943_v1 = vsel %vm1628_vm2, %v1941_v24, %v16953_v57  ;;  %v1398_v31 = vadd.f32 %v1366_v6, %v1328_v11  ;;  %v3117_v8 = vrot.slane %v10909_v18, 1  ;;  %v16954_v9 = vld [vmem:[#allocation49_spill] sm:$0xff]  ;;  %v16955_v6 = vld [vmem:[#allocation71_spill] sm:$0xff] }
 0x107   : > { %v5879_v20 = vadd.f32 %v5763_v33, %v5585_v50  ;;  %v2825_v39 = vsel %vm1628_vm2, %v2823_v13, %v2824_v19  ;;  %v3118_v42 = vrot.slane %v2984_v41, 1  ;;  %v3571_v16 = vmul.f32 %v16954_v9, %v10741_v7 }
 0x108   : > { %v1468_v24 = vadd.f32 %v1436_v35, %v1398_v31  ;;  %v3411_v57 = vrot.slane %v3277_v29, 1  ;;  %v3572_v54 = vmul.f32 %v16954_v9, %v10777_v14  ;;  %v3865_v11 = vmul.f32 %v16955_v6, %v10903_v25 }
 0x109   : > { %v6173_v3 = vadd.f32 %v6057_v32, %v5879_v20  ;;  %v3412_v46 = vrot.slane %v3278_v63, 1  ;;  %v3866_v62 = vmul.f32 %v16955_v6, %v10926_v61  ;;  %v4159_v33 = vmul.f32 %v10610_v53, %v10473_v30 }
 0x10a   : > { %v1763_v34 = vadd.f32 %v1649_v28, %v1468_v24  ;;  %v4160_v18 = vmul.f32 %v10610_v53, %v10512_v60  ;;  %v4454_v13 = vmul.f32 %v10621_v48, %v10705_v47  ;;  %v4455_v19 = vmul.f32 %v10621_v48, %v10714_v15 }
 0x10b   : > { %v6467_v41 = vadd.f32 %v10863_v21, %v6173_v3  ;;  %v3705_v32 = vrot.slane %v3571_v16, 1  ;;  %v4748_v35 = vmul.f32 %v10631_v27, %v10842_v4  ;;  %v4749_v29 = vmul.f32 %v10631_v27, %v10856_v23  ;;  %v10963_v27 = vld [vmem:[%s9292_s14 + $0x198] sm:$0x3] }
 0x10c   : > { %v2057_v30 = vadd.f32 %v1943_v1, %v1763_v34  ;;  %v3706_v28 = vrot.slane %v3572_v54, 1  ;;  %v3999_v50 = vrot.slane %v3865_v11, 1  ;;  %v5042_v60 = vmul.f32 %v10643_v22, %v10496_v12  ;;  %16957 = vst [vmem:[#allocation23_spill] sm:$0xff] %v10963_v27  ;;  %660 = vst.msk [vmem:[#allocation2 + $0x238] sm:$0x3] %vm588_vm1, %v10963_v27 }
 0x10d   : > { %v10956_v63 = vadd.f32 %v10868_v38, %v6467_v41  ;;  %v4000_v31 = vrot.slane %v3866_v62, 1  ;;  %v4294_v20 = vrot.slane %v4159_v33, 2  ;;  %v5043_v21 = vmul.f32 %v10643_v22, %v10528_v59 }
 0x10e   : > { %v2351_v16 = vadd.f32 %v2237_v52, %v2057_v30  ;;  %v4295_v24 = vrot.slane %v4160_v18, 2  ;;  %v4588_v3 = vrot.slane %v4454_v13, 2  ;;  %v4589_v44 = vrot.slane %v4455_v19, 2 }
 0x10f   : > { %16956 = vst [vmem:[#allocation48_spill] sm:$0xff] %v10956_v63  ;;  %v6803_v1 = vsel %vm586_vm0, %v10956_v63, 0.0  ;;  %v4882_v54 = vrot.slane %v4748_v35, 2  ;;  %v4883_v11 = vrot.slane %v4749_v29, 2  ;;  %v5176_v34 = vrot.slane %v5042_v60, 2  ;;  %v10993_v60 = vld [vmem:[#allocation2 + $0x90] sm:$0xff] }
 0x110   : > { %6804 = vadd.xlane.f32.xlu1 %v6803_v1  ;;  %v2645_v12 = vadd.f32 %v2531_v45, %v2351_v16  ;;  %v5177_v38 = vrot.slane %v5043_v21, 2  ;;  %v5336_v62 = vmul.f32 %v10655_v2, %v10729_v58  ;;  %v5337_v59 = vmul.f32 %v10655_v2, %v10763_v56  ;;  %v11007_v16 = vld [vmem:[%s16298_s2 + $0x3] ss:$0 sm:$0xff]  ;;  %v11108_v63 = vld [vmem:[%s16298_s2 + $0x15] ss:$0 sm:$0xff] }
 0x111   : > { %v3119_v52 = vsel %vm1628_vm2, %v3117_v8, %v3118_v42  ;;  %v3413_v33 = vsel %vm1628_vm2, %v3411_v57, %v3412_v46  ;;  %v5630_v18 = vmul.f32 %v10665_v55, %v10865_v49  ;;  %v5631_v45 = vmul.f32 %v10665_v55, %v10892_v17  ;;  %16959 = vst [vmem:[#allocation53_spill] sm:$0xff] %v11007_v16  ;;  %v16973_v55 = vld [vmem:[#allocation61_spill] sm:$0xff] }
 0x112   : > { %v2939_v13 = vadd.f32 %v2825_v39, %v2645_v12  ;;  %v3707_v19 = vsel %vm1628_vm2, %v3705_v32, %v3706_v28  ;;  %v4001_v41 = vsel %vm1628_vm2, %v3999_v50, %v4000_v31  ;;  %v5924_v35 = vmul.f32 %v10677_v51, %v10502_v36  ;;  %16969 = vst [vmem:[#allocation69_spill] sm:$0xff] %v11108_v63 }
 0x113   : > { %v4296_v29 = vsel %vm4275_vm3, %v4294_v20, %v4295_v24  ;;  %v4590_v8 = vsel %vm4275_vm3, %v4588_v3, %v4589_v44  ;;  %v10984_v42 = vsel %vm4275_vm3, %v4882_v54, %v4883_v11  ;;  %v5925_v57 = vmul.f32 %v10677_v51, %v10567_v37  ;;  %v10998_v44 = vld [vmem:[%s16298_s2] ss:$0 sm:$0xff]  ;;  %v11013_v54 = vld [vmem:[#allocation2 + $0x130] sm:$0xff]  ;;  %v16972_v51 = vld [vmem:[#allocation54_spill] sm:$0xff] }
 0x114   : > { %v3233_v46 = vadd.f32 %v3119_v52, %v2939_v13  ;;  %v10989_v39 = vsel %vm4275_vm3, %v5176_v34, %v5177_v38  ;;  %v5470_v32 = vrot.slane %v5336_v62, 2  ;;  %v5471_v30 = vrot.slane %v5337_v59, 2  ;;  %16958 = vst [vmem:[#allocation52_spill] sm:$0xff] %v10998_v44  ;;  %v11018_v11 = vld [vmem:[%s16299_s3] ss:$0 sm:$0xff] }
 0x115   : > { %v5764_v28 = vrot.slane %v5630_v18, 2  ;;  %v5765_v50 = vrot.slane %v5631_v45, 2  ;;  %v6218_v36 = vmul.f32 %v10686_v26, %v10741_v7  ;;  %v877_v37 = vmul.f32 %v10998_v44, %v10705_v47  ;;  %16960 = vst [vmem:[#allocation55_spill] sm:$0xff] %v11018_v11  ;;  %v11027_v59 = vld [vmem:[%s16298_s2 + $0x6] ss:$0 sm:$0xff] }
 0x116   : > { %v3527_v31 = vadd.f32 %v3413_v33, %v3233_v46  ;;  %v6058_v20 = vrot.slane %v5924_v35, 2  ;;  %v885_v21 = vmul.f32 %v10998_v44, %v10729_v58  ;;  %v947_v24 = vmul.f32 %v11007_v16, %v10842_v4  ;;  %16961 = vst [vmem:[#allocation36_spill] sm:$0xff] %v11027_v59 }
 0x117   : > { %v6059_v3 = vrot.slane %v5925_v57, 2  ;;  %v6219_v1 = vmul.f32 %v10686_v26, %v10777_v14  ;;  %v909_v34 = vadd.f32 %v11018_v11, %v877_v37  ;;  %v955_v12 = vmul.f32 %v11007_v16, %v10865_v49 }
 0x118   : > { %v3821_v38 = vadd.f32 %v3707_v19, %v3527_v31  ;;  %v917_v62 = vadd.f32 %v11018_v11, %v885_v21  ;;  %v1017_v52 = vmul.f32 %v11027_v59, %v10993_v60  ;;  %v1025_v33 = vmul.f32 %v11027_v59, %v11013_v54  ;;  %v11041_v19 = vld [vmem:[%s16298_s2 + $0x9] ss:$0 sm:$0xff] }
 0x119   : > { %v5472_v18 = vsel %vm4275_vm3, %v5470_v32, %v5471_v30  ;;  %v11036_v45 = vmul.f32 %v10699_v0, %v10903_v25  ;;  %v979_v13 = vadd.f32 %v947_v24, %v909_v34  ;;  %16962 = vst [vmem:[#allocation59_spill] sm:$0xff] %v11041_v19  ;;  %v1087_v35 = vmul.f32 %v11041_v19, %v10729_v58  ;;  %v11051_v24 = vld [vmem:[%s16298_s2 + $0xc] ss:$0 sm:$0xff] }
 0x11a   : > { %v4115_v57 = vadd.f32 %v4001_v41, %v3821_v38  ;;  %v5766_v46 = vsel %vm4275_vm3, %v5764_v28, %v5765_v50  ;;  %v987_v37 = vadd.f32 %v955_v12, %v917_v62  ;;  %v1095_v32 = vmul.f32 %v11041_v19, %v10741_v7  ;;  %16963 = vst [vmem:[#allocation37_spill] sm:$0xff] %v11051_v24  ;;  %v11066_v38 = vld [vmem:[%s16298_s2 + $0xf] ss:$0 sm:$0xff] }
 0x11b   : > { %v6352_v30 = vrot.slane %v6218_v36, 2  ;;  %v6353_v31 = vrot.slane %v6219_v1, 2  ;;  %v1049_v21 = vadd.f32 %v1017_v52, %v979_v13  ;;  %v1157_v34 = vmul.f32 %v11051_v24, %v10865_v49  ;;  %16964 = vst [vmem:[#allocation18_spill] sm:$0xff] %v11066_v38  ;;  %v11075_v52 = vld [vmem:[%s16298_s2 + $0x1] ss:$0 sm:$0xff] }
 0x11c   : > { %v4410_v27 = vadd.f32 %v4296_v29, %v4115_v57  ;;  %v6060_v41 = vsel %vm4275_vm3, %v6058_v20, %v6059_v3  ;;  %v1057_v28 = vadd.f32 %v1025_v33, %v987_v37  ;;  %v1165_v50 = vmul.f32 %v11051_v24, %v10903_v25  ;;  %v11070_v3 = vld [vmem:[#allocation2 + $0x1d0] sm:$0xff]  ;;  %16965 = vst [vmem:[#allocation42_spill] sm:$0xff] %v11075_v52  ;;  %v11082_v13 = vld [vmem:[%s9292_s14 + $0x1a0] sm:$0xff]  ;;  %v11124_v24 = vld [vmem:[%s16298_s2 + $0x18] ss:$0 sm:$0xff] }
 0x11d   : > { %v11060_v36 = vmul.f32 %v10699_v0, %v10926_v61  ;;  %v6646_v1 = vrot.slane %v11036_v45, 2  ;;  %v1119_v12 = vadd.f32 %v1087_v35, %v1049_v21  ;;  %v1227_v29 = vmul.f32 %v11066_v38, %v11013_v54  ;;  %16966 = vst [vmem:[#allocation20_spill] sm:$0xff] %v11082_v13  ;;  %v784_v57 = vld [vmem:[#allocation2 + $0x250] sm:$0xff]  ;;  %661 = vst.msk [vmem:[#allocation2 + $0x240] sm:$0xff] %vm586_vm0, %v11082_v13 }
 0x11e   : > { %v4704_v20 = vadd.f32 %v4590_v8, %v4410_v27  ;;  %v1127_v62 = vadd.f32 %v1095_v32, %v1057_v28  ;;  %v1514_v33 = vmul.f32 %v11075_v52, %v10705_v47  ;;  %v1515_v45 = vmul.f32 %v11075_v52, %v10714_v15  ;;  %v11090_v37 = vld [vmem:[%s16298_s2 + $0x12] ss:$0 sm:$0xff]  ;;  %16970 = vst [vmem:[#allocation34_spill] sm:$0xff] %v11124_v24 }
 0x11f   : > { %v6354_v35 = vsel %vm4275_vm3, %v6352_v30, %v6353_v31  ;;  %v1189_v27 = vadd.f32 %v1157_v34, %v1119_v12  ;;  %v1235_v8 = vmul.f32 %v11066_v38, %v11070_v3  ;;  %16967 = vst [vmem:[#allocation19_spill] sm:$0xff] %v11090_v37  ;;  %v1297_v32 = vmul.f32 %v11090_v37, %v10741_v7  ;;  %v11101_v31 = vld [vmem:[%s16298_s2 + $0x4] ss:$0 sm:$0xff] }
 0x120   : > { %v4998_v21 = vadd.f32 %v10984_v42, %v4704_v20  ;;  %v1197_v28 = vadd.f32 %v1165_v50, %v1127_v62  ;;  %v1305_v30 = vmul.f32 %v11090_v37, %v784_v57  ;;  %16968 = vst [vmem:[#allocation68_spill] sm:$0xff] %v11101_v31  ;;  %v1809_v34 = vmul.f32 %v11101_v31, %v10842_v4  ;;  %v11117_v57 = vld [vmem:[#allocation2 + $0x98] sm:$0x3] }
 0x121   : > { %v1259_v12 = vadd.f32 %v1227_v29, %v1189_v27  ;;  %v1367_v42 = vmul.f32 %v11108_v63, %v10903_v25  ;;  %v1530_v50 = vmul.f32 %v11075_v52, %v10729_v58  ;;  %v1531_v20 = vmul.f32 %v11075_v52, %v10763_v56 }
 0x122   : > { %v5292_v62 = vadd.f32 %v10989_v39, %v4998_v21  ;;  %v1650_v13 = vrot.slane %v1514_v33, 1  ;;  %v1651_v29 = vrot.slane %v1515_v45, 1  ;;  %v1825_v27 = vmul.f32 %v11101_v31, %v10865_v49 }
 0x123   : > { %v1267_v37 = vadd.f32 %v1235_v8, %v1197_v28  ;;  %v1329_v38 = vadd.f32 %v1297_v32, %v1259_v12  ;;  %v1437_v19 = vmul.f32 %v11124_v24, %v11070_v3  ;;  %v1826_v39 = vmul.f32 %v11101_v31, %v10892_v17  ;;  %v11134_v8 = vld [vmem:[%s16298_s2 + $0x7] ss:$0 sm:$0xff] }
 0x124   : > { %v5586_v21 = vadd.f32 %v5472_v18, %v5292_v62  ;;  %v6647_v33 = vrot.slane %v11060_v36, 2  ;;  %v1944_v45 = vrot.slane %v1809_v34, 1  ;;  %16971 = vst [vmem:[#allocation24_spill] sm:$0xff] %v11134_v8  ;;  %v2103_v32 = vmul.f32 %v11134_v8, %v10993_v60  ;;  %v786_v28 = vld [vmem:[#allocation2 + $0x260] sm:$0xff]  ;;  %v788_v18 = vld [vmem:[#allocation2 + $0x270] sm:$0xff] }
 0x125   : > { %v1399_v12 = vadd.f32 %v1367_v42, %v1329_v38  ;;  %v1674_v52 = vrot.slane %v1530_v50, 1  ;;  %v1675_v59 = vrot.slane %v1531_v20, 1  ;;  %v2104_v11 = vmul.f32 %v11134_v8, %v11117_v57 }
 0x126   : > { %v5880_v31 = vadd.f32 %v5766_v46, %v5586_v21  ;;  %v1375_v36 = vmul.f32 %v11108_v63, %v786_v28  ;;  %v1652_v34 = vsel %vm1628_vm2, %v1650_v13, %v1651_v29  ;;  %v1968_v62 = vrot.slane %v1825_v27, 1 }
 0x127   : > { %v1337_v16 = vadd.f32 %v1305_v30, %v1267_v37  ;;  %v1469_v44 = vadd.f32 %v1437_v19, %v1399_v12  ;;  %v1969_v0 = vrot.slane %v1826_v39, 1  ;;  %v2238_v26 = vrot.slane %v2103_v32, 1  ;;  %v11186_v39 = vld [vmem:[%s9292_s14 + $0x1a8] sm:$0x3] }
 0x128   : > { %v11144_v2 = vadd.f32 %v16973_v55, %v16972_v51  ;;  %v6174_v38 = vadd.f32 %v6060_v41, %v5880_v31  ;;  %v16974_v42 = vrot.slane %v10896_v10, 1  ;;  %v2239_v46 = vrot.slane %v2104_v11, 1  ;;  %v11162_v55 = vld [vmem:[%s16298_s2 + $0xa] ss:$0 sm:$0xff]  ;;  %v11166_v11 = vld [vmem:[#allocation2 + $0x138] sm:$0x3] }
 0x129   : > { %v6648_v20 = vsel %vm4275_vm3, %v6646_v1, %v6647_v33  ;;  %v1445_v21 = vmul.f32 %v11124_v24, %v788_v18  ;;  %v11152_v13 = vsel %vm1628_vm2, %v1674_v52, %v1675_v59  ;;  %v1764_v19 = vadd.f32 %v1652_v34, %v1469_v44  ;;  %16976 = vst [vmem:[#allocation79_spill] sm:$0xff] %v11186_v39  ;;  %v11199_v34 = vld [vmem:[#allocation2 + $0x1d8] sm:$0x3] }
 0x12a   : > { %v1946_v50 = vsel %vm1628_vm2, %v1944_v45, %v16974_v42  ;;  %v6468_v37 = vadd.f32 %v6354_v35, %v6174_v38  ;;  %v11156_v30 = vmul.f32 %v11134_v8, %v11013_v54  ;;  %v2240_v51 = vsel %vm1628_vm2, %v2238_v26, %v2239_v46  ;;  %662 = vst.msk [vmem:[#allocation2 + $0x248] sm:$0x3] %vm588_vm1, %v11186_v39 }
 0x12b   : > { %v2397_v10 = vmul.f32 %v11162_v55, %v10729_v58  ;;  %v1407_v59 = vadd.f32 %v1375_v36, %v1337_v16  ;;  %v11169_v44 = vsel %vm1628_vm2, %v1968_v62, %v1969_v0  ;;  %v2058_v41 = vadd.f32 %v1946_v50, %v1764_v19 }
 0x12c   : > { %v2398_v1 = vmul.f32 %v11162_v55, %v10763_v56  ;;  %v11173_v26 = vadd.f32 %v6648_v20, %v6468_v37  ;;  %v11177_v52 = vmul.f32 %v11134_v8, %v11166_v11  ;;  %v2691_v31 = vmul.f32 %v16945_v5, %v10865_v49 }
 0x12d   : > { %v2532_v35 = vrot.slane %v2397_v10, 1  ;;  %v2352_v29 = vadd.f32 %v2240_v51, %v2058_v41  ;;  %v2692_v0 = vmul.f32 %v16945_v5, %v10892_v17  ;;  %v2985_v16 = vmul.f32 %v16947_v40, %v11013_v54 }
 0x12e   : > { %16975 = vst [vmem:[#allocation67_spill] sm:$0xff] %v11173_v26  ;;  %v2533_v27 = vrot.slane %v2398_v1, 1  ;;  %v6806_v33 = vsel %vm586_vm0, %v11173_v26, 0.0  ;;  %v11192_v45 = vmul.f32 %v11134_v8, %v11070_v3  ;;  %v2826_v32 = vrot.slane %v2691_v31, 1 }
 0x12f   : > { %v2986_v28 = vmul.f32 %v16947_v40, %v11166_v11  ;;  %6807 = vadd.xlane.f32.xlu0 %v6806_v33  ;;  %v1477_v5 = vadd.f32 %v1445_v21, %v1407_v59  ;;  %v2827_v18 = vrot.slane %v2692_v0, 1  ;;  %v3120_v36 = vrot.slane %v2985_v16, 1 }
 0x130   : > { %16977 = vst [vmem:[#allocation49_spill] sm:$0xff] %v11192_v45  ;;  %v2534_v12 = vsel %vm1628_vm2, %v2532_v35, %v2533_v27  ;;  %v3279_v42 = vmul.f32 %v16949_v43, %v10741_v7  ;;  %v3280_v50 = vmul.f32 %v16949_v43, %v10777_v14  ;;  %v2262_v40 = vrot.slane %v11156_v30, 1 }
 0x131   : > { %v2646_v62 = vadd.f32 %v2534_v12, %v2352_v29  ;;  %v3121_v38 = vrot.slane %v2986_v28, 1  ;;  %v2828_v46 = vsel %vm1628_vm2, %v2826_v32, %v2827_v18  ;;  %v3573_v20 = vmul.f32 %v16954_v9, %v10903_v25 }
 0x132   : > { %v3574_v21 = vmul.f32 %v16954_v9, %v10926_v61  ;;  %v3414_v51 = vrot.slane %v3279_v42, 1  ;;  %v3415_v10 = vrot.slane %v3280_v50, 1  ;;  %v3867_v43 = vmul.f32 %v16955_v6, %v11070_v3 }
 0x133   : > { %v2940_v19 = vadd.f32 %v2828_v46, %v2646_v62  ;;  %v3122_v37 = vsel %vm1628_vm2, %v3120_v36, %v3121_v38  ;;  %v3708_v59 = vrot.slane %v3573_v20, 1  ;;  %v3868_v30 = vmul.f32 %v16955_v6, %v11199_v34 }
 0x134   : > { %v3709_v41 = vrot.slane %v3574_v21, 1  ;;  %v3416_v35 = vsel %vm1628_vm2, %v3414_v51, %v3415_v10  ;;  %v4161_v31 = vmul.f32 %v10610_v53, %v10705_v47  ;;  %v4162_v9 = vmul.f32 %v10610_v53, %v10714_v15  ;;  %v16978_v47 = vld [vmem:[#allocation72_spill] sm:$0xff]  ;;  %v16980_v51 = vld [vmem:[#allocation75_spill] sm:$0xff] }
 0x135   : > { %v3234_v1 = vadd.f32 %v3122_v37, %v2940_v19  ;;  %v4002_v27 = vrot.slane %v3867_v43, 1  ;;  %v4003_v0 = vrot.slane %v3868_v30, 1  ;;  %v4456_v16 = vmul.f32 %v10621_v48, %v10842_v4 }
 0x136   : > { %v3710_v29 = vsel %vm1628_vm2, %v3708_v59, %v3709_v41  ;;  %v4297_v32 = vrot.slane %v4161_v31, 2  ;;  %v4298_v28 = vrot.slane %v4162_v9, 2  ;;  %v4457_v6 = vmul.f32 %v10621_v48, %v10856_v23  ;;  %v16979_v23 = vld [vmem:[#allocation74_spill] sm:$0xff] }
 0x137   : > { %v3528_v33 = vadd.f32 %v3416_v35, %v3234_v1  ;;  %v4004_v12 = vsel %vm1628_vm2, %v4002_v27, %v4003_v0  ;;  %v4591_v18 = vrot.slane %v4456_v16, 2  ;;  %v4750_v36 = vmul.f32 %v16978_v47, %v10993_v60 }
 0x138   : > { %v4751_v53 = vmul.f32 %v16978_v47, %v11117_v57  ;;  %v4299_v62 = vsel %vm4275_vm3, %v4297_v32, %v4298_v28  ;;  %v4592_v38 = vrot.slane %v4457_v6, 2  ;;  %v5044_v4 = vmul.f32 %v10643_v22, %v10729_v58  ;;  %v11267_v28 = vld [vmem:[#allocation2 + $0xc0] sm:$0xff] }
 0x139   : > { %v3822_v15 = vadd.f32 %v3710_v29, %v3528_v33  ;;  %v4885_v42 = vrot.slane %v4750_v36, 2  ;;  %v5045_v48 = vmul.f32 %v10643_v22, %v10763_v56  ;;  %v5338_v46 = vmul.f32 %v16979_v23, %v10865_v49 }
 0x13a   : > { %v4886_v50 = vrot.slane %v4751_v53, 2  ;;  %v2263_v60 = vrot.slane %v11177_v52, 1  ;;  %v5179_v21 = vrot.slane %v5044_v4, 2  ;;  %v5339_v57 = vmul.f32 %v16979_v23, %v10892_v17  ;;  %v16981_v52 = vld [vmem:[#allocation76_spill] sm:$0xff] }
 0x13b   : > { %v4116_v20 = vadd.f32 %v4004_v12, %v3822_v15  ;;  %v11242_v19 = vadd.f32 %v11152_v13, %v1477_v5  ;;  %v4593_v58 = vsel %vm4275_vm3, %v4591_v18, %v4592_v38  ;;  %v5180_v37 = vrot.slane %v5045_v48, 2  ;;  %v16982_v5 = vld [vmem:[#allocation77_spill] sm:$0xff]  ;;  %v11275_v18 = vld [vmem:[#allocation2 + $0x140] sm:$0xff]  ;;  %v11286_v38 = vld [vmem:[%s16298_s2 + $0xd] ss:$0 sm:$0xff] }
 0x13c   : > { %v5632_v10 = vmul.f32 %v16980_v51, %v11013_v54  ;;  %v4887_v56 = vsel %vm4275_vm3, %v4885_v42, %v4886_v50  ;;  %v5633_v49 = vmul.f32 %v16980_v51, %v11166_v11  ;;  %v5926_v59 = vmul.f32 %v16981_v52, %v10741_v7  ;;  %v16983_v7 = vld [vmem:[#allocation78_spill] sm:$0xff] }
 0x13d   : > { %v4411_v22 = vadd.f32 %v4299_v62, %v4116_v20  ;;  %v5473_v41 = vrot.slane %v5338_v46, 2  ;;  %v5474_v17 = vrot.slane %v5339_v57, 2  ;;  %v5927_v13 = vmul.f32 %v16981_v52, %v10777_v14  ;;  %v11281_v62 = vld [vmem:[#allocation2 + $0x150] sm:$0xff]  ;;  %v11294_v20 = vld [vmem:[#allocation2 + $0x158] sm:$0x3] }
 0x13e   : > { %v6220_v43 = vmul.f32 %v16982_v5, %v10903_v25  ;;  %v5181_v54 = vsel %vm4275_vm3, %v5179_v21, %v5180_v37  ;;  %v5767_v1 = vrot.slane %v5632_v10, 2  ;;  %v5768_v35 = vrot.slane %v5633_v49, 2  ;;  %v11303_v37 = vld [vmem:[%s16298_s2 + $0x10] ss:$0 sm:$0xff]  ;;  %v16984_v49 = vld [vmem:[#allocation56_spill] sm:$0xff] }
 0x13f   : > { %v4705_v30 = vadd.f32 %v4593_v58, %v4411_v22  ;;  %v6061_v31 = vrot.slane %v5926_v59, 2  ;;  %v6062_v9 = vrot.slane %v5927_v13, 2  ;;  %v6221_v11 = vmul.f32 %v16982_v5, %v10926_v61  ;;  %v11298_v58 = vld [vmem:[#allocation2 + $0x160] sm:$0xff]  ;;  %v11307_v22 = vld [vmem:[#allocation2 + $0x1f8] sm:$0x3] }
 0x140   : > { %v6514_v29 = vmul.f32 %v16983_v7, %v11070_v3  ;;  %v11262_v27 = vsel %vm1628_vm2, %v2262_v40, %v2263_v60  ;;  %v6355_v0 = vrot.slane %v6220_v43, 2  ;;  %v6515_v25 = vmul.f32 %v16983_v7, %v11199_v34  ;;  %v11271_v3 = vld [vmem:[#allocation2 + $0xc8] sm:$0x3]  ;;  %v11336_v7 = vld [vmem:[%s16298_s2 + $0x16] ss:$0 sm:$0xff] }
 0x141   : > { %v4999_v14 = vadd.f32 %v4887_v56, %v4705_v30  ;;  %v5475_v16 = vsel %vm4275_vm3, %v5473_v41, %v5474_v17  ;;  %v6356_v33 = vrot.slane %v6221_v11, 2  ;;  %v2105_v61 = vmul.f32 %v11267_v28, %v11134_v8  ;;  %v11292_v60 = vld [vmem:[#allocation2 + $0x1e8] sm:$0x3]  ;;  %v11318_v30 = vld [vmem:[#allocation2 + $0x1e0] sm:$0xff] }
 0x142   : > { %v6649_v32 = vrot.slane %v6514_v29, 2  ;;  %v6650_v12 = vrot.slane %v6515_v25, 2  ;;  %v2106_v40 = vmul.f32 %v11271_v3, %v11134_v8  ;;  %v2399_v47 = vmul.f32 %v11275_v18, %v11162_v55  ;;  %v11313_v41 = vld [vmem:[#allocation2 + $0x168] sm:$0x3] }
 0x143   : > { %v5293_v6 = vadd.f32 %v5181_v54, %v4999_v14  ;;  %v5769_v36 = vsel %vm4275_vm3, %v5767_v1, %v5768_v35  ;;  %v6063_v53 = vsel %vm4275_vm3, %v6061_v31, %v6062_v9  ;;  %v2241_v15 = vrot.slane %v2105_v61, 1  ;;  %v11323_v54 = vld [vmem:[%s16298_s2 + $0x13] ss:$0 sm:$0xff]  ;;  %v11327_v31 = vld [vmem:[#allocation2 + $0x208] sm:$0x3] }
 0x144   : > { %v2693_v4 = vmul.f32 %v11286_v38, %v11281_v62  ;;  %v6357_v50 = vsel %vm4275_vm3, %v6355_v0, %v6356_v33  ;;  %v2242_v48 = vrot.slane %v2106_v40, 1  ;;  %v2535_v23 = vrot.slane %v2399_v47, 1  ;;  %v11344_v47 = vld [vmem:[#allocation2 + $0x200] sm:$0xff] }
 0x145   : > { %v5587_v42 = vadd.f32 %v5475_v16, %v5293_v6  ;;  %v6651_v46 = vsel %vm4275_vm3, %v6649_v32, %v6650_v12  ;;  %v2694_v21 = vmul.f32 %v11294_v20, %v11286_v38  ;;  %v2987_v51 = vmul.f32 %v11303_v37, %v11298_v58 }
 0x146   : > { %v2829_v57 = vrot.slane %v2693_v4, 1  ;;  %v2243_v56 = vsel %vm1628_vm2, %v2241_v15, %v2242_v48  ;;  %v16985_v52 = vrot.slane %v16984_v49, 1  ;;  %v2988_v17 = vmul.f32 %v11313_v41, %v11303_v37  ;;  %v11361_v48 = vld [vmem:[%s16298_s2 + $0x2] ss:$0 sm:$0xff] }
 0x147   : > { %v5881_v10 = vadd.f32 %v5769_v36, %v5587_v42  ;;  %v2353_v13 = vadd.f32 %v2243_v56, %v11144_v2  ;;  %v2830_v5 = vrot.slane %v2694_v21, 1  ;;  %v3123_v43 = vrot.slane %v2987_v51, 1  ;;  %v11331_v2 = vld [vmem:[#allocation2 + $0x1f0] sm:$0xff]  ;;  %v11349_v36 = vld [vmem:[%s16298_s2 + $0x19] ss:$0 sm:$0xff] }
 0x148   : > { %v2537_v59 = vsel %vm1628_vm2, %v2535_v23, %v16985_v52  ;;  %v3281_v1 = vmul.f32 %v11323_v54, %v11318_v30  ;;  %v3124_v9 = vrot.slane %v2988_v17, 1  ;;  %v3282_v11 = vmul.f32 %v11323_v54, %v11292_v60  ;;  %v8890_v21 = vld [vmem:[#allocation2 + $0xa8] sm:$0x3]  ;;  %v11368_v17 = vld [vmem:[#allocation2 + $0xb0] sm:$0xff] }
 0x149   : > { %v6175_v35 = vadd.f32 %v6063_v53, %v5881_v10  ;;  %v3575_v29 = vmul.f32 %v11336_v7, %v11331_v2  ;;  %v2647_v14 = vadd.f32 %v2537_v59, %v2353_v13  ;;  %v2831_v0 = vsel %vm1628_vm2, %v2829_v57, %v2830_v5  ;;  %v11373_v13 = vld [vmem:[%s16298_s2 + $0x5] ss:$0 sm:$0xff] }
 0x14a   : > { %v3417_v25 = vrot.slane %v3281_v1, 1  ;;  %v3576_v16 = vmul.f32 %v11336_v7, %v11307_v22  ;;  %v3125_v32 = vsel %vm1628_vm2, %v3123_v43, %v3124_v9  ;;  %v3418_v61 = vrot.slane %v3282_v11, 1  ;;  %v11385_v11 = vld [vmem:[%s16298_s2 + $0x8] ss:$0 sm:$0xff] }
 0x14b   : > { %v6469_v33 = vadd.f32 %v6357_v50, %v6175_v35  ;;  %v3711_v6 = vrot.slane %v3575_v29, 1  ;;  %v2941_v12 = vadd.f32 %v2831_v0, %v2647_v14  ;;  %v3869_v53 = vmul.f32 %v11349_v36, %v11344_v47  ;;  %v8888_v50 = vld [vmem:[#allocation2 + $0xa0] sm:$0xff]  ;;  %v11378_v35 = vld [vmem:[#allocation2 + $0xb8] sm:$0x3] }
 0x14c   : > { %v3712_v40 = vrot.slane %v3576_v16, 1  ;;  %v3870_v15 = vmul.f32 %v11349_v36, %v11327_v31  ;;  %v3419_v42 = vsel %vm1628_vm2, %v3417_v25, %v3418_v61  ;;  %v4163_v23 = vmul.f32 %v11361_v48, %v8888_v50  ;;  %v11390_v14 = vld [vmem:[%s9292_s14 + $0x1b8] sm:$0x3]  ;;  %v11408_v50 = vld [vmem:[%s16298_s2 + $0xe] ss:$0 sm:$0xff] }
 0x14d   : > { %v11355_v4 = vadd.f32 %v6651_v46, %v6469_v33  ;;  %v4164_v57 = vmul.f32 %v8890_v21, %v11361_v48  ;;  %v3235_v51 = vadd.f32 %v3125_v32, %v2941_v12  ;;  %v4005_v56 = vrot.slane %v3869_v53, 1  ;;  %16987 = vst [vmem:[#allocation54_spill] sm:$0xff] %v11390_v14  ;;  %v11398_v33 = vld [vmem:[%s16298_s2 + $0xb] ss:$0 sm:$0xff]  ;;  %664 = vst.msk [vmem:[#allocation2 + $0x258] sm:$0x3] %vm588_vm1, %v11390_v14 }
 0x14e   : > { %v3713_v10 = vsel %vm1628_vm2, %v3711_v6, %v3712_v40  ;;  %v4006_v46 = vrot.slane %v3870_v15, 1  ;;  %v4300_v52 = vrot.slane %v4163_v23, 2  ;;  %v4458_v5 = vmul.f32 %v11373_v13, %v11368_v17  ;;  %v8896_v40 = vld [vmem:[#allocation2 + $0x148] sm:$0x3]  ;;  %v16997_v14 = vld [vmem:[#allocation42_spill] sm:$0xff] }
 0x14f   : > { %16986 = vst [vmem:[#allocation71_spill] sm:$0xff] %v11355_v4  ;;  %v6809_v49 = vsel %vm586_vm0, %v11355_v4, 0.0  ;;  %v4301_v59 = vrot.slane %v4164_v57, 2  ;;  %v3529_v43 = vadd.f32 %v3419_v42, %v3235_v51  ;;  %v4459_v9 = vmul.f32 %v11378_v35, %v11373_v13 }
 0x150   : > { %6810 = vadd.xlane.f32.xlu1 %v6809_v49  ;;  %v4007_v1 = vsel %vm1628_vm2, %v4005_v56, %v4006_v46  ;;  %v4752_v29 = vmul.f32 %v11385_v11, %v11267_v28  ;;  %v4594_v25 = vrot.slane %v4458_v5, 2  ;;  %v4753_v16 = vmul.f32 %v11385_v11, %v11271_v3 }
 0x151   : > { %v4302_v0 = vsel %vm4275_vm3, %v4300_v52, %v4301_v59  ;;  %v5046_v32 = vmul.f32 %v11398_v33, %v11275_v18  ;;  %v3823_v61 = vadd.f32 %v3713_v10, %v3529_v43  ;;  %v4595_v6 = vrot.slane %v4459_v9, 2  ;;  %v11419_v10 = vld [vmem:[%s16298_s2 + $0x11] ss:$0 sm:$0xff]  ;;  %v11434_v43 = vld [vmem:[%s16298_s2 + $0x14] ss:$0 sm:$0xff] }
 0x152   : > { %v4888_v12 = vrot.slane %v4752_v29, 2  ;;  %v5047_v53 = vmul.f32 %v8896_v40, %v11398_v33  ;;  %v4889_v15 = vrot.slane %v4753_v16, 2  ;;  %v5340_v23 = vmul.f32 %v11408_v50, %v11281_v62 }
 0x153   : > { %v5182_v42 = vrot.slane %v5046_v32, 2  ;;  %v5341_v18 = vmul.f32 %v11408_v50, %v11294_v20  ;;  %v2066_v21 = vadd.f32 %v11169_v44, %v11242_v19  ;;  %v4117_v57 = vadd.f32 %v4007_v1, %v3823_v61 }
 0x154   : > { %v5183_v51 = vrot.slane %v5047_v53, 2  ;;  %v5634_v56 = vmul.f32 %v11419_v10, %v11298_v58  ;;  %v11425_v46 = vmul.f32 %v11303_v37, %v11199_v34  ;;  %v4596_v49 = vsel %vm4275_vm3, %v4594_v25, %v4595_v6 }
 0x155   : > { %v4890_v52 = vsel %vm4275_vm3, %v4888_v12, %v4889_v15  ;;  %v5635_v44 = vmul.f32 %v11419_v10, %v11313_v41  ;;  %v4412_v19 = vadd.f32 %v4302_v0, %v4117_v57  ;;  %v5476_v59 = vrot.slane %v5340_v23, 2  ;;  %v11444_v0 = vld [vmem:[%s16298_s2 + $0x17] ss:$0 sm:$0xff] }
 0x156   : > { %16988 = vst [vmem:[#allocation61_spill] sm:$0xff] %v11425_v46  ;;  %v5477_v5 = vrot.slane %v5341_v18, 2  ;;  %v5928_v1 = vmul.f32 %v11434_v43, %v11318_v30  ;;  %v5184_v34 = vsel %vm4275_vm3, %v5182_v42, %v5183_v51  ;;  %v5770_v9 = vrot.slane %v5634_v56, 2  ;;  %v11453_v30 = vld [vmem:[%s16298_s2 + $0x1a] ss:$0 sm:$0xff]  ;;  %v16990_v18 = vld [vmem:[#allocation52_spill] sm:$0xff] }
 0x157   : > { %v5929_v29 = vmul.f32 %v11434_v43, %v11292_v60  ;;  %v6222_v25 = vmul.f32 %v11444_v0, %v11331_v2  ;;  %v4706_v16 = vadd.f32 %v4596_v49, %v4412_v19  ;;  %v5771_v32 = vrot.slane %v5635_v44, 2  ;;  %16989 = vst [vmem:[#allocation72_spill] sm:$0xff] %v11453_v30  ;;  %v16992_v44 = vld [vmem:[#allocation53_spill] sm:$0xff] }
 0x158   : > { %v6223_v61 = vmul.f32 %v11444_v0, %v11307_v22  ;;  %v6516_v60 = vmul.f32 %v11453_v30, %v11344_v47  ;;  %v6064_v6 = vrot.slane %v5928_v1, 2  ;;  %v6517_v53 = vmul.f32 %v11453_v30, %v11327_v31 }
 0x159   : > { %v6065_v12 = vrot.slane %v5929_v29, 2  ;;  %v6358_v40 = vrot.slane %v6222_v25, 2  ;;  %v5000_v15 = vadd.f32 %v4890_v52, %v4706_v16  ;;  %v879_v57 = vmul.f32 %v11368_v17, %v16990_v18  ;;  %v16993_v25 = vld [vmem:[#allocation55_spill] sm:$0xff]  ;;  %v11469_v52 = vld [vmem:[#allocation2 + $0xd0] sm:$0xff]  ;;  %v16994_v16 = vld [vmem:[#allocation36_spill] sm:$0xff] }
 0x15a   : > { %v6359_v42 = vrot.slane %v6223_v61, 2  ;;  %v6652_v23 = vrot.slane %v6516_v60, 2  ;;  %v11462_v51 = vadd.f32 %v11262_v27, %v2066_v21  ;;  %v5478_v56 = vsel %vm4275_vm3, %v5476_v59, %v5477_v5  ;;  %v16995_v59 = vld [vmem:[#allocation59_spill] sm:$0xff] }
 0x15b   : > { %v6653_v49 = vrot.slane %v6517_v53, 2  ;;  %v949_v19 = vmul.f32 %v11267_v28, %v16992_v44  ;;  %v5294_v29 = vadd.f32 %v5184_v34, %v5000_v15  ;;  %v911_v39 = vadd.f32 %v16993_v25, %v879_v57  ;;  %v16996_v15 = vld [vmem:[#allocation37_spill] sm:$0xff] }
 0x15c   : > { %16991 = vst [vmem:[#allocation74_spill] sm:$0xff] %v11462_v51  ;;  %v1019_v61 = vmul.f32 %v11469_v52, %v16994_v16  ;;  %v5772_v60 = vsel %vm4275_vm3, %v5770_v9, %v5771_v32  ;;  %v6066_v27 = vsel %vm4275_vm3, %v6064_v6, %v6065_v12  ;;  %v6360_v21 = vsel %vm4275_vm3, %v6358_v40, %v6359_v42  ;;  %v16998_v32 = vld [vmem:[#allocation68_spill] sm:$0xff]  ;;  %v11489_v42 = vld [vmem:[#allocation2 + $0x210] sm:$0xff] }
 0x15d   : > { %v1089_v5 = vmul.f32 %v11281_v62, %v16995_v59  ;;  %v5588_v53 = vadd.f32 %v5478_v56, %v5294_v29  ;;  %v6654_v1 = vsel %vm4275_vm3, %v6652_v23, %v6653_v49  ;;  %v981_v34 = vadd.f32 %v949_v19, %v911_v39  ;;  %v11491_v39 = vld [vmem:[#allocation2 + $0x170] sm:$0xff]  ;;  %v16999_v56 = vld [vmem:[#allocation18_spill] sm:$0xff]  ;;  %v17000_v29 = vld [vmem:[#allocation19_spill] sm:$0xff] }
 0x15e   : > { %v1159_v57 = vmul.f32 %v11298_v58, %v16996_v15  ;;  %v1518_v4 = vmul.f32 %v11368_v17, %v16997_v14  ;;  %v1519_v9 = vmul.f32 %v11378_v35, %v16997_v14  ;;  %v1813_v6 = vmul.f32 %v11267_v28, %v16998_v32 }
 0x15f   : > { %v1814_v12 = vmul.f32 %v11271_v3, %v16998_v32  ;;  %v5882_v40 = vadd.f32 %v5772_v60, %v5588_v53  ;;  %v1051_v23 = vadd.f32 %v1019_v61, %v981_v34  ;;  %v1229_v49 = vmul.f32 %v11491_v39, %v16999_v56  ;;  %v11503_v53 = vld [vmem:[#allocation2 + $0xd8] sm:$0x3] }
 0x160   : > { %v2107_v19 = vmul.f32 %v11469_v52, %v11134_v8  ;;  %v1299_v26 = vmul.f32 %v11331_v2, %v17000_v29  ;;  %v1369_v45 = vmul.f32 %v11344_v47, %v11108_v63  ;;  %v1439_v60 = vmul.f32 %v11124_v24, %v11489_v42 }
 0x161   : > { %v2108_v61 = vmul.f32 %v11503_v53, %v11134_v8  ;;  %v6176_v34 = vadd.f32 %v6066_v27, %v5882_v40  ;;  %v1121_v46 = vadd.f32 %v1089_v5, %v1051_v23  ;;  %v1656_v51 = vrot.slane %v1518_v4, 1 }
 0x162   : > { %v1657_v32 = vrot.slane %v1519_v9, 1  ;;  %v1950_v14 = vrot.slane %v1813_v6, 1  ;;  %v1951_v56 = vrot.slane %v1814_v12, 1  ;;  %v2401_v29 = vmul.f32 %v11281_v62, %v11162_v55  ;;  %v11519_v12 = vld [vmem:[#allocation2 + $0x178] sm:$0x3] }
 0x163   : > { %v2402_v63 = vmul.f32 %v11294_v20, %v11162_v55  ;;  %v6470_v15 = vadd.f32 %v6360_v21, %v6176_v34  ;;  %v1191_v59 = vadd.f32 %v1159_v57, %v1121_v46  ;;  %v2244_v24 = vrot.slane %v2107_v19, 1 }
 0x164   : > { %v2695_v16 = vmul.f32 %v11298_v58, %v11286_v38  ;;  %v2245_v25 = vrot.slane %v2108_v61, 1  ;;  %v2538_v8 = vrot.slane %v2401_v29, 1  ;;  %v2696_v4 = vmul.f32 %v11313_v41, %v11286_v38 }
 0x165   : > { %v2539_v27 = vrot.slane %v2402_v63, 1  ;;  %v11515_v5 = vadd.f32 %v6654_v1, %v6470_v15  ;;  %v1261_v9 = vadd.f32 %v1229_v49, %v1191_v59  ;;  %v2989_v6 = vmul.f32 %v11491_v39, %v11303_v37 }
 0x166   : > { %v2990_v46 = vmul.f32 %v11519_v12, %v11303_v37  ;;  %v1658_v21 = vsel %vm1628_vm2, %v1656_v51, %v1657_v32  ;;  %v2832_v57 = vrot.slane %v2695_v16, 1  ;;  %v2833_v40 = vrot.slane %v2696_v4, 1  ;;  %v11537_v32 = vld [vmem:[#allocation2 + $0x218] sm:$0x3] }
 0x167   : > { %17001 = vst [vmem:[#allocation75_spill] sm:$0xff] %v11515_v5  ;;  %v3283_v63 = vmul.f32 %v11331_v2, %v11323_v54  ;;  %v6812_v1 = vsel %vm586_vm0, %v11515_v5, 0.0  ;;  %v1331_v15 = vadd.f32 %v1299_v26, %v1261_v9  ;;  %v1952_v59 = vsel %vm1628_vm2, %v1950_v14, %v1951_v56 }
 0x168   : > { %v3284_v23 = vmul.f32 %v11323_v54, %v11307_v22  ;;  %6813 = vadd.xlane.f32.xlu0 %v6812_v1  ;;  %v2246_v49 = vsel %vm1628_vm2, %v2244_v24, %v2245_v25  ;;  %v2540_v19 = vsel %vm1628_vm2, %v2538_v8, %v2539_v27  ;;  %v3577_v51 = vmul.f32 %v11344_v47, %v11336_v7 }
 0x169   : > { %v3578_v16 = vmul.f32 %v11336_v7, %v11327_v31  ;;  %v1401_v29 = vadd.f32 %v1369_v45, %v1331_v15  ;;  %v3126_v26 = vrot.slane %v2989_v6, 1  ;;  %v3127_v14 = vrot.slane %v2990_v46, 1 }
 0x16a   : > { %v3871_v56 = vmul.f32 %v11349_v36, %v11489_v42  ;;  %v2834_v61 = vsel %vm1628_vm2, %v2832_v57, %v2833_v40  ;;  %v3420_v24 = vrot.slane %v3283_v63, 1  ;;  %v3872_v8 = vmul.f32 %v11349_v36, %v11537_v32  ;;  %v11551_v57 = vld [vmem:[%s9292_s14 + $0x1c8] sm:$0x3] }
 0x16b   : > { %v4165_v25 = vmul.f32 %v11368_v17, %v11361_v48  ;;  %v1471_v34 = vadd.f32 %v1439_v60, %v1401_v29  ;;  %v3421_v27 = vrot.slane %v3284_v23, 1  ;;  %v3714_v4 = vrot.slane %v3577_v51, 1  ;;  %17002 = vst [vmem:[#allocation76_spill] sm:$0xff] %v11551_v57  ;;  %666 = vst.msk [vmem:[#allocation2 + $0x268] sm:$0x3] %vm588_vm1, %v11551_v57 }
 0x16c   : > { %v4166_v45 = vmul.f32 %v11378_v35, %v11361_v48  ;;  %v3715_v9 = vrot.slane %v3578_v16, 1  ;;  %v4008_v6 = vrot.slane %v3871_v56, 1  ;;  %v4009_v46 = vrot.slane %v3872_v8, 1 }
 0x16d   : > { %v4460_v1 = vmul.f32 %v11373_v13, %v11267_v28  ;;  %v1766_v40 = vadd.f32 %v1658_v21, %v1471_v34  ;;  %v4303_v63 = vrot.slane %v4165_v25, 2  ;;  %v4461_v17 = vmul.f32 %v11373_v13, %v11271_v3 }
 0x16e   : > { %v4304_v15 = vrot.slane %v4166_v45, 2  ;;  %v3128_v60 = vsel %vm1628_vm2, %v3126_v26, %v3127_v14  ;;  %v4754_v35 = vmul.f32 %v11469_v52, %v11385_v11  ;;  %v4755_v23 = vmul.f32 %v11503_v53, %v11385_v11 }
 0x16f   : > { %v5048_v51 = vmul.f32 %v11398_v33, %v11281_v62  ;;  %v2060_v21 = vadd.f32 %v1952_v59, %v1766_v40  ;;  %v3422_v16 = vsel %vm1628_vm2, %v3420_v24, %v3421_v27  ;;  %v4597_v29 = vrot.slane %v4460_v1, 2 }
 0x170   : > { %v4598_v56 = vrot.slane %v4461_v17, 2  ;;  %v3716_v8 = vsel %vm1628_vm2, %v3714_v4, %v3715_v9  ;;  %v4010_v25 = vsel %vm1628_vm2, %v4008_v6, %v4009_v46  ;;  %v5049_v26 = vmul.f32 %v11398_v33, %v11294_v20 }
 0x171   : > { %v5342_v14 = vmul.f32 %v11408_v50, %v11298_v58  ;;  %v2354_v34 = vadd.f32 %v2246_v49, %v2060_v21  ;;  %v4305_v45 = vsel %vm4275_vm3, %v4303_v63, %v4304_v15  ;;  %v5343_v62 = vmul.f32 %v11408_v50, %v11313_v41 }
 0x172   : > { %v5636_v59 = vmul.f32 %v11491_v39, %v11419_v10  ;;  %v4891_v24 = vrot.slane %v4754_v35, 2  ;;  %v4892_v27 = vrot.slane %v4755_v23, 2  ;;  %v5185_v4 = vrot.slane %v5048_v51, 2 }
 0x173   : > { %v5637_v9 = vmul.f32 %v11519_v12, %v11419_v10  ;;  %v2648_v6 = vadd.f32 %v2540_v19, %v2354_v34  ;;  %v4599_v20 = vsel %vm4275_vm3, %v4597_v29, %v4598_v56  ;;  %v5186_v46 = vrot.slane %v5049_v26, 2 }
 0x174   : > { %v5930_v49 = vmul.f32 %v11434_v43, %v11331_v2  ;;  %v5479_v1 = vrot.slane %v5342_v14, 2  ;;  %v5480_v40 = vrot.slane %v5343_v62, 2  ;;  %v5931_v63 = vmul.f32 %v11434_v43, %v11307_v22 }
 0x175   : > { %v6224_v15 = vmul.f32 %v11444_v0, %v11344_v47  ;;  %v2942_v17 = vadd.f32 %v2834_v61, %v2648_v6  ;;  %v5773_v35 = vrot.slane %v5636_v59, 2  ;;  %v5774_v23 = vrot.slane %v5637_v9, 2  ;;  %v17003_v6 = vld [vmem:[#allocation55_spill] sm:$0xff] }
 0x176   : > { %v6225_v19 = vmul.f32 %v11444_v0, %v11327_v31  ;;  %v6067_v51 = vrot.slane %v5930_v49, 2  ;;  %v6068_v21 = vrot.slane %v5931_v63, 2  ;;  %v6518_v2 = vmul.f32 %v11453_v30, %v11489_v42  ;;  %v11604_v63 = vld [vmem:[#allocation2 + $0xe0] sm:$0xff] }
 0x177   : > { %v6361_v29 = vrot.slane %v6224_v15, 2  ;;  %v3236_v56 = vadd.f32 %v3128_v60, %v2942_v17  ;;  %v6519_v22 = vmul.f32 %v11453_v30, %v11537_v32  ;;  %v880_v14 = vmul.f32 %v11267_v28, %v16990_v18  ;;  %v17004_v15 = vld [vmem:[#allocation36_spill] sm:$0xff]  ;;  %v17006_v17 = vld [vmem:[#allocation37_spill] sm:$0xff] }
 0x178   : > { %v6362_v26 = vrot.slane %v6225_v19, 2  ;;  %v4893_v61 = vsel %vm4275_vm3, %v4891_v24, %v4892_v27  ;;  %v5187_v34 = vsel %vm4275_vm3, %v5185_v4, %v5186_v46  ;;  %v11596_v62 = vsel %vm4275_vm3, %v5479_v1, %v5480_v40  ;;  %v17005_v1 = vld [vmem:[#allocation59_spill] sm:$0xff]  ;;  %v17007_v19 = vld [vmem:[#allocation18_spill] sm:$0xff] }
 0x179   : > { %v950_v59 = vmul.f32 %v11469_v52, %v16992_v44  ;;  %v3530_v9 = vadd.f32 %v3422_v16, %v3236_v56  ;;  %v11601_v60 = vsel %vm4275_vm3, %v5773_v35, %v5774_v23  ;;  %v912_v49 = vadd.f32 %v17003_v6, %v880_v14  ;;  %v11618_v23 = vld [vmem:[#allocation2 + $0x180] sm:$0xff] }
 0x17a   : > { %v1020_v18 = vmul.f32 %v11604_v63, %v17004_v15  ;;  %v11609_v24 = vsel %vm4275_vm3, %v6067_v51, %v6068_v21  ;;  %v11612_v27 = vsel %vm4275_vm3, %v6361_v29, %v6362_v26  ;;  %v6655_v4 = vrot.slane %v6518_v2, 2  ;;  %v17008_v51 = vld [vmem:[#allocation42_spill] sm:$0xff]  ;;  %v17009_v2 = vld [vmem:[#allocation68_spill] sm:$0xff] }
 0x17b   : > { %v6656_v46 = vrot.slane %v6519_v22, 2  ;;  %v3824_v44 = vadd.f32 %v3716_v8, %v3530_v9  ;;  %v982_v16 = vadd.f32 %v950_v59, %v912_v49  ;;  %v1090_v40 = vmul.f32 %v11298_v58, %v17005_v1  ;;  %v17010_v59 = vld [vmem:[#allocation24_spill] sm:$0xff]  ;;  %v17011_v49 = vld [vmem:[#allocation19_spill] sm:$0xff]  ;;  %v17012_v1 = vld [vmem:[#allocation69_spill] sm:$0xff] }
 0x17c   : > { %v1160_v35 = vmul.f32 %v11491_v39, %v17006_v17  ;;  %v1230_v56 = vmul.f32 %v11618_v23, %v17007_v19  ;;  %v1520_v21 = vmul.f32 %v11267_v28, %v17008_v51  ;;  %v1521_v29 = vmul.f32 %v11271_v3, %v17008_v51  ;;  %v11639_v19 = vld [vmem:[#allocation2 + $0xe8] sm:$0x3] }
 0x17d   : > { %v1815_v8 = vmul.f32 %v11469_v52, %v17009_v2  ;;  %v4118_v26 = vadd.f32 %v4010_v25, %v3824_v44  ;;  %v1052_v22 = vadd.f32 %v1020_v18, %v982_v16  ;;  %v1816_v14 = vmul.f32 %v11503_v53, %v17009_v2  ;;  %v11643_v2 = vld [vmem:[#allocation2 + $0x220] sm:$0xff] }
 0x17e   : > { %v2109_v9 = vmul.f32 %v11604_v63, %v17010_v59  ;;  %v11633_v6 = vsel %vm4275_vm3, %v6655_v4, %v6656_v46  ;;  %v1300_v15 = vmul.f32 %v11344_v47, %v17011_v49  ;;  %v1370_v17 = vmul.f32 %v17012_v1, %v11489_v42 }
 0x17f   : > { %v2110_v25 = vmul.f32 %v11639_v19, %v17010_v59  ;;  %v4413_v18 = vadd.f32 %v4305_v45, %v4118_v26  ;;  %v1122_v44 = vadd.f32 %v1090_v40, %v1052_v22  ;;  %v1659_v16 = vrot.slane %v1520_v21, 1  ;;  %v17013_v22 = vld [vmem:[#allocation34_spill] sm:$0xff] }
 0x180   : > { %v1660_v51 = vrot.slane %v1521_v29, 1  ;;  %v1953_v57 = vrot.slane %v1815_v8, 1  ;;  %v1954_v4 = vrot.slane %v1816_v14, 1  ;;  %v2403_v46 = vmul.f32 %v11298_v58, %v11162_v55 }
 0x181   : > { %v2404_v49 = vmul.f32 %v11313_v41, %v11162_v55  ;;  %v4707_v1 = vadd.f32 %v4599_v20, %v4413_v18  ;;  %v1192_v5 = vadd.f32 %v1160_v35, %v1122_v44  ;;  %v2247_v30 = vrot.slane %v2109_v9, 1  ;;  %v11658_v44 = vld [vmem:[#allocation2 + $0x188] sm:$0x3] }
 0x182   : > { %v2697_v59 = vmul.f32 %v11491_v39, %v11286_v38  ;;  %v2248_v45 = vrot.slane %v2110_v25, 1  ;;  %v2541_v40 = vrot.slane %v2403_v46, 1  ;;  %v2698_v29 = vmul.f32 %v11519_v12, %v11286_v38 }
 0x183   : > { %v2542_v21 = vrot.slane %v2404_v49, 1  ;;  %v5001_v8 = vadd.f32 %v4893_v61, %v4707_v1  ;;  %v1262_v26 = vadd.f32 %v1230_v56, %v1192_v5  ;;  %v1440_v14 = vmul.f32 %v17013_v22, %v11643_v2  ;;  %v11662_v49 = vld [vmem:[#allocation2 + $0x228] sm:$0x3] }
 0x184   : > { %v2991_v20 = vmul.f32 %v11618_v23, %v11303_v37  ;;  %v1661_v35 = vsel %vm1628_vm2, %v1659_v16, %v1660_v51  ;;  %v2835_v9 = vrot.slane %v2697_v59, 1  ;;  %v2836_v18 = vrot.slane %v2698_v29, 1 }
 0x185   : > { %v2992_v25 = vmul.f32 %v11658_v44, %v11303_v37  ;;  %v5295_v46 = vadd.f32 %v5187_v34, %v5001_v8  ;;  %v1332_v5 = vadd.f32 %v1300_v15, %v1262_v26  ;;  %v3285_v61 = vmul.f32 %v11344_v47, %v11323_v54  ;;  %v526_v34 = vld [vmem:[%s9292_s14 + $0x1e0] sm:$0xff] }
 0x186   : > { %v3286_v56 = vmul.f32 %v11323_v54, %v11327_v31  ;;  %v1955_v16 = vsel %vm1628_vm2, %v1953_v57, %v1954_v4  ;;  %v2249_v51 = vsel %vm1628_vm2, %v2247_v30, %v2248_v45  ;;  %v2543_v1 = vsel %vm1628_vm2, %v2541_v40, %v2542_v21  ;;  %669 = vst.msk [vmem:[#allocation2 + $0x280] sm:$0xff] %vm586_vm0, %v526_v34  ;;  %v11684_v40 = vld [vmem:[%s9292_s14 + $0x1f0] sm:$0xff] }
 0x187   : > { %v3579_v59 = vmul.f32 %v11336_v7, %v11489_v42  ;;  %v5589_v29 = vadd.f32 %v11596_v62, %v5295_v46  ;;  %v1402_v15 = vadd.f32 %v1370_v17, %v1332_v5  ;;  %v3129_v8 = vrot.slane %v2991_v20, 1  ;;  %17014 = vst [vmem:[#allocation77_spill] sm:$0xff] %v11684_v40  ;;  %671 = vst.msk [vmem:[#allocation2 + $0x290] sm:$0xff] %vm586_vm0, %v11684_v40 }
 0x188   : > { %v3580_v26 = vmul.f32 %v11336_v7, %v11537_v32  ;;  %v2837_v57 = vsel %vm1628_vm2, %v2835_v9, %v2836_v18  ;;  %v3130_v4 = vrot.slane %v2992_v25, 1  ;;  %v3873_v30 = vmul.f32 %v11349_v36, %v11643_v2  ;;  %v11694_v25 = vld [vmem:[%s9292_s14 + $0x200] sm:$0xff] }
 0x189   : > { %v3874_v45 = vmul.f32 %v11349_v36, %v11662_v49  ;;  %v5883_v62 = vadd.f32 %v11601_v60, %v5589_v29  ;;  %v1472_v17 = vadd.f32 %v1440_v14, %v1402_v15  ;;  %v3423_v21 = vrot.slane %v3285_v61, 1  ;;  %17015 = vst [vmem:[#allocation78_spill] sm:$0xff] %v11694_v25  ;;  %673 = vst.msk [vmem:[#allocation2 + $0x2a0] sm:$0xff] %vm586_vm0, %v11694_v25  ;;  %v11849_v25 = vld [vmem:[%s16298_s2 + $0x7] ss:$0 sm:$0xff] }
 0x18a   : > { %v3424_v22 = vrot.slane %v3286_v56, 1  ;;  %v3717_v20 = vrot.slane %v3579_v59, 1  ;;  %v3718_v46 = vrot.slane %v3580_v26, 1  ;;  %v4167_v9 = vmul.f32 %v11361_v48, %v11267_v28  ;;  %17029 = vst [vmem:[#allocation69_spill] sm:$0xff] %v11849_v25 }
 0x18b   : > { %v4168_v18 = vmul.f32 %v11361_v48, %v11271_v3  ;;  %v6177_v5 = vadd.f32 %v11609_v24, %v5883_v62  ;;  %v1767_v34 = vadd.f32 %v1661_v35, %v1472_v17  ;;  %v4011_v60 = vrot.slane %v3873_v30, 1 }
 0x18c   : > { %v4462_v14 = vmul.f32 %v11469_v52, %v11373_v13  ;;  %v4012_v61 = vrot.slane %v3874_v45, 1  ;;  %v4306_v56 = vrot.slane %v4167_v9, 2  ;;  %v4463_v28 = vmul.f32 %v11503_v53, %v11373_v13  ;;  %v525_v9 = vld [vmem:[%s9292_s14 + $0x1d8] sm:$0x3] }
 0x18d   : > { %v4307_v59 = vrot.slane %v4168_v18, 2  ;;  %v6471_v3 = vadd.f32 %v11612_v27, %v6177_v5  ;;  %v2061_v29 = vadd.f32 %v1955_v16, %v1767_v34  ;;  %v3131_v24 = vsel %vm1628_vm2, %v3129_v8, %v3130_v4  ;;  %668 = vst.msk [vmem:[#allocation2 + $0x278] sm:$0x3] %vm588_vm1, %v525_v9 }
 0x18e   : > { %v4756_v35 = vmul.f32 %v11604_v63, %v11385_v11  ;;  %v3425_v15 = vsel %vm1628_vm2, %v3423_v21, %v3424_v22  ;;  %v4600_v26 = vrot.slane %v4462_v14, 2  ;;  %v4601_v30 = vrot.slane %v4463_v28, 2 }
 0x18f   : > { %v4757_v45 = vmul.f32 %v11639_v19, %v11385_v11  ;;  %v11711_v62 = vadd.f32 %v11633_v6, %v6471_v3  ;;  %v2355_v17 = vadd.f32 %v2249_v51, %v2061_v29  ;;  %v5050_v27 = vmul.f32 %v11398_v33, %v11298_v58 }
 0x190   : > { %v5051_v16 = vmul.f32 %v11398_v33, %v11313_v41  ;;  %v3719_v8 = vsel %vm1628_vm2, %v3717_v20, %v3718_v46  ;;  %v4013_v4 = vsel %vm1628_vm2, %v4011_v60, %v4012_v61  ;;  %v11720_v21 = vsel %vm4275_vm3, %v4306_v56, %v4307_v59 }
 0x191   : > { %17016 = vst [vmem:[#allocation56_spill] sm:$0xff] %v11711_v62  ;;  %v5344_v22 = vmul.f32 %v11491_v39, %v11408_v50  ;;  %v6815_v6 = vsel %vm586_vm0, %v11711_v62, 0.0  ;;  %v2649_v51 = vadd.f32 %v2543_v1, %v2355_v17  ;;  %v4894_v18 = vrot.slane %v4756_v35, 2  ;;  %v11859_v62 = vld [vmem:[%s16298_s2 + $0x12] ss:$0 sm:$0xff] }
 0x192   : > { %v5345_v58 = vmul.f32 %v11519_v12, %v11408_v50  ;;  %6816 = vadd.xlane.f32.xlu1 %v6815_v6  ;;  %v11731_v41 = vsel %vm4275_vm3, %v4600_v26, %v4601_v30  ;;  %v4895_v20 = vrot.slane %v4757_v45, 2  ;;  %v5638_v46 = vmul.f32 %v11618_v23, %v11419_v10  ;;  %v527_v26 = vld [vmem:[%s9292_s14 + $0x1e8] sm:$0x3]  ;;  %v11759_v6 = vld [vmem:[%s9292_s14 + $0x1f8] sm:$0x3]  ;;  %17030 = vst [vmem:[#allocation34_spill] sm:$0xff] %v11859_v62 }
 0x193   : > { %v5639_v5 = vmul.f32 %v11658_v44, %v11419_v10  ;;  %v2943_v34 = vadd.f32 %v2837_v57, %v2649_v51  ;;  %v5188_v1 = vrot.slane %v5050_v27, 2  ;;  %v5189_v60 = vrot.slane %v5051_v16, 2  ;;  %670 = vst.msk [vmem:[#allocation2 + $0x288] sm:$0x3] %vm588_vm1, %v527_v26  ;;  %17019 = vst [vmem:[#allocation53_spill] sm:$0xff] %v11759_v6 }
 0x194   : > { %v5932_v14 = vmul.f32 %v11434_v43, %v11344_v47  ;;  %v5482_v61 = vrot.slane %v5344_v22, 2  ;;  %v5483_v56 = vrot.slane %v5345_v58, 2  ;;  %v5933_v59 = vmul.f32 %v11434_v43, %v11327_v31  ;;  %v17017_v47 = vld [vmem:[#allocation72_spill] sm:$0xff]  ;;  %672 = vst.msk [vmem:[#allocation2 + $0x298] sm:$0x3] %vm588_vm1, %v11759_v6 }
 0x195   : > { %v6226_v28 = vmul.f32 %v11444_v0, %v11489_v42  ;;  %v3237_v3 = vadd.f32 %v3131_v24, %v2943_v34  ;;  %v5776_v29 = vrot.slane %v5638_v46, 2  ;;  %v5777_v35 = vrot.slane %v5639_v5, 2  ;;  %v11754_v24 = vld [vmem:[%s16298_s2] ss:$0 sm:$0xff]  ;;  %v11769_v46 = vld [vmem:[%s16298_s2 + $0x3] ss:$0 sm:$0xff] }
 0x196   : > { %v6227_v57 = vmul.f32 %v11444_v0, %v11537_v32  ;;  %v6070_v30 = vrot.slane %v5932_v14, 2  ;;  %v6071_v45 = vrot.slane %v5933_v59, 2  ;;  %v6520_v27 = vmul.f32 %v17017_v47, %v11643_v2  ;;  %17018 = vst [vmem:[#allocation52_spill] sm:$0xff] %v11754_v24  ;;  %17020 = vst [vmem:[#allocation55_spill] sm:$0xff] %v11769_v46 }
 0x197   : > { %v6364_v17 = vrot.slane %v6226_v28, 2  ;;  %v3531_v31 = vadd.f32 %v3425_v15, %v3237_v3  ;;  %v6521_v22 = vmul.f32 %v17017_v47, %v11662_v49  ;;  %v881_v9 = vmul.f32 %v11754_v24, %v11469_v52 }
 0x198   : > { %v6365_v16 = vrot.slane %v6227_v57, 2  ;;  %v4896_v51 = vsel %vm4275_vm3, %v4894_v18, %v4895_v20  ;;  %v5190_v58 = vsel %vm4275_vm3, %v5188_v1, %v5189_v60  ;;  %v11764_v15 = vsel %vm4275_vm3, %v5482_v61, %v5483_v56  ;;  %v11781_v18 = vld [vmem:[%s16299_s3] ss:$0 sm:$0xff]  ;;  %v11787_v1 = vld [vmem:[%s16298_s2 + $0x6] ss:$0 sm:$0xff]  ;;  %v11789_v60 = vld [vmem:[#allocation2 + $0xf0] sm:$0xff] }
 0x199   : > { %v951_v5 = vmul.f32 %v11769_v46, %v11604_v63  ;;  %v3825_v34 = vadd.f32 %v3719_v8, %v3531_v31  ;;  %v11776_v14 = vsel %vm4275_vm3, %v5776_v29, %v5777_v35  ;;  %17021 = vst [vmem:[#allocation36_spill] sm:$0xff] %v11781_v18  ;;  %v913_v20 = vadd.f32 %v11781_v18, %v881_v9  ;;  %v11794_v61 = vld [vmem:[%s9292_s14 + $0x208] sm:$0x3]  ;;  %v11830_v31 = vld [vmem:[%s16298_s2 + $0x1] ss:$0 sm:$0xff] }
 0x19a   : > { %17022 = vst [vmem:[#allocation59_spill] sm:$0xff] %v11787_v1  ;;  %v1021_v8 = vmul.f32 %v11789_v60, %v11787_v1  ;;  %17023 = vst [vmem:[#allocation37_spill] sm:$0xff] %v11794_v61  ;;  %v11797_v56 = vsel %vm4275_vm3, %v6070_v30, %v6071_v45  ;;  %v11800_v59 = vsel %vm4275_vm3, %v6364_v17, %v6365_v16  ;;  %v6658_v28 = vrot.slane %v6520_v27, 2  ;;  %v11807_v57 = vld [vmem:[%s16298_s2 + $0x9] ss:$0 sm:$0xff]  ;;  %v11823_v17 = vld [vmem:[#allocation2 + $0x190] sm:$0xff] }
 0x19b   : > { %v6659_v3 = vrot.slane %v6521_v22, 2  ;;  %674 = vst.msk [vmem:[#allocation2 + $0x2a8] sm:$0x3] %vm588_vm1, %v11794_v61  ;;  %v4119_v29 = vadd.f32 %v4013_v4, %v3825_v34  ;;  %v983_v35 = vadd.f32 %v951_v5, %v913_v20  ;;  %17024 = vst [vmem:[#allocation18_spill] sm:$0xff] %v11807_v57  ;;  %v1091_v26 = vmul.f32 %v11807_v57, %v11491_v39  ;;  %v11814_v30 = vld [vmem:[%s16298_s2 + $0xc] ss:$0 sm:$0xff] }
 0x19c   : > { %17025 = vst [vmem:[#allocation42_spill] sm:$0xff] %v11814_v30  ;;  %v1161_v45 = vmul.f32 %v11814_v30, %v11618_v23  ;;  %v11821_v4 = vld [vmem:[%s16298_s2 + $0xf] ss:$0 sm:$0xff]  ;;  %17027 = vst [vmem:[#allocation24_spill] sm:$0xff] %v11830_v31  ;;  %v1522_v16 = vmul.f32 %v11830_v31, %v11469_v52  ;;  %v1523_v22 = vmul.f32 %v11830_v31, %v11503_v53  ;;  %v11839_v9 = vld [vmem:[%s16298_s2 + $0x4] ss:$0 sm:$0xff] }
 0x19d   : > { %17026 = vst [vmem:[#allocation68_spill] sm:$0xff] %v11821_v4  ;;  %v1231_v27 = vmul.f32 %v11823_v17, %v11821_v4  ;;  %17028 = vst [vmem:[#allocation19_spill] sm:$0xff] %v11839_v9  ;;  %v1817_v5 = vmul.f32 %v11839_v9, %v11604_v63  ;;  %v4414_v34 = vadd.f32 %v11720_v21, %v4119_v29 }
 0x19e   : > { %v1053_v20 = vadd.f32 %v1021_v8, %v983_v35  ;;  %v1818_v61 = vmul.f32 %v11839_v9, %v11639_v19  ;;  %v2111_v6 = vmul.f32 %v11849_v25, %v11789_v60  ;;  %v11854_v40 = vsel %vm4275_vm3, %v6658_v28, %v6659_v3  ;;  %v11866_v8 = vld [vmem:[%s16298_s2 + $0x15] ss:$0 sm:$0xff]  ;;  %v11870_v35 = vld [vmem:[#allocation2 + $0xf8] sm:$0x3] }
 0x19f   : > { %v1301_v21 = vmul.f32 %v11859_v62, %v11489_v42  ;;  %17031 = vst [vmem:[#allocation72_spill] sm:$0xff] %v11866_v8  ;;  %v1371_v29 = vmul.f32 %v11866_v8, %v11643_v2  ;;  %v2112_v28 = vmul.f32 %v11870_v35, %v11849_v25  ;;  %v4708_v3 = vadd.f32 %v11731_v41, %v4414_v34  ;;  %v11881_v25 = vld [vmem:[#allocation2 + $0x230] sm:$0xff] }
 0x1a0   : > { %v1123_v4 = vadd.f32 %v1091_v26, %v1053_v20  ;;  %v1662_v9 = vrot.slane %v1522_v16, 1  ;;  %v1663_v31 = vrot.slane %v1523_v22, 1  ;;  %v1956_v30 = vrot.slane %v1817_v5, 1 }
 0x1a1   : > { %v1957_v62 = vrot.slane %v1818_v61, 1  ;;  %v2405_v57 = vmul.f32 %v11491_v39, %v11162_v55  ;;  %v2406_v1 = vmul.f32 %v11519_v12, %v11162_v55  ;;  %v5002_v18 = vadd.f32 %v4896_v51, %v4708_v3  ;;  %v11888_v55 = vld [vmem:[%s16298_s2 + $0x18] ss:$0 sm:$0xff] }
 0x1a2   : > { %v1193_v8 = vadd.f32 %v1161_v45, %v1123_v4  ;;  %v2250_v46 = vrot.slane %v2111_v6, 1  ;;  %v2699_v24 = vmul.f32 %v11618_v23, %v11286_v38  ;;  %v2251_v41 = vrot.slane %v2112_v28, 1  ;;  %17032 = vst [vmem:[#allocation82_spill] sm:$0xff] %v11888_v55  ;;  %v11895_v4 = vld [vmem:[#allocation2 + $0x198] sm:$0x3] }
 0x1a3   : > { %v2544_v26 = vrot.slane %v2405_v57, 1  ;;  %v2545_v16 = vrot.slane %v2406_v1, 1  ;;  %v2700_v61 = vmul.f32 %v11658_v44, %v11286_v38  ;;  %v5296_v22 = vadd.f32 %v5190_v58, %v5002_v18 }
 0x1a4   : > { %v1263_v5 = vadd.f32 %v1231_v27, %v1193_v8  ;;  %v1441_v6 = vmul.f32 %v11888_v55, %v11881_v25  ;;  %v2993_v51 = vmul.f32 %v11823_v17, %v11303_v37  ;;  %v1664_v45 = vsel %vm1628_vm2, %v1662_v9, %v1663_v31  ;;  %v11910_v8 = vld [vmem:[#allocation2 + $0x238] sm:$0x3] }
 0x1a5   : > { %v2838_v57 = vrot.slane %v2699_v24, 1  ;;  %v2839_v1 = vrot.slane %v2700_v61, 1  ;;  %v2994_v38 = vmul.f32 %v11895_v4, %v11303_v37  ;;  %v5590_v58 = vadd.f32 %v11764_v15, %v5296_v22 }
 0x1a6   : > { %v1333_v18 = vadd.f32 %v1301_v21, %v1263_v5  ;;  %v3287_v27 = vmul.f32 %v11323_v54, %v11489_v42  ;;  %v3288_v34 = vmul.f32 %v11323_v54, %v11537_v32  ;;  %v1958_v20 = vsel %vm1628_vm2, %v1956_v30, %v1957_v62 }
 0x1a7   : > { %v2252_v31 = vsel %vm1628_vm2, %v2250_v46, %v2251_v41  ;;  %v2546_v24 = vsel %vm1628_vm2, %v2544_v26, %v2545_v16  ;;  %v3581_v9 = vmul.f32 %v11336_v7, %v11643_v2  ;;  %v5884_v37 = vadd.f32 %v11776_v14, %v5590_v58 }
 0x1a8   : > { %v1403_v15 = vadd.f32 %v1371_v29, %v1333_v18  ;;  %v3132_v21 = vrot.slane %v2993_v51, 1  ;;  %v3582_v28 = vmul.f32 %v11336_v7, %v11662_v49  ;;  %v2840_v54 = vsel %vm1628_vm2, %v2838_v57, %v2839_v1 }
 0x1a9   : > { %v3133_v3 = vrot.slane %v2994_v38, 1  ;;  %v3875_v62 = vmul.f32 %v11349_v36, %v11881_v25  ;;  %v3876_v46 = vmul.f32 %v11349_v36, %v11910_v8  ;;  %v6178_v30 = vadd.f32 %v11797_v56, %v5884_v37 }
 0x1aa   : > { %v1473_v41 = vadd.f32 %v1441_v6, %v1403_v15  ;;  %v3426_v14 = vrot.slane %v3287_v27, 1  ;;  %v3427_v26 = vrot.slane %v3288_v34, 1  ;;  %v3720_v16 = vrot.slane %v3581_v9, 1 }
 0x1ab   : > { %v3721_v29 = vrot.slane %v3582_v28, 1  ;;  %v4169_v61 = vmul.f32 %v11469_v52, %v11361_v48  ;;  %v4170_v7 = vmul.f32 %v11503_v53, %v11361_v48  ;;  %v6472_v22 = vadd.f32 %v11800_v59, %v6178_v30 }
 0x1ac   : > { %v1768_v5 = vadd.f32 %v1664_v45, %v1473_v41  ;;  %v4014_v51 = vrot.slane %v3875_v62, 1  ;;  %v4464_v36 = vmul.f32 %v11604_v63, %v11373_v13  ;;  %v4015_v57 = vrot.slane %v3876_v46, 1 }
 0x1ad   : > { %v4309_v56 = vrot.slane %v4169_v61, 2  ;;  %v4310_v6 = vrot.slane %v4170_v7, 2  ;;  %v4465_v1 = vmul.f32 %v11639_v19, %v11373_v13  ;;  %v11930_v38 = vadd.f32 %v11854_v40, %v6472_v22 }
 0x1ae   : > { %v2062_v52 = vadd.f32 %v1958_v20, %v1768_v5  ;;  %v3134_v58 = vsel %vm1628_vm2, %v3132_v21, %v3133_v3  ;;  %v4758_v48 = vmul.f32 %v11789_v60, %v11385_v11  ;;  %v3428_v53 = vsel %vm1628_vm2, %v3426_v14, %v3427_v26 }
 0x1af   : > { %17033 = vst [vmem:[#allocation83_spill] sm:$0xff] %v11930_v38  ;;  %v4603_v59 = vrot.slane %v4464_v36, 2  ;;  %v4604_v45 = vrot.slane %v4465_v1, 2  ;;  %v4759_v18 = vmul.f32 %v11870_v35, %v11385_v11  ;;  %v6818_v27 = vsel %vm586_vm0, %v11930_v38, 0.0  ;;  %v12058_v38 = vld [vmem:[%s16298_s2 + $0x13] ss:$0 sm:$0xff] }
 0x1b0   : > { %v2356_v13 = vadd.f32 %v2252_v31, %v2062_v52  ;;  %v5052_v40 = vmul.f32 %v11491_v39, %v11398_v33  ;;  %v5053_v34 = vmul.f32 %v11519_v12, %v11398_v33  ;;  %6819 = vadd.xlane.f32.xlu0 %v6818_v27  ;;  %v3722_v20 = vsel %vm1628_vm2, %v3720_v16, %v3721_v29  ;;  %v11975_v52 = vld [vmem:[%s9292_s14 + $0x210] sm:$0xff] }
 0x1b1   : > { %v4016_v9 = vsel %vm1628_vm2, %v4014_v51, %v4015_v57  ;;  %v4311_v37 = vsel %vm4275_vm3, %v4309_v56, %v4310_v6  ;;  %v5346_v11 = vmul.f32 %v11618_v23, %v11408_v50  ;;  %v4897_v21 = vrot.slane %v4758_v48, 2  ;;  %v17034_v51 = vld [vmem:[#allocation52_spill] sm:$0xff]  ;;  %v17035_v6 = vld [vmem:[#allocation55_spill] sm:$0xff]  ;;  %675 = vst.msk [vmem:[#allocation2 + $0x2b0] sm:$0xff] %vm586_vm0, %v11975_v52 }
 0x1b2   : > { %v2650_v15 = vadd.f32 %v2546_v24, %v2356_v13  ;;  %v5347_v31 = vmul.f32 %v11658_v44, %v11408_v50  ;;  %v5640_v39 = vmul.f32 %v11823_v17, %v11419_v10  ;;  %v4605_v33 = vsel %vm4275_vm3, %v4603_v59, %v4604_v45  ;;  %17036 = vst [vmem:[#allocation52_spill] sm:$0xff] %v11975_v52  ;;  %v11979_v59 = vld [vmem:[#allocation2 + $0x100] sm:$0xff] }
 0x1b3   : > { %v4898_v12 = vrot.slane %v4759_v18, 2  ;;  %v5641_v28 = vmul.f32 %v11895_v4, %v11419_v10  ;;  %v5934_v3 = vmul.f32 %v11434_v43, %v11489_v42  ;;  %v5191_v46 = vrot.slane %v5052_v40, 2  ;;  %v17038_v45 = vld [vmem:[#allocation59_spill] sm:$0xff] }
 0x1b4   : > { %v2944_v62 = vadd.f32 %v2840_v54, %v2650_v15  ;;  %v5192_v30 = vrot.slane %v5053_v34, 2  ;;  %v5485_v24 = vrot.slane %v5346_v11, 2  ;;  %v5486_v41 = vrot.slane %v5347_v31, 2  ;;  %v17039_v34 = vld [vmem:[#allocation18_spill] sm:$0xff]  ;;  %17049 = vst [vmem:[#allocation59_spill] sm:$0xff] %v12058_v38 }
 0x1b5   : > { %v5779_v14 = vrot.slane %v5640_v39, 2  ;;  %v5935_v50 = vmul.f32 %v11434_v43, %v11537_v32  ;;  %v6228_v26 = vmul.f32 %v11444_v0, %v11643_v2  ;;  %v5780_v29 = vrot.slane %v5641_v28, 2  ;;  %v17040_v39 = vld [vmem:[#allocation42_spill] sm:$0xff]  ;;  %v17041_v28 = vld [vmem:[#allocation24_spill] sm:$0xff] }
 0x1b6   : > { %v3238_v16 = vadd.f32 %v3134_v58, %v2944_v62  ;;  %v6229_v10 = vmul.f32 %v11444_v0, %v11662_v49  ;;  %v6522_v42 = vmul.f32 %v17017_v47, %v11881_v25  ;;  %v6073_v54 = vrot.slane %v5934_v3, 2 }
 0x1b7   : > { %v6074_v61 = vrot.slane %v5935_v50, 2  ;;  %v6367_v7 = vrot.slane %v6228_v26, 2  ;;  %v6523_v22 = vmul.f32 %v17017_v47, %v11910_v8  ;;  %v882_v36 = vmul.f32 %v17034_v51, %v11604_v63  ;;  %v17037_v47 = vld [vmem:[#allocation36_spill] sm:$0xff] }
 0x1b8   : > { %v3532_v5 = vadd.f32 %v3428_v53, %v3238_v16  ;;  %v6368_v43 = vrot.slane %v6229_v10, 2  ;;  %v6661_v32 = vrot.slane %v6522_v42, 2  ;;  %v4899_v57 = vsel %vm4275_vm3, %v4897_v21, %v4898_v12  ;;  %v11997_v21 = vld [vmem:[#allocation2 + $0x240] sm:$0xff]  ;;  %v17043_v50 = vld [vmem:[#allocation68_spill] sm:$0xff]  ;;  %v17044_v16 = vld [vmem:[#allocation69_spill] sm:$0xff] }
 0x1b9   : > { %v5193_v56 = vsel %vm4275_vm3, %v5191_v46, %v5192_v30  ;;  %v6662_v0 = vrot.slane %v6523_v22, 2  ;;  %v952_v1 = vmul.f32 %v11789_v60, %v17035_v6  ;;  %v5487_v48 = vsel %vm4275_vm3, %v5485_v24, %v5486_v41  ;;  %v17042_v46 = vld [vmem:[#allocation19_spill] sm:$0xff]  ;;  %v17045_v10 = vld [vmem:[#allocation34_spill] sm:$0xff]  ;;  %v12021_v22 = vld [vmem:[#allocation2 + $0x108] sm:$0x3] }
 0x1ba   : > { %v3826_v58 = vadd.f32 %v3722_v20, %v3532_v5  ;;  %v914_v53 = vadd.f32 %v17037_v47, %v882_v36  ;;  %v1022_v18 = vmul.f32 %v11979_v59, %v17038_v45  ;;  %v5781_v27 = vsel %vm4275_vm3, %v5779_v14, %v5780_v29  ;;  %v12009_v14 = vld [vmem:[#allocation2 + $0x1a0] sm:$0xff] }
 0x1bb   : > { %v11987_v13 = vsel %vm4275_vm3, %v6073_v54, %v6074_v61  ;;  %v11990_v40 = vsel %vm4275_vm3, %v6367_v7, %v6368_v43  ;;  %v1092_v20 = vmul.f32 %v17039_v34, %v11618_v23  ;;  %v11995_v15 = vsel %vm4275_vm3, %v6661_v32, %v6662_v0  ;;  %v17046_v54 = vld [vmem:[#allocation72_spill] sm:$0xff] }
 0x1bc   : > { %v4120_v11 = vadd.f32 %v4016_v9, %v3826_v58  ;;  %v984_v31 = vadd.f32 %v952_v1, %v914_v53  ;;  %v1162_v12 = vmul.f32 %v11823_v17, %v17040_v39  ;;  %v1524_v3 = vmul.f32 %v17041_v28, %v11604_v63  ;;  %v12028_v58 = vld [vmem:[%s16298_s2 + $0xa] ss:$0 sm:$0xff] }
 0x1bd   : > { %v1525_v62 = vmul.f32 %v17041_v28, %v11639_v19  ;;  %v1819_v30 = vmul.f32 %v17042_v46, %v11789_v60  ;;  %v1820_v9 = vmul.f32 %v11870_v35, %v17042_v46  ;;  %v1232_v26 = vmul.f32 %v12009_v14, %v17043_v50 }
 0x1be   : > { %v4415_v24 = vadd.f32 %v4311_v37, %v4120_v11  ;;  %v1054_v41 = vadd.f32 %v1022_v18, %v984_v31  ;;  %v2113_v29 = vmul.f32 %v11979_v59, %v17044_v16  ;;  %v1302_v42 = vmul.f32 %v17045_v10, %v11643_v2 }
 0x1bf   : > { %v1372_v61 = vmul.f32 %v17046_v54, %v11881_v25  ;;  %v1442_v7 = vmul.f32 %v11888_v55, %v11997_v21  ;;  %v2114_v37 = vmul.f32 %v12021_v22, %v17044_v16  ;;  %v1665_v32 = vrot.slane %v1524_v3, 1 }
 0x1c0   : > { %v4709_v5 = vadd.f32 %v4605_v33, %v4415_v24  ;;  %v1124_v43 = vadd.f32 %v1092_v20, %v1054_v41  ;;  %v1666_v36 = vrot.slane %v1525_v62, 1  ;;  %v1959_v0 = vrot.slane %v1819_v30, 1  ;;  %v12037_v33 = vld [vmem:[%s16298_s2 + $0xd] ss:$0 sm:$0xff] }
 0x1c1   : > { %v1960_v1 = vrot.slane %v1820_v9, 1  ;;  %v2407_v53 = vmul.f32 %v12028_v58, %v11618_v23  ;;  %v2408_v18 = vmul.f32 %v12028_v58, %v11658_v44  ;;  %v2253_v52 = vrot.slane %v2113_v29, 1  ;;  %17047 = vst [vmem:[#allocation55_spill] sm:$0xff] %v12037_v33  ;;  %v12046_v9 = vld [vmem:[%s16298_s2 + $0x10] ss:$0 sm:$0xff] }
 0x1c2   : > { %v5003_v11 = vadd.f32 %v4899_v57, %v4709_v5  ;;  %v1194_v31 = vadd.f32 %v1162_v12, %v1124_v43  ;;  %v2701_v20 = vmul.f32 %v12037_v33, %v11823_v17  ;;  %v2254_v3 = vrot.slane %v2114_v37, 1  ;;  %17048 = vst [vmem:[#allocation36_spill] sm:$0xff] %v12046_v9  ;;  %v12050_v29 = vld [vmem:[#allocation2 + $0x1a8] sm:$0x3] }
 0x1c3   : > { %v2547_v62 = vrot.slane %v2407_v53, 1  ;;  %v2702_v30 = vmul.f32 %v12037_v33, %v11895_v4  ;;  %v2995_v57 = vmul.f32 %v12046_v9, %v12009_v14  ;;  %v2548_v41 = vrot.slane %v2408_v18, 1  ;;  %v12062_v18 = vld [vmem:[#allocation2 + $0x248] sm:$0x3] }
 0x1c4   : > { %v5297_v12 = vadd.f32 %v5193_v56, %v5003_v11  ;;  %v1264_v24 = vadd.f32 %v1232_v26, %v1194_v31  ;;  %v2996_v37 = vmul.f32 %v12050_v29, %v12046_v9  ;;  %v1667_v5 = vsel %vm1628_vm2, %v1665_v32, %v1666_v36  ;;  %v12070_v36 = vld [vmem:[%s16298_s2 + $0x16] ss:$0 sm:$0xff] }
 0x1c5   : > { %v2841_v43 = vrot.slane %v2701_v20, 1  ;;  %v2842_v53 = vrot.slane %v2702_v30, 1  ;;  %v3289_v56 = vmul.f32 %v12058_v38, %v11643_v2  ;;  %v3135_v31 = vrot.slane %v2995_v57, 1  ;;  %17050 = vst [vmem:[#allocation18_spill] sm:$0xff] %v12070_v36 }
 0x1c6   : > { %v5591_v26 = vadd.f32 %v5487_v48, %v5297_v12  ;;  %v1334_v11 = vadd.f32 %v1302_v42, %v1264_v24  ;;  %v3136_v33 = vrot.slane %v2996_v37, 1  ;;  %v1961_v9 = vsel %vm1628_vm2, %v1959_v0, %v1960_v1  ;;  %v12079_v1 = vld [vmem:[%s9292_s14 + $0x218] sm:$0x3] }
 0x1c7   : > { %v3290_v32 = vmul.f32 %v12058_v38, %v11662_v49  ;;  %v3583_v20 = vmul.f32 %v12070_v36, %v11881_v25  ;;  %v3584_v48 = vmul.f32 %v12070_v36, %v11910_v8  ;;  %v2255_v57 = vsel %vm1628_vm2, %v2253_v52, %v2254_v3  ;;  %17051 = vst [vmem:[#allocation42_spill] sm:$0xff] %v12079_v1  ;;  %v12085_v37 = vld [vmem:[%s16298_s2 + $0x19] ss:$0 sm:$0xff] }
 0x1c8   : > { %v5885_v30 = vadd.f32 %v5781_v27, %v5591_v26  ;;  %v1404_v42 = vadd.f32 %v1372_v61, %v1334_v11  ;;  %v2549_v0 = vsel %vm1628_vm2, %v2547_v62, %v2548_v41  ;;  %v2843_v12 = vsel %vm1628_vm2, %v2841_v43, %v2842_v53  ;;  %17052 = vst [vmem:[#allocation84_spill] sm:$0xff] %v12085_v37  ;;  %v12098_v62 = vld [vmem:[%s16298_s2 + $0x2] ss:$0 sm:$0xff] }
 0x1c9   : > { %v3429_v24 = vrot.slane %v3289_v56, 1  ;;  %v3877_v38 = vmul.f32 %v12085_v37, %v11997_v21  ;;  %v3878_v27 = vmul.f32 %v12085_v37, %v12062_v18  ;;  %676 = vst.msk [vmem:[#allocation2 + $0x2b8] sm:$0x3] %vm588_vm1, %v12079_v1  ;;  %v3137_v3 = vsel %vm1628_vm2, %v3135_v31, %v3136_v33  ;;  %v12108_v33 = vld [vmem:[%s16298_s2 + $0x5] ss:$0 sm:$0xff] }
 0x1ca   : > { %v6179_v52 = vadd.f32 %v11987_v13, %v5885_v30  ;;  %v1474_v61 = vadd.f32 %v1442_v7, %v1404_v42  ;;  %v4171_v41 = vmul.f32 %v12098_v62, %v11604_v63  ;;  %v3430_v43 = vrot.slane %v3290_v32, 1  ;;  %v12175_v1 = vld [vmem:[%s16298_s2 + $0x17] ss:$0 sm:$0xff] }
 0x1cb   : > { %v3723_v53 = vrot.slane %v3583_v20, 1  ;;  %v3724_v56 = vrot.slane %v3584_v48, 1  ;;  %v4172_v26 = vmul.f32 %v12098_v62, %v11639_v19  ;;  %v4017_v7 = vrot.slane %v3877_v38, 1  ;;  %v12120_v38 = vld [vmem:[%s16298_s2 + $0x8] ss:$0 sm:$0xff]  ;;  %17058 = vst [vmem:[#allocation90_spill] sm:$0xff] %v12175_v1 }
 0x1cc   : > { %v6473_v11 = vadd.f32 %v11990_v40, %v6179_v52  ;;  %v1769_v13 = vadd.f32 %v1667_v5, %v1474_v61  ;;  %v4466_v31 = vmul.f32 %v12108_v33, %v11789_v60  ;;  %v4018_v30 = vrot.slane %v3878_v27, 1 }
 0x1cd   : > { %v4312_v63 = vrot.slane %v4171_v41, 2  ;;  %v4313_v32 = vrot.slane %v4172_v26, 2  ;;  %v4467_v20 = vmul.f32 %v12108_v33, %v11870_v35  ;;  %v4760_v5 = vmul.f32 %v12120_v38, %v11979_v59 }
 0x1ce   : > { %v12115_v19 = vadd.f32 %v11995_v15, %v6473_v11  ;;  %v2063_v40 = vadd.f32 %v1961_v9, %v1769_v13  ;;  %v4761_v48 = vmul.f32 %v12120_v38, %v12021_v22  ;;  %v3431_v42 = vsel %vm1628_vm2, %v3429_v24, %v3430_v43  ;;  %v12130_v15 = vld [vmem:[%s16298_s2 + $0xb] ss:$0 sm:$0xff]  ;;  %v12144_v13 = vld [vmem:[%s16298_s2 + $0xe] ss:$0 sm:$0xff] }
 0x1cf   : > { %v4606_v27 = vrot.slane %v4466_v31, 2  ;;  %v4607_v52 = vrot.slane %v4467_v20, 2  ;;  %v5054_v9 = vmul.f32 %v12130_v15, %v11618_v23  ;;  %v3725_v26 = vsel %vm1628_vm2, %v3723_v53, %v3724_v56  ;;  %17054 = vst [vmem:[#allocation86_spill] sm:$0xff] %v12144_v13 }
 0x1d0   : > { %17053 = vst [vmem:[#allocation85_spill] sm:$0xff] %v12115_v19  ;;  %v6821_v61 = vsel %vm586_vm0, %v12115_v19, 0.0  ;;  %v2357_v41 = vadd.f32 %v2255_v57, %v2063_v40  ;;  %v5055_v11 = vmul.f32 %v12130_v15, %v11658_v44  ;;  %v4019_v24 = vsel %vm1628_vm2, %v4017_v7, %v4018_v30  ;;  %v12153_v7 = vld [vmem:[%s16298_s2 + $0x11] ss:$0 sm:$0xff] }
 0x1d1   : > { %6822 = vadd.xlane.f32.xlu1 %v6821_v61  ;;  %v4314_v43 = vsel %vm4275_vm3, %v4312_v63, %v4313_v32  ;;  %v5348_v23 = vmul.f32 %v12144_v13, %v11823_v17  ;;  %v5349_v57 = vmul.f32 %v12144_v13, %v11895_v4  ;;  %v4900_v56 = vrot.slane %v4760_v5, 2  ;;  %17055 = vst [vmem:[#allocation87_spill] sm:$0xff] %v12153_v7  ;;  %v12198_v13 = vld [vmem:[#allocation2 + $0x110] sm:$0xff] }
 0x1d2   : > { %v2651_v53 = vadd.f32 %v2549_v0, %v2357_v41  ;;  %v4901_v44 = vrot.slane %v4761_v48, 2  ;;  %v5642_v31 = vmul.f32 %v12153_v7, %v12009_v14  ;;  %v4608_v30 = vsel %vm4275_vm3, %v4606_v27, %v4607_v52  ;;  %v12163_v0 = vld [vmem:[%s16298_s2 + $0x14] ss:$0 sm:$0xff]  ;;  %v12170_v41 = vld [vmem:[%s9292_s14 + $0x220] sm:$0xff] }
 0x1d3   : > { %v5194_v63 = vrot.slane %v5054_v9, 2  ;;  %v5643_v32 = vmul.f32 %v12153_v7, %v12050_v29  ;;  %17056 = vst [vmem:[#allocation88_spill] sm:$0xff] %v12163_v0  ;;  %v5936_v20 = vmul.f32 %v12163_v0, %v11643_v2  ;;  %v5195_v5 = vrot.slane %v5055_v11, 2  ;;  %17057 = vst [vmem:[#allocation89_spill] sm:$0xff] %v12170_v41  ;;  %v12186_v11 = vld [vmem:[%s16298_s2 + $0x1a] ss:$0 sm:$0xff] }
 0x1d4   : > { %v2945_v40 = vadd.f32 %v2843_v12, %v2651_v53  ;;  %v5488_v48 = vrot.slane %v5348_v23, 2  ;;  %v5937_v61 = vmul.f32 %v12163_v0, %v11662_v49  ;;  %v5489_v27 = vrot.slane %v5349_v57, 2  ;;  %677 = vst.msk [vmem:[#allocation2 + $0x2c0] sm:$0xff] %vm586_vm0, %v12170_v41  ;;  %17059 = vst [vmem:[#allocation91_spill] sm:$0xff] %v12186_v11 }
 0x1d5   : > { %v5782_v52 = vrot.slane %v5642_v31, 2  ;;  %v5783_v9 = vrot.slane %v5643_v32, 2  ;;  %v6230_v19 = vmul.f32 %v12175_v1, %v11881_v25  ;;  %v6076_v12 = vrot.slane %v5936_v20, 2 }
 0x1d6   : > { %v3239_v2 = vadd.f32 %v3137_v3, %v2945_v40  ;;  %v6231_v49 = vmul.f32 %v12175_v1, %v11910_v8  ;;  %v6524_v23 = vmul.f32 %v12186_v11, %v11997_v21  ;;  %v6077_v57 = vrot.slane %v5937_v61, 2 }
 0x1d7   : > { %v6370_v53 = vrot.slane %v6230_v19, 2  ;;  %v6525_v31 = vmul.f32 %v12186_v11, %v12062_v18  ;;  %v883_v3 = vmul.f32 %v11789_v60, %v17034_v51  ;;  %v4902_v20 = vsel %vm4275_vm3, %v4900_v56, %v4901_v44 }
 0x1d8   : > { %v3533_v32 = vadd.f32 %v3431_v42, %v3239_v2  ;;  %v6371_v40 = vrot.slane %v6231_v49, 2  ;;  %v6664_v41 = vrot.slane %v6524_v23, 2  ;;  %v953_v7 = vmul.f32 %v11979_v59, %v17035_v6 }
 0x1d9   : > { %v6665_v1 = vrot.slane %v6525_v31, 2  ;;  %v915_v0 = vadd.f32 %v17037_v47, %v883_v3  ;;  %v1023_v19 = vmul.f32 %v12198_v13, %v17038_v45  ;;  %v5196_v11 = vsel %vm4275_vm3, %v5194_v63, %v5195_v5 }
 0x1da   : > { %v3827_v61 = vadd.f32 %v3725_v26, %v3533_v32  ;;  %v5490_v42 = vsel %vm4275_vm3, %v5488_v48, %v5489_v27  ;;  %v5784_v56 = vsel %vm4275_vm3, %v5782_v52, %v5783_v9  ;;  %v12206_v44 = vsel %vm4275_vm3, %v6076_v12, %v6077_v57  ;;  %v12226_v27 = vld [vmem:[#allocation2 + $0x1b0] sm:$0xff]  ;;  %v12232_v52 = vld [vmem:[#allocation2 + $0x118] sm:$0x3] }
 0x1db   : > { %v12209_v2 = vsel %vm4275_vm3, %v6370_v53, %v6371_v40  ;;  %v985_v49 = vadd.f32 %v953_v7, %v915_v0  ;;  %v1093_v23 = vmul.f32 %v11823_v17, %v17039_v34  ;;  %v12214_v3 = vsel %vm4275_vm3, %v6664_v41, %v6665_v1  ;;  %v12240_v53 = vld [vmem:[#allocation2 + $0x250] sm:$0xff] }
 0x1dc   : > { %v4121_v31 = vadd.f32 %v4019_v24, %v3827_v61  ;;  %v1163_v26 = vmul.f32 %v12009_v14, %v17040_v39  ;;  %v1526_v63 = vmul.f32 %v17041_v28, %v11789_v60  ;;  %v1527_v48 = vmul.f32 %v11870_v35, %v17041_v28  ;;  %v17060_v28 = vld [vmem:[#allocation55_spill] sm:$0xff] }
 0x1dd   : > { %v1055_v5 = vadd.f32 %v1023_v19, %v985_v49  ;;  %v1821_v7 = vmul.f32 %v11979_v59, %v17042_v46  ;;  %v1822_v0 = vmul.f32 %v12021_v22, %v17042_v46  ;;  %v1233_v1 = vmul.f32 %v12226_v27, %v17043_v50 }
 0x1de   : > { %v4416_v24 = vadd.f32 %v4314_v43, %v4121_v31  ;;  %v2115_v41 = vmul.f32 %v12198_v13, %v17044_v16  ;;  %v2116_v9 = vmul.f32 %v12232_v52, %v17044_v16  ;;  %v1303_v57 = vmul.f32 %v17045_v10, %v11881_v25 }
 0x1df   : > { %v1125_v12 = vadd.f32 %v1093_v23, %v1055_v5  ;;  %v1373_v43 = vmul.f32 %v17046_v54, %v11997_v21  ;;  %v1443_v32 = vmul.f32 %v12240_v53, %v11888_v55  ;;  %v1668_v19 = vrot.slane %v1526_v63, 1 }
 0x1e0   : > { %v4710_v40 = vadd.f32 %v4608_v30, %v4416_v24  ;;  %v1669_v61 = vrot.slane %v1527_v48, 1  ;;  %v2409_v49 = vmul.f32 %v12028_v58, %v11823_v17  ;;  %v1962_v23 = vrot.slane %v1821_v7, 1  ;;  %v12253_v48 = vld [vmem:[%s9292_s14 + $0x228] sm:$0x3] }
 0x1e1   : > { %v1195_v31 = vadd.f32 %v1163_v26, %v1125_v12  ;;  %v1963_v5 = vrot.slane %v1822_v0, 1  ;;  %v2410_v16 = vmul.f32 %v12028_v58, %v11895_v4  ;;  %v2256_v54 = vrot.slane %v2115_v41, 1  ;;  %17061 = vst [vmem:[#allocation55_spill] sm:$0xff] %v12253_v48  ;;  %v17062_v0 = vld [vmem:[#allocation36_spill] sm:$0xff]  ;;  %678 = vst.msk [vmem:[#allocation2 + $0x2c8] sm:$0x3] %vm588_vm1, %v12253_v48 }
 0x1e2   : > { %v5004_v10 = vadd.f32 %v4902_v20, %v4710_v40  ;;  %v2257_v46 = vrot.slane %v2116_v9, 1  ;;  %v2703_v50 = vmul.f32 %v17060_v28, %v12009_v14  ;;  %v2550_v30 = vrot.slane %v2409_v49, 1  ;;  %v12258_v20 = vld [vmem:[#allocation2 + $0x1b8] sm:$0x3]  ;;  %v17063_v40 = vld [vmem:[#allocation59_spill] sm:$0xff] }
 0x1e3   : > { %v1265_v55 = vadd.f32 %v1233_v1, %v1195_v31  ;;  %v2551_v24 = vrot.slane %v2410_v16, 1  ;;  %v2704_v63 = vmul.f32 %v12050_v29, %v17060_v28  ;;  %v1670_v7 = vsel %vm1628_vm2, %v1668_v19, %v1669_v61 }
 0x1e4   : > { %v5298_v26 = vadd.f32 %v5196_v11, %v5004_v10  ;;  %v2997_v12 = vmul.f32 %v12226_v27, %v17062_v0  ;;  %v2998_v41 = vmul.f32 %v12258_v20, %v17062_v0  ;;  %v2844_v1 = vrot.slane %v2703_v50, 1 }
 0x1e5   : > { %v1335_v16 = vadd.f32 %v1303_v57, %v1265_v55  ;;  %v2845_v9 = vrot.slane %v2704_v63, 1  ;;  %v3291_v49 = vmul.f32 %v17063_v40, %v11881_v25  ;;  %v1964_v11 = vsel %vm1628_vm2, %v1962_v23, %v1963_v5  ;;  %v12275_v57 = vld [vmem:[#allocation2 + $0x258] sm:$0x3] }
 0x1e6   : > { %v5592_v10 = vadd.f32 %v5490_v42, %v5298_v26  ;;  %v2258_v19 = vsel %vm1628_vm2, %v2256_v54, %v2257_v46  ;;  %v3292_v61 = vmul.f32 %v17063_v40, %v11910_v8  ;;  %v2552_v0 = vsel %vm1628_vm2, %v2550_v30, %v2551_v24 }
 0x1e7   : > { %v1405_v31 = vadd.f32 %v1373_v43, %v1335_v16  ;;  %v3585_v48 = vmul.f32 %v12070_v36, %v11997_v21  ;;  %v3586_v55 = vmul.f32 %v12070_v36, %v12062_v18  ;;  %v3138_v42 = vrot.slane %v2997_v12, 1 }
 0x1e8   : > { %v5886_v50 = vadd.f32 %v5784_v56, %v5592_v10  ;;  %v3139_v63 = vrot.slane %v2998_v41, 1  ;;  %v3879_v46 = vmul.f32 %v12240_v53, %v12085_v37  ;;  %v2846_v23 = vsel %vm1628_vm2, %v2844_v1, %v2845_v9 }
 0x1e9   : > { %v1475_v54 = vadd.f32 %v1443_v32, %v1405_v31  ;;  %v3432_v43 = vrot.slane %v3291_v49, 1  ;;  %v3880_v5 = vmul.f32 %v12085_v37, %v12275_v57  ;;  %v3433_v24 = vrot.slane %v3292_v61, 1 }
 0x1ea   : > { %v6180_v30 = vadd.f32 %v12206_v44, %v5886_v50  ;;  %v3726_v26 = vrot.slane %v3585_v48, 1  ;;  %v4173_v56 = vmul.f32 %v12098_v62, %v11789_v60  ;;  %v3727_v12 = vrot.slane %v3586_v55, 1 }
 0x1eb   : > { %v1770_v16 = vadd.f32 %v1670_v7, %v1475_v54  ;;  %v4020_v41 = vrot.slane %v3879_v46, 1  ;;  %v4174_v10 = vmul.f32 %v12098_v62, %v11870_v35  ;;  %v4021_v1 = vrot.slane %v3880_v5, 1  ;;  %v17065_v5 = vld [vmem:[#allocation86_spill] sm:$0xff] }
 0x1ec   : > { %v6474_v32 = vadd.f32 %v12209_v2, %v6180_v30  ;;  %v4468_v9 = vmul.f32 %v12108_v33, %v11979_v59  ;;  %v4469_v44 = vmul.f32 %v12108_v33, %v12021_v22  ;;  %v3140_v48 = vsel %vm1628_vm2, %v3138_v42, %v3139_v63 }
 0x1ed   : > { %v2064_v49 = vadd.f32 %v1964_v11, %v1770_v16  ;;  %v4315_v61 = vrot.slane %v4173_v56, 2  ;;  %v4316_v60 = vrot.slane %v4174_v10, 2  ;;  %v4762_v35 = vmul.f32 %v12198_v13, %v12120_v38  ;;  %v17066_v16 = vld [vmem:[#allocation87_spill] sm:$0xff]  ;;  %v17067_v10 = vld [vmem:[#allocation88_spill] sm:$0xff] }
 0x1ee   : > { %v12294_v7 = vadd.f32 %v12214_v3, %v6474_v32  ;;  %v4609_v31 = vrot.slane %v4468_v9, 2  ;;  %v4610_v55 = vrot.slane %v4469_v44, 2  ;;  %v3434_v50 = vsel %vm1628_vm2, %v3432_v43, %v3433_v24 }
 0x1ef   : > { %v2358_v2 = vadd.f32 %v2258_v19, %v2064_v49  ;;  %v4763_v46 = vmul.f32 %v12232_v52, %v12120_v38  ;;  %v5056_v11 = vmul.f32 %v12130_v15, %v11823_v17  ;;  %v3728_v3 = vsel %vm1628_vm2, %v3726_v26, %v3727_v12 }
 0x1f0   : > { %17064 = vst [vmem:[#allocation59_spill] sm:$0xff] %v12294_v7  ;;  %v6824_v42 = vsel %vm586_vm0, %v12294_v7, 0.0  ;;  %v4022_v63 = vsel %vm1628_vm2, %v4020_v41, %v4021_v1  ;;  %v5057_v54 = vmul.f32 %v12130_v15, %v11895_v4  ;;  %v4317_v43 = vsel %vm4275_vm3, %v4315_v61, %v4316_v60 }
 0x1f1   : > { %6825 = vadd.xlane.f32.xlu0 %v6824_v42  ;;  %v2652_v19 = vadd.f32 %v2552_v0, %v2358_v2  ;;  %v5350_v30 = vmul.f32 %v17065_v5, %v12009_v14  ;;  %v5351_v17 = vmul.f32 %v17065_v5, %v12050_v29  ;;  %v4611_v24 = vsel %vm4275_vm3, %v4609_v31, %v4610_v55  ;;  %v17068_v55 = vld [vmem:[#allocation90_spill] sm:$0xff]  ;;  %v12330_v42 = vld [vmem:[%s9292_s14 + $0x230] sm:$0xff] }
 0x1f2   : > { %v4903_v56 = vrot.slane %v4762_v35, 2  ;;  %v5644_v26 = vmul.f32 %v12226_v27, %v17066_v16  ;;  %v5645_v12 = vmul.f32 %v12258_v20, %v17066_v16  ;;  %v4904_v0 = vrot.slane %v4763_v46, 2  ;;  %17070 = vst [vmem:[#allocation86_spill] sm:$0xff] %v12330_v42  ;;  %679 = vst.msk [vmem:[#allocation2 + $0x2d0] sm:$0xff] %vm586_vm0, %v12330_v42  ;;  %v17076_v42 = vld [vmem:[#allocation72_spill] sm:$0xff] }
 0x1f3   : > { %v2946_v4 = vadd.f32 %v2846_v23, %v2652_v19  ;;  %v5197_v41 = vrot.slane %v5056_v11, 2  ;;  %v5938_v32 = vmul.f32 %v17067_v10, %v11881_v25  ;;  %v5198_v1 = vrot.slane %v5057_v54, 2  ;;  %v17069_v11 = vld [vmem:[#allocation91_spill] sm:$0xff] }
 0x1f4   : > { %v5491_v9 = vrot.slane %v5350_v30, 2  ;;  %v5492_v44 = vrot.slane %v5351_v17, 2  ;;  %v5939_v49 = vmul.f32 %v17067_v10, %v11910_v8  ;;  %v5785_v60 = vrot.slane %v5644_v26, 2 }
 0x1f5   : > { %v3240_v61 = vadd.f32 %v3140_v48, %v2946_v4  ;;  %v5786_v31 = vrot.slane %v5645_v12, 2  ;;  %v6232_v35 = vmul.f32 %v17068_v55, %v11997_v21  ;;  %v6079_v2 = vrot.slane %v5938_v32, 2 }
 0x1f6   : > { %v6080_v23 = vrot.slane %v5939_v49, 2  ;;  %v6233_v46 = vmul.f32 %v17068_v55, %v12062_v18  ;;  %v6526_v25 = vmul.f32 %v12240_v53, %v17069_v11  ;;  %v6527_v8 = vmul.f32 %v17069_v11, %v12275_v57  ;;  %v12344_v49 = vld [vmem:[#allocation2 + $0x120] sm:$0xff] }
 0x1f7   : > { %v3534_v54 = vadd.f32 %v3434_v50, %v3240_v61  ;;  %v6373_v19 = vrot.slane %v6232_v35, 2  ;;  %v884_v48 = vmul.f32 %v11979_v59, %v17034_v51  ;;  %v4905_v30 = vsel %vm4275_vm3, %v4903_v56, %v4904_v0 }
 0x1f8   : > { %v5199_v17 = vsel %vm4275_vm3, %v5197_v41, %v5198_v1  ;;  %v6374_v26 = vrot.slane %v6233_v46, 2  ;;  %v954_v12 = vmul.f32 %v12198_v13, %v17035_v6  ;;  %v5493_v50 = vsel %vm4275_vm3, %v5491_v9, %v5492_v44  ;;  %v12359_v44 = vld [vmem:[#allocation2 + $0x1c0] sm:$0xff] }
 0x1f9   : > { %v3828_v4 = vadd.f32 %v3728_v3, %v3534_v54  ;;  %v916_v32 = vadd.f32 %v17037_v47, %v884_v48  ;;  %v1024_v51 = vmul.f32 %v12344_v49, %v17038_v45  ;;  %v5787_v61 = vsel %vm4275_vm3, %v5785_v60, %v5786_v31  ;;  %v17071_v45 = vld [vmem:[#allocation68_spill] sm:$0xff]  ;;  %v17073_v46 = vld [vmem:[#allocation19_spill] sm:$0xff]  ;;  %v17074_v54 = vld [vmem:[#allocation34_spill] sm:$0xff] }
 0x1fa   : > { %v12350_v56 = vsel %vm4275_vm3, %v6079_v2, %v6080_v23  ;;  %v6667_v0 = vrot.slane %v6526_v25, 2  ;;  %v6668_v41 = vrot.slane %v6527_v8, 2  ;;  %v12353_v6 = vsel %vm4275_vm3, %v6373_v19, %v6374_v26  ;;  %v17072_v31 = vld [vmem:[#allocation24_spill] sm:$0xff]  ;;  %v17075_v8 = vld [vmem:[#allocation69_spill] sm:$0xff] }
 0x1fb   : > { %v4122_v1 = vadd.f32 %v4022_v63, %v3828_v4  ;;  %v986_v3 = vadd.f32 %v954_v12, %v916_v32  ;;  %v1094_v47 = vmul.f32 %v12009_v14, %v17039_v34  ;;  %v1164_v9 = vmul.f32 %v12226_v27, %v17040_v39  ;;  %v12378_v26 = vld [vmem:[#allocation2 + $0x128] sm:$0x3] }
 0x1fc   : > { %v1234_v60 = vmul.f32 %v12359_v44, %v17071_v45  ;;  %v1528_v35 = vmul.f32 %v11979_v59, %v17072_v31  ;;  %v1529_v63 = vmul.f32 %v12021_v22, %v17072_v31  ;;  %v1823_v25 = vmul.f32 %v12198_v13, %v17073_v46 }
 0x1fd   : > { %v4417_v2 = vadd.f32 %v4317_v43, %v4122_v1  ;;  %v1056_v23 = vadd.f32 %v1024_v51, %v986_v3  ;;  %v1824_v34 = vmul.f32 %v12232_v52, %v17073_v46  ;;  %v12372_v39 = vsel %vm4275_vm3, %v6667_v0, %v6668_v41 }
 0x1fe   : > { %v1304_v19 = vmul.f32 %v17074_v54, %v11997_v21  ;;  %v2117_v48 = vmul.f32 %v12344_v49, %v17075_v8  ;;  %v2118_v43 = vmul.f32 %v12378_v26, %v17075_v8  ;;  %v1671_v32 = vrot.slane %v1528_v35, 1 }
 0x1ff   : > { %v4711_v12 = vadd.f32 %v4611_v24, %v4417_v2  ;;  %v1126_v4 = vadd.f32 %v1094_v47, %v1056_v23  ;;  %v1672_v51 = vrot.slane %v1529_v63, 1  ;;  %v1965_v1 = vrot.slane %v1823_v25, 1  ;;  %v12392_v2 = vld [vmem:[#allocation2 + $0x260] sm:$0xff] }
 0x200   : > { %v1966_v3 = vrot.slane %v1824_v34, 1  ;;  %v2259_v45 = vrot.slane %v2117_v48, 1  ;;  %v2411_v0 = vmul.f32 %v12028_v58, %v12009_v14  ;;  %v2260_v46 = vrot.slane %v2118_v43, 1  ;;  %v17078_v34 = vld [vmem:[#allocation36_spill] sm:$0xff] }
 0x201   : > { %v5005_v41 = vadd.f32 %v4905_v30, %v4711_v12  ;;  %v1196_v31 = vadd.f32 %v1164_v9, %v1126_v4  ;;  %v2412_v54 = vmul.f32 %v12050_v29, %v12028_v58  ;;  %v1374_v7 = vmul.f32 %v12240_v53, %v17076_v42  ;;  %v17077_v30 = vld [vmem:[#allocation82_spill] sm:$0xff]  ;;  %v12400_v43 = vld [vmem:[#allocation2 + $0x1c8] sm:$0x3] }
 0x202   : > { %v2553_v8 = vrot.slane %v2411_v0, 1  ;;  %v2705_v24 = vmul.f32 %v12226_v27, %v17060_v28  ;;  %v2706_v47 = vmul.f32 %v12258_v20, %v17060_v28  ;;  %v1444_v9 = vmul.f32 %v12392_v2, %v17077_v30 }
 0x203   : > { %v5299_v35 = vadd.f32 %v5199_v17, %v5005_v41  ;;  %v1266_v63 = vadd.f32 %v1234_v60, %v1196_v31  ;;  %v2554_v23 = vrot.slane %v2412_v54, 1  ;;  %v1673_v25 = vsel %vm1628_vm2, %v1671_v32, %v1672_v51  ;;  %v12404_v60 = vld [vmem:[#allocation2 + $0x268] sm:$0x3]  ;;  %v12410_v32 = vld [vmem:[%s9292_s14 + $0x238] sm:$0x3] }
 0x204   : > { %v1967_v42 = vsel %vm1628_vm2, %v1965_v1, %v1966_v3  ;;  %v2999_v48 = vmul.f32 %v12359_v44, %v17078_v34  ;;  %v3000_v12 = vmul.f32 %v12400_v43, %v17078_v34  ;;  %v2261_v0 = vsel %vm1628_vm2, %v2259_v45, %v2260_v46  ;;  %17079 = vst [vmem:[#allocation87_spill] sm:$0xff] %v12410_v32 }
 0x205   : > { %v5593_v17 = vadd.f32 %v5493_v50, %v5299_v35  ;;  %v1336_v4 = vadd.f32 %v1304_v19, %v1266_v63  ;;  %v3293_v41 = vmul.f32 %v17063_v40, %v11997_v21  ;;  %v2555_v51 = vsel %vm1628_vm2, %v2553_v8, %v2554_v23  ;;  %680 = vst.msk [vmem:[#allocation2 + $0x2d8] sm:$0x3] %vm588_vm1, %v12410_v32 }
 0x206   : > { %v2847_v1 = vrot.slane %v2705_v24, 1  ;;  %v2848_v3 = vrot.slane %v2706_v47, 1  ;;  %v3294_v31 = vmul.f32 %v17063_v40, %v12062_v18  ;;  %v3587_v19 = vmul.f32 %v12240_v53, %v12070_v36 }
 0x207   : > { %v5887_v50 = vadd.f32 %v5787_v61, %v5593_v17  ;;  %v1406_v54 = vadd.f32 %v1374_v7, %v1336_v4  ;;  %v3588_v45 = vmul.f32 %v12070_v36, %v12275_v57  ;;  %v3141_v46 = vrot.slane %v2999_v48, 1 }
 0x208   : > { %v3142_v35 = vrot.slane %v3000_v12, 1  ;;  %v3881_v8 = vmul.f32 %v12392_v2, %v12085_v37  ;;  %v3882_v24 = vmul.f32 %v12085_v37, %v12404_v60  ;;  %v3435_v30 = vrot.slane %v3293_v41, 1 }
 0x209   : > { %v6181_v47 = vadd.f32 %v12350_v56, %v5887_v50  ;;  %v1476_v63 = vadd.f32 %v1444_v9, %v1406_v54  ;;  %v3436_v61 = vrot.slane %v3294_v31, 1  ;;  %v3729_v7 = vrot.slane %v3587_v19, 1 }
 0x20a   : > { %v3730_v23 = vrot.slane %v3588_v45, 1  ;;  %v4023_v17 = vrot.slane %v3881_v8, 1  ;;  %v4024_v4 = vrot.slane %v3882_v24, 1  ;;  %v4175_v48 = vmul.f32 %v12098_v62, %v11979_v59 }
 0x20b   : > { %v6475_v32 = vadd.f32 %v12353_v6, %v6181_v47  ;;  %v1771_v36 = vadd.f32 %v1673_v25, %v1476_v63  ;;  %v4176_v12 = vmul.f32 %v12098_v62, %v12021_v22  ;;  %v2849_v37 = vsel %vm1628_vm2, %v2847_v1, %v2848_v3 }
 0x20c   : > { %v3143_v56 = vsel %vm1628_vm2, %v3141_v46, %v3142_v35  ;;  %v4470_v9 = vmul.f32 %v12198_v13, %v12108_v33  ;;  %v4471_v41 = vmul.f32 %v12232_v52, %v12108_v33  ;;  %v3437_v25 = vsel %vm1628_vm2, %v3435_v30, %v3436_v61 }
 0x20d   : > { %v12438_v31 = vadd.f32 %v12372_v39, %v6475_v32  ;;  %v2065_v6 = vadd.f32 %v1967_v42, %v1771_v36  ;;  %v4764_v59 = vmul.f32 %v12344_v49, %v12120_v38  ;;  %v3731_v22 = vsel %vm1628_vm2, %v3729_v7, %v3730_v23 }
 0x20e   : > { %v4025_v1 = vsel %vm1628_vm2, %v4023_v17, %v4024_v4  ;;  %v4765_v3 = vmul.f32 %v12378_v26, %v12120_v38  ;;  %v5058_v50 = vmul.f32 %v12130_v15, %v12009_v14  ;;  %v4318_v36 = vrot.slane %v4175_v48, 2 }
 0x20f   : > { %17080 = vst [vmem:[#allocation88_spill] sm:$0xff] %v12438_v31  ;;  %v6827_v39 = vsel %vm586_vm0, %v12438_v31, 0.0  ;;  %v2359_v32 = vadd.f32 %v2261_v0, %v2065_v6  ;;  %v4319_v42 = vrot.slane %v4176_v12, 2  ;;  %v4612_v54 = vrot.slane %v4470_v9, 2  ;;  %v12467_v12 = vld [vmem:[%s9292_s14 + $0x240] sm:$0xff] }
 0x210   : > { %6828 = vadd.xlane.f32.xlu1 %v6827_v39  ;;  %v4613_v19 = vrot.slane %v4471_v41, 2  ;;  %v4906_v45 = vrot.slane %v4764_v59, 2  ;;  %v5059_v46 = vmul.f32 %v12130_v15, %v12050_v29  ;;  %v5352_v8 = vmul.f32 %v12226_v27, %v17065_v5  ;;  %17081 = vst [vmem:[#allocation90_spill] sm:$0xff] %v12467_v12  ;;  %681 = vst.msk [vmem:[#allocation2 + $0x2e0] sm:$0xff] %vm586_vm0, %v12467_v12 }
 0x211   : > { %v2653_v35 = vadd.f32 %v2555_v51, %v2359_v32  ;;  %v5353_v14 = vmul.f32 %v12258_v20, %v17065_v5  ;;  %v5646_v0 = vmul.f32 %v12359_v44, %v17066_v16  ;;  %v4907_v24 = vrot.slane %v4765_v3, 2 }
 0x212   : > { %v5200_v47 = vrot.slane %v5058_v50, 2  ;;  %v5647_v63 = vmul.f32 %v12400_v43, %v17066_v16  ;;  %v5940_v30 = vmul.f32 %v17067_v10, %v11997_v21  ;;  %v5201_v51 = vrot.slane %v5059_v46, 2 }
 0x213   : > { %v2947_v29 = vadd.f32 %v2849_v37, %v2653_v35  ;;  %v5494_v61 = vrot.slane %v5352_v8, 2  ;;  %v5495_v7 = vrot.slane %v5353_v14, 2  ;;  %v4320_v23 = vsel %vm4275_vm3, %v4318_v36, %v4319_v42 }
 0x214   : > { %v5788_v17 = vrot.slane %v5646_v0, 2  ;;  %v5789_v4 = vrot.slane %v5647_v63, 2  ;;  %v5941_v48 = vmul.f32 %v17067_v10, %v12062_v18  ;;  %v6082_v41 = vrot.slane %v5940_v30, 2 }
 0x215   : > { %v3241_v9 = vadd.f32 %v3143_v56, %v2947_v29  ;;  %v6234_v6 = vmul.f32 %v12240_v53, %v17068_v55  ;;  %v6235_v21 = vmul.f32 %v17068_v55, %v12275_v57  ;;  %v4614_v37 = vsel %vm4275_vm3, %v4612_v54, %v4613_v19 }
 0x216   : > { %v4908_v59 = vsel %vm4275_vm3, %v4906_v45, %v4907_v24  ;;  %v6083_v3 = vrot.slane %v5941_v48, 2  ;;  %v12479_v18 = vmul.f32 %v12392_v2, %v17069_v11  ;;  %v5202_v50 = vsel %vm4275_vm3, %v5200_v47, %v5201_v51  ;;  %v12502_v24 = vld [vmem:[#allocation2 + $0x1d0] sm:$0xff] }
 0x217   : > { %v3535_v56 = vadd.f32 %v3437_v25, %v3241_v9  ;;  %v5496_v39 = vsel %vm4275_vm3, %v5494_v61, %v5495_v7  ;;  %v12485_v32 = vmul.f32 %v17069_v11, %v12404_v60  ;;  %v12488_v36 = vsel %vm4275_vm3, %v5788_v17, %v5789_v4  ;;  %v12512_v9 = vld [vmem:[#allocation2 + $0x278] sm:$0x3] }
 0x218   : > { %v6376_v42 = vrot.slane %v6234_v6, 2  ;;  %v6377_v54 = vrot.slane %v6235_v21, 2  ;;  %v2413_v19 = vmul.f32 %v12226_v27, %v12028_v58  ;;  %v12493_v46 = vsel %vm4275_vm3, %v6082_v41, %v6083_v3  ;;  %v17083_v21 = vld [vmem:[#allocation74_spill] sm:$0xff] }
 0x219   : > { %v3829_v45 = vadd.f32 %v3731_v22, %v3535_v56  ;;  %v2414_v25 = vmul.f32 %v12258_v20, %v12028_v58  ;;  %v2707_v35 = vmul.f32 %v12359_v44, %v17060_v28  ;;  %v6670_v8 = vrot.slane %v12479_v18, 2 }
 0x21a   : > { %v2556_v14 = vrot.slane %v2413_v19, 1  ;;  %v2708_v0 = vmul.f32 %v12400_v43, %v17060_v28  ;;  %v3001_v22 = vmul.f32 %v12502_v24, %v17078_v34  ;;  %v6671_v63 = vrot.slane %v12485_v32, 2  ;;  %v17084_v32 = vld [vmem:[#allocation61_spill] sm:$0xff] }
 0x21b   : > { %v4123_v47 = vadd.f32 %v4025_v1, %v3829_v45  ;;  %v2557_v30 = vrot.slane %v2414_v25, 1  ;;  %v2850_v29 = vrot.slane %v2707_v35, 1  ;;  %v3295_v7 = vmul.f32 %v12240_v53, %v17063_v40  ;;  %v17082_v1 = vld [vmem:[#allocation18_spill] sm:$0xff] }
 0x21c   : > { %v2851_v51 = vrot.slane %v2708_v0, 1  ;;  %v3144_v61 = vrot.slane %v3001_v22, 1  ;;  %v3296_v17 = vmul.f32 %v17063_v40, %v12275_v57  ;;  %v6378_v48 = vsel %vm4275_vm3, %v6376_v42, %v6377_v54  ;;  %v17086_v22 = vld [vmem:[#allocation84_spill] sm:$0xff] }
 0x21d   : > { %v4418_v4 = vadd.f32 %v4320_v23, %v4123_v47  ;;  %v2558_v41 = vsel %vm1628_vm2, %v2556_v14, %v2557_v30  ;;  %v3589_v6 = vmul.f32 %v12392_v2, %v17082_v1  ;;  %v17085_v19 = vrot.slane %v17084_v32, 1  ;;  %v12524_v14 = vld [vmem:[#allocation2 + $0x270] sm:$0xff] }
 0x21e   : > { %v2654_v3 = vadd.f32 %v2558_v41, %v17083_v21  ;;  %v2852_v56 = vsel %vm1628_vm2, %v2850_v29, %v2851_v51  ;;  %v3438_v25 = vrot.slane %v3295_v7, 1  ;;  %v3439_v23 = vrot.slane %v3296_v17, 1 }
 0x21f   : > { %v3146_v45 = vsel %vm1628_vm2, %v3144_v61, %v17085_v19  ;;  %v4712_v35 = vadd.f32 %v4614_v37, %v4418_v4  ;;  %v3590_v42 = vmul.f32 %v17082_v1, %v12404_v60  ;;  %v3732_v54 = vrot.slane %v3589_v6, 1  ;;  %v12539_v19 = vld [vmem:[%s9292_s14 + $0x248] sm:$0x3] }
 0x220   : > { %v2948_v0 = vadd.f32 %v2852_v56, %v2654_v3  ;;  %v3883_v47 = vmul.f32 %v12524_v14, %v17086_v22  ;;  %v3884_v30 = vmul.f32 %v17086_v22, %v12512_v9  ;;  %v4177_v29 = vmul.f32 %v12198_v13, %v12098_v62  ;;  %17087 = vst [vmem:[#allocation91_spill] sm:$0xff] %v12539_v19 }
 0x221   : > { %v5006_v51 = vadd.f32 %v4908_v59, %v4712_v35  ;;  %v3440_v37 = vsel %vm1628_vm2, %v3438_v25, %v3439_v23  ;;  %v3733_v61 = vrot.slane %v3590_v42, 1  ;;  %v4178_v7 = vmul.f32 %v12232_v52, %v12098_v62  ;;  %v8958_v52 = vld [vmem:[#allocation2 + $0x130] sm:$0xff]  ;;  %682 = vst.msk [vmem:[#allocation2 + $0x2e8] sm:$0x3] %vm588_vm1, %v12539_v19  ;;  %v8959_v42 = vld [vmem:[#allocation2 + $0x138] sm:$0x3] }
 0x222   : > { %v3242_v17 = vadd.f32 %v3146_v45, %v2948_v0  ;;  %v4026_v4 = vrot.slane %v3883_v47, 1  ;;  %v4027_v41 = vrot.slane %v3884_v30, 1  ;;  %v4321_v6 = vrot.slane %v4177_v29, 2  ;;  %v12740_v19 = vld [vmem:[#allocation2 + $0x288] sm:$0x3] }
 0x223   : > { %v5300_v21 = vadd.f32 %v5202_v50, %v5006_v51  ;;  %v3734_v3 = vsel %vm1628_vm2, %v3732_v54, %v3733_v61  ;;  %v4322_v56 = vrot.slane %v4178_v7, 2  ;;  %v4472_v32 = vmul.f32 %v12344_v49, %v12108_v33 }
 0x224   : > { %v3536_v13 = vadd.f32 %v3440_v37, %v3242_v17  ;;  %v4028_v59 = vsel %vm1628_vm2, %v4026_v4, %v4027_v41  ;;  %v4473_v25 = vmul.f32 %v12378_v26, %v12108_v33  ;;  %v4766_v45 = vmul.f32 %v8958_v52, %v12120_v38 }
 0x225   : > { %v5594_v50 = vadd.f32 %v5496_v39, %v5300_v21  ;;  %v4323_v35 = vsel %vm4275_vm3, %v4321_v6, %v4322_v56  ;;  %v4615_v23 = vrot.slane %v4472_v32, 2  ;;  %v4767_v49 = vmul.f32 %v8959_v42, %v12120_v38  ;;  %v8960_v21 = vld [vmem:[#allocation2 + $0x1d8] sm:$0x3] }
 0x226   : > { %v3830_v54 = vadd.f32 %v3734_v3, %v3536_v13  ;;  %v4616_v0 = vrot.slane %v4473_v25, 2  ;;  %v4909_v47 = vrot.slane %v4766_v45, 2  ;;  %v5060_v30 = vmul.f32 %v12226_v27, %v12130_v15  ;;  %v12574_v3 = vld [vmem:[%s16298_s2 + $0x7] ss:$0 sm:$0xff] }
 0x227   : > { %v5888_v26 = vadd.f32 %v12488_v36, %v5594_v50  ;;  %v4910_v29 = vrot.slane %v4767_v49, 2  ;;  %v5061_v51 = vmul.f32 %v12258_v20, %v12130_v15  ;;  %v5354_v39 = vmul.f32 %v12359_v44, %v17065_v5  ;;  %17088 = vst [vmem:[#allocation68_spill] sm:$0xff] %v12574_v3 }
 0x228   : > { %v6672_v37 = vsel %vm4275_vm3, %v6670_v8, %v6671_v63  ;;  %v4124_v61 = vadd.f32 %v4028_v59, %v3830_v54  ;;  %v5203_v7 = vrot.slane %v5060_v30, 2  ;;  %v5355_v17 = vmul.f32 %v12400_v43, %v17065_v5 }
 0x229   : > { %v6182_v27 = vadd.f32 %v12493_v46, %v5888_v26  ;;  %v4617_v36 = vsel %vm4275_vm3, %v4615_v23, %v4616_v0  ;;  %v5204_v4 = vrot.slane %v5061_v51, 2  ;;  %v5497_v41 = vrot.slane %v5354_v39, 2  ;;  %v12603_v26 = vld [vmem:[#allocation2 + $0x140] sm:$0xff] }
 0x22a   : > { %v4419_v6 = vadd.f32 %v4323_v35, %v4124_v61  ;;  %v5498_v20 = vrot.slane %v5355_v17, 2  ;;  %v5648_v44 = vmul.f32 %v12502_v24, %v17066_v16  ;;  %v5649_v18 = vmul.f32 %v8960_v21, %v17066_v16  ;;  %v17089_v24 = vld [vmem:[#allocation49_spill] sm:$0xff] }
 0x22b   : > { %v6476_v8 = vadd.f32 %v6378_v48, %v6182_v27  ;;  %v4911_v63 = vsel %vm4275_vm3, %v4909_v47, %v4910_v29  ;;  %v5942_v43 = vmul.f32 %v12240_v53, %v17067_v10  ;;  %v5943_v46 = vmul.f32 %v17067_v10, %v12275_v57  ;;  %v12592_v47 = vld [vmem:[#allocation2 + $0x1e8] sm:$0x3]  ;;  %v12613_v61 = vld [vmem:[#allocation2 + $0x150] sm:$0xff] }
 0x22c   : > { %v2136_v56 = vmul.f32 %v12574_v3, %v8960_v21  ;;  %v2286_v32 = vrot.slane %v17089_v24, 1  ;;  %v4713_v13 = vadd.f32 %v4617_v36, %v4419_v6  ;;  %v5205_v48 = vsel %vm4275_vm3, %v5203_v7, %v5204_v4  ;;  %v12624_v36 = vld [vmem:[%s16299_s3] ss:$0 sm:$0xff] }
 0x22d   : > { %v12579_v59 = vadd.f32 %v6672_v37, %v6476_v8  ;;  %v5791_v25 = vrot.slane %v5648_v44, 2  ;;  %v5792_v52 = vrot.slane %v5649_v18, 2  ;;  %v6236_v53 = vmul.f32 %v12392_v2, %v17068_v55  ;;  %v12611_v37 = vld [vmem:[%s16298_s2 + $0x3] ss:$0 sm:$0xff]  ;;  %17093 = vst [vmem:[#allocation69_spill] sm:$0xff] %v12624_v36  ;;  %v17095_v18 = vld [vmem:[#allocation38_spill] sm:$0xff] }
 0x22e   : > { %v5007_v57 = vadd.f32 %v4911_v63, %v4713_v13  ;;  %v5499_v45 = vsel %vm4275_vm3, %v5497_v41, %v5498_v20  ;;  %v6085_v50 = vrot.slane %v5942_v43, 2  ;;  %v6237_v35 = vmul.f32 %v17068_v55, %v12404_v60  ;;  %v12601_v60 = vld [vmem:[%s16298_s2] ss:$0 sm:$0xff]  ;;  %17091 = vst [vmem:[#allocation19_spill] sm:$0xff] %v12611_v37  ;;  %v12630_v41 = vld [vmem:[%s16298_s2 + $0x6] ss:$0 sm:$0xff] }
 0x22f   : > { %17090 = vst [vmem:[#allocation24_spill] sm:$0xff] %v12579_v59  ;;  %v6830_v23 = vsel %vm586_vm0, %v12579_v59, 0.0  ;;  %v6086_v42 = vrot.slane %v5943_v46, 2  ;;  %v6530_v49 = vmul.f32 %v12524_v14, %v17069_v11  ;;  %v6531_v54 = vmul.f32 %v17069_v11, %v12512_v9  ;;  %17094 = vst [vmem:[#allocation72_spill] sm:$0xff] %v12630_v41  ;;  %v12632_v6 = vld [vmem:[#allocation2 + $0x160] sm:$0xff]  ;;  %v17097_v63 = vld [vmem:[#allocation30_spill] sm:$0xff] }
 0x230   : > { %v2287_v0 = vrot.slane %v2136_v56, 1  ;;  %v12596_v2 = vmul.f32 %v12592_v47, %v12028_v58  ;;  %6831 = vadd.xlane.f32.xlu0 %v6830_v23  ;;  %v5301_v30 = vadd.f32 %v5205_v48, %v5007_v57  ;;  %v886_v14 = vmul.f32 %v12603_v26, %v12601_v60  ;;  %v12644_v24 = vld [vmem:[#allocation2 + $0x280] sm:$0xff]  ;;  %v12649_v48 = vld [vmem:[%s16298_s2 + $0x9] ss:$0 sm:$0xff]  ;;  %v12670_v23 = vld [vmem:[%s9292_s14 + $0x250] sm:$0xff] }
 0x231   : > { %v5793_v29 = vsel %vm4275_vm3, %v5791_v25, %v5792_v52  ;;  %v6379_v51 = vrot.slane %v6236_v53, 2  ;;  %v6380_v39 = vrot.slane %v6237_v35, 2  ;;  %v956_v7 = vmul.f32 %v12613_v61, %v12611_v37  ;;  %17099 = vst [vmem:[#allocation82_spill] sm:$0xff] %v12649_v48  ;;  %v12651_v25 = vld [vmem:[#allocation2 + $0x1e0] sm:$0xff]  ;;  %17103 = vst [vmem:[#allocation61_spill] sm:$0xff] %v12670_v23 }
 0x232   : > { %v12619_v17 = vmul.f32 %v17078_v34, %v12512_v9  ;;  %v5595_v27 = vadd.f32 %v5499_v45, %v5301_v30  ;;  %v918_v4 = vadd.f32 %v12624_v36, %v886_v14  ;;  %v1026_v20 = vmul.f32 %v12632_v6, %v12630_v41  ;;  %v12661_v57 = vld [vmem:[%s16298_s2 + $0x1] ss:$0 sm:$0xff]  ;;  %v12680_v30 = vld [vmem:[%s16298_s2 + $0xc] ss:$0 sm:$0xff]  ;;  %v12682_v14 = vld [vmem:[#allocation2 + $0x1f0] sm:$0xff]  ;;  %683 = vst.msk [vmem:[#allocation2 + $0x2f0] sm:$0xff] %vm586_vm0, %v12670_v23 }
 0x233   : > { %v6087_v9 = vsel %vm4275_vm3, %v6085_v50, %v6086_v42  ;;  %v6673_v44 = vrot.slane %v6530_v49, 2  ;;  %v6674_v21 = vrot.slane %v6531_v54, 2  ;;  %v17096_v8 = vrot.slane %v17095_v18, 1  ;;  %17101 = vst [vmem:[#allocation18_spill] sm:$0xff] %v12661_v57  ;;  %v12675_v54 = vld [vmem:[#allocation2 + $0x2a0] sm:$0xff]  ;;  %17104 = vst [vmem:[#allocation84_spill] sm:$0xff] %v12680_v30 }
 0x234   : > { %17092 = vst [vmem:[#allocation34_spill] sm:$0xff] %v12619_v17  ;;  %v17098_v43 = vrot.slane %v17097_v63, 1  ;;  %v5889_v56 = vadd.f32 %v5793_v29, %v5595_v27  ;;  %v988_v13 = vadd.f32 %v956_v7, %v918_v4  ;;  %v1096_v52 = vmul.f32 %v12651_v25, %v12649_v48  ;;  %v12694_v7 = vld [vmem:[#allocation2 + $0x200] sm:$0xff]  ;;  %v12701_v4 = vld [vmem:[%s16298_s2 + $0x12] ss:$0 sm:$0xff] }
 0x235   : > { %v12656_v53 = vsel %vm1628_vm2, %v2286_v32, %v2287_v0  ;;  %v12665_v45 = vmul.f32 %v12661_v57, %v12592_v47  ;;  %v6381_v35 = vsel %vm4275_vm3, %v6379_v51, %v6380_v39  ;;  %v12673_v32 = vld [vmem:[#allocation2 + $0x290] sm:$0xff]  ;;  %v1166_v29 = vmul.f32 %v12682_v14, %v12680_v30  ;;  %v12692_v39 = vld [vmem:[%s16298_s2 + $0xf] ss:$0 sm:$0xff]  ;;  %17106 = vst [vmem:[#allocation38_spill] sm:$0xff] %v12701_v4 }
 0x236   : > { %v12642_v46 = vsel %vm1628_vm2, %v17098_v43, %v17096_v8  ;;  %17100 = vst [vmem:[#allocation36_spill] sm:$0xff] %v12656_v53  ;;  %v6183_v49 = vadd.f32 %v6087_v9, %v5889_v56  ;;  %v1058_v0 = vadd.f32 %v1026_v20, %v988_v13  ;;  %v6675_v51 = vsel %vm4275_vm3, %v6673_v44, %v6674_v21  ;;  %v12708_v9 = vld [vmem:[%s16298_s2 + $0x4] ss:$0 sm:$0xff]  ;;  %v12712_v8 = vld [vmem:[#allocation2 + $0x158] sm:$0x3] }
 0x237   : > { %17102 = vst [vmem:[#allocation74_spill] sm:$0xff] %v12665_v45  ;;  %17105 = vst [vmem:[#allocation49_spill] sm:$0xff] %v12692_v39  ;;  %v1236_v27 = vmul.f32 %v12694_v7, %v12692_v39  ;;  %v1306_v20 = vmul.f32 %v12701_v4, %v12644_v24  ;;  %v1827_v44 = vmul.f32 %v12708_v9, %v12613_v61  ;;  %v12721_v56 = vld [vmem:[%s16298_s2 + $0x15] ss:$0 sm:$0xff]  ;;  %v12748_v45 = vld [vmem:[#allocation2 + $0x1f8] sm:$0x3] }
 0x238   : > { %17107 = vst [vmem:[#allocation30_spill] sm:$0xff] %v12708_v9  ;;  %v6477_v21 = vadd.f32 %v6381_v35, %v6183_v49  ;;  %v1128_v18 = vadd.f32 %v1096_v52, %v1058_v0  ;;  %v1828_v63 = vmul.f32 %v12712_v8, %v12708_v9  ;;  %v2121_v43 = vmul.f32 %v12632_v6, %v12574_v3  ;;  %v12728_v52 = vld [vmem:[%s16298_s2 + $0x18] ss:$0 sm:$0xff]  ;;  %v12732_v49 = vld [vmem:[#allocation2 + $0x168] sm:$0x3] }
 0x239   : > { %17108 = vst [vmem:[#allocation92_spill] sm:$0xff] %v12721_v56  ;;  %v1376_v13 = vmul.f32 %v12721_v56, %v12673_v32  ;;  %17109 = vst [vmem:[#allocation93_spill] sm:$0xff] %v12728_v52  ;;  %v1446_v35 = vmul.f32 %v12728_v52, %v12675_v54  ;;  %v2122_v0 = vmul.f32 %v12732_v49, %v12574_v3  ;;  %v1971_v59 = vrot.slane %v1827_v44, 1  ;;  %v12760_v44 = vld [vmem:[#allocation2 + $0x298] sm:$0x3] }
 0x23a   : > { %v2415_v42 = vmul.f32 %v12651_v25, %v12028_v58  ;;  %v12738_v50 = vadd.f32 %v6675_v51, %v6477_v21  ;;  %v1198_v12 = vadd.f32 %v1166_v29, %v1128_v18  ;;  %v12744_v23 = vmul.f32 %v12028_v58, %v12644_v24  ;;  %v12754_v21 = vld [vmem:[#allocation2 + $0x208] sm:$0x3]  ;;  %v12767_v4 = vld [vmem:[%s16298_s2 + $0xa] ss:$0 sm:$0xff] }
 0x23b   : > { %v2709_v31 = vmul.f32 %v12682_v14, %v17060_v28  ;;  %v2710_v17 = vmul.f32 %v12748_v45, %v17060_v28  ;;  %v3003_v51 = vmul.f32 %v12694_v7, %v17078_v34  ;;  %v3004_v29 = vmul.f32 %v12754_v21, %v17078_v34  ;;  %v12762_v56 = vld [vmem:[#allocation2 + $0x2a8] sm:$0x3]  ;;  %17112 = vst [vmem:[#allocation96_spill] sm:$0xff] %v12767_v4 }
 0x23c   : > { %17110 = vst [vmem:[#allocation94_spill] sm:$0xff] %v12738_v50  ;;  %17111 = vst [vmem:[#allocation95_spill] sm:$0xff] %v12744_v23  ;;  %v6833_v58 = vsel %vm586_vm0, %v12738_v50, 0.0  ;;  %v1268_v18 = vadd.f32 %v1236_v27, %v1198_v12  ;;  %v1972_v53 = vrot.slane %v1828_v63, 1  ;;  %v2265_v52 = vrot.slane %v2121_v43, 1 }
 0x23d   : > { %6834 = vadd.xlane.f32.xlu1 %v6833_v58  ;;  %v2266_v28 = vrot.slane %v2122_v0, 1  ;;  %v12771_v34 = vmul.f32 %v12767_v4, %v12740_v19  ;;  %v3297_v12 = vmul.f32 %v17063_v40, %v12644_v24  ;;  %v3298_v27 = vmul.f32 %v17063_v40, %v12740_v19 }
 0x23e   : > { %v1338_v63 = vadd.f32 %v1306_v20, %v1268_v18  ;;  %v2559_v43 = vrot.slane %v2415_v42, 1  ;;  %v2853_v0 = vrot.slane %v2709_v31, 1  ;;  %v2854_v50 = vrot.slane %v2710_v17, 1 }
 0x23f   : > { %17113 = vst [vmem:[#allocation97_spill] sm:$0xff] %v12771_v34  ;;  %v3147_v39 = vrot.slane %v3003_v51, 1  ;;  %v3148_v3 = vrot.slane %v3004_v29, 1  ;;  %v3591_v9 = vmul.f32 %v17082_v1, %v12673_v32  ;;  %v12783_v34 = vld [vmem:[%s16298_s2 + $0x16] ss:$0 sm:$0xff]  ;;  %v3885_v42 = vmul.f32 %v17086_v22, %v12675_v54 }
 0x240   : > { %v1408_v57 = vadd.f32 %v1376_v13, %v1338_v63  ;;  %v3592_v40 = vmul.f32 %v12783_v34, %v12760_v44  ;;  %v3886_v31 = vmul.f32 %v17086_v22, %v12762_v56  ;;  %v3441_v17 = vrot.slane %v3297_v12, 1  ;;  %v8987_v13 = vld [vmem:[#allocation2 + $0x148] sm:$0x3] }
 0x241   : > { %v3442_v20 = vrot.slane %v3298_v27, 1  ;;  %v4179_v1 = vmul.f32 %v12603_v26, %v12098_v62  ;;  %v4180_v51 = vmul.f32 %v8987_v13, %v12098_v62  ;;  %v1973_v18 = vsel %vm1628_vm2, %v1971_v59, %v1972_v53  ;;  %v12806_v53 = vld [vmem:[%s9292_s14 + $0x258] sm:$0x3] }
 0x242   : > { %v1478_v29 = vadd.f32 %v1446_v35, %v1408_v57  ;;  %v2267_v63 = vsel %vm1628_vm2, %v2265_v52, %v2266_v28  ;;  %v4474_v58 = vmul.f32 %v12613_v61, %v12108_v33  ;;  %v17114_v23 = vrot.slane %v12596_v2, 1  ;;  %17115 = vst [vmem:[#allocation98_spill] sm:$0xff] %v12806_v53  ;;  %684 = vst.msk [vmem:[#allocation2 + $0x2f8] sm:$0x3] %vm588_vm1, %v12806_v53 }
 0x243   : > { %v2855_v12 = vsel %vm1628_vm2, %v2853_v0, %v2854_v50  ;;  %v3735_v27 = vrot.slane %v3591_v9, 1  ;;  %v4475_v26 = vmul.f32 %v12712_v8, %v12108_v33  ;;  %v3736_v57 = vrot.slane %v3592_v40, 1 }
 0x244   : > { %v2561_v22 = vsel %vm1628_vm2, %v2559_v43, %v17114_v23  ;;  %v1773_v62 = vadd.f32 %v12642_v46, %v1478_v29  ;;  %v4029_v35 = vrot.slane %v3885_v42, 1  ;;  %v4030_v59 = vrot.slane %v3886_v31, 1 }
 0x245   : > { %v3149_v52 = vsel %vm1628_vm2, %v3147_v39, %v3148_v3  ;;  %v3443_v28 = vsel %vm1628_vm2, %v3441_v17, %v3442_v20  ;;  %v4324_v2 = vrot.slane %v4179_v1, 2  ;;  %v4325_v13 = vrot.slane %v4180_v51, 2 }
 0x246   : > { %v2067_v50 = vadd.f32 %v1973_v18, %v1773_v62  ;;  %v4618_v23 = vrot.slane %v4474_v58, 2  ;;  %v4768_v33 = vmul.f32 %v12632_v6, %v12120_v38  ;;  %v4769_v46 = vmul.f32 %v12732_v49, %v12120_v38 }
 0x247   : > { %v4619_v9 = vrot.slane %v4475_v26, 2  ;;  %v5062_v43 = vmul.f32 %v12651_v25, %v12130_v15  ;;  %v5063_v3 = vmul.f32 %v12592_v47, %v12130_v15  ;;  %v5356_v39 = vmul.f32 %v12682_v14, %v17065_v5 }
 0x248   : > { %v2361_v0 = vadd.f32 %v2267_v63, %v2067_v50  ;;  %v3737_v40 = vsel %vm1628_vm2, %v3735_v27, %v3736_v57  ;;  %v4031_v58 = vsel %vm1628_vm2, %v4029_v35, %v4030_v59  ;;  %v5357_v42 = vmul.f32 %v12748_v45, %v17065_v5 }
 0x249   : > { %v4326_v38 = vsel %vm4275_vm3, %v4324_v2, %v4325_v13  ;;  %v5650_v31 = vmul.f32 %v12694_v7, %v17066_v16  ;;  %v5651_v25 = vmul.f32 %v12754_v21, %v17066_v16  ;;  %v5944_v15 = vmul.f32 %v17067_v10, %v12644_v24  ;;  %v12851_v13 = vld [vmem:[#allocation2 + $0x170] sm:$0xff] }
 0x24a   : > { %v2655_v47 = vadd.f32 %v2561_v22, %v2361_v0  ;;  %v4912_v17 = vrot.slane %v4768_v33, 2  ;;  %v4913_v20 = vrot.slane %v4769_v46, 2  ;;  %v5945_v1 = vmul.f32 %v17067_v10, %v12740_v19 }
 0x24b   : > { %v4620_v51 = vsel %vm4275_vm3, %v4618_v23, %v4619_v9  ;;  %v5206_v5 = vrot.slane %v5062_v43, 2  ;;  %v5207_v29 = vrot.slane %v5063_v3, 2  ;;  %v5500_v18 = vrot.slane %v5356_v39, 2  ;;  %v12864_v9 = vld [vmem:[%s16298_s2 + $0x1a] ss:$0 sm:$0xff] }
 0x24c   : > { %v2949_v63 = vadd.f32 %v2855_v12, %v2655_v47  ;;  %v5501_v27 = vrot.slane %v5357_v42, 2  ;;  %v6238_v26 = vmul.f32 %v17068_v55, %v12673_v32  ;;  %v6239_v16 = vmul.f32 %v17068_v55, %v12760_v44  ;;  %17116 = vst [vmem:[#allocation99_spill] sm:$0xff] %v12864_v9 }
 0x24d   : > { %v5794_v24 = vrot.slane %v5650_v31, 2  ;;  %v5795_v22 = vrot.slane %v5651_v25, 2  ;;  %v6088_v62 = vrot.slane %v5944_v15, 2  ;;  %v887_v57 = vmul.f32 %v12613_v61, %v12601_v60  ;;  %v17117_v15 = vld [vmem:[#allocation18_spill] sm:$0xff] }
 0x24e   : > { %v3243_v10 = vadd.f32 %v3149_v52, %v2949_v63  ;;  %v6089_v19 = vrot.slane %v5945_v1, 2  ;;  %v12844_v35 = vmul.f32 %v17069_v11, %v12675_v54  ;;  %v957_v12 = vmul.f32 %v12632_v6, %v12611_v37  ;;  %v17120_v63 = vld [vmem:[#allocation68_spill] sm:$0xff] }
 0x24f   : > { %v4914_v59 = vsel %vm4275_vm3, %v4912_v17, %v4913_v20  ;;  %v5208_v2 = vsel %vm4275_vm3, %v5206_v5, %v5207_v29  ;;  %v919_v55 = vadd.f32 %v12624_v36, %v887_v57  ;;  %v1027_v50 = vmul.f32 %v12851_v13, %v12630_v41  ;;  %v17118_v20 = vld [vmem:[#allocation30_spill] sm:$0xff]  ;;  %v12885_v5 = vld [vmem:[%s9292_s14 + $0x260] sm:$0xff] }
 0x250   : > { %v3537_v52 = vadd.f32 %v3443_v28, %v3243_v10  ;;  %v12856_v23 = vsel %vm4275_vm3, %v5500_v18, %v5501_v27  ;;  %v6382_v11 = vrot.slane %v6238_v26, 2  ;;  %v6383_v33 = vrot.slane %v6239_v16, 2  ;;  %17119 = vst [vmem:[#allocation100_spill] sm:$0xff] %v12885_v5  ;;  %685 = vst.msk [vmem:[#allocation2 + $0x300] sm:$0xff] %vm586_vm0, %v12885_v5  ;;  %v12899_v16 = vld [vmem:[#allocation2 + $0x2b0] sm:$0xff] }
 0x251   : > { %v12859_v46 = vsel %vm4275_vm3, %v5794_v24, %v5795_v22  ;;  %v12868_v43 = vmul.f32 %v12864_v9, %v12762_v56  ;;  %v989_v3 = vadd.f32 %v957_v12, %v919_v55  ;;  %v1097_v28 = vmul.f32 %v12682_v14, %v12649_v48  ;;  %v12901_v22 = vld [vmem:[#allocation2 + $0x210] sm:$0xff]  ;;  %v12905_v57 = vld [vmem:[#allocation2 + $0x178] sm:$0x3] }
 0x252   : > { %v3831_v39 = vadd.f32 %v3737_v40, %v3537_v52  ;;  %v12873_v0 = vsel %vm4275_vm3, %v6088_v62, %v6089_v19  ;;  %v1167_v31 = vmul.f32 %v12694_v7, %v12680_v30  ;;  %v1534_v47 = vmul.f32 %v17117_v15, %v12613_v61  ;;  %v17122_v12 = vld [vmem:[#allocation38_spill] sm:$0xff] }
 0x253   : > { %v1059_v25 = vadd.f32 %v1027_v50, %v989_v3  ;;  %v1535_v17 = vmul.f32 %v12712_v8, %v17117_v15  ;;  %v1829_v1 = vmul.f32 %v17118_v20, %v12632_v6  ;;  %v12888_v29 = vsel %vm4275_vm3, %v6382_v11, %v6383_v33  ;;  %v17123_v50 = vld [vmem:[#allocation92_spill] sm:$0xff]  ;;  %v17124_v11 = vld [vmem:[#allocation93_spill] sm:$0xff] }
 0x254   : > { %v4125_v40 = vadd.f32 %v4031_v58, %v3831_v39  ;;  %v1830_v18 = vmul.f32 %v12732_v49, %v17118_v20  ;;  %v12894_v27 = vmul.f32 %v12851_v13, %v17120_v63  ;;  %v6677_v26 = vrot.slane %v12868_v43, 2  ;;  %v17121_v58 = vld [vmem:[#allocation49_spill] sm:$0xff]  ;;  %v12956_v20 = vld [vmem:[#allocation2 + $0x2b8] sm:$0x3] }
 0x255   : > { %v1129_v24 = vadd.f32 %v1097_v28, %v1059_v25  ;;  %v1237_v62 = vmul.f32 %v12901_v22, %v17121_v58  ;;  %v2124_v10 = vmul.f32 %v12905_v57, %v17120_v63  ;;  %v1307_v55 = vmul.f32 %v17122_v12, %v12673_v32 }
 0x256   : > { %v4420_v19 = vadd.f32 %v4326_v38, %v4125_v40  ;;  %v1377_v52 = vmul.f32 %v17123_v50, %v12675_v54  ;;  %v1447_v33 = vmul.f32 %v17124_v11, %v12899_v16  ;;  %v1680_v3 = vrot.slane %v1534_v47, 1  ;;  %v12923_v11 = vld [vmem:[%s16298_s2 + $0xd] ss:$0 sm:$0xff] }
 0x257   : > { %v1199_v43 = vadd.f32 %v1167_v31, %v1129_v24  ;;  %v1681_v28 = vrot.slane %v1535_v17, 1  ;;  %v1974_v39 = vrot.slane %v1829_v1, 1  ;;  %v1975_v42 = vrot.slane %v1830_v18, 1  ;;  %17125 = vst [vmem:[#allocation101_spill] sm:$0xff] %v12923_v11  ;;  %v12932_v17 = vld [vmem:[%s16298_s2 + $0x10] ss:$0 sm:$0xff] }
 0x258   : > { %v4714_v25 = vadd.f32 %v4620_v51, %v4420_v19  ;;  %v2268_v5 = vrot.slane %v12894_v27, 1  ;;  %v2417_v38 = vmul.f32 %v12767_v4, %v12682_v14  ;;  %v2269_v53 = vrot.slane %v2124_v10, 1  ;;  %17126 = vst [vmem:[#allocation102_spill] sm:$0xff] %v12932_v17  ;;  %v12936_v18 = vld [vmem:[#allocation2 + $0x218] sm:$0x3] }
 0x259   : > { %v1269_v40 = vadd.f32 %v1237_v62, %v1199_v43  ;;  %v2418_v12 = vmul.f32 %v12767_v4, %v12748_v45  ;;  %v2711_v31 = vmul.f32 %v12923_v11, %v12694_v7  ;;  %v2712_v47 = vmul.f32 %v12923_v11, %v12754_v21 }
 0x25a   : > { %v5008_v51 = vadd.f32 %v4914_v59, %v4714_v25  ;;  %v3005_v1 = vmul.f32 %v12932_v17, %v12901_v22  ;;  %v3006_v27 = vmul.f32 %v12936_v18, %v12932_v17  ;;  %v1682_v62 = vsel %vm1628_vm2, %v1680_v3, %v1681_v28  ;;  %v12944_v59 = vld [vmem:[%s16298_s2 + $0x13] ss:$0 sm:$0xff] }
 0x25b   : > { %v1339_v24 = vadd.f32 %v1307_v55, %v1269_v40  ;;  %v3299_v10 = vmul.f32 %v12944_v59, %v12673_v32  ;;  %v3300_v19 = vmul.f32 %v12944_v59, %v12760_v44  ;;  %v1976_v25 = vsel %vm1628_vm2, %v1974_v39, %v1975_v42 }
 0x25c   : > { %v5302_v43 = vadd.f32 %v5208_v2, %v5008_v51  ;;  %v2562_v50 = vrot.slane %v2417_v38, 1  ;;  %v3593_v55 = vmul.f32 %v12783_v34, %v12675_v54  ;;  %v2563_v3 = vrot.slane %v2418_v12, 1  ;;  %v12962_v12 = vld [vmem:[%s16298_s2 + $0x19] ss:$0 sm:$0xff] }
 0x25d   : > { %v1409_v40 = vadd.f32 %v1377_v52, %v1339_v24  ;;  %v2856_v28 = vrot.slane %v2711_v31, 1  ;;  %v3594_v17 = vmul.f32 %v12783_v34, %v12762_v56  ;;  %v2857_v4 = vrot.slane %v2712_v47, 1 }
 0x25e   : > { %v5596_v11 = vadd.f32 %v12856_v23, %v5302_v43  ;;  %v3150_v58 = vrot.slane %v3005_v1, 1  ;;  %v3151_v63 = vrot.slane %v3006_v27, 1  ;;  %v3444_v51 = vrot.slane %v3299_v10, 1 }
 0x25f   : > { %v1479_v2 = vadd.f32 %v1447_v33, %v1409_v40  ;;  %v3445_v42 = vrot.slane %v3300_v19, 1  ;;  %v3738_v39 = vrot.slane %v3593_v55, 1  ;;  %v3739_v52 = vrot.slane %v3594_v17, 1  ;;  %v12977_v17 = vld [vmem:[%s16298_s2 + $0x2] ss:$0 sm:$0xff] }
 0x260   : > { %v5890_v38 = vadd.f32 %v12859_v46, %v5596_v11  ;;  %v3887_v23 = vmul.f32 %v12962_v12, %v12899_v16  ;;  %v3888_v31 = vmul.f32 %v12962_v12, %v12956_v20  ;;  %v17127_v33 = vrot.slane %v12844_v35, 2 }
 0x261   : > { %v1774_v1 = vadd.f32 %v1682_v62, %v1479_v2  ;;  %v2270_v27 = vsel %vm1628_vm2, %v2268_v5, %v2269_v53  ;;  %v2564_v46 = vsel %vm1628_vm2, %v2562_v50, %v2563_v3  ;;  %v4181_v24 = vmul.f32 %v12977_v17, %v12613_v61 }
 0x262   : > { %v6678_v47 = vsel %vm4275_vm3, %v17127_v33, %v6677_v26  ;;  %v6184_v11 = vadd.f32 %v12873_v0, %v5890_v38  ;;  %v4182_v35 = vmul.f32 %v12977_v17, %v12712_v8  ;;  %v12986_v26 = vld [vmem:[%s16298_s2 + $0x5] ss:$0 sm:$0xff]  ;;  %v12991_v0 = vld [vmem:[%s9292_s14 + $0x268] sm:$0x3]  ;;  %v2858_v50 = vsel %vm1628_vm2, %v2856_v28, %v2857_v4  ;;  %v13025_v38 = vld [vmem:[%s16298_s2 + $0xe] ss:$0 sm:$0xff] }
 0x263   : > { %v4476_v53 = vmul.f32 %v12986_v26, %v12632_v6  ;;  %17128 = vst [vmem:[#allocation103_spill] sm:$0xff] %v12991_v0  ;;  %v2068_v5 = vadd.f32 %v1976_v25, %v1774_v1  ;;  %v3152_v62 = vsel %vm1628_vm2, %v3150_v58, %v3151_v63  ;;  %v3446_v61 = vsel %vm1628_vm2, %v3444_v51, %v3445_v42  ;;  %v13005_v4 = vld [vmem:[%s16298_s2 + $0x8] ss:$0 sm:$0xff]  ;;  %v13016_v51 = vld [vmem:[%s16298_s2 + $0xb] ss:$0 sm:$0xff] }
 0x264   : > { %686 = vst.msk [vmem:[#allocation2 + $0x308] sm:$0x3] %vm588_vm1, %v12991_v0  ;;  %v6478_v8 = vadd.f32 %v12888_v29, %v6184_v11  ;;  %v3740_v10 = vsel %vm1628_vm2, %v3738_v39, %v3739_v52  ;;  %v4032_v19 = vrot.slane %v3887_v23, 1  ;;  %v4033_v43 = vrot.slane %v3888_v31, 1 }
 0x265   : > { %v2362_v55 = vadd.f32 %v2270_v27, %v2068_v5  ;;  %v4477_v40 = vmul.f32 %v12986_v26, %v12732_v49  ;;  %v4770_v63 = vmul.f32 %v13005_v4, %v12851_v13  ;;  %v4771_v58 = vmul.f32 %v13005_v4, %v12905_v57 }
 0x266   : > { %v13011_v29 = vadd.f32 %v6678_v47, %v6478_v8  ;;  %v4327_v25 = vrot.slane %v4181_v24, 2  ;;  %v4328_v3 = vrot.slane %v4182_v35, 2  ;;  %v4621_v28 = vrot.slane %v4476_v53, 2  ;;  %v13047_v35 = vld [vmem:[%s16298_s2 + $0x14] ss:$0 sm:$0xff] }
 0x267   : > { %v2656_v2 = vadd.f32 %v2564_v46, %v2362_v55  ;;  %v5064_v42 = vmul.f32 %v13016_v51, %v12682_v14  ;;  %v5065_v39 = vmul.f32 %v13016_v51, %v12748_v45  ;;  %v5358_v52 = vmul.f32 %v13025_v38, %v12694_v7  ;;  %v13036_v14 = vld [vmem:[%s16298_s2 + $0x11] ss:$0 sm:$0xff] }
 0x268   : > { %17129 = vst [vmem:[#allocation104_spill] sm:$0xff] %v13011_v29  ;;  %v6836_v23 = vsel %vm586_vm0, %v13011_v29, 0.0  ;;  %v5359_v31 = vmul.f32 %v13025_v38, %v12754_v21  ;;  %v5652_v45 = vmul.f32 %v13036_v14, %v12901_v22  ;;  %v5653_v33 = vmul.f32 %v13036_v14, %v12936_v18 }
 0x269   : > { %6837 = vadd.xlane.f32.xlu0 %v6836_v23  ;;  %v2950_v47 = vadd.f32 %v2858_v50, %v2656_v2  ;;  %v4622_v1 = vrot.slane %v4477_v40, 2  ;;  %v4915_v27 = vrot.slane %v4770_v63, 2  ;;  %v4916_v46 = vrot.slane %v4771_v58, 2 }
 0x26a   : > { %v4034_v11 = vsel %vm1628_vm2, %v4032_v19, %v4033_v43  ;;  %v4329_v24 = vsel %vm4275_vm3, %v4327_v25, %v4328_v3  ;;  %v5946_v53 = vmul.f32 %v13047_v35, %v12673_v32  ;;  %v5947_v5 = vmul.f32 %v13047_v35, %v12760_v44  ;;  %v13056_v43 = vld [vmem:[%s16298_s2 + $0x17] ss:$0 sm:$0xff] }
 0x26b   : > { %v3244_v8 = vadd.f32 %v3152_v62, %v2950_v47  ;;  %v5209_v50 = vrot.slane %v5064_v42, 2  ;;  %v5210_v55 = vrot.slane %v5065_v39, 2  ;;  %v5503_v40 = vrot.slane %v5358_v52, 2 }
 0x26c   : > { %v5504_v63 = vrot.slane %v5359_v31, 2  ;;  %v5797_v58 = vrot.slane %v5652_v45, 2  ;;  %v5798_v19 = vrot.slane %v5653_v33, 2  ;;  %v6240_v25 = vmul.f32 %v13056_v43, %v12675_v54  ;;  %v13070_v45 = vld [vmem:[#allocation2 + $0x180] sm:$0xff] }
 0x26d   : > { %v3538_v3 = vadd.f32 %v3446_v61, %v3244_v8  ;;  %v4623_v32 = vsel %vm4275_vm3, %v4621_v28, %v4622_v1  ;;  %v4917_v44 = vsel %vm4275_vm3, %v4915_v27, %v4916_v46  ;;  %v888_v62 = vmul.f32 %v12632_v6, %v12601_v60 }
 0x26e   : > { %v6091_v2 = vrot.slane %v5946_v53, 2  ;;  %v6092_v42 = vrot.slane %v5947_v5, 2  ;;  %v6241_v39 = vmul.f32 %v13056_v43, %v12762_v56  ;;  %v958_v52 = vmul.f32 %v12851_v13, %v12611_v37 }
 0x26f   : > { %v3832_v23 = vadd.f32 %v3740_v10, %v3538_v3  ;;  %v5211_v31 = vsel %vm4275_vm3, %v5209_v50, %v5210_v55  ;;  %v920_v61 = vadd.f32 %v12624_v36, %v888_v62  ;;  %v1028_v28 = vmul.f32 %v13070_v45, %v12630_v41  ;;  %v17135_v36 = vld [vmem:[#allocation101_spill] sm:$0xff] }
 0x270   : > { %v5505_v33 = vsel %vm4275_vm3, %v5503_v40, %v5504_v63  ;;  %v5799_v47 = vsel %vm4275_vm3, %v5797_v58, %v5798_v19  ;;  %v6385_v1 = vrot.slane %v6240_v25, 2  ;;  %v6534_v27 = vmul.f32 %v12864_v9, %v12899_v16  ;;  %v17130_v19 = vld [vmem:[#allocation30_spill] sm:$0xff] }
 0x271   : > { %v4126_v46 = vadd.f32 %v4034_v11, %v3832_v23  ;;  %v6535_v10 = vmul.f32 %v12864_v9, %v12956_v20  ;;  %v990_v53 = vadd.f32 %v958_v52, %v920_v61  ;;  %v1098_v5 = vmul.f32 %v12694_v7, %v12649_v48  ;;  %v17136_v9 = vld [vmem:[#allocation92_spill] sm:$0xff] }
 0x272   : > { %v6093_v8 = vsel %vm4275_vm3, %v6091_v2, %v6092_v42  ;;  %v6386_v50 = vrot.slane %v6241_v39, 2  ;;  %v1168_v55 = vmul.f32 %v12901_v22, %v12680_v30  ;;  %v1536_v40 = vmul.f32 %v17117_v15, %v12632_v6  ;;  %v17131_v2 = vld [vmem:[#allocation68_spill] sm:$0xff] }
 0x273   : > { %v4421_v63 = vadd.f32 %v4329_v24, %v4126_v46  ;;  %v1060_v58 = vadd.f32 %v1028_v28, %v990_v53  ;;  %v1537_v11 = vmul.f32 %v12732_v49, %v17117_v15  ;;  %v1831_v25 = vmul.f32 %v12851_v13, %v17130_v19  ;;  %v13095_v39 = vld [vmem:[#allocation2 + $0x188] sm:$0x3]  ;;  %v13099_v28 = vld [vmem:[#allocation2 + $0x220] sm:$0xff]  ;;  %v17132_v46 = vld [vmem:[#allocation49_spill] sm:$0xff] }
 0x274   : > { %v6679_v3 = vrot.slane %v6534_v27, 2  ;;  %v1832_v62 = vmul.f32 %v12905_v57, %v17130_v19  ;;  %v2125_v42 = vmul.f32 %v13070_v45, %v17131_v2  ;;  %v2126_v24 = vmul.f32 %v13095_v39, %v17131_v2  ;;  %v17133_v53 = vld [vmem:[#allocation38_spill] sm:$0xff]  ;;  %v17134_v19 = vld [vmem:[#allocation96_spill] sm:$0xff] }
 0x275   : > { %v4715_v52 = vadd.f32 %v4623_v32, %v4421_v63  ;;  %v6680_v23 = vrot.slane %v6535_v10, 2  ;;  %v1130_v61 = vadd.f32 %v1098_v5, %v1060_v58  ;;  %v1238_v27 = vmul.f32 %v13099_v28, %v17132_v46  ;;  %v544_v5 = vld [vmem:[%s9292_s14 + $0x270] sm:$0xff]  ;;  %v13110_v63 = vld [vmem:[#allocation2 + $0x2c0] sm:$0xff] }
 0x276   : > { %v1308_v0 = vmul.f32 %v17133_v53, %v12675_v54  ;;  %v1683_v29 = vrot.slane %v1536_v40, 1  ;;  %v2419_v15 = vmul.f32 %v17134_v19, %v12694_v7  ;;  %v2420_v30 = vmul.f32 %v17134_v19, %v12754_v21  ;;  %687 = vst.msk [vmem:[#allocation2 + $0x310] sm:$0xff] %vm586_vm0, %v544_v5 }
 0x277   : > { %v5009_v48 = vadd.f32 %v4917_v44, %v4715_v52  ;;  %v1200_v2 = vadd.f32 %v1168_v55, %v1130_v61  ;;  %v1684_v32 = vrot.slane %v1537_v11, 1  ;;  %v1977_v10 = vrot.slane %v1831_v25, 1 }
 0x278   : > { %v1978_v58 = vrot.slane %v1832_v62, 1  ;;  %v2271_v41 = vrot.slane %v2125_v42, 1  ;;  %v2272_v46 = vrot.slane %v2126_v24, 1  ;;  %v2713_v53 = vmul.f32 %v17135_v36, %v12901_v22  ;;  %v17137_v62 = vld [vmem:[#allocation102_spill] sm:$0xff] }
 0x279   : > { %v5303_v40 = vadd.f32 %v5211_v31, %v5009_v48  ;;  %v1270_v37 = vadd.f32 %v1238_v27, %v1200_v2  ;;  %v1378_v19 = vmul.f32 %v17136_v9, %v12899_v16  ;;  %v2714_v44 = vmul.f32 %v12936_v18, %v17135_v36  ;;  %v17138_v48 = vld [vmem:[#allocation93_spill] sm:$0xff]  ;;  %v13130_v9 = vld [vmem:[#allocation2 + $0x228] sm:$0x3] }
 0x27a   : > { %v6387_v55 = vsel %vm4275_vm3, %v6385_v1, %v6386_v50  ;;  %v2565_v11 = vrot.slane %v2419_v15, 1  ;;  %v2566_v25 = vrot.slane %v2420_v30, 1  ;;  %v3007_v42 = vmul.f32 %v13099_v28, %v17137_v62  ;;  %v13128_v15 = vld [vmem:[#allocation2 + $0x2c8] sm:$0x3] }
 0x27b   : > { %v5597_v24 = vadd.f32 %v5505_v33, %v5303_v40  ;;  %v6681_v52 = vsel %vm4275_vm3, %v6679_v3, %v6680_v23  ;;  %v1340_v61 = vadd.f32 %v1308_v0, %v1270_v37  ;;  %v1448_v31 = vmul.f32 %v17138_v48, %v13110_v63 }
 0x27c   : > { %v1685_v2 = vsel %vm1628_vm2, %v1683_v29, %v1684_v32  ;;  %v1979_v27 = vsel %vm1628_vm2, %v1977_v10, %v1978_v58  ;;  %v2273_v5 = vsel %vm1628_vm2, %v2271_v41, %v2272_v46  ;;  %v2859_v36 = vrot.slane %v2713_v53, 1 }
 0x27d   : > { %v5891_v1 = vadd.f32 %v5799_v47, %v5597_v24  ;;  %v1410_v30 = vadd.f32 %v1378_v19, %v1340_v61  ;;  %v2860_v50 = vrot.slane %v2714_v44, 1  ;;  %v3008_v37 = vmul.f32 %v13130_v9, %v17137_v62 }
 0x27e   : > { %v2567_v0 = vsel %vm1628_vm2, %v2565_v11, %v2566_v25  ;;  %v3153_v33 = vrot.slane %v3007_v42, 1  ;;  %v3301_v29 = vmul.f32 %v12944_v59, %v12675_v54  ;;  %v3302_v41 = vmul.f32 %v12944_v59, %v12762_v56 }
 0x27f   : > { %v6185_v3 = vadd.f32 %v6093_v8, %v5891_v1  ;;  %v1480_v47 = vadd.f32 %v1448_v31, %v1410_v30  ;;  %v3595_v19 = vmul.f32 %v12783_v34, %v12899_v16  ;;  %v3596_v23 = vmul.f32 %v12783_v34, %v12956_v20 }
 0x280   : > { %v3889_v46 = vmul.f32 %v12962_v12, %v13110_v63  ;;  %v3890_v53 = vmul.f32 %v12962_v12, %v13128_v15  ;;  %v4183_v32 = vmul.f32 %v12977_v17, %v12632_v6  ;;  %v4184_v10 = vmul.f32 %v12977_v17, %v12732_v49 }
 0x281   : > { %v6479_v8 = vadd.f32 %v6387_v55, %v6185_v3  ;;  %v1775_v58 = vadd.f32 %v1685_v2, %v1480_v47  ;;  %v2861_v40 = vsel %vm1628_vm2, %v2859_v36, %v2860_v50  ;;  %v3154_v44 = vrot.slane %v3008_v37, 1  ;;  %v545_v47 = vld [vmem:[%s9292_s14 + $0x278] sm:$0x3]  ;;  %s461_s14 = sadd.s32 %s8476_s17, %s8475_s16 }
 0x282   : > { %v3447_v11 = vrot.slane %v3301_v29, 1  ;;  %v3448_v25 = vrot.slane %v3302_v41, 1  ;;  %v4478_v42 = vmul.f32 %v12986_v26, %v12851_v13  ;;  %v4479_v24 = vmul.f32 %v12986_v26, %v12905_v57  ;;  %688 = vst.msk [vmem:[#allocation2 + $0x318] sm:$0x3] %vm588_vm1, %v545_v47  ;;  %v17142_v47 = vld [vmem:[#allocation69_spill] sm:$0xff]  ;;  %s8477_s18 = sshll.u32 %s461_s14, 3 }
 0x283   : > { %v13156_v61 = vadd.f32 %v6681_v52, %v6479_v8  ;;  %v2069_v31 = vadd.f32 %v1979_v27, %v1775_v58  ;;  %v3741_v6 = vrot.slane %v3595_v19, 1  ;;  %v3742_v1 = vrot.slane %v3596_v23, 1  ;;  %s16069_s30 = scalar_lea.vmem %s16307_s11, %s8477_s18 }
 0x284   : > { %v4035_v49 = vrot.slane %v3889_v46, 1  ;;  %v4036_v55 = vrot.slane %v3890_v53, 1  ;;  %v4330_v2 = vrot.slane %v4183_v32, 2  ;;  %v4331_v30 = vrot.slane %v4184_v10, 2 }
 0x285   : > { %17139 = vst [vmem:[#allocation93_spill] sm:$0xff] %v13156_v61  ;;  %v6839_v36 = vsel %vm586_vm0, %v13156_v61, 0.0  ;;  %v2363_v50 = vadd.f32 %v2273_v5, %v2069_v31  ;;  %v4772_v37 = vmul.f32 %v13070_v45, %v13005_v4  ;;  %v4773_v29 = vmul.f32 %v13095_v39, %v13005_v4 }
 0x286   : > { %6840 = vadd.xlane.f32.xlu1 %v6839_v36  ;;  %v4624_v52 = vrot.slane %v4478_v42, 2  ;;  %v4625_v27 = vrot.slane %v4479_v24, 2  ;;  %v5066_v41 = vmul.f32 %v13016_v51, %v12694_v7  ;;  %v5067_v3 = vmul.f32 %v13016_v51, %v12754_v21 }
 0x287   : > { %v2657_v19 = vadd.f32 %v2567_v0, %v2363_v50  ;;  %v3155_v23 = vsel %vm1628_vm2, %v3153_v33, %v3154_v44  ;;  %v5360_v5 = vmul.f32 %v13025_v38, %v12901_v22  ;;  %v5361_v46 = vmul.f32 %v13025_v38, %v12936_v18 }
 0x288   : > { %v3449_v53 = vsel %vm1628_vm2, %v3447_v11, %v3448_v25  ;;  %v3743_v32 = vsel %vm1628_vm2, %v3741_v6, %v3742_v1  ;;  %v5654_v7 = vmul.f32 %v13099_v28, %v13036_v14  ;;  %v5655_v21 = vmul.f32 %v13130_v9, %v13036_v14 }
 0x289   : > { %v2951_v0 = vadd.f32 %v2861_v40, %v2657_v19  ;;  %v4037_v33 = vsel %vm1628_vm2, %v4035_v49, %v4036_v55  ;;  %v4918_v10 = vrot.slane %v4772_v37, 2  ;;  %v4919_v8 = vrot.slane %v4773_v29, 2  ;;  %v17140_v37 = vld [vmem:[#allocation99_spill] sm:$0xff] }
 0x28a   : > { %v4332_v58 = vsel %vm4275_vm3, %v4330_v2, %v4331_v30  ;;  %v4626_v44 = vsel %vm4275_vm3, %v4624_v52, %v4625_v27  ;;  %v5212_v42 = vrot.slane %v5066_v41, 2  ;;  %v5213_v24 = vrot.slane %v5067_v3, 2  ;;  %v17141_v52 = vld [vmem:[#allocation19_spill] sm:$0xff] }
 0x28b   : > { %v3245_v11 = vadd.f32 %v3155_v23, %v2951_v0  ;;  %v5506_v25 = vrot.slane %v5360_v5, 2  ;;  %v5507_v31 = vrot.slane %v5361_v46, 2  ;;  %v5948_v6 = vmul.f32 %v13047_v35, %v12675_v54  ;;  %v13203_v23 = vld [vmem:[#allocation2 + $0x190] sm:$0xff]  ;;  %v17143_v5 = vld [vmem:[#allocation72_spill] sm:$0xff]  ;;  %v566_v46 = vld [vmem:[%s9339_s25 + $0xa0] sm:$0xff] }
 0x28c   : > { %v5800_v1 = vrot.slane %v5654_v7, 2  ;;  %v5801_v36 = vrot.slane %v5655_v21, 2  ;;  %v5949_v40 = vmul.f32 %v13047_v35, %v12762_v56  ;;  %v6242_v49 = vmul.f32 %v13056_v43, %v12899_v16  ;;  %690 = vst.msk [vmem:[#allocation2 + $0x320] sm:$0xff] %vm586_vm0, %v566_v46  ;;  %v13235_v46 = vld [vmem:[#allocation2 + $0x230] sm:$0xff] }
 0x28d   : > { %v3539_v55 = vadd.f32 %v3449_v53, %v3245_v11  ;;  %v4920_v2 = vsel %vm4275_vm3, %v4918_v10, %v4919_v8  ;;  %v6243_v30 = vmul.f32 %v13056_v43, %v12956_v20  ;;  %v889_v50 = vmul.f32 %v12851_v13, %v12601_v60  ;;  %v568_v11 = vld [vmem:[%s9339_s25 + $0xb0] sm:$0xff] }
 0x28e   : > { %v5214_v54 = vsel %vm4275_vm3, %v5212_v42, %v5213_v24  ;;  %v6536_v29 = vmul.f32 %v17140_v37, %v13110_v63  ;;  %v6537_v56 = vmul.f32 %v17140_v37, %v13128_v15  ;;  %v959_v27 = vmul.f32 %v13070_v45, %v17141_v52  ;;  %v17144_v42 = vld [vmem:[#allocation82_spill] sm:$0xff]  ;;  %692 = vst.msk [vmem:[#allocation2 + $0x330] sm:$0xff] %vm586_vm0, %v568_v11  ;;  %v17151_v11 = vld [vmem:[#allocation92_spill] sm:$0xff] }
 0x28f   : > { %v3833_v41 = vadd.f32 %v3743_v32, %v3539_v55  ;;  %v6094_v3 = vrot.slane %v5948_v6, 2  ;;  %v921_v19 = vadd.f32 %v17142_v47, %v889_v50  ;;  %v1029_v60 = vmul.f32 %v13203_v23, %v17143_v5  ;;  %v17145_v50 = vld [vmem:[#allocation84_spill] sm:$0xff]  ;;  %v13229_v47 = vld [vmem:[#allocation2 + $0x198] sm:$0x3] }
 0x290   : > { %v5508_v53 = vsel %vm4275_vm3, %v5506_v25, %v5507_v31  ;;  %v5802_v7 = vsel %vm4275_vm3, %v5800_v1, %v5801_v36  ;;  %v6095_v21 = vrot.slane %v5949_v40, 2  ;;  %v6388_v0 = vrot.slane %v6242_v49, 2  ;;  %v17146_v25 = vld [vmem:[#allocation18_spill] sm:$0xff] }
 0x291   : > { %v4127_v10 = vadd.f32 %v4037_v33, %v3833_v41  ;;  %v6389_v32 = vrot.slane %v6243_v30, 2  ;;  %v991_v8 = vadd.f32 %v959_v27, %v921_v19  ;;  %v1099_v24 = vmul.f32 %v12901_v22, %v17144_v42  ;;  %v17147_v40 = vld [vmem:[#allocation30_spill] sm:$0xff]  ;;  %v570_v30 = vld [vmem:[%s9339_s25 + $0xc0] sm:$0xff]  ;;  %v17148_v27 = vld [vmem:[#allocation68_spill] sm:$0xff] }
 0x292   : > { %v6682_v6 = vrot.slane %v6536_v29, 2  ;;  %v6683_v55 = vrot.slane %v6537_v56, 2  ;;  %v1169_v52 = vmul.f32 %v13099_v28, %v17145_v50  ;;  %v1538_v31 = vmul.f32 %v12851_v13, %v17146_v25  ;;  %694 = vst.msk [vmem:[#allocation2 + $0x340] sm:$0xff] %vm586_vm0, %v570_v30 }
 0x293   : > { %v4422_v1 = vadd.f32 %v4332_v58, %v4127_v10  ;;  %v1061_v36 = vadd.f32 %v1029_v60, %v991_v8  ;;  %v1539_v33 = vmul.f32 %v12905_v57, %v17146_v25  ;;  %v1833_v49 = vmul.f32 %v13070_v45, %v17147_v40  ;;  %v17150_v8 = vld [vmem:[#allocation38_spill] sm:$0xff] }
 0x294   : > { %v6096_v29 = vsel %vm4275_vm3, %v6094_v3, %v6095_v21  ;;  %v1834_v56 = vmul.f32 %v13095_v39, %v17147_v40  ;;  %v2127_v41 = vmul.f32 %v13203_v23, %v17148_v27  ;;  %v2128_v58 = vmul.f32 %v13229_v47, %v17148_v27  ;;  %v17149_v3 = vld [vmem:[#allocation49_spill] sm:$0xff] }
 0x295   : > { %v4716_v19 = vadd.f32 %v4626_v44, %v4422_v1  ;;  %v6390_v5 = vsel %vm4275_vm3, %v6388_v0, %v6389_v32  ;;  %v1131_v60 = vadd.f32 %v1099_v24, %v1061_v36  ;;  %v1239_v21 = vmul.f32 %v13235_v46, %v17149_v3  ;;  %v17152_v36 = vld [vmem:[#allocation96_spill] sm:$0xff] }
 0x296   : > { %v6684_v10 = vsel %vm4275_vm3, %v6682_v6, %v6683_v55  ;;  %v1309_v42 = vmul.f32 %v17150_v8, %v12899_v16  ;;  %v1379_v50 = vmul.f32 %v17151_v11, %v13110_v63  ;;  %v1686_v25 = vrot.slane %v1538_v31, 1  ;;  %v17153_v55 = vld [vmem:[#allocation101_spill] sm:$0xff]  ;;  %v13256_v31 = vld [vmem:[#allocation2 + $0x238] sm:$0x3] }
 0x297   : > { %v5010_v40 = vadd.f32 %v4920_v2, %v4716_v19  ;;  %v1201_v30 = vadd.f32 %v1169_v52, %v1131_v60  ;;  %v1687_v44 = vrot.slane %v1539_v33, 1  ;;  %v1980_v1 = vrot.slane %v1833_v49, 1  ;;  %v13250_v11 = vld [vmem:[#allocation2 + $0x2d0] sm:$0xff] }
 0x298   : > { %v1981_v0 = vrot.slane %v1834_v56, 1  ;;  %v2274_v32 = vrot.slane %v2127_v41, 1  ;;  %v2275_v24 = vrot.slane %v2128_v58, 1  ;;  %v2421_v27 = vmul.f32 %v12901_v22, %v17152_v36 }
 0x299   : > { %v5304_v3 = vadd.f32 %v5214_v54, %v5010_v40  ;;  %v1271_v61 = vadd.f32 %v1239_v21, %v1201_v30  ;;  %v2422_v6 = vmul.f32 %v12936_v18, %v17152_v36  ;;  %v2715_v8 = vmul.f32 %v13099_v28, %v17153_v55 }
 0x29a   : > { %v2716_v2 = vmul.f32 %v13130_v9, %v17153_v55  ;;  %v3009_v52 = vmul.f32 %v13235_v46, %v17137_v62  ;;  %v3010_v54 = vmul.f32 %v13256_v31, %v17137_v62  ;;  %v3303_v33 = vmul.f32 %v12944_v59, %v12899_v16 }
 0x29b   : > { %v5598_v49 = vadd.f32 %v5508_v53, %v5304_v3  ;;  %v1341_v56 = vadd.f32 %v1309_v42, %v1271_v61  ;;  %v1449_v41 = vmul.f32 %v17138_v48, %v13250_v11  ;;  %v1688_v58 = vsel %vm1628_vm2, %v1686_v25, %v1687_v44  ;;  %v567_v48 = vld [vmem:[%s9339_s25 + $0xa8] sm:$0x3]  ;;  %v13270_v25 = vld [vmem:[#allocation2 + $0x2d8] sm:$0x3] }
 0x29c   : > { %v1982_v19 = vsel %vm1628_vm2, %v1980_v1, %v1981_v0  ;;  %v2276_v60 = vsel %vm1628_vm2, %v2274_v32, %v2275_v24  ;;  %v2568_v21 = vrot.slane %v2421_v27, 1  ;;  %v3304_v40 = vmul.f32 %v12944_v59, %v12956_v20  ;;  %691 = vst.msk [vmem:[#allocation2 + $0x328] sm:$0x3] %vm588_vm1, %v567_v48  ;;  %v569_v24 = vld [vmem:[%s9339_s25 + $0xb8] sm:$0x3] }
 0x29d   : > { %v5892_v30 = vadd.f32 %v5802_v7, %v5598_v49  ;;  %v1411_v36 = vadd.f32 %v1379_v50, %v1341_v56  ;;  %v2569_v62 = vrot.slane %v2422_v6, 1  ;;  %v2862_v55 = vrot.slane %v2715_v8, 1  ;;  %693 = vst.msk [vmem:[#allocation2 + $0x338] sm:$0x3] %vm588_vm1, %v569_v24 }
 0x29e   : > { %v2863_v53 = vrot.slane %v2716_v2, 1  ;;  %v3156_v61 = vrot.slane %v3009_v52, 1  ;;  %v3157_v42 = vrot.slane %v3010_v54, 1  ;;  %v3450_v3 = vrot.slane %v3303_v33, 1  ;;  %v571_v33 = vld [vmem:[%s9339_s25 + $0xc8] sm:$0x3] }
 0x29f   : > { %v6186_v37 = vadd.f32 %v6096_v29, %v5892_v30  ;;  %v1481_v44 = vadd.f32 %v1449_v41, %v1411_v36  ;;  %v3597_v1 = vmul.f32 %v12783_v34, %v13110_v63  ;;  %v3598_v0 = vmul.f32 %v12783_v34, %v13128_v15  ;;  %695 = vst.msk [vmem:[#allocation2 + $0x348] sm:$0x3] %vm588_vm1, %v571_v33 }
 0x2a0   : > { %v3451_v7 = vrot.slane %v3304_v40, 1  ;;  %v3891_v50 = vmul.f32 %v12962_v12, %v13250_v11  ;;  %v3892_v32 = vmul.f32 %v12962_v12, %v13270_v25  ;;  %v4185_v29 = vmul.f32 %v12977_v17, %v12851_v13 }
 0x2a1   : > { %v6480_v27 = vadd.f32 %v6390_v5, %v6186_v37  ;;  %v1776_v6 = vadd.f32 %v1688_v58, %v1481_v44  ;;  %v2570_v8 = vsel %vm1628_vm2, %v2568_v21, %v2569_v62  ;;  %v4186_v34 = vmul.f32 %v12977_v17, %v12905_v57 }
 0x2a2   : > { %v2864_v2 = vsel %vm1628_vm2, %v2862_v55, %v2863_v53  ;;  %v3158_v52 = vsel %vm1628_vm2, %v3156_v61, %v3157_v42  ;;  %v4480_v54 = vmul.f32 %v13070_v45, %v12986_v26  ;;  %v4481_v13 = vmul.f32 %v13095_v39, %v12986_v26 }
 0x2a3   : > { %v13295_v37 = vadd.f32 %v6684_v10, %v6480_v27  ;;  %v2070_v5 = vadd.f32 %v1982_v19, %v1776_v6  ;;  %v3744_v62 = vrot.slane %v3597_v1, 1  ;;  %v3745_v49 = vrot.slane %v3598_v0, 1 }
 0x2a4   : > { %v3452_v57 = vsel %vm1628_vm2, %v3450_v3, %v3451_v7  ;;  %v4038_v56 = vrot.slane %v3891_v50, 1  ;;  %v4039_v55 = vrot.slane %v3892_v32, 1  ;;  %v4333_v41 = vrot.slane %v4185_v29, 2 }
 0x2a5   : > { %17154 = vst [vmem:[#allocation19_spill] sm:$0xff] %v13295_v37  ;;  %v6842_v58 = vsel %vm586_vm0, %v13295_v37, 0.0  ;;  %v2364_v21 = vadd.f32 %v2276_v60, %v2070_v5  ;;  %v4334_v40 = vrot.slane %v4186_v34, 2  ;;  %v4774_v30 = vmul.f32 %v13203_v23, %v13005_v4 }
 0x2a6   : > { %6843 = vadd.xlane.f32.xlu0 %v6842_v58  ;;  %v4627_v10 = vrot.slane %v4480_v54, 2  ;;  %v4628_v19 = vrot.slane %v4481_v13, 2  ;;  %v4775_v36 = vmul.f32 %v13229_v47, %v13005_v4  ;;  %v5068_v53 = vmul.f32 %v13016_v51, %v12901_v22 }
 0x2a7   : > { %v2658_v61 = vadd.f32 %v2570_v8, %v2364_v21  ;;  %v5069_v42 = vmul.f32 %v13016_v51, %v12936_v18  ;;  %v5362_v60 = vmul.f32 %v13099_v28, %v13025_v38  ;;  %v5363_v3 = vmul.f32 %v13130_v9, %v13025_v38 }
 0x2a8   : > { %v3746_v48 = vsel %vm1628_vm2, %v3744_v62, %v3745_v49  ;;  %v4040_v44 = vsel %vm1628_vm2, %v4038_v56, %v4039_v55  ;;  %v5656_v1 = vmul.f32 %v13235_v46, %v13036_v14  ;;  %v5657_v22 = vmul.f32 %v13256_v31, %v13036_v14  ;;  %v17156_v56 = vld [vmem:[#allocation99_spill] sm:$0xff] }
 0x2a9   : > { %v2952_v0 = vadd.f32 %v2864_v2, %v2658_v61  ;;  %v4335_v7 = vsel %vm4275_vm3, %v4333_v41, %v4334_v40  ;;  %v5950_v18 = vmul.f32 %v13047_v35, %v12899_v16  ;;  %v5951_v50 = vmul.f32 %v13047_v35, %v12956_v20  ;;  %v13332_v16 = vld [vmem:[%s16298_s2] ss:$0 sm:$0xff]  ;;  %v13360_v40 = vld [vmem:[%s16298_s2 + $0x6] ss:$0 sm:$0xff] }
 0x2aa   : > { %v4629_v32 = vsel %vm4275_vm3, %v4627_v10, %v4628_v19  ;;  %v4921_v29 = vrot.slane %v4774_v30, 2  ;;  %v4922_v24 = vrot.slane %v4775_v36, 2  ;;  %v5215_v27 = vrot.slane %v5068_v53, 2  ;;  %17155 = vst [vmem:[#allocation69_spill] sm:$0xff] %v13332_v16  ;;  %v13347_v41 = vld [vmem:[%s16299_s3] ss:$0 sm:$0xff] }
 0x2ab   : > { %v3246_v6 = vadd.f32 %v3158_v52, %v2952_v0  ;;  %v5216_v8 = vrot.slane %v5069_v42, 2  ;;  %v5509_v34 = vrot.slane %v5362_v60, 2  ;;  %v5510_v54 = vrot.slane %v5363_v3, 2  ;;  %17157 = vst [vmem:[#allocation72_spill] sm:$0xff] %v13347_v41  ;;  %17159 = vst [vmem:[#allocation84_spill] sm:$0xff] %v13360_v40  ;;  %v13362_v30 = vld [vmem:[#allocation2 + $0x1a0] sm:$0xff] }
 0x2ac   : > { %v5803_v13 = vrot.slane %v5656_v1, 2  ;;  %v5804_v33 = vrot.slane %v5657_v22, 2  ;;  %v13327_v2 = vmul.f32 %v13056_v43, %v13110_v63  ;;  %v890_v20 = vmul.f32 %v13332_v16, %v13070_v45  ;;  %v13376_v1 = vld [vmem:[%s16298_s2 + $0x9] ss:$0 sm:$0xff] }
 0x2ad   : > { %v3540_v5 = vadd.f32 %v3452_v57, %v3246_v6  ;;  %v6097_v62 = vrot.slane %v5950_v18, 2  ;;  %v6098_v52 = vrot.slane %v5951_v50, 2  ;;  %v13338_v49 = vmul.f32 %v13056_v43, %v13128_v15  ;;  %v13353_v57 = vld [vmem:[%s16298_s2 + $0x3] ss:$0 sm:$0xff]  ;;  %17160 = vst [vmem:[#allocation18_spill] sm:$0xff] %v13376_v1 }
 0x2ae   : > { %v13342_v55 = vmul.f32 %v17156_v56, %v13250_v11  ;;  %v922_v58 = vadd.f32 %v13347_v41, %v890_v20  ;;  %17158 = vst [vmem:[#allocation82_spill] sm:$0xff] %v13353_v57  ;;  %v960_v21 = vmul.f32 %v13353_v57, %v13203_v23  ;;  %v1030_v10 = vmul.f32 %v13362_v30, %v13360_v40 }
 0x2af   : > { %v3834_v19 = vadd.f32 %v3746_v48, %v3540_v5  ;;  %v4923_v36 = vsel %vm4275_vm3, %v4921_v29, %v4922_v24  ;;  %v5217_v53 = vsel %vm4275_vm3, %v5215_v27, %v5216_v8  ;;  %v5511_v61 = vsel %vm4275_vm3, %v5509_v34, %v5510_v54  ;;  %v13390_v27 = vld [vmem:[%s16298_s2 + $0xc] ss:$0 sm:$0xff]  ;;  %v13415_v5 = vld [vmem:[%s16298_s2 + $0xf] ss:$0 sm:$0xff] }
 0x2b0   : > { %v13370_v42 = vsel %vm4275_vm3, %v5803_v13, %v5804_v33  ;;  %v6391_v60 = vrot.slane %v13327_v2, 2  ;;  %v992_v3 = vadd.f32 %v960_v21, %v922_v58  ;;  %v1100_v48 = vmul.f32 %v13376_v1, %v13099_v28  ;;  %17161 = vst [vmem:[#allocation30_spill] sm:$0xff] %v13390_v27  ;;  %v13406_v13 = vld [vmem:[%s16298_s2 + $0x4] ss:$0 sm:$0xff]  ;;  %17164 = vst [vmem:[#allocation38_spill] sm:$0xff] %v13415_v5  ;;  %v572_v58 = vld [vmem:[%s9339_s25 + $0xd0] sm:$0xff] }
 0x2b1   : > { %v4128_v22 = vadd.f32 %v4040_v44, %v3834_v19  ;;  %v13381_v0 = vsel %vm4275_vm3, %v6097_v62, %v6098_v52  ;;  %v6392_v18 = vrot.slane %v13338_v49, 2  ;;  %v6539_v50 = vmul.f32 %v17156_v56, %v13270_v25  ;;  %v13397_v44 = vld [vmem:[%s16298_s2 + $0x1] ss:$0 sm:$0xff]  ;;  %17163 = vst [vmem:[#allocation49_spill] sm:$0xff] %v13406_v13  ;;  %v13424_v52 = vld [vmem:[%s16298_s2 + $0x7] ss:$0 sm:$0xff] }
 0x2b2   : > { %v6685_v29 = vrot.slane %v13342_v55, 2  ;;  %v1062_v24 = vadd.f32 %v1030_v10, %v992_v3  ;;  %v1170_v6 = vmul.f32 %v13390_v27, %v13235_v46  ;;  %17162 = vst [vmem:[#allocation68_spill] sm:$0xff] %v13397_v44  ;;  %v1540_v8 = vmul.f32 %v13397_v44, %v13070_v45  ;;  %17165 = vst [vmem:[#allocation92_spill] sm:$0xff] %v13424_v52  ;;  %v13428_v56 = vld [vmem:[#allocation2 + $0x1a8] sm:$0x3]  ;;  %v17169_v27 = vld [vmem:[#allocation101_spill] sm:$0xff] }
 0x2b3   : > { %v4423_v34 = vadd.f32 %v4335_v7, %v4128_v22  ;;  %v1541_v54 = vmul.f32 %v13397_v44, %v13095_v39  ;;  %v1835_v33 = vmul.f32 %v13406_v13, %v13203_v23  ;;  %v1836_v2 = vmul.f32 %v13406_v13, %v13229_v47  ;;  %v13417_v7 = vld [vmem:[#allocation2 + $0x240] sm:$0xff]  ;;  %v13436_v19 = vld [vmem:[%s16298_s2 + $0x12] ss:$0 sm:$0xff]  ;;  %696 = vst.msk [vmem:[#allocation2 + $0x350] sm:$0xff] %vm586_vm0, %v572_v58 }
 0x2b4   : > { %v1132_v20 = vadd.f32 %v1100_v48, %v1062_v24  ;;  %v1240_v62 = vmul.f32 %v13417_v7, %v13415_v5  ;;  %v2129_v49 = vmul.f32 %v13424_v52, %v13362_v30  ;;  %v2130_v55 = vmul.f32 %v13428_v56, %v13424_v52  ;;  %17166 = vst [vmem:[#allocation96_spill] sm:$0xff] %v13436_v19  ;;  %v13443_v48 = vld [vmem:[%s16298_s2 + $0xa] ss:$0 sm:$0xff]  ;;  %v13457_v13 = vld [vmem:[#allocation2 + $0x2e0] sm:$0xff] }
 0x2b5   : > { %v4717_v21 = vadd.f32 %v4629_v32, %v4423_v34  ;;  %v6686_v10 = vrot.slane %v6539_v50, 2  ;;  %v1310_v3 = vmul.f32 %v13436_v19, %v13110_v63  ;;  %17167 = vst [vmem:[#allocation99_spill] sm:$0xff] %v13443_v48  ;;  %v2423_v22 = vmul.f32 %v13443_v48, %v13099_v28  ;;  %v13451_v50 = vld [vmem:[%s16298_s2 + $0x15] ss:$0 sm:$0xff] }
 0x2b6   : > { %v1202_v32 = vadd.f32 %v1170_v6, %v1132_v20  ;;  %17168 = vst [vmem:[#allocation105_spill] sm:$0xff] %v13451_v50  ;;  %v1380_v24 = vmul.f32 %v13451_v50, %v13250_v11  ;;  %v1689_v34 = vrot.slane %v1540_v8, 1  ;;  %v2424_v37 = vmul.f32 %v13443_v48, %v13130_v9 }
 0x2b7   : > { %v5011_v52 = vadd.f32 %v4923_v36, %v4717_v21  ;;  %v1690_v19 = vrot.slane %v1541_v54, 1  ;;  %v1983_v5 = vrot.slane %v1835_v33, 1  ;;  %v1984_v44 = vrot.slane %v1836_v2, 1  ;;  %v13467_v54 = vld [vmem:[%s16298_s2 + $0x18] ss:$0 sm:$0xff] }
 0x2b8   : > { %v1272_v58 = vadd.f32 %v1240_v62, %v1202_v32  ;;  %v2277_v6 = vrot.slane %v2129_v49, 1  ;;  %v2278_v20 = vrot.slane %v2130_v55, 1  ;;  %v2717_v1 = vmul.f32 %v13235_v46, %v17169_v27  ;;  %17170 = vst [vmem:[#allocation101_spill] sm:$0xff] %v13467_v54  ;;  %v17171_v2 = vld [vmem:[#allocation102_spill] sm:$0xff]  ;;  %v13479_v21 = vld [vmem:[#allocation2 + $0x248] sm:$0x3] }
 0x2b9   : > { %v5305_v40 = vadd.f32 %v5217_v53, %v5011_v52  ;;  %v2571_v41 = vrot.slane %v2423_v22, 1  ;;  %v2572_v57 = vrot.slane %v2424_v37, 1  ;;  %v2718_v8 = vmul.f32 %v13256_v31, %v17169_v27 }
 0x2ba   : > { %v6393_v48 = vsel %vm4275_vm3, %v6391_v60, %v6392_v18  ;;  %v1342_v36 = vadd.f32 %v1310_v3, %v1272_v58  ;;  %v1450_v33 = vmul.f32 %v13467_v54, %v13457_v13  ;;  %v3011_v62 = vmul.f32 %v13417_v7, %v17171_v2  ;;  %v13476_v60 = vld [vmem:[#allocation2 + $0x2e8] sm:$0x3] }
 0x2bb   : > { %v5599_v53 = vadd.f32 %v5511_v61, %v5305_v40  ;;  %v6687_v37 = vsel %vm4275_vm3, %v6685_v29, %v6686_v10  ;;  %v1691_v52 = vsel %vm1628_vm2, %v1689_v34, %v1690_v19  ;;  %v1985_v27 = vsel %vm1628_vm2, %v1983_v5, %v1984_v44 }
 0x2bc   : > { %v1412_v18 = vadd.f32 %v1380_v24, %v1342_v36  ;;  %v2279_v49 = vsel %vm1628_vm2, %v2277_v6, %v2278_v20  ;;  %v2865_v55 = vrot.slane %v2717_v1, 1  ;;  %v3012_v3 = vmul.f32 %v13479_v21, %v17171_v2  ;;  %v13492_v1 = vld [vmem:[%s16298_s2 + $0x16] ss:$0 sm:$0xff] }
 0x2bd   : > { %v5893_v22 = vadd.f32 %v13370_v42, %v5599_v53  ;;  %v2573_v40 = vsel %vm1628_vm2, %v2571_v41, %v2572_v57  ;;  %v2866_v61 = vrot.slane %v2718_v8, 1  ;;  %v3305_v29 = vmul.f32 %v12944_v59, %v13110_v63  ;;  %17172 = vst [vmem:[#allocation102_spill] sm:$0xff] %v13492_v1 }
 0x2be   : > { %v1482_v44 = vadd.f32 %v1450_v33, %v1412_v18  ;;  %v3159_v5 = vrot.slane %v3011_v62, 1  ;;  %v3306_v10 = vmul.f32 %v12944_v59, %v13128_v15  ;;  %v3599_v19 = vmul.f32 %v13492_v1, %v13250_v11  ;;  %v573_v18 = vld [vmem:[%s9339_s25 + $0xd8] sm:$0x3] }
 0x2bf   : > { %v6187_v42 = vadd.f32 %v13381_v0, %v5893_v22  ;;  %v3600_v41 = vmul.f32 %v13492_v1, %v13270_v25  ;;  %v3893_v57 = vmul.f32 %v12962_v12, %v13457_v13  ;;  %v3894_v32 = vmul.f32 %v12962_v12, %v13476_v60  ;;  %697 = vst.msk [vmem:[#allocation2 + $0x358] sm:$0x3] %vm588_vm1, %v573_v18 }
 0x2c0   : > { %v1777_v59 = vadd.f32 %v1691_v52, %v1482_v44  ;;  %v3160_v24 = vrot.slane %v3012_v3, 1  ;;  %v4187_v34 = vmul.f32 %v13070_v45, %v12977_v17  ;;  %v4188_v58 = vmul.f32 %v13095_v39, %v12977_v17 }
 0x2c1   : > { %v6481_v6 = vadd.f32 %v6393_v48, %v6187_v42  ;;  %v3453_v0 = vrot.slane %v3305_v29, 1  ;;  %v4482_v20 = vmul.f32 %v13203_v23, %v12986_v26  ;;  %v4483_v8 = vmul.f32 %v13229_v47, %v12986_v26 }
 0x2c2   : > { %v2071_v36 = vadd.f32 %v1985_v27, %v1777_v59  ;;  %v2867_v12 = vsel %vm1628_vm2, %v2865_v55, %v2866_v61  ;;  %v3454_v33 = vrot.slane %v3306_v10, 1  ;;  %v3747_v2 = vrot.slane %v3599_v19, 1 }
 0x2c3   : > { %v13512_v62 = vadd.f32 %v6687_v37, %v6481_v6  ;;  %v3748_v53 = vrot.slane %v3600_v41, 1  ;;  %v4041_v45 = vrot.slane %v3893_v57, 1  ;;  %v4042_v52 = vrot.slane %v3894_v32, 1 }
 0x2c4   : > { %v2365_v17 = vadd.f32 %v2279_v49, %v2071_v36  ;;  %v4336_v39 = vrot.slane %v4187_v34, 2  ;;  %v4337_v48 = vrot.slane %v4188_v58, 2  ;;  %v4776_v3 = vmul.f32 %v13362_v30, %v13005_v4  ;;  %v574_v34 = vld [vmem:[%s9339_s25 + $0xe0] sm:$0xff] }
 0x2c5   : > { %17173 = vst [vmem:[#allocation106_spill] sm:$0xff] %v13512_v62  ;;  %v6845_v26 = vsel %vm586_vm0, %v13512_v62, 0.0  ;;  %v4630_v27 = vrot.slane %v4482_v20, 2  ;;  %v4631_v55 = vrot.slane %v4483_v8, 2  ;;  %v4777_v37 = vmul.f32 %v13428_v56, %v13005_v4  ;;  %698 = vst.msk [vmem:[#allocation2 + $0x360] sm:$0xff] %vm586_vm0, %v574_v34 }
 0x2c6   : > { %6846 = vadd.xlane.f32.xlu1 %v6845_v26  ;;  %v2659_v22 = vadd.f32 %v2573_v40, %v2365_v17  ;;  %v5070_v49 = vmul.f32 %v13099_v28, %v13016_v51  ;;  %v5071_v61 = vmul.f32 %v13130_v9, %v13016_v51  ;;  %v5364_v29 = vmul.f32 %v13235_v46, %v13025_v38  ;;  %v13577_v17 = vld [vmem:[#allocation2 + $0x1b0] sm:$0xff] }
 0x2c7   : > { %v3161_v44 = vsel %vm1628_vm2, %v3159_v5, %v3160_v24  ;;  %v5365_v10 = vmul.f32 %v13256_v31, %v13025_v38  ;;  %v5658_v4 = vmul.f32 %v13417_v7, %v13036_v14  ;;  %v5659_v40 = vmul.f32 %v13479_v21, %v13036_v14 }
 0x2c8   : > { %v2953_v19 = vadd.f32 %v2867_v12, %v2659_v22  ;;  %v3455_v28 = vsel %vm1628_vm2, %v3453_v0, %v3454_v33  ;;  %v3749_v9 = vsel %vm1628_vm2, %v3747_v2, %v3748_v53  ;;  %v4043_v51 = vsel %vm1628_vm2, %v4041_v45, %v4042_v52  ;;  %v17175_v2 = vld [vmem:[#allocation82_spill] sm:$0xff]  ;;  %v17176_v52 = vld [vmem:[#allocation72_spill] sm:$0xff] }
 0x2c9   : > { %v4338_v42 = vsel %vm4275_vm3, %v4336_v39, %v4337_v48  ;;  %v4632_v5 = vsel %vm4275_vm3, %v4630_v27, %v4631_v55  ;;  %v4924_v41 = vrot.slane %v4776_v3, 2  ;;  %v4925_v57 = vrot.slane %v4777_v37, 2  ;;  %v17177_v39 = vld [vmem:[#allocation84_spill] sm:$0xff] }
 0x2ca   : > { %v3247_v38 = vadd.f32 %v3161_v44, %v2953_v19  ;;  %v5218_v32 = vrot.slane %v5070_v49, 2  ;;  %v5219_v59 = vrot.slane %v5071_v61, 2  ;;  %v5512_v24 = vrot.slane %v5364_v29, 2  ;;  %v17178_v61 = vld [vmem:[#allocation18_spill] sm:$0xff] }
 0x2cb   : > { %v5513_v58 = vrot.slane %v5365_v10, 2  ;;  %v5806_v14 = vrot.slane %v5658_v4, 2  ;;  %v5807_v6 = vrot.slane %v5659_v40, 2  ;;  %v13543_v0 = vmul.f32 %v13047_v35, %v13110_v63  ;;  %v13563_v63 = vld [vmem:[%s16298_s2 + $0x1a] ss:$0 sm:$0xff] }
 0x2cc   : > { %v3541_v20 = vadd.f32 %v3455_v28, %v3247_v38  ;;  %v13548_v8 = vmul.f32 %v13047_v35, %v13128_v15  ;;  %v13552_v36 = vmul.f32 %v13056_v43, %v13250_v11  ;;  %v891_v12 = vmul.f32 %v13332_v16, %v13203_v23  ;;  %17174 = vst [vmem:[#allocation107_spill] sm:$0xff] %v13563_v63  ;;  %v13596_v38 = vld [vmem:[#allocation2 + $0x250] sm:$0xff] }
 0x2cd   : > { %v13558_v33 = vmul.f32 %v13056_v43, %v13270_v25  ;;  %v13567_v35 = vmul.f32 %v13563_v63, %v13457_v13  ;;  %v13571_v15 = vmul.f32 %v13563_v63, %v13476_v60  ;;  %v961_v53 = vmul.f32 %v13362_v30, %v17175_v2 }
 0x2ce   : > { %v3835_v45 = vadd.f32 %v3749_v9, %v3541_v20  ;;  %v4926_v43 = vsel %vm4275_vm3, %v4924_v41, %v4925_v57  ;;  %v923_v18 = vadd.f32 %v17176_v52, %v891_v12  ;;  %v1031_v48 = vmul.f32 %v13577_v17, %v17177_v39  ;;  %v17179_v9 = vld [vmem:[#allocation30_spill] sm:$0xff] }
 0x2cf   : > { %v5220_v3 = vsel %vm4275_vm3, %v5218_v32, %v5219_v59  ;;  %v5514_v26 = vsel %vm4275_vm3, %v5512_v24, %v5513_v58  ;;  %v5808_v27 = vsel %vm4275_vm3, %v5806_v14, %v5807_v6  ;;  %v6100_v55 = vrot.slane %v13543_v0, 2  ;;  %v17181_v32 = vld [vmem:[#allocation38_spill] sm:$0xff]  ;;  %v17182_v24 = vld [vmem:[#allocation96_spill] sm:$0xff]  ;;  %v13606_v0 = vld [vmem:[#allocation2 + $0x2f0] sm:$0xff] }
 0x2d0   : > { %v4129_v37 = vadd.f32 %v4043_v51, %v3835_v45  ;;  %v6101_v22 = vrot.slane %v13548_v8, 2  ;;  %v993_v49 = vadd.f32 %v961_v53, %v923_v18  ;;  %v1101_v29 = vmul.f32 %v17178_v61, %v13235_v46  ;;  %v17180_v51 = vld [vmem:[#allocation68_spill] sm:$0xff]  ;;  %v17185_v53 = vld [vmem:[#allocation99_spill] sm:$0xff] }
 0x2d1   : > { %v6394_v44 = vrot.slane %v13552_v36, 2  ;;  %v6395_v10 = vrot.slane %v13558_v33, 2  ;;  %v6688_v4 = vrot.slane %v13567_v35, 2  ;;  %v6689_v40 = vrot.slane %v13571_v15, 2  ;;  %v17184_v36 = vld [vmem:[#allocation92_spill] sm:$0xff] }
 0x2d2   : > { %v4424_v19 = vadd.f32 %v4338_v42, %v4129_v37  ;;  %v1063_v28 = vadd.f32 %v1031_v48, %v993_v49  ;;  %v1171_v41 = vmul.f32 %v13417_v7, %v17179_v9  ;;  %v1542_v57 = vmul.f32 %v17180_v51, %v13203_v23  ;;  %v17183_v42 = vld [vmem:[#allocation49_spill] sm:$0xff]  ;;  %v13616_v15 = vld [vmem:[#allocation2 + $0x1b8] sm:$0x3] }
 0x2d3   : > { %v1241_v59 = vmul.f32 %v13596_v38, %v17181_v32  ;;  %v1311_v34 = vmul.f32 %v17182_v24, %v13250_v11  ;;  %v1543_v58 = vmul.f32 %v17180_v51, %v13229_v47  ;;  %v1837_v14 = vmul.f32 %v17183_v42, %v13362_v30  ;;  %v575_v24 = vld [vmem:[%s9339_s25 + $0xe8] sm:$0x3] }
 0x2d4   : > { %v4718_v6 = vadd.f32 %v4632_v5, %v4424_v19  ;;  %v1133_v20 = vadd.f32 %v1101_v29, %v1063_v28  ;;  %v1838_v8 = vmul.f32 %v13428_v56, %v17183_v42  ;;  %v2131_v12 = vmul.f32 %v13577_v17, %v17184_v36  ;;  %v13627_v28 = vld [vmem:[%s16298_s2 + $0xd] ss:$0 sm:$0xff]  ;;  %699 = vst.msk [vmem:[#allocation2 + $0x368] sm:$0x3] %vm588_vm1, %v575_v24 }
 0x2d5   : > { %v1381_v33 = vmul.f32 %v13451_v50, %v13457_v13  ;;  %v1451_v35 = vmul.f32 %v13467_v54, %v13606_v0  ;;  %v2132_v5 = vmul.f32 %v13616_v15, %v17184_v36  ;;  %v2425_v45 = vmul.f32 %v17185_v53, %v13235_v46  ;;  %17186 = vst [vmem:[#allocation108_spill] sm:$0xff] %v13627_v28 }
 0x2d6   : > { %v5012_v18 = vadd.f32 %v4926_v43, %v4718_v6  ;;  %v1203_v48 = vadd.f32 %v1171_v41, %v1133_v20  ;;  %v1692_v37 = vrot.slane %v1542_v57, 1  ;;  %v2426_v49 = vmul.f32 %v17185_v53, %v13256_v31 }
 0x2d7   : > { %v1693_v29 = vrot.slane %v1543_v58, 1  ;;  %v1986_v19 = vrot.slane %v1837_v14, 1  ;;  %v2719_v62 = vmul.f32 %v13627_v28, %v13417_v7  ;;  %v2720_v54 = vmul.f32 %v13627_v28, %v13479_v21  ;;  %v13636_v58 = vld [vmem:[%s16298_s2 + $0x10] ss:$0 sm:$0xff] }
 0x2d8   : > { %v5306_v43 = vadd.f32 %v5220_v3, %v5012_v18  ;;  %v1273_v41 = vadd.f32 %v1241_v59, %v1203_v48  ;;  %v1987_v57 = vrot.slane %v1838_v8, 1  ;;  %v2280_v6 = vrot.slane %v2131_v12, 1  ;;  %17187 = vst [vmem:[#allocation109_spill] sm:$0xff] %v13636_v58 }
 0x2d9   : > { %v2281_v20 = vrot.slane %v2132_v5, 1  ;;  %v2574_v50 = vrot.slane %v2425_v45, 1  ;;  %v2575_v53 = vrot.slane %v2426_v49, 1  ;;  %v13640_v14 = vmul.f32 %v13636_v58, %v13596_v38  ;;  %v13647_v5 = vld [vmem:[#allocation2 + $0x258] sm:$0x3] }
 0x2da   : > { %v5600_v36 = vadd.f32 %v5514_v26, %v5306_v43  ;;  %v1343_v42 = vadd.f32 %v1311_v34, %v1273_v41  ;;  %v2868_v28 = vrot.slane %v2719_v62, 1  ;;  %v2869_v3 = vrot.slane %v2720_v54, 1  ;;  %v13666_v34 = vld [vmem:[#allocation2 + $0x2f8] sm:$0x3]  ;;  %v13693_v41 = vld [vmem:[%s16298_s2 + $0x5] ss:$0 sm:$0xff] }
 0x2db   : > { %v6102_v59 = vsel %vm4275_vm3, %v6100_v55, %v6101_v22  ;;  %v6396_v8 = vsel %vm4275_vm3, %v6394_v44, %v6395_v10  ;;  %v6690_v12 = vsel %vm4275_vm3, %v6688_v4, %v6689_v40  ;;  %v3014_v45 = vmul.f32 %v13647_v5, %v13636_v58  ;;  %v13659_v22 = vld [vmem:[%s16298_s2 + $0x13] ss:$0 sm:$0xff] }
 0x2dc   : > { %v5894_v18 = vadd.f32 %v5808_v27, %v5600_v36  ;;  %v1413_v48 = vadd.f32 %v1381_v33, %v1343_v42  ;;  %v1694_v26 = vsel %vm1628_vm2, %v1692_v37, %v1693_v29  ;;  %v1988_v62 = vsel %vm1628_vm2, %v1986_v19, %v1987_v57  ;;  %17188 = vst [vmem:[#allocation110_spill] sm:$0xff] %v13659_v22  ;;  %v13675_v33 = vld [vmem:[%s16298_s2 + $0x19] ss:$0 sm:$0xff]  ;;  %v13684_v29 = vld [vmem:[%s16298_s2 + $0x2] ss:$0 sm:$0xff] }
 0x2dd   : > { %v2282_v54 = vsel %vm1628_vm2, %v2280_v6, %v2281_v20  ;;  %v2576_v24 = vsel %vm1628_vm2, %v2574_v50, %v2575_v53  ;;  %v3162_v55 = vrot.slane %v13640_v14, 1  ;;  %v3307_v44 = vmul.f32 %v13659_v22, %v13250_v11 }
 0x2de   : > { %v6188_v27 = vadd.f32 %v6102_v59, %v5894_v18  ;;  %v1483_v10 = vadd.f32 %v1451_v35, %v1413_v48  ;;  %v2870_v4 = vsel %vm1628_vm2, %v2868_v28, %v2869_v3  ;;  %v3308_v40 = vmul.f32 %v13659_v22, %v13270_v25 }
 0x2df   : > { %v3163_v50 = vrot.slane %v3014_v45, 1  ;;  %v3601_v42 = vmul.f32 %v13492_v1, %v13457_v13  ;;  %v3602_v36 = vmul.f32 %v13492_v1, %v13476_v60  ;;  %v3895_v35 = vmul.f32 %v13675_v33, %v13606_v0 }
 0x2e0   : > { %v6482_v53 = vadd.f32 %v6396_v8, %v6188_v27  ;;  %v1778_v37 = vadd.f32 %v1694_v26, %v1483_v10  ;;  %v3896_v49 = vmul.f32 %v13675_v33, %v13666_v34  ;;  %v4189_v19 = vmul.f32 %v13684_v29, %v13203_v23  ;;  %v13704_v23 = vld [vmem:[%s16298_s2 + $0x8] ss:$0 sm:$0xff] }
 0x2e1   : > { %v3456_v28 = vrot.slane %v3307_v44, 1  ;;  %v4190_v43 = vmul.f32 %v13684_v29, %v13229_v47  ;;  %v4484_v57 = vmul.f32 %v13693_v41, %v13362_v30  ;;  %v4485_v6 = vmul.f32 %v13693_v41, %v13428_v56 }
 0x2e2   : > { %v13699_v20 = vadd.f32 %v6690_v12, %v6482_v53  ;;  %v2072_v14 = vadd.f32 %v1988_v62, %v1778_v37  ;;  %v3457_v3 = vrot.slane %v3308_v40, 1  ;;  %v4778_v47 = vmul.f32 %v13704_v23, %v13577_v17  ;;  %v13715_v40 = vld [vmem:[%s16298_s2 + $0xb] ss:$0 sm:$0xff]  ;;  %v17190_v37 = vld [vmem:[#allocation97_spill] sm:$0xff] }
 0x2e3   : > { %v3750_v59 = vrot.slane %v3601_v42, 1  ;;  %v3751_v8 = vrot.slane %v3602_v36, 1  ;;  %v4044_v45 = vrot.slane %v3895_v35, 1  ;;  %v4779_v18 = vmul.f32 %v13704_v23, %v13616_v15 }
 0x2e4   : > { %17189 = vst [vmem:[#allocation111_spill] sm:$0xff] %v13699_v20  ;;  %v6848_v12 = vsel %vm586_vm0, %v13699_v20, 0.0  ;;  %v2366_v48 = vadd.f32 %v2282_v54, %v2072_v14  ;;  %v4045_v26 = vrot.slane %v3896_v49, 1  ;;  %v4339_v62 = vrot.slane %v4189_v19, 2 }
 0x2e5   : > { %6849 = vadd.xlane.f32.xlu0 %v6848_v12  ;;  %v4340_v44 = vrot.slane %v4190_v43, 2  ;;  %v4633_v27 = vrot.slane %v4484_v57, 2  ;;  %v4634_v10 = vrot.slane %v4485_v6, 2  ;;  %v5072_v42 = vmul.f32 %v13715_v40, %v13235_v46  ;;  %v13727_v57 = vld [vmem:[%s16298_s2 + $0xe] ss:$0 sm:$0xff] }
 0x2e6   : > { %v2660_v36 = vadd.f32 %v2576_v24, %v2366_v48  ;;  %v4927_v35 = vrot.slane %v4778_v47, 2  ;;  %v4928_v53 = vrot.slane %v4779_v18, 2  ;;  %v5073_v54 = vmul.f32 %v13715_v40, %v13256_v31  ;;  %v13750_v12 = vld [vmem:[%s16298_s2 + $0x14] ss:$0 sm:$0xff] }
 0x2e7   : > { %v3164_v19 = vsel %vm1628_vm2, %v3162_v55, %v3163_v50  ;;  %v3458_v43 = vsel %vm1628_vm2, %v3456_v28, %v3457_v3  ;;  %v5366_v46 = vmul.f32 %v13727_v57, %v13417_v7  ;;  %v3752_v6 = vsel %vm1628_vm2, %v3750_v59, %v3751_v8  ;;  %v13740_v3 = vld [vmem:[%s16298_s2 + $0x11] ss:$0 sm:$0xff] }
 0x2e8   : > { %v2954_v24 = vadd.f32 %v2870_v4, %v2660_v36  ;;  %v4046_v14 = vsel %vm1628_vm2, %v4044_v45, %v4045_v26  ;;  %v5367_v31 = vmul.f32 %v13727_v57, %v13479_v21  ;;  %v4341_v55 = vsel %vm4275_vm3, %v4339_v62, %v4340_v44  ;;  %v13759_v62 = vld [vmem:[%s16298_s2 + $0x17] ss:$0 sm:$0xff] }
 0x2e9   : > { %v4635_v50 = vsel %vm4275_vm3, %v4633_v27, %v4634_v10  ;;  %v5221_v28 = vrot.slane %v5072_v42, 2  ;;  %v5660_v4 = vmul.f32 %v13740_v3, %v13596_v38  ;;  %v4929_v59 = vsel %vm4275_vm3, %v4927_v35, %v4928_v53 }
 0x2ea   : > { %v3248_v47 = vadd.f32 %v3164_v19, %v2954_v24  ;;  %v5222_v8 = vrot.slane %v5073_v54, 2  ;;  %v5661_v45 = vmul.f32 %v13740_v3, %v13647_v5  ;;  %v5515_v18 = vrot.slane %v5366_v46, 2  ;;  %v13775_v46 = vld [vmem:[#allocation2 + $0x1c0] sm:$0xff] }
 0x2eb   : > { %v5954_v48 = vmul.f32 %v13750_v12, %v13250_v11  ;;  %v5955_v26 = vmul.f32 %v13750_v12, %v13270_v25  ;;  %v6248_v44 = vmul.f32 %v13759_v62, %v13457_v13  ;;  %v5516_v10 = vrot.slane %v5367_v31, 2 }
 0x2ec   : > { %v3542_v27 = vadd.f32 %v3458_v43, %v3248_v47  ;;  %v6249_v42 = vmul.f32 %v13759_v62, %v13476_v60  ;;  %v892_v36 = vmul.f32 %v13362_v30, %v13332_v16  ;;  %v5809_v11 = vrot.slane %v5660_v4, 2 }
 0x2ed   : > { %v6542_v25 = vmul.f32 %v13563_v63, %v13606_v0  ;;  %v6543_v35 = vmul.f32 %v13563_v63, %v13666_v34  ;;  %v962_v53 = vmul.f32 %v13577_v17, %v17175_v2  ;;  %v5223_v19 = vsel %vm4275_vm3, %v5221_v28, %v5222_v8 }
 0x2ee   : > { %v3836_v54 = vadd.f32 %v3752_v6, %v3542_v27  ;;  %v924_v43 = vadd.f32 %v17176_v52, %v892_v36  ;;  %v1032_v24 = vmul.f32 %v13775_v46, %v17177_v39  ;;  %v5810_v31 = vrot.slane %v5661_v45, 2  ;;  %v17193_v39 = vld [vmem:[#allocation96_spill] sm:$0xff] }
 0x2ef   : > { %v6103_v4 = vrot.slane %v5954_v48, 2  ;;  %v6104_v47 = vrot.slane %v5955_v26, 2  ;;  %v6397_v49 = vrot.slane %v6248_v44, 2  ;;  %v6398_v16 = vrot.slane %v6249_v42, 2  ;;  %v13788_v26 = vld [vmem:[#allocation2 + $0x260] sm:$0xff]  ;;  %v17191_v42 = vld [vmem:[#allocation49_spill] sm:$0xff] }
 0x2f0   : > { %v4130_v20 = vadd.f32 %v4046_v14, %v3836_v54  ;;  %v994_v63 = vadd.f32 %v962_v53, %v924_v43  ;;  %v1102_v2 = vmul.f32 %v13417_v7, %v17178_v61  ;;  %v6691_v6 = vrot.slane %v6542_v25, 2  ;;  %v17192_v53 = vld [vmem:[#allocation92_spill] sm:$0xff] }
 0x2f1   : > { %v6692_v27 = vrot.slane %v6543_v35, 2  ;;  %v1544_v28 = vmul.f32 %v17180_v51, %v13362_v30  ;;  %v1545_v8 = vmul.f32 %v13428_v56, %v17180_v51  ;;  %v5517_v45 = vsel %vm4275_vm3, %v5515_v18, %v5516_v10 }
 0x2f2   : > { %v4425_v36 = vadd.f32 %v4341_v55, %v4130_v20  ;;  %v1064_v48 = vadd.f32 %v1032_v24, %v994_v63  ;;  %v1172_v14 = vmul.f32 %v13596_v38, %v17179_v9  ;;  %v1242_v44 = vmul.f32 %v13788_v26, %v17181_v32  ;;  %v13798_v63 = vld [vmem:[#allocation2 + $0x300] sm:$0xff]  ;;  %v576_v9 = vld [vmem:[%s9339_s25 + $0xf0] sm:$0xff] }
 0x2f3   : > { %v1839_v25 = vmul.f32 %v13577_v17, %v17191_v42  ;;  %v1840_v35 = vmul.f32 %v13616_v15, %v17191_v42  ;;  %v2133_v20 = vmul.f32 %v13775_v46, %v17192_v53  ;;  %v1695_v10 = vrot.slane %v1544_v28, 1  ;;  %700 = vst.msk [vmem:[#allocation2 + $0x370] sm:$0xff] %vm586_vm0, %v576_v9  ;;  %v17196_v28 = vld [vmem:[#allocation99_spill] sm:$0xff] }
 0x2f4   : > { %v4719_v55 = vadd.f32 %v4635_v50, %v4425_v36  ;;  %v1134_v18 = vadd.f32 %v1102_v2, %v1064_v48  ;;  %v1696_v54 = vrot.slane %v1545_v8, 1  ;;  %v5811_v43 = vsel %vm4275_vm3, %v5809_v11, %v5810_v31  ;;  %v17194_v50 = vld [vmem:[#allocation105_spill] sm:$0xff]  ;;  %v17197_v48 = vld [vmem:[#allocation108_spill] sm:$0xff] }
 0x2f5   : > { %v6105_v24 = vsel %vm4275_vm3, %v6103_v4, %v6104_v47  ;;  %v6399_v51 = vsel %vm4275_vm3, %v6397_v49, %v6398_v16  ;;  %v6693_v32 = vsel %vm4275_vm3, %v6691_v6, %v6692_v27  ;;  %v1312_v52 = vmul.f32 %v17193_v39, %v13457_v13  ;;  %v17195_v2 = vld [vmem:[#allocation101_spill] sm:$0xff]  ;;  %v13812_v47 = vld [vmem:[#allocation2 + $0x1c8] sm:$0x3] }
 0x2f6   : > { %v5013_v61 = vadd.f32 %v4929_v59, %v4719_v55  ;;  %v1204_v42 = vadd.f32 %v1172_v14, %v1134_v18  ;;  %v1382_v36 = vmul.f32 %v17194_v50, %v13606_v0  ;;  %v1452_v11 = vmul.f32 %v17195_v2, %v13798_v63 }
 0x2f7   : > { %v1989_v31 = vrot.slane %v1839_v25, 1  ;;  %v1990_v4 = vrot.slane %v1840_v35, 1  ;;  %v2134_v16 = vmul.f32 %v13812_v47, %v17192_v53  ;;  %v1697_v6 = vsel %vm1628_vm2, %v1695_v10, %v1696_v54 }
 0x2f8   : > { %v5307_v49 = vadd.f32 %v5223_v19, %v5013_v61  ;;  %v1274_v59 = vadd.f32 %v1242_v44, %v1204_v42  ;;  %v2283_v27 = vrot.slane %v2133_v20, 1  ;;  %v2427_v8 = vmul.f32 %v17196_v28, %v13417_v7  ;;  %v13827_v19 = vld [vmem:[#allocation2 + $0x268] sm:$0x3] }
 0x2f9   : > { %v2428_v9 = vmul.f32 %v13479_v21, %v17196_v28  ;;  %v2721_v14 = vmul.f32 %v17197_v48, %v13596_v38  ;;  %v2722_v25 = vmul.f32 %v13647_v5, %v17197_v48  ;;  %v3015_v61 = vmul.f32 %v13788_v26, %v13636_v58 }
 0x2fa   : > { %v5601_v35 = vadd.f32 %v5517_v45, %v5307_v49  ;;  %v1344_v55 = vadd.f32 %v1312_v52, %v1274_v59  ;;  %v3016_v44 = vmul.f32 %v13827_v19, %v13636_v58  ;;  %v1991_v42 = vsel %vm1628_vm2, %v1989_v31, %v1990_v4  ;;  %v13836_v45 = vld [vmem:[#allocation2 + $0x308] sm:$0x3] }
 0x2fb   : > { %v2284_v53 = vrot.slane %v2134_v16, 1  ;;  %v3309_v20 = vmul.f32 %v13659_v22, %v13457_v13  ;;  %v3310_v18 = vmul.f32 %v13659_v22, %v13476_v60  ;;  %v3603_v54 = vmul.f32 %v13492_v1, %v13606_v0 }
 0x2fc   : > { %v5895_v10 = vadd.f32 %v5811_v43, %v5601_v35  ;;  %v1414_v52 = vadd.f32 %v1382_v36, %v1344_v55  ;;  %v3604_v49 = vmul.f32 %v13492_v1, %v13666_v34  ;;  %v2577_v59 = vrot.slane %v2427_v8, 1 }
 0x2fd   : > { %v2578_v2 = vrot.slane %v2428_v9, 1  ;;  %v2871_v31 = vrot.slane %v2721_v14, 1  ;;  %v2872_v4 = vrot.slane %v2722_v25, 1  ;;  %v3165_v50 = vrot.slane %v3015_v61, 1  ;;  %v17199_v9 = vld [vmem:[#allocation95_spill] sm:$0xff] }
 0x2fe   : > { %v6189_v16 = vadd.f32 %v6105_v24, %v5895_v10  ;;  %v1484_v58 = vadd.f32 %v1452_v11, %v1414_v52  ;;  %v3166_v39 = vrot.slane %v3016_v44, 1  ;;  %v3459_v48 = vrot.slane %v3309_v20, 1 }
 0x2ff   : > { %v3460_v22 = vrot.slane %v3310_v18, 1  ;;  %v3897_v43 = vmul.f32 %v13675_v33, %v13798_v63  ;;  %v3898_v36 = vmul.f32 %v13675_v33, %v13836_v45  ;;  %v3753_v28 = vrot.slane %v3603_v54, 1 }
 0x300   : > { %v6483_v35 = vadd.f32 %v6399_v51, %v6189_v16  ;;  %v1779_v55 = vadd.f32 %v1697_v6, %v1484_v58  ;;  %v3754_v1 = vrot.slane %v3604_v49, 1  ;;  %v17198_v8 = vrot.slane %v17190_v37, 1 }
 0x301   : > { %v17200_v14 = vrot.slane %v17199_v9, 1  ;;  %v2285_v11 = vsel %vm1628_vm2, %v2283_v27, %v2284_v53  ;;  %v4191_v25 = vmul.f32 %v13684_v29, %v13362_v30  ;;  %v4192_v61 = vmul.f32 %v13684_v29, %v13428_v56 }
 0x302   : > { %v13858_v51 = vadd.f32 %v6693_v32, %v6483_v35  ;;  %v2073_v58 = vadd.f32 %v1991_v42, %v1779_v55  ;;  %v2579_v6 = vsel %vm1628_vm2, %v2577_v59, %v2578_v2  ;;  %v2873_v37 = vsel %vm1628_vm2, %v2871_v31, %v2872_v4  ;;  %v577_v32 = vld [vmem:[%s9339_s25 + $0xf8] sm:$0x3] }
 0x303   : > { %v13851_v24 = vsel %vm1628_vm2, %v17200_v14, %v17198_v8  ;;  %v3167_v44 = vsel %vm1628_vm2, %v3165_v50, %v3166_v39  ;;  %v3461_v20 = vsel %vm1628_vm2, %v3459_v48, %v3460_v22  ;;  %v4047_v18 = vrot.slane %v3897_v43, 1  ;;  %701 = vst.msk [vmem:[#allocation2 + $0x378] sm:$0x3] %vm588_vm1, %v577_v32 }
 0x304   : > { %17201 = vst [vmem:[#allocation97_spill] sm:$0xff] %v13858_v51  ;;  %v4048_v10 = vrot.slane %v3898_v36, 1  ;;  %v6851_v27 = vsel %vm586_vm0, %v13858_v51, 0.0  ;;  %v2367_v30 = vadd.f32 %v2285_v11, %v2073_v58  ;;  %v3755_v53 = vsel %vm1628_vm2, %v3753_v28, %v3754_v1 }
 0x305   : > { %v4486_v56 = vmul.f32 %v13693_v41, %v13577_v17  ;;  %6852 = vadd.xlane.f32.xlu1 %v6851_v27  ;;  %v4342_v2 = vrot.slane %v4191_v25, 2  ;;  %v4343_v42 = vrot.slane %v4192_v61, 2  ;;  %v4487_v39 = vmul.f32 %v13693_v41, %v13616_v15 }
 0x306   : > { %v4780_v22 = vmul.f32 %v13775_v46, %v13704_v23  ;;  %v2661_v50 = vadd.f32 %v2579_v6, %v2367_v30  ;;  %v4781_v48 = vmul.f32 %v13812_v47, %v13704_v23  ;;  %v5074_v1 = vmul.f32 %v13715_v40, %v13417_v7 }
 0x307   : > { %v5075_v28 = vmul.f32 %v13715_v40, %v13479_v21  ;;  %v5368_v52 = vmul.f32 %v13727_v57, %v13596_v38  ;;  %v5369_v54 = vmul.f32 %v13727_v57, %v13647_v5  ;;  %v5662_v49 = vmul.f32 %v13788_v26, %v13740_v3 }
 0x308   : > { %v5663_v59 = vmul.f32 %v13827_v19, %v13740_v3  ;;  %v2955_v31 = vadd.f32 %v2873_v37, %v2661_v50  ;;  %v4049_v4 = vsel %vm1628_vm2, %v4047_v18, %v4048_v10  ;;  %v4636_v16 = vrot.slane %v4486_v56, 2  ;;  %v17202_v18 = vld [vmem:[#allocation69_spill] sm:$0xff]  ;;  %v17204_v56 = vld [vmem:[#allocation82_spill] sm:$0xff]  ;;  %v17206_v50 = vld [vmem:[#allocation84_spill] sm:$0xff] }
 0x309   : > { %v5956_v7 = vmul.f32 %v13750_v12, %v13457_v13  ;;  %v4344_v21 = vsel %vm4275_vm3, %v4342_v2, %v4343_v42  ;;  %v4637_v43 = vrot.slane %v4487_v39, 2  ;;  %v4930_v36 = vrot.slane %v4780_v22, 2  ;;  %v17205_v42 = vld [vmem:[#allocation72_spill] sm:$0xff]  ;;  %v13907_v22 = vld [vmem:[#allocation2 + $0x1d0] sm:$0xff] }
 0x30a   : > { %v5957_v35 = vmul.f32 %v13750_v12, %v13476_v60  ;;  %v3249_v55 = vadd.f32 %v3167_v44, %v2955_v31  ;;  %v4931_v8 = vrot.slane %v4781_v48, 2  ;;  %v5224_v9 = vrot.slane %v5074_v1, 2  ;;  %v17203_v44 = vld [vmem:[#allocation107_spill] sm:$0xff]  ;;  %v17207_v31 = vld [vmem:[#allocation18_spill] sm:$0xff] }
 0x30b   : > { %v5225_v14 = vrot.slane %v5075_v28, 2  ;;  %v5518_v11 = vrot.slane %v5368_v52, 2  ;;  %v5519_v25 = vrot.slane %v5369_v54, 2  ;;  %v5812_v61 = vrot.slane %v5662_v49, 2 }
 0x30c   : > { %v5813_v58 = vrot.slane %v5663_v59, 2  ;;  %v3543_v6 = vadd.f32 %v3461_v20, %v3249_v55  ;;  %v6106_v37 = vrot.slane %v5956_v7, 2  ;;  %v6250_v13 = vmul.f32 %v13759_v62, %v13606_v0 }
 0x30d   : > { %v893_v10 = vmul.f32 %v13577_v17, %v17202_v18  ;;  %v6107_v27 = vrot.slane %v5957_v35, 2  ;;  %v6251_v60 = vmul.f32 %v13759_v62, %v13666_v34  ;;  %v6544_v30 = vmul.f32 %v17203_v44, %v13798_v63 }
 0x30e   : > { %v963_v32 = vmul.f32 %v13775_v46, %v17204_v56  ;;  %v3837_v2 = vadd.f32 %v3755_v53, %v3543_v6  ;;  %v4638_v20 = vsel %vm4275_vm3, %v4636_v16, %v4637_v43  ;;  %v1033_v48 = vmul.f32 %v13907_v22, %v17206_v50 }
 0x30f   : > { %v925_v39 = vadd.f32 %v17205_v42, %v893_v10  ;;  %v4932_v1 = vsel %vm4275_vm3, %v4930_v36, %v4931_v8  ;;  %v5226_v28 = vsel %vm4275_vm3, %v5224_v9, %v5225_v14  ;;  %v5520_v52 = vsel %vm4275_vm3, %v5518_v11, %v5519_v25  ;;  %v578_v36 = vld [vmem:[%s9339_s25 + $0x100] sm:$0xff]  ;;  %v17208_v14 = vld [vmem:[#allocation30_spill] sm:$0xff]  ;;  %v13923_v25 = vld [vmem:[#allocation2 + $0x270] sm:$0xff] }
 0x310   : > { %v5814_v54 = vsel %vm4275_vm3, %v5812_v61, %v5813_v58  ;;  %v4131_v49 = vadd.f32 %v4049_v4, %v3837_v2  ;;  %v6400_v53 = vrot.slane %v6250_v13, 2  ;;  %v1103_v16 = vmul.f32 %v13596_v38, %v17207_v31  ;;  %v17209_v4 = vld [vmem:[#allocation38_spill] sm:$0xff]  ;;  %702 = vst.msk [vmem:[#allocation2 + $0x380] sm:$0xff] %vm586_vm0, %v578_v36  ;;  %v17210_v58 = vld [vmem:[#allocation68_spill] sm:$0xff]  ;;  %v17211_v13 = vld [vmem:[#allocation49_spill] sm:$0xff] }
 0x311   : > { %v995_v59 = vadd.f32 %v963_v32, %v925_v39  ;;  %v6108_v7 = vsel %vm4275_vm3, %v6106_v37, %v6107_v27  ;;  %v6401_v43 = vrot.slane %v6251_v60, 2  ;;  %v6545_v35 = vmul.f32 %v17203_v44, %v13836_v45  ;;  %v17212_v60 = vld [vmem:[#allocation99_spill] sm:$0xff]  ;;  %v17213_v42 = vld [vmem:[#allocation108_spill] sm:$0xff]  ;;  %v17215_v31 = vld [vmem:[#allocation105_spill] sm:$0xff] }
 0x312   : > { %v6694_v55 = vrot.slane %v6544_v30, 2  ;;  %v4426_v8 = vadd.f32 %v4344_v21, %v4131_v49  ;;  %v1173_v11 = vmul.f32 %v13788_v26, %v17208_v14  ;;  %v1243_v61 = vmul.f32 %v13923_v25, %v17209_v4  ;;  %v13949_v36 = vld [vmem:[#allocation2 + $0x310] sm:$0xff] }
 0x313   : > { %v1065_v9 = vadd.f32 %v1033_v48, %v995_v59  ;;  %v1546_v6 = vmul.f32 %v13577_v17, %v17210_v58  ;;  %v1547_v37 = vmul.f32 %v13616_v15, %v17210_v58  ;;  %v1841_v21 = vmul.f32 %v13775_v46, %v17211_v13  ;;  %17216 = vst [vmem:[#allocation92_spill] sm:$0xff] %v13949_v36 }
 0x314   : > { %v1842_v18 = vmul.f32 %v13812_v47, %v17211_v13  ;;  %v4720_v10 = vadd.f32 %v4638_v20, %v4426_v8  ;;  %v2429_v30 = vmul.f32 %v13596_v38, %v17212_v60  ;;  %v2430_v56 = vmul.f32 %v13647_v5, %v17212_v60  ;;  %v17214_v20 = vld [vmem:[#allocation96_spill] sm:$0xff] }
 0x315   : > { %v1135_v27 = vadd.f32 %v1103_v16, %v1065_v9  ;;  %v6402_v32 = vsel %vm4275_vm3, %v6400_v53, %v6401_v43  ;;  %v6695_v2 = vrot.slane %v6545_v35, 2  ;;  %v2723_v39 = vmul.f32 %v13788_v26, %v17213_v42 }
 0x316   : > { %v2724_v50 = vmul.f32 %v13827_v19, %v17213_v42  ;;  %v5014_v48 = vadd.f32 %v4932_v1, %v4720_v10  ;;  %v1313_v59 = vmul.f32 %v17214_v20, %v13606_v0  ;;  %v1383_v16 = vmul.f32 %v17215_v31, %v13798_v63  ;;  %v17217_v10 = vld [vmem:[#allocation109_spill] sm:$0xff]  ;;  %v13954_v20 = vld [vmem:[#allocation2 + $0x318] sm:$0x3] }
 0x317   : > { %v1205_v49 = vadd.f32 %v1173_v11, %v1135_v27  ;;  %v1698_v8 = vrot.slane %v1546_v6, 1  ;;  %v1699_v9 = vrot.slane %v1547_v37, 1  ;;  %v1992_v53 = vrot.slane %v1841_v21, 1  ;;  %v17218_v6 = vld [vmem:[#allocation101_spill] sm:$0xff]  ;;  %v17219_v21 = vld [vmem:[#allocation110_spill] sm:$0xff] }
 0x318   : > { %v1993_v43 = vrot.slane %v1842_v18, 1  ;;  %v5308_v35 = vadd.f32 %v5226_v28, %v5014_v48  ;;  %v2580_v4 = vrot.slane %v2429_v30, 1  ;;  %v2581_v58 = vrot.slane %v2430_v56, 1  ;;  %v17220_v30 = vld [vmem:[#allocation102_spill] sm:$0xff] }
 0x319   : > { %v1275_v14 = vadd.f32 %v1243_v61, %v1205_v49  ;;  %v6696_v13 = vsel %vm4275_vm3, %v6694_v55, %v6695_v2  ;;  %v2874_v1 = vrot.slane %v2723_v39, 1  ;;  %v2875_v11 = vrot.slane %v2724_v50, 1 }
 0x31a   : > { %v3017_v27 = vmul.f32 %v13923_v25, %v17217_v10  ;;  %v5602_v60 = vadd.f32 %v5520_v52, %v5308_v35  ;;  %v1453_v37 = vmul.f32 %v17218_v6, %v13949_v36  ;;  %v3311_v28 = vmul.f32 %v17219_v21, %v13606_v0  ;;  %v9055_v6 = vld [vmem:[#allocation2 + $0x1d8] sm:$0x3] }
 0x31b   : > { %v1345_v31 = vadd.f32 %v1313_v59, %v1275_v14  ;;  %v1700_v61 = vsel %vm1628_vm2, %v1698_v8, %v1699_v9  ;;  %v1994_v18 = vsel %vm1628_vm2, %v1992_v53, %v1993_v43  ;;  %v3312_v55 = vmul.f32 %v17219_v21, %v13666_v34 }
 0x31c   : > { %v3605_v56 = vmul.f32 %v17220_v30, %v13798_v63  ;;  %v5896_v52 = vadd.f32 %v5814_v54, %v5602_v60  ;;  %v2582_v39 = vsel %vm1628_vm2, %v2580_v4, %v2581_v58  ;;  %v3606_v50 = vmul.f32 %v17220_v30, %v13836_v45 }
 0x31d   : > { %v1415_v2 = vadd.f32 %v1383_v16, %v1345_v31  ;;  %v2876_v48 = vsel %vm1628_vm2, %v2874_v1, %v2875_v11  ;;  %v3168_v49 = vrot.slane %v3017_v27, 1  ;;  %v3899_v59 = vmul.f32 %v13675_v33, %v13949_v36 }
 0x31e   : > { %v3900_v8 = vmul.f32 %v13675_v33, %v13954_v20  ;;  %v6190_v9 = vadd.f32 %v6108_v7, %v5896_v52  ;;  %v3462_v43 = vrot.slane %v3311_v28, 1  ;;  %v4193_v54 = vmul.f32 %v13684_v29, %v13577_v17  ;;  %v579_v7 = vld [vmem:[%s9339_s25 + $0x108] sm:$0x3] }
 0x31f   : > { %v1485_v53 = vadd.f32 %v1453_v37, %v1415_v2  ;;  %v3463_v16 = vrot.slane %v3312_v55, 1  ;;  %v3756_v35 = vrot.slane %v3605_v56, 1  ;;  %v4194_v14 = vmul.f32 %v13684_v29, %v13616_v15  ;;  %703 = vst.msk [vmem:[#allocation2 + $0x388] sm:$0x3] %vm588_vm1, %v579_v7  ;;  %v17222_v56 = vld [vmem:[#allocation36_spill] sm:$0xff] }
 0x320   : > { %v4488_v4 = vmul.f32 %v13775_v46, %v13693_v41  ;;  %v6484_v58 = vadd.f32 %v6402_v32, %v6190_v9  ;;  %v3757_v11 = vrot.slane %v3606_v50, 1  ;;  %v4489_v27 = vmul.f32 %v13812_v47, %v13693_v41  ;;  %v17223_v9 = vld [vmem:[#allocation34_spill] sm:$0xff] }
 0x321   : > { %v1780_v1 = vadd.f32 %v1700_v61, %v1485_v53  ;;  %v4050_v60 = vrot.slane %v3899_v59, 1  ;;  %v4051_v31 = vrot.slane %v3900_v8, 1  ;;  %v4782_v17 = vmul.f32 %v13907_v22, %v13704_v23 }
 0x322   : > { %v4783_v37 = vmul.f32 %v9055_v6, %v13704_v23  ;;  %v13987_v15 = vadd.f32 %v6696_v13, %v6484_v58  ;;  %v4345_v32 = vrot.slane %v4193_v54, 2  ;;  %v5076_v28 = vmul.f32 %v13715_v40, %v13596_v38 }
 0x323   : > { %v2074_v46 = vadd.f32 %v1994_v18, %v1780_v1  ;;  %v4346_v61 = vrot.slane %v4194_v14, 2  ;;  %v4639_v47 = vrot.slane %v4488_v4, 2  ;;  %v4640_v55 = vrot.slane %v4489_v27, 2  ;;  %v14005_v14 = vld [vmem:[#allocation2 + $0x278] sm:$0x3] }
 0x324   : > { %17221 = vst [vmem:[#allocation95_spill] sm:$0xff] %v13987_v15  ;;  %v5077_v30 = vmul.f32 %v13715_v40, %v13647_v5  ;;  %v6854_v22 = vsel %vm586_vm0, %v13987_v15, 0.0  ;;  %v4933_v2 = vrot.slane %v4782_v17, 2  ;;  %v4934_v50 = vrot.slane %v4783_v37, 2  ;;  %17225 = vst [vmem:[#allocation69_spill] sm:$0xff] %v14005_v14  ;;  %v14036_v37 = vld [vmem:[#allocation2 + $0x1e0] sm:$0xff] }
 0x325   : > { %v2368_v52 = vadd.f32 %v17222_v56, %v2074_v46  ;;  %6855 = vadd.xlane.f32.xlu0 %v6854_v22  ;;  %v5227_v13 = vrot.slane %v5076_v28, 2  ;;  %v5370_v59 = vmul.f32 %v13788_v26, %v13727_v57  ;;  %v5371_v38 = vmul.f32 %v13827_v19, %v13727_v57  ;;  %v14061_v22 = vld [vmem:[%s16298_s2 + $0x3] ss:$0 sm:$0xff] }
 0x326   : > { %v5228_v18 = vrot.slane %v5077_v30, 2  ;;  %v17224_v53 = vrot.slane %v17223_v9, 1  ;;  %v5664_v54 = vmul.f32 %v13923_v25, %v13740_v3  ;;  %v5665_v4 = vmul.f32 %v14005_v14, %v13740_v3  ;;  %17228 = vst [vmem:[#allocation72_spill] sm:$0xff] %v14061_v22 }
 0x327   : > { %v2662_v8 = vadd.f32 %v2582_v39, %v2368_v52  ;;  %v3464_v58 = vsel %vm1628_vm2, %v3462_v43, %v3463_v16  ;;  %v5521_v1 = vrot.slane %v5370_v59, 2  ;;  %v5522_v26 = vrot.slane %v5371_v38, 2  ;;  %v14065_v52 = vld [vmem:[#allocation2 + $0x200] sm:$0xff] }
 0x328   : > { %v3170_v5 = vsel %vm1628_vm2, %v3168_v49, %v17224_v53  ;;  %v5958_v19 = vmul.f32 %v13750_v12, %v13606_v0  ;;  %v3758_v27 = vsel %vm1628_vm2, %v3756_v35, %v3757_v11  ;;  %v4052_v49 = vsel %vm1628_vm2, %v4050_v60, %v4051_v31  ;;  %v14034_v31 = vld [vmem:[%s16298_s2] ss:$0 sm:$0xff]  ;;  %v14084_v53 = vld [vmem:[%s16298_s2 + $0x9] ss:$0 sm:$0xff] }
 0x329   : > { %v2956_v39 = vadd.f32 %v2876_v48, %v2662_v8  ;;  %v5959_v25 = vmul.f32 %v13750_v12, %v13666_v34  ;;  %v4347_v7 = vsel %vm4275_vm3, %v4345_v32, %v4346_v61  ;;  %v4641_v17 = vsel %vm4275_vm3, %v4639_v47, %v4640_v55  ;;  %17226 = vst [vmem:[#allocation107_spill] sm:$0xff] %v14034_v31  ;;  %v14044_v61 = vld [vmem:[#allocation2 + $0x1f0] sm:$0xff]  ;;  %v14055_v55 = vld [vmem:[%s16299_s3] ss:$0 sm:$0xff] }
 0x32a   : > { %v14019_v6 = vsel %vm4275_vm3, %v4933_v2, %v4934_v50  ;;  %v14022_v43 = vsel %vm4275_vm3, %v5227_v13, %v5228_v18  ;;  %v5815_v0 = vrot.slane %v5664_v54, 2  ;;  %v5816_v48 = vrot.slane %v5665_v4, 2  ;;  %17227 = vst [vmem:[#allocation82_spill] sm:$0xff] %v14055_v55  ;;  %v14073_v13 = vld [vmem:[%s16298_s2 + $0x6] ss:$0 sm:$0xff]  ;;  %v14077_v8 = vld [vmem:[#allocation2 + $0x210] sm:$0xff] }
 0x32b   : > { %v3250_v16 = vadd.f32 %v3170_v5, %v2956_v39  ;;  %v6252_v35 = vmul.f32 %v13759_v62, %v13798_v63  ;;  %v14027_v11 = vsel %vm4275_vm3, %v5521_v1, %v5522_v26  ;;  %v6109_v34 = vrot.slane %v5958_v19, 2  ;;  %17229 = vst [vmem:[#allocation84_spill] sm:$0xff] %v14073_v13  ;;  %17230 = vst [vmem:[#allocation18_spill] sm:$0xff] %v14084_v53  ;;  %v14086_v5 = vld [vmem:[#allocation2 + $0x280] sm:$0xff]  ;;  %v14093_v26 = vld [vmem:[#allocation2 + $0x290] sm:$0xff] }
 0x32c   : > { %v6253_v60 = vmul.f32 %v13759_v62, %v13836_v45  ;;  %v894_v46 = vmul.f32 %v14036_v37, %v14034_v31  ;;  %v6110_v28 = vrot.slane %v5959_v25, 2  ;;  %v14042_v63 = vmul.f32 %v17203_v44, %v13949_v36  ;;  %v14101_v25 = vld [vmem:[#allocation2 + $0x320] sm:$0xff] }
 0x32d   : > { %v3544_v32 = vadd.f32 %v3464_v58, %v3250_v16  ;;  %v895_v45 = vmul.f32 %v14044_v61, %v14034_v31  ;;  %v14050_v47 = vmul.f32 %v17203_v44, %v13954_v20  ;;  %v964_v56 = vmul.f32 %v14061_v22, %v14044_v61 }
 0x32e   : > { %v926_v30 = vadd.f32 %v14055_v55, %v894_v46  ;;  %v965_v44 = vmul.f32 %v14065_v52, %v14061_v22  ;;  %v6403_v2 = vrot.slane %v6252_v35, 2  ;;  %v1034_v18 = vmul.f32 %v14073_v13, %v14065_v52  ;;  %v14113_v46 = vld [vmem:[#allocation2 + $0x2a0] sm:$0xff] }
 0x32f   : > { %v3838_v20 = vadd.f32 %v3758_v27, %v3544_v32  ;;  %v927_v50 = vadd.f32 %v14055_v55, %v895_v45  ;;  %v6404_v59 = vrot.slane %v6253_v60, 2  ;;  %v1035_v9 = vmul.f32 %v14077_v8, %v14073_v13  ;;  %v14111_v60 = vld [vmem:[#allocation2 + $0x330] sm:$0xff]  ;;  %v14173_v27 = vld [vmem:[%s16298_s2 + $0x7] ss:$0 sm:$0xff]  ;;  %v14203_v55 = vld [vmem:[#allocation2 + $0x2a8] sm:$0x3] }
 0x330   : > { %v996_v38 = vadd.f32 %v964_v56, %v926_v30  ;;  %v1104_v54 = vmul.f32 %v14086_v5, %v14084_v53  ;;  %v14091_v58 = vsel %vm4275_vm3, %v5815_v0, %v5816_v48  ;;  %v1105_v19 = vmul.f32 %v14093_v26, %v14084_v53  ;;  %v14123_v30 = vld [vmem:[%s16298_s2 + $0xf] ss:$0 sm:$0xff]  ;;  %v14127_v56 = vld [vmem:[#allocation2 + $0x2b0] sm:$0xff]  ;;  %17238 = vst [vmem:[#allocation105_spill] sm:$0xff] %v14173_v27 }
 0x331   : > { %v4132_v4 = vadd.f32 %v4052_v49, %v3838_v20  ;;  %v997_v1 = vadd.f32 %v965_v44, %v927_v50  ;;  %v14098_v39 = vsel %vm4275_vm3, %v6109_v34, %v6110_v28  ;;  %v14106_v49 = vld [vmem:[%s16298_s2 + $0xc] ss:$0 sm:$0xff]  ;;  %v14118_v28 = vsel %vm4275_vm3, %v6403_v2, %v6404_v59  ;;  %17232 = vst [vmem:[#allocation38_spill] sm:$0xff] %v14123_v30  ;;  %v580_v20 = vld [vmem:[%s9339_s25 + $0x110] sm:$0xff] }
 0x332   : > { %v1066_v16 = vadd.f32 %v1034_v18, %v996_v38  ;;  %17231 = vst [vmem:[#allocation30_spill] sm:$0xff] %v14106_v49  ;;  %v1174_v0 = vmul.f32 %v14106_v49, %v14093_v26  ;;  %v1175_v32 = vmul.f32 %v14113_v46, %v14106_v49  ;;  %17233 = vst [vmem:[#allocation68_spill] sm:$0xff] %v14127_v56  ;;  %v14135_v2 = vld [vmem:[%s16298_s2 + $0x12] ss:$0 sm:$0xff]  ;;  %v14142_v38 = vld [vmem:[%s16298_s2 + $0x1] ss:$0 sm:$0xff] }
 0x333   : > { %v4427_v48 = vadd.f32 %v4347_v7, %v4132_v4  ;;  %v1067_v34 = vadd.f32 %v1035_v9, %v997_v1  ;;  %v1244_v7 = vmul.f32 %v14123_v30, %v14113_v46  ;;  %v1245_v44 = vmul.f32 %v14127_v56, %v14123_v30  ;;  %17234 = vst [vmem:[#allocation49_spill] sm:$0xff] %v14135_v2  ;;  %v14152_v4 = vld [vmem:[%s16298_s2 + $0x15] ss:$0 sm:$0xff] }
 0x334   : > { %v1136_v45 = vadd.f32 %v1104_v54, %v1066_v16  ;;  %v1314_v59 = vmul.f32 %v14135_v2, %v14101_v25  ;;  %17235 = vst [vmem:[#allocation99_spill] sm:$0xff] %v14142_v38  ;;  %v1548_v9 = vmul.f32 %v14142_v38, %v14036_v37  ;;  %704 = vst.msk [vmem:[#allocation2 + $0x390] sm:$0xff] %vm586_vm0, %v580_v20 }
 0x335   : > { %v4721_v50 = vadd.f32 %v4641_v17, %v4427_v48  ;;  %v1137_v18 = vadd.f32 %v1105_v19, %v1067_v34  ;;  %v1315_v54 = vmul.f32 %v14135_v2, %v14111_v60  ;;  %17236 = vst [vmem:[#allocation108_spill] sm:$0xff] %v14152_v4  ;;  %v1384_v1 = vmul.f32 %v14152_v4, %v14111_v60  ;;  %v14159_v19 = vld [vmem:[%s16298_s2 + $0x4] ss:$0 sm:$0xff] }
 0x336   : > { %v1206_v17 = vadd.f32 %v1174_v0, %v1136_v45  ;;  %17237 = vst [vmem:[#allocation96_spill] sm:$0xff] %v14159_v19  ;;  %v1843_v16 = vmul.f32 %v14159_v19, %v14044_v61  ;;  %v14164_v48 = vld [vmem:[#allocation2 + $0x340] sm:$0xff]  ;;  %v14166_v45 = vld [vmem:[#allocation2 + $0x1f8] sm:$0x3]  ;;  %v2137_v35 = vmul.f32 %v14173_v27, %v14065_v52  ;;  %v1701_v14 = vrot.slane %v1548_v9, 1 }
 0x337   : > { %v5015_v0 = vadd.f32 %v14019_v6, %v4721_v50  ;;  %v1207_v34 = vadd.f32 %v1175_v32, %v1137_v18  ;;  %v1844_v20 = vmul.f32 %v14166_v45, %v14159_v19  ;;  %v1385_v6 = vmul.f32 %v14152_v4, %v14164_v48  ;;  %v17239_v50 = vld [vmem:[#allocation74_spill] sm:$0xff]  ;;  %v14180_v32 = vld [vmem:[#allocation2 + $0x208] sm:$0x3] }
 0x338   : > { %v1276_v51 = vadd.f32 %v1244_v7, %v1206_v17  ;;  %v1702_v15 = vrot.slane %v17239_v50, 1  ;;  %v2138_v18 = vmul.f32 %v14180_v32, %v14173_v27  ;;  %v2725_v30 = vmul.f32 %v14093_v26, %v17213_v42  ;;  %v14190_v7 = vld [vmem:[%s16298_s2 + $0x18] ss:$0 sm:$0xff] }
 0x339   : > { %v5309_v2 = vadd.f32 %v14022_v43, %v5015_v0  ;;  %v1277_v36 = vadd.f32 %v1245_v44, %v1207_v34  ;;  %17240 = vst [vmem:[#allocation109_spill] sm:$0xff] %v14190_v7  ;;  %v1454_v17 = vmul.f32 %v14190_v7, %v14164_v48  ;;  %v14194_v50 = vld [vmem:[#allocation2 + $0x298] sm:$0x3]  ;;  %v3019_v43 = vmul.f32 %v14113_v46, %v17217_v10  ;;  %v14201_v0 = vld [vmem:[#allocation2 + $0x328] sm:$0x3] }
 0x33a   : > { %v1346_v49 = vadd.f32 %v1314_v59, %v1276_v51  ;;  %v2726_v4 = vmul.f32 %v14194_v50, %v17213_v42  ;;  %v1995_v9 = vrot.slane %v1843_v16, 1  ;;  %v1996_v51 = vrot.slane %v1844_v20, 1 }
 0x33b   : > { %v5603_v44 = vadd.f32 %v14027_v11, %v5309_v2  ;;  %v2289_v59 = vrot.slane %v2137_v35, 1  ;;  %v1347_v34 = vadd.f32 %v1315_v54, %v1277_v36  ;;  %v2290_v13 = vrot.slane %v2138_v18, 1 }
 0x33c   : > { %v1416_v53 = vadd.f32 %v1384_v1, %v1346_v49  ;;  %v3020_v22 = vmul.f32 %v14203_v55, %v17217_v10  ;;  %v1703_v31 = vsel %vm1628_vm2, %v1701_v14, %v1702_v15  ;;  %v2877_v56 = vrot.slane %v2725_v30, 1  ;;  %v14212_v49 = vld [vmem:[#allocation2 + $0x338] sm:$0x3]  ;;  %v14230_v1 = vld [vmem:[#allocation2 + $0x348] sm:$0x3] }
 0x33d   : > { %v5897_v42 = vadd.f32 %v14091_v58, %v5603_v44  ;;  %v2878_v27 = vrot.slane %v2726_v4, 1  ;;  %v3171_v2 = vrot.slane %v3019_v43, 1  ;;  %v3313_v35 = vmul.f32 %v17219_v21, %v14101_v25  ;;  %v581_v43 = vld [vmem:[%s9339_s25 + $0x118] sm:$0x3] }
 0x33e   : > { %v1486_v11 = vadd.f32 %v1454_v17, %v1416_v53  ;;  %v3172_v16 = vrot.slane %v3020_v22, 1  ;;  %v1997_v54 = vsel %vm1628_vm2, %v1995_v9, %v1996_v51  ;;  %v3314_v10 = vmul.f32 %v17219_v21, %v14201_v0  ;;  %705 = vst.msk [vmem:[#allocation2 + $0x398] sm:$0x3] %vm588_vm1, %v581_v43 }
 0x33f   : > { %v6191_v36 = vadd.f32 %v14098_v39, %v5897_v42  ;;  %v14219_v15 = vmul.f32 %v17219_v21, %v14111_v60  ;;  %v17241_v14 = vrot.slane %v14050_v47, 2  ;;  %v17242_v22 = vrot.slane %v14042_v63, 2  ;;  %v14240_v63 = vld [vmem:[%s16298_s2 + $0x16] ss:$0 sm:$0xff] }
 0x340   : > { %v14226_v58 = vadd.f32 %v1385_v6, %v1347_v34  ;;  %v1781_v39 = vadd.f32 %v1703_v31, %v1486_v11  ;;  %v2291_v30 = vsel %vm1628_vm2, %v2289_v59, %v2290_v13  ;;  %v2879_v20 = vsel %vm1628_vm2, %v2877_v56, %v2878_v27 }
 0x341   : > { %v6699_v53 = vsel %vm4275_vm3, %v17242_v22, %v17241_v14  ;;  %v6485_v4 = vadd.f32 %v14118_v28, %v6191_v36  ;;  %v14235_v18 = vmul.f32 %v17219_v21, %v14212_v49  ;;  %v3607_v31 = vmul.f32 %v14240_v63, %v14111_v60 }
 0x342   : > { %v2075_v47 = vadd.f32 %v1997_v54, %v1781_v39  ;;  %v3173_v13 = vsel %vm1628_vm2, %v3171_v2, %v3172_v16  ;;  %v3465_v28 = vrot.slane %v3313_v35, 1  ;;  %v3608_v6 = vmul.f32 %v14240_v63, %v14212_v49  ;;  %v9083_v2 = vld [vmem:[#allocation2 + $0x1e8] sm:$0x3] }
 0x343   : > { %v14247_v27 = vadd.f32 %v6699_v53, %v6485_v4  ;;  %v3466_v56 = vrot.slane %v3314_v10, 1  ;;  %v3468_v21 = vrot.slane %v14219_v15, 1  ;;  %v3901_v17 = vmul.f32 %v13675_v33, %v14164_v48 }
 0x344   : > { %v2369_v44 = vadd.f32 %v2291_v30, %v2075_v47  ;;  %v3759_v9 = vrot.slane %v3607_v31, 1  ;;  %v3760_v51 = vrot.slane %v3608_v6, 1  ;;  %v3902_v59 = vmul.f32 %v13675_v33, %v14230_v1 }
 0x345   : > { %17243 = vst [vmem:[#allocation101_spill] sm:$0xff] %v14247_v27  ;;  %v6857_v34 = vsel %vm586_vm0, %v14247_v27, 0.0  ;;  %v4053_v42 = vrot.slane %v3901_v17, 1  ;;  %v4195_v11 = vmul.f32 %v14036_v37, %v13684_v29  ;;  %v4196_v16 = vmul.f32 %v9083_v2, %v13684_v29 }
 0x346   : > { %6858 = vadd.xlane.f32.xlu1 %v6857_v34  ;;  %v2663_v35 = vadd.f32 %v13851_v24, %v2369_v44  ;;  %v3469_v36 = vrot.slane %v14235_v18, 1  ;;  %v4054_v54 = vrot.slane %v3902_v59, 1  ;;  %v4490_v33 = vmul.f32 %v14044_v61, %v13693_v41 }
 0x347   : > { %v3467_v10 = vsel %vm1628_vm2, %v3465_v28, %v3466_v56  ;;  %v14268_v14 = vmul.f32 %v14240_v63, %v14230_v1  ;;  %v4491_v37 = vmul.f32 %v14166_v45, %v13693_v41  ;;  %v4784_v29 = vmul.f32 %v14065_v52, %v13704_v23  ;;  %v9084_v41 = vld [vmem:[#allocation2 + $0x288] sm:$0x3] }
 0x348   : > { %v2957_v22 = vadd.f32 %v2879_v20, %v2663_v35  ;;  %v3761_v24 = vsel %vm1628_vm2, %v3759_v9, %v3760_v51  ;;  %v4348_v53 = vrot.slane %v4195_v11, 2  ;;  %v4785_v39 = vmul.f32 %v14180_v32, %v13704_v23 }
 0x349   : > { %v4055_v30 = vsel %vm1628_vm2, %v4053_v42, %v4054_v54  ;;  %v4349_v4 = vrot.slane %v4196_v16, 2  ;;  %v4642_v31 = vrot.slane %v4490_v33, 2  ;;  %v5078_v47 = vmul.f32 %v14086_v5, %v13715_v40 }
 0x34a   : > { %v3251_v28 = vadd.f32 %v3173_v13, %v2957_v22  ;;  %v4643_v6 = vrot.slane %v4491_v37, 2  ;;  %v5079_v56 = vmul.f32 %v9084_v41, %v13715_v40  ;;  %v5372_v20 = vmul.f32 %v14093_v26, %v13727_v57 }
 0x34b   : > { %v4936_v17 = vrot.slane %v4784_v29, 2  ;;  %v4937_v43 = vrot.slane %v4785_v39, 2  ;;  %v5373_v23 = vmul.f32 %v14194_v50, %v13727_v57  ;;  %v5666_v44 = vmul.f32 %v14113_v46, %v13740_v3  ;;  %v14317_v29 = vld [vmem:[#allocation2 + $0x350] sm:$0xff] }
 0x34c   : > { %v3545_v9 = vadd.f32 %v3467_v10, %v3251_v28  ;;  %v5230_v51 = vrot.slane %v5078_v47, 2  ;;  %v5231_v59 = vrot.slane %v5079_v56, 2  ;;  %v5524_v5 = vrot.slane %v5372_v20, 2  ;;  %v582_v47 = vld [vmem:[%s9339_s25 + $0x120] sm:$0xff] }
 0x34d   : > { %v4350_v13 = vsel %vm4275_vm3, %v4348_v53, %v4349_v4  ;;  %v5525_v34 = vrot.slane %v5373_v23, 2  ;;  %v5667_v40 = vmul.f32 %v14203_v55, %v13740_v3  ;;  %v14292_v42 = vmul.f32 %v13750_v12, %v14101_v25  ;;  %706 = vst.msk [vmem:[#allocation2 + $0x3a0] sm:$0xff] %vm586_vm0, %v582_v47 }
 0x34e   : > { %v3839_v11 = vadd.f32 %v3761_v24, %v3545_v9  ;;  %v5818_v2 = vrot.slane %v5666_v44, 2  ;;  %v5961_v57 = vmul.f32 %v13750_v12, %v14201_v0  ;;  %v14298_v16 = vmul.f32 %v13759_v62, %v14111_v60  ;;  %v14311_v12 = vld [vmem:[%s16298_s2 + $0x1a] ss:$0 sm:$0xff] }
 0x34f   : > { %v4644_v35 = vsel %vm4275_vm3, %v4642_v31, %v4643_v6  ;;  %v4938_v54 = vsel %vm4275_vm3, %v4936_v17, %v4937_v43  ;;  %v5819_v33 = vrot.slane %v5667_v40, 2  ;;  %v14304_v3 = vmul.f32 %v13759_v62, %v14212_v49 }
 0x350   : > { %v4133_v25 = vadd.f32 %v4055_v30, %v3839_v11  ;;  %v5232_v10 = vsel %vm4275_vm3, %v5230_v51, %v5231_v59  ;;  %v5526_v37 = vsel %vm4275_vm3, %v5524_v5, %v5525_v34  ;;  %v14315_v0 = vmul.f32 %v14311_v12, %v14164_v48  ;;  %v17244_v51 = vld [vmem:[#allocation105_spill] sm:$0xff]  ;;  %v14341_v5 = vld [vmem:[#allocation2 + $0x218] sm:$0x3] }
 0x351   : > { %v6112_v22 = vrot.slane %v14292_v42, 2  ;;  %v6113_v62 = vrot.slane %v5961_v57, 2  ;;  %v6549_v24 = vmul.f32 %v14311_v12, %v14230_v1  ;;  %v1455_v53 = vmul.f32 %v14190_v7, %v14317_v29  ;;  %v14348_v42 = vld [vmem:[%s16298_s2 + $0xa] ss:$0 sm:$0xff] }
 0x352   : > { %v4428_v39 = vadd.f32 %v4350_v13, %v4133_v25  ;;  %v5820_v30 = vsel %vm4275_vm3, %v5818_v2, %v5819_v33  ;;  %v6406_v4 = vrot.slane %v14298_v16, 2  ;;  %v1550_v31 = vmul.f32 %v14142_v38, %v14044_v61  ;;  %17245 = vst [vmem:[#allocation110_spill] sm:$0xff] %v14348_v42 }
 0x353   : > { %v6407_v28 = vrot.slane %v14304_v3, 2  ;;  %v6700_v6 = vrot.slane %v14315_v0, 2  ;;  %v1487_v41 = vadd.f32 %v1455_v53, %v14226_v58  ;;  %v1551_v56 = vmul.f32 %v14166_v45, %v14142_v38  ;;  %v14360_v53 = vld [vmem:[%s16298_s2 + $0xd] ss:$0 sm:$0xff] }
 0x354   : > { %v4722_v20 = vadd.f32 %v4644_v35, %v4428_v39  ;;  %v1704_v17 = vrot.slane %v1550_v31, 1  ;;  %v1845_v43 = vmul.f32 %v14159_v19, %v14065_v52  ;;  %v1846_v23 = vmul.f32 %v14180_v32, %v14159_v19  ;;  %17246 = vst [vmem:[#allocation102_spill] sm:$0xff] %v14360_v53 }
 0x355   : > { %v6701_v44 = vrot.slane %v6549_v24, 2  ;;  %v1705_v9 = vrot.slane %v1551_v56, 1  ;;  %v2139_v59 = vmul.f32 %v17244_v51, %v14077_v8  ;;  %v2140_v58 = vmul.f32 %v14341_v5, %v17244_v51  ;;  %v17247_v56 = vld [vmem:[#allocation68_spill] sm:$0xff] }
 0x356   : > { %v5016_v13 = vadd.f32 %v4938_v54, %v4722_v20  ;;  %v1998_v34 = vrot.slane %v1845_v43, 1  ;;  %v1999_v40 = vrot.slane %v1846_v23, 1  ;;  %v2433_v11 = vmul.f32 %v14348_v42, %v14093_v26 }
 0x357   : > { %v1706_v2 = vsel %vm1628_vm2, %v1704_v17, %v1705_v9  ;;  %v2292_v57 = vrot.slane %v2139_v59, 1  ;;  %v2293_v16 = vrot.slane %v2140_v58, 1  ;;  %v2434_v35 = vmul.f32 %v14348_v42, %v14194_v50  ;;  %v14373_v17 = vld [vmem:[#allocation2 + $0x2b8] sm:$0x3] }
 0x358   : > { %v5310_v33 = vadd.f32 %v5232_v10, %v5016_v13  ;;  %v1782_v3 = vadd.f32 %v1706_v2, %v1487_v41  ;;  %v2000_v54 = vsel %vm1628_vm2, %v1998_v34, %v1999_v40  ;;  %v2586_v25 = vrot.slane %v2433_v11, 1  ;;  %v14369_v41 = vld [vmem:[%s16298_s2 + $0x10] ss:$0 sm:$0xff] }
 0x359   : > { %v2294_v0 = vsel %vm1628_vm2, %v2292_v57, %v2293_v16  ;;  %v2587_v24 = vrot.slane %v2434_v35, 1  ;;  %v2727_v39 = vmul.f32 %v14360_v53, %v14113_v46  ;;  %v2728_v31 = vmul.f32 %v14360_v53, %v14203_v55 }
 0x35a   : > { %v5604_v47 = vadd.f32 %v5526_v37, %v5310_v33  ;;  %v2076_v10 = vadd.f32 %v2000_v54, %v1782_v3  ;;  %v3021_v20 = vmul.f32 %v14369_v41, %v17247_v56  ;;  %v3022_v43 = vmul.f32 %v14373_v17, %v14369_v41 }
 0x35b   : > { %v6114_v23 = vsel %vm4275_vm3, %v6112_v22, %v6113_v62  ;;  %v2588_v9 = vsel %vm1628_vm2, %v2586_v25, %v2587_v24  ;;  %v2880_v59 = vrot.slane %v2727_v39, 1  ;;  %v2881_v37 = vrot.slane %v2728_v31, 1  ;;  %v14385_v62 = vld [vmem:[#allocation2 + $0x358] sm:$0x3] }
 0x35c   : > { %v5898_v58 = vadd.f32 %v5820_v30, %v5604_v47  ;;  %v2370_v13 = vadd.f32 %v2294_v0, %v2076_v10  ;;  %v3174_v34 = vrot.slane %v3021_v20, 1  ;;  %v3175_v40 = vrot.slane %v3022_v43, 1  ;;  %v14390_v30 = vld [vmem:[%s16298_s2 + $0x19] ss:$0 sm:$0xff]  ;;  %v14414_v47 = vld [vmem:[%s16298_s2 + $0x5] ss:$0 sm:$0xff] }
 0x35d   : > { %v3763_v11 = vrot.slane %v14268_v14, 1  ;;  %v6408_v2 = vsel %vm4275_vm3, %v6406_v4, %v6407_v28  ;;  %v2882_v57 = vsel %vm1628_vm2, %v2880_v59, %v2881_v37  ;;  %v3609_v16 = vmul.f32 %v14240_v63, %v14164_v48  ;;  %17248 = vst [vmem:[#allocation36_spill] sm:$0xff] %v14414_v47  ;;  %v583_v10 = vld [vmem:[%s9339_s25 + $0x128] sm:$0x3] }
 0x35e   : > { %v6192_v35 = vadd.f32 %v6114_v23, %v5898_v58  ;;  %v6702_v22 = vsel %vm4275_vm3, %v6700_v6, %v6701_v44  ;;  %v2664_v33 = vadd.f32 %v2588_v9, %v2370_v13  ;;  %v3903_v14 = vmul.f32 %v14390_v30, %v14317_v29  ;;  %v14400_v6 = vld [vmem:[%s16298_s2 + $0x2] ss:$0 sm:$0xff]  ;;  %707 = vst.msk [vmem:[#allocation2 + $0x3a8] sm:$0x3] %vm588_vm1, %v583_v10 }
 0x35f   : > { %v3176_v4 = vsel %vm1628_vm2, %v3174_v34, %v3175_v40  ;;  %v3762_v28 = vrot.slane %v3609_v16, 1  ;;  %v3904_v3 = vmul.f32 %v14390_v30, %v14385_v62  ;;  %v4197_v44 = vmul.f32 %v14400_v6, %v14044_v61  ;;  %v14440_v40 = vld [vmem:[%s16298_s2 + $0xb] ss:$0 sm:$0xff]  ;;  %v14449_v16 = vld [vmem:[%s16298_s2 + $0xe] ss:$0 sm:$0xff] }
 0x360   : > { %v6486_v54 = vadd.f32 %v6408_v2, %v6192_v35  ;;  %v2958_v25 = vadd.f32 %v2882_v57, %v2664_v33  ;;  %v4056_v0 = vrot.slane %v3903_v14, 1  ;;  %v4198_v24 = vmul.f32 %v14400_v6, %v14166_v45  ;;  %17251 = vst [vmem:[#allocation68_spill] sm:$0xff] %v14440_v40 }
 0x361   : > { %v3470_v39 = vsel %vm1628_vm2, %v3468_v21, %v3469_v36  ;;  %v4057_v31 = vrot.slane %v3904_v3, 1  ;;  %v4492_v61 = vmul.f32 %v14414_v47, %v14065_v52  ;;  %v3764_v45 = vsel %vm1628_vm2, %v3762_v28, %v3763_v11  ;;  %v14428_v36 = vld [vmem:[%s16298_s2 + $0x8] ss:$0 sm:$0xff] }
 0x362   : > { %v14419_v20 = vadd.f32 %v6702_v22, %v6486_v54  ;;  %v3252_v43 = vadd.f32 %v3176_v4, %v2958_v25  ;;  %v4493_v15 = vmul.f32 %v14414_v47, %v14180_v32  ;;  %v4351_v18 = vrot.slane %v4197_v44, 2  ;;  %17250 = vst [vmem:[#allocation74_spill] sm:$0xff] %v14428_v36 }
 0x363   : > { %v4352_v21 = vrot.slane %v4198_v24, 2  ;;  %v4786_v23 = vmul.f32 %v14428_v36, %v14077_v8  ;;  %v4787_v9 = vmul.f32 %v14428_v36, %v14341_v5  ;;  %v4058_v58 = vsel %vm1628_vm2, %v4056_v0, %v4057_v31  ;;  %v14469_v31 = vld [vmem:[%s16298_s2 + $0x14] ss:$0 sm:$0xff] }
 0x364   : > { %17249 = vst [vmem:[#allocation34_spill] sm:$0xff] %v14419_v20  ;;  %v6860_v59 = vsel %vm586_vm0, %v14419_v20, 0.0  ;;  %v3546_v37 = vadd.f32 %v3470_v39, %v3252_v43  ;;  %v4645_v13 = vrot.slane %v4492_v61, 2  ;;  %v4646_v34 = vrot.slane %v4493_v15, 2 }
 0x365   : > { %6861 = vadd.xlane.f32.xlu0 %v6860_v59  ;;  %v5080_v11 = vmul.f32 %v14440_v40, %v14093_v26  ;;  %v5081_v2 = vmul.f32 %v14440_v40, %v14194_v50  ;;  %v5374_v35 = vmul.f32 %v14449_v16, %v14113_v46  ;;  %v5375_v22 = vmul.f32 %v14449_v16, %v14203_v55  ;;  %v14459_v50 = vld [vmem:[%s16298_s2 + $0x11] ss:$0 sm:$0xff]  ;;  %v17253_v59 = vld [vmem:[#allocation107_spill] sm:$0xff] }
 0x366   : > { %v3840_v57 = vadd.f32 %v3764_v45, %v3546_v37  ;;  %v4353_v33 = vsel %vm4275_vm3, %v4351_v18, %v4352_v21  ;;  %v4939_v14 = vrot.slane %v4786_v23, 2  ;;  %v4940_v4 = vrot.slane %v4787_v9, 2  ;;  %v14481_v9 = vld [vmem:[%s16298_s2 + $0x17] ss:$0 sm:$0xff] }
 0x367   : > { %v5233_v26 = vrot.slane %v5080_v11, 2  ;;  %v5234_v3 = vrot.slane %v5081_v2, 2  ;;  %v5668_v44 = vmul.f32 %v14459_v50, %v17247_v56  ;;  %v5669_v54 = vmul.f32 %v14459_v50, %v14373_v17  ;;  %17252 = vst [vmem:[#allocation112_spill] sm:$0xff] %v14481_v9  ;;  %v17254_v11 = vld [vmem:[#allocation72_spill] sm:$0xff] }
 0x368   : > { %v4134_v28 = vadd.f32 %v4058_v58, %v3840_v57  ;;  %v4647_v25 = vsel %vm4275_vm3, %v4645_v13, %v4646_v34  ;;  %v5527_v0 = vrot.slane %v5374_v35, 2  ;;  %v5528_v24 = vrot.slane %v5375_v22, 2  ;;  %v17255_v22 = vld [vmem:[#allocation82_spill] sm:$0xff] }
 0x369   : > { %v5962_v61 = vmul.f32 %v14469_v31, %v14111_v60  ;;  %v5963_v10 = vmul.f32 %v14469_v31, %v14212_v49  ;;  %v4941_v43 = vsel %vm4275_vm3, %v4939_v14, %v4940_v4  ;;  %v5235_v15 = vsel %vm4275_vm3, %v5233_v26, %v5234_v3  ;;  %v14496_v14 = vld [vmem:[#allocation2 + $0x220] sm:$0xff]  ;;  %v17256_v4 = vld [vmem:[#allocation84_spill] sm:$0xff] }
 0x36a   : > { %v4429_v39 = vadd.f32 %v4353_v33, %v4134_v28  ;;  %v5821_v18 = vrot.slane %v5668_v44, 2  ;;  %v5822_v21 = vrot.slane %v5669_v54, 2  ;;  %v5529_v23 = vsel %vm4275_vm3, %v5527_v0, %v5528_v24  ;;  %v17257_v0 = vld [vmem:[#allocation18_spill] sm:$0xff] }
 0x36b   : > { %v6256_v60 = vmul.f32 %v14481_v9, %v14164_v48  ;;  %v6257_v49 = vmul.f32 %v14481_v9, %v14230_v1  ;;  %v896_v37 = vmul.f32 %v14065_v52, %v17253_v59  ;;  %v6115_v13 = vrot.slane %v5962_v61, 2 }
 0x36c   : > { %v4723_v45 = vadd.f32 %v4647_v25, %v4429_v39  ;;  %v6116_v34 = vrot.slane %v5963_v10, 2  ;;  %v966_v2 = vmul.f32 %v14077_v8, %v17254_v11  ;;  %v6550_v57 = vmul.f32 %v14311_v12, %v14317_v29 }
 0x36d   : > { %v6551_v35 = vmul.f32 %v14311_v12, %v14385_v62  ;;  %v928_v33 = vadd.f32 %v17255_v22, %v896_v37  ;;  %v1036_v26 = vmul.f32 %v14496_v14, %v17256_v4  ;;  %v5823_v3 = vsel %vm4275_vm3, %v5821_v18, %v5822_v21  ;;  %v17258_v37 = vld [vmem:[#allocation30_spill] sm:$0xff] }
 0x36e   : > { %v5017_v58 = vadd.f32 %v4941_v43, %v4723_v45  ;;  %v6409_v44 = vrot.slane %v6256_v60, 2  ;;  %v6410_v54 = vrot.slane %v6257_v49, 2  ;;  %v1106_v24 = vmul.f32 %v14113_v46, %v17257_v0  ;;  %v14509_v60 = vld [vmem:[#allocation2 + $0x2c0] sm:$0xff]  ;;  %v17259_v49 = vld [vmem:[#allocation38_spill] sm:$0xff] }
 0x36f   : > { %v998_v25 = vadd.f32 %v966_v2, %v928_v33  ;;  %v6117_v61 = vsel %vm4275_vm3, %v6115_v13, %v6116_v34  ;;  %v6703_v10 = vrot.slane %v6550_v57, 2  ;;  %v6704_v43 = vrot.slane %v6551_v35, 2  ;;  %v584_v13 = vld [vmem:[%s9339_s25 + $0x130] sm:$0xff]  ;;  %v17262_v57 = vld [vmem:[#allocation92_spill] sm:$0xff] }
 0x370   : > { %v5311_v28 = vadd.f32 %v5235_v15, %v5017_v58  ;;  %v1176_v27 = vmul.f32 %v17247_v56, %v17258_v37  ;;  %v1552_v15 = vmul.f32 %v14142_v38, %v14065_v52  ;;  %v6411_v18 = vsel %vm4275_vm3, %v6409_v44, %v6410_v54  ;;  %v17260_v34 = vld [vmem:[#allocation69_spill] sm:$0xff]  ;;  %708 = vst.msk [vmem:[#allocation2 + $0x3b0] sm:$0xff] %vm586_vm0, %v584_v13 }
 0x371   : > { %v1068_v45 = vadd.f32 %v1036_v26, %v998_v25  ;;  %v1553_v58 = vmul.f32 %v14180_v32, %v14142_v38  ;;  %v14518_v2 = vmul.f32 %v17244_v51, %v17260_v34  ;;  %v14522_v35 = vmul.f32 %v14369_v41, %v17262_v57  ;;  %v14527_v33 = vld [vmem:[%s16298_s2 + $0x13] ss:$0 sm:$0xff]  ;;  %v14539_v34 = vld [vmem:[#allocation2 + $0x360] sm:$0xff] }
 0x372   : > { %v5605_v39 = vadd.f32 %v5529_v23, %v5311_v28  ;;  %v1246_v23 = vmul.f32 %v14509_v60, %v17259_v49  ;;  %v14531_v26 = vmul.f32 %v14527_v33, %v14230_v1  ;;  %v17264_v54 = vld [vmem:[#allocation49_spill] sm:$0xff]  ;;  %v1707_v57 = vrot.slane %v1552_v15, 1  ;;  %v14576_v49 = vld [vmem:[#allocation2 + $0x2c8] sm:$0x3] }
 0x373   : > { %v1138_v21 = vadd.f32 %v1106_v24, %v1068_v45  ;;  %17261 = vst [vmem:[#allocation107_spill] sm:$0xff] %v14518_v2  ;;  %17263 = vst [vmem:[#allocation72_spill] sm:$0xff] %v14522_v35  ;;  %v1316_v25 = vmul.f32 %v17264_v54, %v14164_v48  ;;  %v17265_v24 = vld [vmem:[#allocation108_spill] sm:$0xff]  ;;  %v1847_v35 = vmul.f32 %v14159_v19, %v14077_v8  ;;  %v1708_v13 = vrot.slane %v1553_v58, 1 }
 0x374   : > { %v5899_v20 = vadd.f32 %v5823_v3, %v5605_v39  ;;  %v6705_v3 = vsel %vm4275_vm3, %v6703_v10, %v6704_v43  ;;  %v1386_v39 = vmul.f32 %v17265_v24, %v14317_v29  ;;  %v14547_v10 = vld [vmem:[#allocation2 + $0x228] sm:$0x3]  ;;  %v2730_v2 = vmul.f32 %v14373_v17, %v14360_v53 }
 0x375   : > { %v1208_v44 = vadd.f32 %v1176_v27, %v1138_v21  ;;  %v2141_v27 = vmul.f32 %v14496_v14, %v17244_v51  ;;  %v2142_v43 = vmul.f32 %v14547_v10, %v17244_v51  ;;  %v2435_v21 = vmul.f32 %v14348_v42, %v14113_v46  ;;  %v14572_v54 = vld [vmem:[#allocation2 + $0x368] sm:$0x3] }
 0x376   : > { %v6193_v28 = vadd.f32 %v6117_v61, %v5899_v20  ;;  %v1848_v20 = vmul.f32 %v14341_v5, %v14159_v19  ;;  %v2001_v51 = vrot.slane %v1847_v35, 1  ;;  %17268 = vst [vmem:[#allocation18_spill] sm:$0xff] %v14572_v54 }
 0x377   : > { %v1278_v61 = vadd.f32 %v1246_v23, %v1208_v44  ;;  %v2436_v23 = vmul.f32 %v14348_v42, %v14203_v55  ;;  %v2729_v44 = vmul.f32 %v14360_v53, %v17247_v56  ;;  %v2589_v19 = vrot.slane %v2435_v21, 1 }
 0x378   : > { %v6487_v45 = vadd.f32 %v6411_v18, %v6193_v28  ;;  %v14553_v18 = vmul.f32 %v14527_v33, %v14385_v62  ;;  %v1456_v28 = vmul.f32 %v14190_v7, %v14539_v34  ;;  %v2002_v24 = vrot.slane %v1848_v20, 1 }
 0x379   : > { %v1348_v58 = vadd.f32 %v1316_v25, %v1278_v61  ;;  %v1709_v25 = vsel %vm1628_vm2, %v1707_v57, %v1708_v13  ;;  %v2295_v61 = vrot.slane %v2141_v27, 1  ;;  %v2296_v7 = vrot.slane %v2142_v43, 1 }
 0x37a   : > { %17266 = vst [vmem:[#allocation82_spill] sm:$0xff] %v14553_v18  ;;  %v14555_v15 = vadd.f32 %v6705_v3, %v6487_v45  ;;  %v3612_v3 = vmul.f32 %v14240_v63, %v14385_v62  ;;  %v2590_v38 = vrot.slane %v2436_v23, 1  ;;  %v3023_v53 = vmul.f32 %v14509_v60, %v14369_v41 }
 0x37b   : > { %v1418_v42 = vadd.f32 %v1386_v39, %v1348_v58  ;;  %v2883_v20 = vrot.slane %v2729_v44, 1  ;;  %v3317_v39 = vmul.f32 %v14527_v33, %v14164_v48  ;;  %v3472_v57 = vrot.slane %v14531_v26, 1 }
 0x37c   : > { %17267 = vst [vmem:[#allocation84_spill] sm:$0xff] %v14555_v15  ;;  %v6863_v45 = vsel %vm586_vm0, %v14555_v15, 0.0  ;;  %v3024_v15 = vmul.f32 %v14576_v49, %v14369_v41  ;;  %v2003_v27 = vsel %vm1628_vm2, %v2001_v51, %v2002_v24  ;;  %v3611_v43 = vmul.f32 %v14240_v63, %v14317_v29 }
 0x37d   : > { %6864 = vadd.xlane.f32.xlu1 %v6863_v45  ;;  %v1488_v35 = vadd.f32 %v1456_v28, %v1418_v42  ;;  %v2884_v45 = vrot.slane %v2730_v2, 1  ;;  %v3766_v21 = vrot.slane %v3612_v3, 1  ;;  %v3905_v42 = vmul.f32 %v14390_v30, %v14539_v34 }
 0x37e   : > { %v3906_v2 = vmul.f32 %v14390_v30, %v14572_v54  ;;  %v2297_v58 = vsel %vm1628_vm2, %v2295_v61, %v2296_v7  ;;  %v2591_v26 = vsel %vm1628_vm2, %v2589_v19, %v2590_v38  ;;  %v3177_v28 = vrot.slane %v3023_v53, 1  ;;  %v585_v19 = vld [vmem:[%s9339_s25 + $0x138] sm:$0x3] }
 0x37f   : > { %v1783_v23 = vadd.f32 %v1709_v25, %v1488_v35  ;;  %v3178_v44 = vrot.slane %v3024_v15, 1  ;;  %v2885_v51 = vsel %vm1628_vm2, %v2883_v20, %v2884_v45  ;;  %v14596_v24 = vmul.f32 %v14527_v33, %v14572_v54  ;;  %709 = vst.msk [vmem:[#allocation2 + $0x3b8] sm:$0x3] %vm588_vm1, %v585_v19 }
 0x380   : > { %v3471_v3 = vrot.slane %v3317_v39, 1  ;;  %v14600_v25 = vmul.f32 %v14240_v63, %v14572_v54  ;;  %v3765_v35 = vrot.slane %v3611_v43, 1  ;;  %v4199_v7 = vmul.f32 %v14400_v6, %v14065_v52 }
 0x381   : > { %v2077_v13 = vadd.f32 %v2003_v27, %v1783_v23  ;;  %17269 = vst [vmem:[#allocation30_spill] sm:$0xff] %v14596_v24  ;;  %v4200_v38 = vmul.f32 %v14400_v6, %v14180_v32  ;;  %v4059_v15 = vrot.slane %v3905_v42, 1  ;;  %v4060_v61 = vrot.slane %v3906_v2, 1 }
 0x382   : > { %v4494_v20 = vmul.f32 %v14414_v47, %v14077_v8  ;;  %v4495_v45 = vmul.f32 %v14414_v47, %v14341_v5  ;;  %v4788_v39 = vmul.f32 %v14496_v14, %v14428_v36  ;;  %v4789_v52 = vmul.f32 %v14547_v10, %v14428_v36 }
 0x383   : > { %v2371_v53 = vadd.f32 %v2297_v58, %v2077_v13  ;;  %v5082_v32 = vmul.f32 %v14440_v40, %v14113_v46  ;;  %v3179_v27 = vsel %vm1628_vm2, %v3177_v28, %v3178_v44  ;;  %v5083_v43 = vmul.f32 %v14440_v40, %v14203_v55 }
 0x384   : > { %v5376_v23 = vmul.f32 %v14449_v16, %v17247_v56  ;;  %v3473_v42 = vsel %vm1628_vm2, %v3471_v3, %v3472_v57  ;;  %v3767_v2 = vsel %vm1628_vm2, %v3765_v35, %v3766_v21  ;;  %v4354_v58 = vrot.slane %v4199_v7, 2 }
 0x385   : > { %v2665_v13 = vadd.f32 %v2591_v26, %v2371_v53  ;;  %v5377_v19 = vmul.f32 %v14449_v16, %v14373_v17  ;;  %v4061_v46 = vsel %vm1628_vm2, %v4059_v15, %v4060_v61  ;;  %v4355_v26 = vrot.slane %v4200_v38, 2  ;;  %v14638_v15 = vld [vmem:[#allocation2 + $0x230] sm:$0xff] }
 0x386   : > { %v4648_v53 = vrot.slane %v4494_v20, 2  ;;  %v4649_v28 = vrot.slane %v4495_v45, 2  ;;  %v4942_v44 = vrot.slane %v4788_v39, 2  ;;  %v4943_v36 = vrot.slane %v4789_v52, 2 }
 0x387   : > { %v2959_v18 = vadd.f32 %v2885_v51, %v2665_v13  ;;  %v5236_v55 = vrot.slane %v5082_v32, 2  ;;  %v5237_v24 = vrot.slane %v5083_v43, 2  ;;  %v5530_v47 = vrot.slane %v5376_v23, 2 }
 0x388   : > { %v897_v57 = vmul.f32 %v14077_v8, %v17253_v59  ;;  %v5531_v21 = vrot.slane %v5377_v19, 2  ;;  %v5670_v3 = vmul.f32 %v14509_v60, %v14459_v50  ;;  %v5671_v51 = vmul.f32 %v14576_v49, %v14459_v50  ;;  %v17270_v19 = vld [vmem:[#allocation38_spill] sm:$0xff] }
 0x389   : > { %v3253_v40 = vadd.f32 %v3179_v27, %v2959_v18  ;;  %v967_v35 = vmul.f32 %v14496_v14, %v17254_v11  ;;  %v4356_v38 = vsel %vm4275_vm3, %v4354_v58, %v4355_v26  ;;  %v1037_v59 = vmul.f32 %v14638_v15, %v17256_v4  ;;  %v14662_v58 = vld [vmem:[#allocation2 + $0x2d0] sm:$0xff]  ;;  %v17271_v26 = vld [vmem:[#allocation99_spill] sm:$0xff] }
 0x38a   : > { %v929_v18 = vadd.f32 %v17255_v22, %v897_v57  ;;  %v4650_v61 = vsel %vm4275_vm3, %v4648_v53, %v4649_v28  ;;  %v4944_v20 = vsel %vm4275_vm3, %v4942_v44, %v4943_v36  ;;  %v5964_v45 = vmul.f32 %v14469_v31, %v14164_v48  ;;  %v17272_v44 = vld [vmem:[#allocation96_spill] sm:$0xff] }
 0x38b   : > { %v3547_v7 = vadd.f32 %v3473_v42, %v3253_v40  ;;  %v5965_v11 = vmul.f32 %v14469_v31, %v14230_v1  ;;  %v5238_v39 = vsel %vm4275_vm3, %v5236_v55, %v5237_v24  ;;  %v1107_v22 = vmul.f32 %v17247_v56, %v17257_v0 }
 0x38c   : > { %v999_v52 = vadd.f32 %v967_v35, %v929_v18  ;;  %v5532_v32 = vsel %vm4275_vm3, %v5530_v47, %v5531_v21  ;;  %v5824_v4 = vrot.slane %v5670_v3, 2  ;;  %v5825_v13 = vrot.slane %v5671_v51, 2  ;;  %v14674_v51 = vld [vmem:[#allocation2 + $0x370] sm:$0xff] }
 0x38d   : > { %v3841_v40 = vadd.f32 %v3767_v2, %v3547_v7  ;;  %v6258_v36 = vmul.f32 %v14481_v9, %v14317_v29  ;;  %v6259_v48 = vmul.f32 %v14481_v9, %v14385_v62  ;;  %v1177_v1 = vmul.f32 %v14509_v60, %v17258_v37  ;;  %v17273_v7 = vld [vmem:[#allocation49_spill] sm:$0xff] }
 0x38e   : > { %v1069_v43 = vadd.f32 %v1037_v59, %v999_v52  ;;  %v6118_v24 = vrot.slane %v5964_v45, 2  ;;  %v6119_v23 = vrot.slane %v5965_v11, 2  ;;  %v6552_v0 = vmul.f32 %v14311_v12, %v14539_v34  ;;  %v17274_v45 = vld [vmem:[#allocation108_spill] sm:$0xff] }
 0x38f   : > { %v4135_v27 = vadd.f32 %v4061_v46, %v3841_v40  ;;  %v6553_v47 = vmul.f32 %v14311_v12, %v14572_v54  ;;  %v1247_v46 = vmul.f32 %v14662_v58, %v17270_v19  ;;  %v1554_v53 = vmul.f32 %v17271_v26, %v14077_v8  ;;  %v17275_v40 = vld [vmem:[#allocation109_spill] sm:$0xff] }
 0x390   : > { %v1139_v2 = vadd.f32 %v1107_v22, %v1069_v43  ;;  %v6412_v28 = vrot.slane %v6258_v36, 2  ;;  %v1555_v37 = vmul.f32 %v14341_v5, %v17271_v26  ;;  %v1849_v55 = vmul.f32 %v14496_v14, %v17272_v44  ;;  %v17276_v43 = vld [vmem:[#allocation105_spill] sm:$0xff]  ;;  %v17277_v26 = vld [vmem:[#allocation110_spill] sm:$0xff] }
 0x391   : > { %v4430_v42 = vadd.f32 %v4356_v38, %v4135_v27  ;;  %v1850_v57 = vmul.f32 %v14547_v10, %v17272_v44  ;;  %v6413_v3 = vrot.slane %v6259_v48, 2  ;;  %v1317_v38 = vmul.f32 %v17273_v7, %v14317_v29 }
 0x392   : > { %v1209_v35 = vadd.f32 %v1177_v1, %v1139_v2  ;;  %v6706_v18 = vrot.slane %v6552_v0, 2  ;;  %v6707_v59 = vrot.slane %v6553_v47, 2  ;;  %v1387_v11 = vmul.f32 %v17274_v45, %v14539_v34  ;;  %v14684_v2 = vld [vmem:[#allocation2 + $0x238] sm:$0x3] }
 0x393   : > { %v4724_v21 = vadd.f32 %v4650_v61, %v4430_v42  ;;  %v1457_v52 = vmul.f32 %v17275_v40, %v14674_v51  ;;  %v1710_v27 = vrot.slane %v1554_v53, 1  ;;  %v2143_v61 = vmul.f32 %v14638_v15, %v17276_v43 }
 0x394   : > { %v1279_v36 = vadd.f32 %v1247_v46, %v1209_v35  ;;  %v1711_v48 = vrot.slane %v1555_v37, 1  ;;  %v2004_v42 = vrot.slane %v1849_v55, 1  ;;  %v2005_v1 = vrot.slane %v1850_v57, 1  ;;  %v17278_v37 = vld [vmem:[#allocation102_spill] sm:$0xff] }
 0x395   : > { %v5018_v22 = vadd.f32 %v4944_v20, %v4724_v21  ;;  %v2144_v0 = vmul.f32 %v14684_v2, %v17276_v43  ;;  %v2437_v44 = vmul.f32 %v17277_v26, %v17247_v56  ;;  %v2438_v20 = vmul.f32 %v14373_v17, %v17277_v26 }
 0x396   : > { %v1349_v19 = vadd.f32 %v1317_v38, %v1279_v36  ;;  %v5826_v46 = vsel %vm4275_vm3, %v5824_v4, %v5825_v13  ;;  %v6120_v53 = vsel %vm4275_vm3, %v6118_v24, %v6119_v23  ;;  %v2731_v55 = vmul.f32 %v14509_v60, %v17278_v37 }
 0x397   : > { %v5312_v47 = vadd.f32 %v5238_v39, %v5018_v22  ;;  %v2732_v57 = vmul.f32 %v14576_v49, %v17278_v37  ;;  %v6414_v39 = vsel %vm4275_vm3, %v6412_v28, %v6413_v3  ;;  %v6708_v35 = vsel %vm4275_vm3, %v6706_v18, %v6707_v59  ;;  %v14708_v18 = vld [vmem:[#allocation2 + $0x378] sm:$0x3] }
 0x398   : > { %v1419_v7 = vadd.f32 %v1387_v11, %v1349_v19  ;;  %v1712_v38 = vsel %vm1628_vm2, %v1710_v27, %v1711_v48  ;;  %v2006_v45 = vsel %vm1628_vm2, %v2004_v42, %v2005_v1  ;;  %v2298_v40 = vrot.slane %v2143_v61, 1 }
 0x399   : > { %v5606_v21 = vadd.f32 %v5532_v32, %v5312_v47  ;;  %v2299_v4 = vrot.slane %v2144_v0, 1  ;;  %v2592_v23 = vrot.slane %v2437_v44, 1  ;;  %v2593_v22 = vrot.slane %v2438_v20, 1  ;;  %v14704_v47 = vld [vmem:[#allocation2 + $0x2d8] sm:$0x3] }
 0x39a   : > { %v1489_v24 = vadd.f32 %v1457_v52, %v1419_v7  ;;  %v2886_v36 = vrot.slane %v2731_v55, 1  ;;  %v2887_v43 = vrot.slane %v2732_v57, 1  ;;  %v3025_v32 = vmul.f32 %v14662_v58, %v14369_v41 }
 0x39b   : > { %v5900_v13 = vadd.f32 %v5826_v46, %v5606_v21  ;;  %v3026_v28 = vmul.f32 %v14704_v47, %v14369_v41  ;;  %v3319_v11 = vmul.f32 %v14527_v33, %v14317_v29  ;;  %v3613_v52 = vmul.f32 %v14240_v63, %v14539_v34 }
 0x39c   : > { %v1784_v59 = vadd.f32 %v1712_v38, %v1489_v24  ;;  %v2300_v27 = vsel %vm1628_vm2, %v2298_v40, %v2299_v4  ;;  %v3907_v61 = vmul.f32 %v14390_v30, %v14674_v51  ;;  %v3908_v48 = vmul.f32 %v14390_v30, %v14708_v18 }
 0x39d   : > { %v6194_v3 = vadd.f32 %v6120_v53, %v5900_v13  ;;  %v4201_v42 = vmul.f32 %v14400_v6, %v14077_v8  ;;  %v3769_v1 = vrot.slane %v14600_v25, 1  ;;  %v4202_v44 = vmul.f32 %v14400_v6, %v14341_v5  ;;  %v17280_v25 = vld [vmem:[#allocation36_spill] sm:$0xff] }
 0x39e   : > { %v2078_v19 = vadd.f32 %v2006_v45, %v1784_v59  ;;  %v2594_v20 = vsel %vm1628_vm2, %v2592_v23, %v2593_v22  ;;  %v2888_v46 = vsel %vm1628_vm2, %v2886_v36, %v2887_v43  ;;  %v3180_v53 = vrot.slane %v3025_v32, 1  ;;  %v17281_v23 = vld [vmem:[#allocation30_spill] sm:$0xff] }
 0x39f   : > { %v6488_v0 = vadd.f32 %v6414_v39, %v6194_v3  ;;  %v3181_v55 = vrot.slane %v3026_v28, 1  ;;  %v3474_v7 = vrot.slane %v3319_v11, 1  ;;  %v3768_v38 = vrot.slane %v3613_v52, 1  ;;  %v17282_v36 = vld [vmem:[#allocation74_spill] sm:$0xff]  ;;  %v17285_v52 = vld [vmem:[#allocation68_spill] sm:$0xff] }
 0x3a0   : > { %v2372_v21 = vadd.f32 %v2300_v27, %v2078_v19  ;;  %v4062_v40 = vrot.slane %v3907_v61, 1  ;;  %v4063_v8 = vrot.slane %v3908_v48, 1  ;;  %v4357_v4 = vrot.slane %v4201_v42, 2  ;;  %v17283_v3 = vld [vmem:[#allocation82_spill] sm:$0xff] }
 0x3a1   : > { %v14726_v57 = vadd.f32 %v6708_v35, %v6488_v0  ;;  %v4496_v39 = vmul.f32 %v14496_v14, %v17280_v25  ;;  %v4358_v13 = vrot.slane %v4202_v44, 2  ;;  %v4497_v24 = vmul.f32 %v14547_v10, %v17280_v25 }
 0x3a2   : > { %v2666_v45 = vadd.f32 %v2594_v20, %v2372_v21  ;;  %v3182_v22 = vsel %vm1628_vm2, %v3180_v53, %v3181_v55  ;;  %v4790_v43 = vmul.f32 %v14638_v15, %v17282_v36  ;;  %v4791_v32 = vmul.f32 %v14684_v2, %v17282_v36 }
 0x3a3   : > { %17279 = vst [vmem:[#allocation69_spill] sm:$0xff] %v14726_v57  ;;  %v6866_v5 = vsel %vm586_vm0, %v14726_v57, 0.0  ;;  %v17284_v59 = vrot.slane %v17283_v3, 1  ;;  %v5084_v27 = vmul.f32 %v17285_v52, %v17247_v56  ;;  %v5085_v61 = vmul.f32 %v17285_v52, %v14373_v17 }
 0x3a4   : > { %6867 = vadd.xlane.f32.xlu0 %v6866_v5  ;;  %v2960_v28 = vadd.f32 %v2888_v46, %v2666_v45  ;;  %v3770_v48 = vsel %vm1628_vm2, %v3768_v38, %v3769_v1  ;;  %v4064_v42 = vsel %vm1628_vm2, %v4062_v40, %v4063_v8  ;;  %v4651_v0 = vrot.slane %v4496_v39, 2  ;;  %v14761_v40 = vld [vmem:[%s16298_s2] ss:$0 sm:$0xff]  ;;  %v14772_v45 = vld [vmem:[%s16298_s2 + $0x3] ss:$0 sm:$0xff] }
 0x3a5   : > { %v3476_v11 = vsel %vm1628_vm2, %v3474_v7, %v17284_v59  ;;  %v5378_v19 = vmul.f32 %v14509_v60, %v14449_v16  ;;  %v4359_v20 = vsel %vm4275_vm3, %v4357_v4, %v4358_v13  ;;  %v4652_v46 = vrot.slane %v4497_v24, 2  ;;  %17286 = vst [vmem:[#allocation92_spill] sm:$0xff] %v14772_v45 }
 0x3a6   : > { %v3254_v44 = vadd.f32 %v3182_v22, %v2960_v28  ;;  %v5379_v53 = vmul.f32 %v14576_v49, %v14449_v16  ;;  %v4945_v55 = vrot.slane %v4790_v43, 2  ;;  %v4946_v56 = vrot.slane %v4791_v32, 2  ;;  %v14779_v43 = vld [vmem:[%s16299_s3] ss:$0 sm:$0xff] }
 0x3a7   : > { %v5672_v17 = vmul.f32 %v14662_v58, %v14459_v50  ;;  %v5673_v1 = vmul.f32 %v14704_v47, %v14459_v50  ;;  %v5239_v7 = vrot.slane %v5084_v27, 2  ;;  %v5240_v38 = vrot.slane %v5085_v61, 2  ;;  %17287 = vst [vmem:[#allocation38_spill] sm:$0xff] %v14779_v43  ;;  %v14787_v32 = vld [vmem:[#allocation2 + $0x240] sm:$0xff] }
 0x3a8   : > { %v3548_v21 = vadd.f32 %v3476_v11, %v3254_v44  ;;  %v898_v8 = vmul.f32 %v14761_v40, %v14496_v14  ;;  %v5533_v4 = vrot.slane %v5378_v19, 2  ;;  %v5966_v39 = vmul.f32 %v14469_v31, %v14317_v29  ;;  %v14803_v44 = vld [vmem:[%s16298_s2 + $0x9] ss:$0 sm:$0xff] }
 0x3a9   : > { %v5967_v5 = vmul.f32 %v14469_v31, %v14385_v62  ;;  %v968_v13 = vmul.f32 %v14772_v45, %v14638_v15  ;;  %v5534_v22 = vrot.slane %v5379_v53, 2  ;;  %v14785_v62 = vld [vmem:[%s16298_s2 + $0x6] ss:$0 sm:$0xff]  ;;  %v4653_v3 = vsel %vm4275_vm3, %v4651_v0, %v4652_v46  ;;  %17289 = vst [vmem:[#allocation96_spill] sm:$0xff] %v14803_v44 }
 0x3aa   : > { %v3842_v24 = vadd.f32 %v3770_v48, %v3548_v21  ;;  %v930_v29 = vadd.f32 %v14779_v43, %v898_v8  ;;  %17288 = vst [vmem:[#allocation99_spill] sm:$0xff] %v14785_v62  ;;  %v1038_v28 = vmul.f32 %v14787_v32, %v14785_v62  ;;  %v5827_v59 = vrot.slane %v5672_v17, 2 }
 0x3ab   : > { %v5828_v11 = vrot.slane %v5673_v1, 2  ;;  %v14794_v27 = vmul.f32 %v14481_v9, %v14539_v34  ;;  %v14798_v48 = vmul.f32 %v14481_v9, %v14572_v54  ;;  %v1108_v0 = vmul.f32 %v14803_v44, %v14509_v60 }
 0x3ac   : > { %v4136_v61 = vadd.f32 %v4064_v42, %v3842_v24  ;;  %v1000_v19 = vadd.f32 %v968_v13, %v930_v29  ;;  %v4947_v46 = vsel %vm4275_vm3, %v4945_v55, %v4946_v56  ;;  %v5241_v53 = vsel %vm4275_vm3, %v5239_v7, %v5240_v38  ;;  %v14813_v13 = vld [vmem:[%s16298_s2 + $0xc] ss:$0 sm:$0xff] }
 0x3ad   : > { %v6121_v17 = vrot.slane %v5966_v39, 2  ;;  %v6122_v1 = vrot.slane %v5967_v5, 2  ;;  %v5535_v21 = vsel %vm4275_vm3, %v5533_v4, %v5534_v22  ;;  %17290 = vst [vmem:[#allocation49_spill] sm:$0xff] %v14813_v13  ;;  %v1178_v24 = vmul.f32 %v14813_v13, %v14662_v58  ;;  %v14827_v39 = vld [vmem:[%s16298_s2 + $0xf] ss:$0 sm:$0xff]  ;;  %v14829_v5 = vld [vmem:[#allocation2 + $0x2e0] sm:$0xff] }
 0x3ae   : > { %v4431_v42 = vadd.f32 %v4359_v20, %v4136_v61  ;;  %v1070_v8 = vadd.f32 %v1038_v28, %v1000_v19  ;;  %v5829_v29 = vsel %vm4275_vm3, %v5827_v59, %v5828_v11  ;;  %v6415_v55 = vrot.slane %v14794_v27, 2  ;;  %17291 = vst [vmem:[#allocation108_spill] sm:$0xff] %v14827_v39  ;;  %v14844_v59 = vld [vmem:[%s16298_s2 + $0x1] ss:$0 sm:$0xff] }
 0x3af   : > { %v6554_v56 = vmul.f32 %v14311_v12, %v14674_v51  ;;  %v6555_v20 = vmul.f32 %v14311_v12, %v14708_v18  ;;  %v6416_v38 = vrot.slane %v14798_v48, 2  ;;  %v1248_v22 = vmul.f32 %v14829_v5, %v14827_v39  ;;  %v14837_v12 = vld [vmem:[%s16298_s2 + $0x12] ss:$0 sm:$0xff]  ;;  %17293 = vst [vmem:[#allocation105_spill] sm:$0xff] %v14844_v59  ;;  %v14850_v48 = vld [vmem:[#allocation2 + $0x380] sm:$0xff] }
 0x3b0   : > { %v4725_v7 = vadd.f32 %v4653_v3, %v4431_v42  ;;  %v1140_v4 = vadd.f32 %v1108_v0, %v1070_v8  ;;  %v6123_v28 = vsel %vm4275_vm3, %v6121_v17, %v6122_v1  ;;  %17292 = vst [vmem:[#allocation109_spill] sm:$0xff] %v14837_v12  ;;  %v1318_v3 = vmul.f32 %v14837_v12, %v14539_v34  ;;  %v14855_v0 = vld [vmem:[%s16298_s2 + $0x4] ss:$0 sm:$0xff]  ;;  %v14864_v8 = vld [vmem:[%s16298_s2 + $0x7] ss:$0 sm:$0xff] }
 0x3b1   : > { %v1556_v11 = vmul.f32 %v14844_v59, %v14496_v14  ;;  %v1557_v27 = vmul.f32 %v14844_v59, %v14547_v10  ;;  %17294 = vst [vmem:[#allocation110_spill] sm:$0xff] %v14855_v0  ;;  %v1851_v17 = vmul.f32 %v14855_v0, %v14638_v15  ;;  %v1852_v1 = vmul.f32 %v14855_v0, %v14684_v2 }
 0x3b2   : > { %v5019_v61 = vadd.f32 %v4947_v46, %v4725_v7  ;;  %v1210_v19 = vadd.f32 %v1178_v24, %v1140_v4  ;;  %v6709_v42 = vrot.slane %v6554_v56, 2  ;;  %17295 = vst [vmem:[#allocation102_spill] sm:$0xff] %v14864_v8  ;;  %v2145_v46 = vmul.f32 %v14864_v8, %v14787_v32  ;;  %v14868_v24 = vld [vmem:[#allocation2 + $0x248] sm:$0x3]  ;;  %v14877_v56 = vld [vmem:[%s16298_s2 + $0x15] ss:$0 sm:$0xff] }
 0x3b3   : > { %v2146_v7 = vmul.f32 %v14868_v24, %v14864_v8  ;;  %v2439_v4 = vmul.f32 %v14509_v60, %v17277_v26  ;;  %17296 = vst [vmem:[#allocation36_spill] sm:$0xff] %v14877_v56  ;;  %v1388_v12 = vmul.f32 %v14877_v56, %v14674_v51  ;;  %v2440_v0 = vmul.f32 %v14576_v49, %v17277_v26  ;;  %v14886_v8 = vld [vmem:[%s16298_s2 + $0x18] ss:$0 sm:$0xff] }
 0x3b4   : > { %v5313_v35 = vadd.f32 %v5241_v53, %v5019_v61  ;;  %v1280_v57 = vadd.f32 %v1248_v22, %v1210_v19  ;;  %v6710_v59 = vrot.slane %v6555_v20, 2  ;;  %17297 = vst [vmem:[#allocation30_spill] sm:$0xff] %v14886_v8  ;;  %v1458_v53 = vmul.f32 %v14886_v8, %v14850_v48 }
 0x3b5   : > { %v1713_v22 = vrot.slane %v1556_v11, 1  ;;  %v1714_v61 = vrot.slane %v1557_v27, 1  ;;  %v2007_v13 = vrot.slane %v1851_v17, 1  ;;  %v2008_v44 = vrot.slane %v1852_v1, 1  ;;  %v14909_v1 = vld [vmem:[#allocation2 + $0x2e8] sm:$0x3] }
 0x3b6   : > { %v5607_v19 = vadd.f32 %v5535_v21, %v5313_v35  ;;  %v1350_v39 = vadd.f32 %v1318_v3, %v1280_v57  ;;  %v2301_v9 = vrot.slane %v2145_v46, 1  ;;  %v2302_v56 = vrot.slane %v2146_v7, 1 }
 0x3b7   : > { %v2595_v62 = vrot.slane %v2439_v4, 1  ;;  %v2733_v26 = vmul.f32 %v14662_v58, %v17278_v37  ;;  %v2596_v54 = vrot.slane %v2440_v0, 1  ;;  %v2734_v45 = vmul.f32 %v14704_v47, %v17278_v37 }
 0x3b8   : > { %v5901_v20 = vadd.f32 %v5829_v29, %v5607_v19  ;;  %v1420_v43 = vadd.f32 %v1388_v12, %v1350_v39  ;;  %v14896_v11 = vmul.f32 %v14527_v33, %v14708_v18  ;;  %v3616_v57 = vmul.f32 %v14240_v63, %v14708_v18  ;;  %v14903_v29 = vld [vmem:[#allocation2 + $0x388] sm:$0x3] }
 0x3b9   : > { %v6417_v35 = vsel %vm4275_vm3, %v6415_v55, %v6416_v38  ;;  %v1715_v21 = vsel %vm1628_vm2, %v1713_v22, %v1714_v61  ;;  %v6711_v27 = vsel %vm4275_vm3, %v6709_v42, %v6710_v59  ;;  %17298 = vst [vmem:[#allocation74_spill] sm:$0xff] %v14903_v29  ;;  %v2009_v12 = vsel %vm1628_vm2, %v2007_v13, %v2008_v44 }
 0x3ba   : > { %v6195_v3 = vadd.f32 %v6123_v28, %v5901_v20  ;;  %v1490_v39 = vadd.f32 %v1458_v53, %v1420_v43  ;;  %v2303_v37 = vsel %vm1628_vm2, %v2301_v9, %v2302_v56  ;;  %v2889_v0 = vrot.slane %v2733_v26, 1  ;;  %v14919_v9 = vld [vmem:[%s16298_s2 + $0x16] ss:$0 sm:$0xff] }
 0x3bb   : > { %v3027_v17 = vmul.f32 %v14829_v5, %v14369_v41  ;;  %v3028_v63 = vmul.f32 %v14909_v1, %v14369_v41  ;;  %v2597_v28 = vsel %vm1628_vm2, %v2595_v62, %v2596_v54  ;;  %v2890_v59 = vrot.slane %v2734_v45, 1  ;;  %17299 = vst [vmem:[#allocation82_spill] sm:$0xff] %v14919_v9 }
 0x3bc   : > { %v6489_v55 = vadd.f32 %v6417_v35, %v6195_v3  ;;  %v1785_v38 = vadd.f32 %v1715_v21, %v1490_v39  ;;  %v3321_v43 = vmul.f32 %v14527_v33, %v14539_v34  ;;  %v3615_v44 = vmul.f32 %v14919_v9, %v14674_v51 }
 0x3bd   : > { %v3909_v13 = vmul.f32 %v14390_v30, %v14850_v48  ;;  %v3910_v41 = vmul.f32 %v14390_v30, %v14903_v29  ;;  %v4203_v45 = vmul.f32 %v14496_v14, %v14400_v6  ;;  %v4204_v62 = vmul.f32 %v14547_v10, %v14400_v6 }
 0x3be   : > { %v14927_v42 = vadd.f32 %v6711_v27, %v6489_v55  ;;  %v2079_v54 = vadd.f32 %v2009_v12, %v1785_v38  ;;  %v3183_v46 = vrot.slane %v3027_v17, 1  ;;  %v3184_v7 = vrot.slane %v3028_v63, 1 }
 0x3bf   : > { %v4498_v4 = vmul.f32 %v14638_v15, %v17280_v25  ;;  %v4499_v56 = vmul.f32 %v14684_v2, %v17280_v25  ;;  %v3772_v53 = vrot.slane %v3616_v57, 1  ;;  %v2891_v61 = vsel %vm1628_vm2, %v2889_v0, %v2890_v59 }
 0x3c0   : > { %17300 = vst [vmem:[#allocation68_spill] sm:$0xff] %v14927_v42  ;;  %v6869_v30 = vsel %vm586_vm0, %v14927_v42, 0.0  ;;  %v2373_v22 = vadd.f32 %v2303_v37, %v2079_v54  ;;  %v3477_v14 = vrot.slane %v3321_v43, 1  ;;  %v3771_v19 = vrot.slane %v3615_v44, 1 }
 0x3c1   : > { %6870 = vadd.xlane.f32.xlu1 %v6869_v30  ;;  %v4065_v26 = vrot.slane %v3909_v13, 1  ;;  %v4066_v6 = vrot.slane %v3910_v41, 1  ;;  %v4360_v20 = vrot.slane %v4203_v45, 2  ;;  %v4361_v35 = vrot.slane %v4204_v62, 2 }
 0x3c2   : > { %v2667_v10 = vadd.f32 %v2597_v28, %v2373_v22  ;;  %v4792_v21 = vmul.f32 %v14787_v32, %v17282_v36  ;;  %v3185_v25 = vsel %vm1628_vm2, %v3183_v46, %v3184_v7  ;;  %v4654_v57 = vrot.slane %v4498_v4, 2  ;;  %v17302_v7 = vld [vmem:[#allocation92_spill] sm:$0xff]  ;;  %v17304_v22 = vld [vmem:[#allocation38_spill] sm:$0xff] }
 0x3c3   : > { %v4655_v3 = vrot.slane %v4499_v56, 2  ;;  %v4793_v27 = vmul.f32 %v14868_v24, %v17282_v36  ;;  %v14947_v12 = vmul.f32 %v14919_v9, %v14903_v29  ;;  %v5086_v37 = vmul.f32 %v14509_v60, %v17285_v52 }
 0x3c4   : > { %v2961_v39 = vadd.f32 %v2891_v61, %v2667_v10  ;;  %v5087_v0 = vmul.f32 %v14576_v49, %v17285_v52  ;;  %v17301_v17 = vrot.slane %v17281_v23, 1  ;;  %v3773_v55 = vsel %vm1628_vm2, %v3771_v19, %v3772_v53  ;;  %v17303_v53 = vld [vmem:[#allocation18_spill] sm:$0xff]  ;;  %v14977_v61 = vld [vmem:[#allocation2 + $0x250] sm:$0xff] }
 0x3c5   : > { %v5380_v36 = vmul.f32 %v14662_v58, %v14449_v16  ;;  %v5381_v38 = vmul.f32 %v14704_v47, %v14449_v16  ;;  %v4067_v59 = vsel %vm1628_vm2, %v4065_v26, %v4066_v6  ;;  %v4362_v60 = vsel %vm4275_vm3, %v4360_v20, %v4361_v35 }
 0x3c6   : > { %v3479_v63 = vsel %vm1628_vm2, %v3477_v14, %v17301_v17  ;;  %v3255_v28 = vadd.f32 %v3185_v25, %v2961_v39  ;;  %v4948_v43 = vrot.slane %v4792_v21, 2  ;;  %v4656_v49 = vsel %vm4275_vm3, %v4654_v57, %v4655_v3  ;;  %v17305_v14 = vld [vmem:[#allocation99_spill] sm:$0xff] }
 0x3c7   : > { %v4949_v52 = vrot.slane %v4793_v27, 2  ;;  %v5674_v23 = vmul.f32 %v14829_v5, %v14459_v50  ;;  %v5675_v44 = vmul.f32 %v14909_v1, %v14459_v50  ;;  %v5242_v41 = vrot.slane %v5086_v37, 2  ;;  %v14993_v37 = vld [vmem:[%s16298_s2 + $0x1a] ss:$0 sm:$0xff] }
 0x3c8   : > { %v3549_v13 = vadd.f32 %v3479_v63, %v3255_v28  ;;  %v5243_v54 = vrot.slane %v5087_v0, 2  ;;  %v899_v16 = vmul.f32 %v14761_v40, %v14638_v15  ;;  %v5536_v45 = vrot.slane %v5380_v36, 2  ;;  %17308 = vst [vmem:[#allocation92_spill] sm:$0xff] %v14993_v37  ;;  %v17309_v36 = vld [vmem:[#allocation49_spill] sm:$0xff] }
 0x3c9   : > { %v5537_v62 = vrot.slane %v5381_v38, 2  ;;  %v5968_v46 = vmul.f32 %v14469_v31, %v14539_v34  ;;  %v969_v4 = vmul.f32 %v14787_v32, %v17302_v7  ;;  %v5969_v30 = vmul.f32 %v14469_v31, %v17303_v53  ;;  %v17306_v34 = vld [vmem:[#allocation112_spill] sm:$0xff] }
 0x3ca   : > { %v3843_v56 = vadd.f32 %v3773_v55, %v3549_v13  ;;  %v931_v50 = vadd.f32 %v17304_v22, %v899_v16  ;;  %v1039_v19 = vmul.f32 %v14977_v61, %v17305_v14  ;;  %v4950_v26 = vsel %vm4275_vm3, %v4948_v43, %v4949_v52  ;;  %v17307_v31 = vld [vmem:[#allocation96_spill] sm:$0xff]  ;;  %v15002_v52 = vld [vmem:[#allocation2 + $0x2f0] sm:$0xff] }
 0x3cb   : > { %v5830_v6 = vrot.slane %v5674_v23, 2  ;;  %v5831_v10 = vrot.slane %v5675_v44, 2  ;;  %v6262_v20 = vmul.f32 %v17306_v34, %v14674_v51  ;;  %v5244_v21 = vsel %vm4275_vm3, %v5242_v41, %v5243_v54  ;;  %v17310_v23 = vld [vmem:[#allocation108_spill] sm:$0xff] }
 0x3cc   : > { %v4137_v35 = vadd.f32 %v4067_v59, %v3843_v56  ;;  %v1001_v25 = vadd.f32 %v969_v4, %v931_v50  ;;  %v1109_v57 = vmul.f32 %v17307_v31, %v14662_v58  ;;  %v5538_v3 = vsel %vm4275_vm3, %v5536_v45, %v5537_v62 }
 0x3cd   : > { %v6124_v27 = vrot.slane %v5968_v46, 2  ;;  %v6263_v39 = vmul.f32 %v17306_v34, %v14708_v18  ;;  %v6556_v0 = vmul.f32 %v14993_v37, %v14850_v48  ;;  %v6125_v63 = vrot.slane %v5969_v30, 2  ;;  %v17312_v46 = vld [vmem:[#allocation110_spill] sm:$0xff] }
 0x3ce   : > { %v4432_v17 = vadd.f32 %v4362_v60, %v4137_v35  ;;  %v1071_v55 = vadd.f32 %v1039_v19, %v1001_v25  ;;  %v1179_v38 = vmul.f32 %v14829_v5, %v17309_v36  ;;  %v5832_v28 = vsel %vm4275_vm3, %v5830_v6, %v5831_v10  ;;  %v17311_v60 = vld [vmem:[#allocation105_spill] sm:$0xff]  ;;  %v17314_v10 = vld [vmem:[#allocation36_spill] sm:$0xff]  ;;  %v15021_v25 = vld [vmem:[#allocation2 + $0x258] sm:$0x3] }
 0x3cf   : > { %v6418_v59 = vrot.slane %v6262_v20, 2  ;;  %v6557_v43 = vmul.f32 %v14993_v37, %v14903_v29  ;;  %v1249_v44 = vmul.f32 %v15002_v52, %v17310_v23  ;;  %v1558_v54 = vmul.f32 %v17311_v60, %v14638_v15  ;;  %v17315_v20 = vld [vmem:[#allocation102_spill] sm:$0xff] }
 0x3d0   : > { %v4726_v13 = vadd.f32 %v4656_v49, %v4432_v17  ;;  %v1141_v41 = vadd.f32 %v1109_v57, %v1071_v55  ;;  %v1559_v16 = vmul.f32 %v17311_v60, %v14684_v2  ;;  %v6419_v45 = vrot.slane %v6263_v39, 2  ;;  %v17313_v49 = vld [vmem:[#allocation109_spill] sm:$0xff] }
 0x3d1   : > { %v6712_v62 = vrot.slane %v6556_v0, 2  ;;  %v1853_v4 = vmul.f32 %v17312_v46, %v14787_v32  ;;  %v1854_v56 = vmul.f32 %v14868_v24, %v17312_v46  ;;  %v6126_v30 = vsel %vm4275_vm3, %v6124_v27, %v6125_v63  ;;  %v15025_v17 = vld [vmem:[#allocation2 + $0x390] sm:$0xff] }
 0x3d2   : > { %v5020_v53 = vadd.f32 %v4950_v26, %v4726_v13  ;;  %v1211_v50 = vadd.f32 %v1179_v38, %v1141_v41  ;;  %v1319_v19 = vmul.f32 %v17313_v49, %v14674_v51  ;;  %v6713_v6 = vrot.slane %v6557_v43, 2  ;;  %v15030_v38 = vld [vmem:[%s16298_s2 + $0xa] ss:$0 sm:$0xff] }
 0x3d3   : > { %v1389_v34 = vmul.f32 %v17314_v10, %v14850_v48  ;;  %v2147_v35 = vmul.f32 %v14977_v61, %v17315_v20  ;;  %v2148_v57 = vmul.f32 %v15021_v25, %v17315_v20  ;;  %v1716_v0 = vrot.slane %v1558_v54, 1  ;;  %17316 = vst [vmem:[#allocation18_spill] sm:$0xff] %v15030_v38 }
 0x3d4   : > { %v5314_v39 = vadd.f32 %v5244_v21, %v5020_v53  ;;  %v1281_v26 = vadd.f32 %v1249_v44, %v1211_v50  ;;  %v1717_v27 = vrot.slane %v1559_v16, 1  ;;  %v2010_v63 = vrot.slane %v1853_v4, 1 }
 0x3d5   : > { %v2011_v55 = vrot.slane %v1854_v56, 1  ;;  %v2441_v43 = vmul.f32 %v15030_v38, %v14662_v58  ;;  %v2442_v13 = vmul.f32 %v15030_v38, %v14704_v47  ;;  %v6420_v21 = vsel %vm4275_vm3, %v6418_v59, %v6419_v45  ;;  %v15043_v56 = vld [vmem:[%s16298_s2 + $0xd] ss:$0 sm:$0xff] }
 0x3d6   : > { %v5608_v41 = vadd.f32 %v5538_v3, %v5314_v39  ;;  %v1351_v44 = vadd.f32 %v1319_v19, %v1281_v26  ;;  %v1459_v54 = vmul.f32 %v14886_v8, %v15025_v17  ;;  %v6714_v16 = vsel %vm4275_vm3, %v6712_v62, %v6713_v6  ;;  %17317 = vst [vmem:[#allocation38_spill] sm:$0xff] %v15043_v56 }
 0x3d7   : > { %v2304_v4 = vrot.slane %v2147_v35, 1  ;;  %v2735_v53 = vmul.f32 %v15043_v56, %v14829_v5  ;;  %v2736_v3 = vmul.f32 %v15043_v56, %v14909_v1  ;;  %v1718_v45 = vsel %vm1628_vm2, %v1716_v0, %v1717_v27  ;;  %v15054_v35 = vld [vmem:[%s16298_s2 + $0x10] ss:$0 sm:$0xff]  ;;  %v15058_v56 = vld [vmem:[#allocation2 + $0x2f8] sm:$0x3] }
 0x3d8   : > { %v5902_v50 = vadd.f32 %v5832_v28, %v5608_v41  ;;  %v1421_v59 = vadd.f32 %v1389_v34, %v1351_v44  ;;  %v2305_v19 = vrot.slane %v2148_v57, 1  ;;  %v2012_v39 = vsel %vm1628_vm2, %v2010_v63, %v2011_v55  ;;  %17318 = vst [vmem:[#allocation99_spill] sm:$0xff] %v15054_v35  ;;  %v15064_v57 = vld [vmem:[#allocation2 + $0x398] sm:$0x3] }
 0x3d9   : > { %v2598_v62 = vrot.slane %v2441_v43, 1  ;;  %v2599_v6 = vrot.slane %v2442_v13, 1  ;;  %v3029_v26 = vmul.f32 %v15054_v35, %v15002_v52  ;;  %v3030_v28 = vmul.f32 %v15058_v56, %v15054_v35  ;;  %17319 = vst [vmem:[#allocation112_spill] sm:$0xff] %v15064_v57 }
 0x3da   : > { %v6196_v42 = vadd.f32 %v6126_v30, %v5902_v50  ;;  %v1491_v38 = vadd.f32 %v1459_v54, %v1421_v59  ;;  %v3323_v34 = vmul.f32 %v14527_v33, %v14674_v51  ;;  %v2892_v0 = vrot.slane %v2735_v53, 1  ;;  %v15071_v30 = vld [vmem:[%s16298_s2 + $0x19] ss:$0 sm:$0xff] }
 0x3db   : > { %v2893_v27 = vrot.slane %v2736_v3, 1  ;;  %v3617_v63 = vmul.f32 %v14919_v9, %v14850_v48  ;;  %v3911_v55 = vmul.f32 %v15071_v30, %v15025_v17  ;;  %v3481_v43 = vrot.slane %v14896_v11, 1 }
 0x3dc   : > { %v6490_v13 = vadd.f32 %v6420_v21, %v6196_v42  ;;  %v1786_v41 = vadd.f32 %v1718_v45, %v1491_v38  ;;  %v3912_v44 = vmul.f32 %v15071_v30, %v15064_v57  ;;  %v15080_v54 = vmul.f32 %v14527_v33, %v14903_v29 }
 0x3dd   : > { %v3775_v53 = vrot.slane %v14947_v12, 1  ;;  %v2306_v3 = vsel %vm1628_vm2, %v2304_v4, %v2305_v19  ;;  %v3186_v50 = vrot.slane %v3029_v26, 1  ;;  %v3187_v9 = vrot.slane %v3030_v28, 1  ;;  %v15093_v12 = vld [vmem:[%s16298_s2 + $0x2] ss:$0 sm:$0xff] }
 0x3de   : > { %17320 = vst [vmem:[#allocation113_spill] sm:$0xff] %v15080_v54  ;;  %v15084_v59 = vadd.f32 %v6714_v16, %v6490_v13  ;;  %v2080_v35 = vadd.f32 %v2012_v39, %v1786_v41  ;;  %v3480_v20 = vrot.slane %v3323_v34, 1  ;;  %v2600_v11 = vsel %vm1628_vm2, %v2598_v62, %v2599_v6  ;;  %v15102_v19 = vld [vmem:[%s16298_s2 + $0x5] ss:$0 sm:$0xff]  ;;  %v15111_v6 = vld [vmem:[%s16298_s2 + $0x8] ss:$0 sm:$0xff] }
 0x3df   : > { %v2894_v42 = vsel %vm1628_vm2, %v2892_v0, %v2893_v27  ;;  %v3774_v38 = vrot.slane %v3617_v63, 1  ;;  %v4068_v21 = vrot.slane %v3911_v55, 1  ;;  %v4069_v54 = vrot.slane %v3912_v44, 1  ;;  %v15123_v0 = vld [vmem:[%s16298_s2 + $0xb] ss:$0 sm:$0xff] }
 0x3e0   : > { %17321 = vst [vmem:[#allocation114_spill] sm:$0xff] %v15084_v59  ;;  %v6872_v33 = vsel %vm586_vm0, %v15084_v59, 0.0  ;;  %v2374_v45 = vadd.f32 %v2306_v3, %v2080_v35  ;;  %v4205_v16 = vmul.f32 %v15093_v12, %v14638_v15  ;;  %v4206_v4 = vmul.f32 %v15093_v12, %v14684_v2 }
 0x3e1   : > { %6873 = vadd.xlane.f32.xlu0 %v6872_v33  ;;  %v4500_v39 = vmul.f32 %v15102_v19, %v14787_v32  ;;  %v4501_v62 = vmul.f32 %v15102_v19, %v14868_v24  ;;  %v4794_v15 = vmul.f32 %v15111_v6, %v14977_v61  ;;  %v3188_v35 = vsel %vm1628_vm2, %v3186_v50, %v3187_v9  ;;  %v15132_v9 = vld [vmem:[%s16298_s2 + $0xe] ss:$0 sm:$0xff] }
 0x3e2   : > { %v2668_v2 = vadd.f32 %v2600_v11, %v2374_v45  ;;  %v3482_v26 = vsel %vm1628_vm2, %v3480_v20, %v3481_v43  ;;  %v4795_v28 = vmul.f32 %v15111_v6, %v15021_v25  ;;  %v3776_v34 = vsel %vm1628_vm2, %v3774_v38, %v3775_v53  ;;  %v15142_v11 = vld [vmem:[%s16298_s2 + $0x11] ss:$0 sm:$0xff] }
 0x3e3   : > { %v5088_v27 = vmul.f32 %v15123_v0, %v14662_v58  ;;  %v5089_v63 = vmul.f32 %v15123_v0, %v14704_v47  ;;  %v5382_v20 = vmul.f32 %v15132_v9, %v14829_v5  ;;  %v4070_v43 = vsel %vm1628_vm2, %v4068_v21, %v4069_v54 }
 0x3e4   : > { %v2962_v55 = vadd.f32 %v2894_v42, %v2668_v2  ;;  %v4363_v13 = vrot.slane %v4205_v16, 2  ;;  %v5383_v41 = vmul.f32 %v15132_v9, %v14909_v1  ;;  %v4364_v44 = vrot.slane %v4206_v4, 2 }
 0x3e5   : > { %v4657_v58 = vrot.slane %v4500_v39, 2  ;;  %v4658_v53 = vrot.slane %v4501_v62, 2  ;;  %v4951_v3 = vrot.slane %v4794_v15, 2  ;;  %v4952_v50 = vrot.slane %v4795_v28, 2  ;;  %v15153_v39 = vld [vmem:[%s16298_s2 + $0x14] ss:$0 sm:$0xff] }
 0x3e6   : > { %v3256_v47 = vadd.f32 %v3188_v35, %v2962_v55  ;;  %v5676_v42 = vmul.f32 %v15142_v11, %v15002_v52  ;;  %v5677_v54 = vmul.f32 %v15142_v11, %v15058_v56  ;;  %v5245_v38 = vrot.slane %v5088_v27, 2 }
 0x3e7   : > { %v5246_v21 = vrot.slane %v5089_v63, 2  ;;  %v5539_v33 = vrot.slane %v5382_v20, 2  ;;  %v900_v45 = vmul.f32 %v14787_v32, %v14761_v40  ;;  %v5540_v4 = vrot.slane %v5383_v41, 2 }
 0x3e8   : > { %v3550_v16 = vadd.f32 %v3482_v26, %v3256_v47  ;;  %v15157_v62 = vmul.f32 %v15153_v39, %v14674_v51  ;;  %v970_v15 = vmul.f32 %v14977_v61, %v17302_v7  ;;  %v4365_v2 = vsel %vm4275_vm3, %v4363_v13, %v4364_v44  ;;  %v15164_v26 = vld [vmem:[#allocation2 + $0x260] sm:$0xff]  ;;  %v15174_v13 = vld [vmem:[%s16298_s2 + $0x17] ss:$0 sm:$0xff] }
 0x3e9   : > { %v4659_v35 = vsel %vm4275_vm3, %v4657_v58, %v4658_v53  ;;  %v932_v28 = vadd.f32 %v17304_v22, %v900_v45  ;;  %v1040_v27 = vmul.f32 %v15164_v26, %v17305_v14  ;;  %v5833_v20 = vrot.slane %v5676_v42, 2  ;;  %17322 = vst [vmem:[#allocation115_spill] sm:$0xff] %v15174_v13 }
 0x3ea   : > { %v3844_v63 = vadd.f32 %v3776_v34, %v3550_v16  ;;  %v5834_v55 = vrot.slane %v5677_v54, 2  ;;  %v5971_v51 = vmul.f32 %v15153_v39, %v14708_v18  ;;  %v4953_v41 = vsel %vm4275_vm3, %v4951_v3, %v4952_v50 }
 0x3eb   : > { %v6264_v44 = vmul.f32 %v15174_v13, %v14850_v48  ;;  %v1002_v58 = vadd.f32 %v970_v15, %v932_v28  ;;  %v1110_v53 = vmul.f32 %v14829_v5, %v17307_v31  ;;  %v5247_v47 = vsel %vm4275_vm3, %v5245_v38, %v5246_v21  ;;  %v15233_v31 = vld [vmem:[#allocation2 + $0x3a8] sm:$0x3] }
 0x3ec   : > { %v4138_v34 = vadd.f32 %v4070_v43, %v3844_v63  ;;  %v5541_v42 = vsel %vm4275_vm3, %v5539_v33, %v5540_v4  ;;  %v6127_v18 = vrot.slane %v15157_v62, 2  ;;  %v6265_v3 = vmul.f32 %v15174_v13, %v14903_v29  ;;  %v15192_v33 = vld [vmem:[#allocation2 + $0x3a0] sm:$0xff] }
 0x3ed   : > { %v6558_v50 = vmul.f32 %v14993_v37, %v15025_v17  ;;  %v1072_v54 = vadd.f32 %v1040_v27, %v1002_v58  ;;  %v1180_v45 = vmul.f32 %v15002_v52, %v17309_v36  ;;  %v5835_v15 = vsel %vm4275_vm3, %v5833_v20, %v5834_v55  ;;  %v15194_v62 = vld [vmem:[#allocation2 + $0x300] sm:$0xff] }
 0x3ee   : > { %v4433_v16 = vadd.f32 %v4365_v2, %v4138_v34  ;;  %v6128_v43 = vrot.slane %v5971_v51, 2  ;;  %v6559_v38 = vmul.f32 %v14993_v37, %v15064_v57  ;;  %v6421_v21 = vrot.slane %v6264_v44, 2  ;;  %v17327_v29 = vld [vmem:[#allocation99_spill] sm:$0xff] }
 0x3ef   : > { %v1142_v4 = vadd.f32 %v1110_v53, %v1072_v54  ;;  %v1250_v28 = vmul.f32 %v15194_v62, %v17310_v23  ;;  %v1560_v27 = vmul.f32 %v17311_v60, %v14787_v32  ;;  %v1561_v2 = vmul.f32 %v14868_v24, %v17311_v60  ;;  %v17323_v23 = vld [vmem:[#allocation102_spill] sm:$0xff] }
 0x3f0   : > { %v4727_v63 = vadd.f32 %v4659_v35, %v4433_v16  ;;  %v1855_v20 = vmul.f32 %v14977_v61, %v17312_v46  ;;  %v1856_v55 = vmul.f32 %v15021_v25, %v17312_v46  ;;  %v6422_v51 = vrot.slane %v6265_v3, 2  ;;  %v15214_v46 = vld [vmem:[#allocation2 + $0x268] sm:$0x3] }
 0x3f1   : > { %v6715_v44 = vrot.slane %v6558_v50, 2  ;;  %v1212_v58 = vadd.f32 %v1180_v45, %v1142_v4  ;;  %v1320_v53 = vmul.f32 %v17313_v49, %v14850_v48  ;;  %v6716_v54 = vrot.slane %v6559_v38, 2 }
 0x3f2   : > { %v5021_v34 = vadd.f32 %v4953_v41, %v4727_v63  ;;  %v1390_v35 = vmul.f32 %v17314_v10, %v15025_v17  ;;  %v1460_v16 = vmul.f32 %v14886_v8, %v15192_v33  ;;  %v1719_v60 = vrot.slane %v1560_v27, 1  ;;  %v17324_v63 = vld [vmem:[#allocation18_spill] sm:$0xff] }
 0x3f3   : > { %v1282_v59 = vadd.f32 %v1250_v28, %v1212_v58  ;;  %v2149_v37 = vmul.f32 %v15164_v26, %v17323_v23  ;;  %v2150_v3 = vmul.f32 %v15214_v46, %v17323_v23  ;;  %v1720_v45 = vrot.slane %v1561_v2, 1  ;;  %v17325_v27 = vld [vmem:[#allocation38_spill] sm:$0xff] }
 0x3f4   : > { %v5315_v50 = vadd.f32 %v5247_v47, %v5021_v34  ;;  %v2013_v41 = vrot.slane %v1855_v20, 1  ;;  %v2014_v38 = vrot.slane %v1856_v55, 1  ;;  %v2443_v10 = vmul.f32 %v17324_v63, %v14829_v5  ;;  %v17326_v8 = vld [vmem:[#allocation82_spill] sm:$0xff] }
 0x3f5   : > { %v1352_v4 = vadd.f32 %v1320_v53, %v1282_v59  ;;  %v2444_v28 = vmul.f32 %v17324_v63, %v14909_v1  ;;  %v2737_v58 = vmul.f32 %v17325_v27, %v15002_v52  ;;  %v3620_v49 = vmul.f32 %v17326_v8, %v15064_v57 }
 0x3f6   : > { %v5609_v36 = vadd.f32 %v5541_v42, %v5315_v50  ;;  %v6129_v23 = vsel %vm4275_vm3, %v6127_v18, %v6128_v43  ;;  %v2738_v47 = vmul.f32 %v15058_v56, %v17325_v27  ;;  %v6423_v59 = vsel %vm4275_vm3, %v6421_v21, %v6422_v51  ;;  %v15237_v51 = vld [vmem:[#allocation2 + $0x308] sm:$0x3] }
 0x3f7   : > { %v6717_v2 = vsel %vm4275_vm3, %v6715_v44, %v6716_v54  ;;  %v1422_v20 = vadd.f32 %v1390_v35, %v1352_v4  ;;  %v2307_v55 = vrot.slane %v2149_v37, 1  ;;  %v1721_v34 = vsel %vm1628_vm2, %v1719_v60, %v1720_v45  ;;  %v15244_v60 = vld [vmem:[%s16298_s2 + $0x13] ss:$0 sm:$0xff]  ;;  %v15252_v44 = vld [vmem:[#allocation2 + $0x318] sm:$0x3] }
 0x3f8   : > { %v5903_v53 = vadd.f32 %v5835_v15, %v5609_v36  ;;  %v2015_v63 = vsel %vm1628_vm2, %v2013_v41, %v2014_v38  ;;  %v2308_v13 = vrot.slane %v2150_v3, 1  ;;  %v2601_v50 = vrot.slane %v2443_v10, 1  ;;  %v17328_v45 = vld [vmem:[#allocation113_spill] sm:$0xff] }
 0x3f9   : > { %v1492_v42 = vadd.f32 %v1460_v16, %v1422_v20  ;;  %v2602_v18 = vrot.slane %v2444_v28, 1  ;;  %v2895_v43 = vrot.slane %v2737_v58, 1  ;;  %v2896_v27 = vrot.slane %v2738_v47, 1 }
 0x3fa   : > { %v6197_v57 = vadd.f32 %v6129_v23, %v5903_v53  ;;  %v3031_v21 = vmul.f32 %v15194_v62, %v17327_v29  ;;  %v3032_v37 = vmul.f32 %v15237_v51, %v17327_v29  ;;  %v3325_v10 = vmul.f32 %v15244_v60, %v14850_v48 }
 0x3fb   : > { %v1787_v36 = vadd.f32 %v1721_v34, %v1492_v42  ;;  %v3619_v23 = vmul.f32 %v17326_v8, %v15025_v17  ;;  %v3913_v15 = vmul.f32 %v15071_v30, %v15192_v33  ;;  %v15256_v54 = vmul.f32 %v15252_v44, %v17327_v29 }
 0x3fc   : > { %v6491_v35 = vadd.f32 %v6423_v59, %v6197_v57  ;;  %v2309_v16 = vsel %vm1628_vm2, %v2307_v55, %v2308_v13  ;;  %v3914_v3 = vmul.f32 %v15071_v30, %v15233_v31  ;;  %v3484_v41 = vrot.slane %v17328_v45, 1  ;;  %v15266_v13 = vpop.xlane.xlu0 %6789 }
 0x3fd   : > { %v3778_v38 = vrot.slane %v3620_v49, 1  ;;  %v2081_v4 = vadd.f32 %v2015_v63, %v1787_v36  ;;  %v2603_v28 = vsel %vm1628_vm2, %v2601_v50, %v2602_v18  ;;  %v2897_v47 = vsel %vm1628_vm2, %v2895_v43, %v2896_v27 }
 0x3fe   : > { %v15263_v58 = vadd.f32 %v6717_v2, %v6491_v35  ;;  %v3189_v20 = vrot.slane %v3031_v21, 1  ;;  %v3190_v53 = vrot.slane %v3032_v37, 1  ;;  %v3483_v34 = vrot.slane %v3325_v10, 1 }
 0x3ff   : > { %v2375_v29 = vadd.f32 %v2309_v16, %v2081_v4  ;;  %v3777_v57 = vrot.slane %v3619_v23, 1  ;;  %v4071_v59 = vrot.slane %v3913_v15, 1  ;;  %v4072_v42 = vrot.slane %v3914_v3, 1 }
 0x400   : > { %17329 = vst [vmem:[#allocation82_spill] sm:$0xff] %v15263_v58  ;;  %v6875_v55 = vsel %vm586_vm0, %v15263_v58, 0.0  ;;  %v4207_v49 = vmul.f32 %v15093_v12, %v14787_v32  ;;  %v4208_v63 = vmul.f32 %v15093_v12, %v14868_v24  ;;  %v4502_v2 = vmul.f32 %v15102_v19, %v14977_v61 }
 0x401   : > { %6876 = vadd.xlane.f32.xlu1 %v6875_v55  ;;  %v2669_v27 = vadd.f32 %v2603_v28, %v2375_v29  ;;  %v4503_v50 = vmul.f32 %v15102_v19, %v15021_v25  ;;  %v4796_v18 = vmul.f32 %v15164_v26, %v15111_v6  ;;  %v3191_v43 = vsel %vm1628_vm2, %v3189_v20, %v3190_v53 }
 0x402   : > { %v4797_v21 = vmul.f32 %v15214_v46, %v15111_v6  ;;  %v5090_v32 = vmul.f32 %v15123_v0, %v14829_v5  ;;  %v5091_v24 = vmul.f32 %v15123_v0, %v14909_v1  ;;  %v3485_v36 = vsel %vm1628_vm2, %v3483_v34, %v3484_v41  ;;  %v15294_v1 = vpop.xlane.xlu0 %6792 }
 0x403   : > { %v2963_v37 = vadd.f32 %v2897_v47, %v2669_v27  ;;  %v3779_v10 = vsel %vm1628_vm2, %v3777_v57, %v3778_v38  ;;  %v5384_v23 = vmul.f32 %v15132_v9, %v15002_v52  ;;  %v4073_v15 = vsel %vm1628_vm2, %v4071_v59, %v4072_v42  ;;  %17330 = vst [vmem:[#allocation99_spill] sm:$0xff] %v15294_v1  ;;  %v17343_v1 = vld [vmem:[#allocation30_spill] sm:$0xff] }
 0x404   : > { %v4366_v35 = vrot.slane %v4207_v49, 2  ;;  %v4367_v16 = vrot.slane %v4208_v63, 2  ;;  %v5385_v3 = vmul.f32 %v15132_v9, %v15058_v56  ;;  %v4660_v5 = vrot.slane %v4502_v2, 2  ;;  %v15305_v49 = vld [vmem:[#allocation2 + $0x270] sm:$0xff] }
 0x405   : > { %v3257_v45 = vadd.f32 %v3191_v43, %v2963_v37  ;;  %v4661_v4 = vrot.slane %v4503_v50, 2  ;;  %v4954_v28 = vrot.slane %v4796_v18, 2  ;;  %v4955_v47 = vrot.slane %v4797_v21, 2  ;;  %v17331_v18 = vld [vmem:[#allocation74_spill] sm:$0xff] }
 0x406   : > { %v5248_v41 = vrot.slane %v5090_v32, 2  ;;  %v5249_v20 = vrot.slane %v5091_v24, 2  ;;  %v901_v38 = vmul.f32 %v14977_v61, %v14761_v40  ;;  %v5542_v29 = vrot.slane %v5384_v23, 2  ;;  %v15321_v23 = vpop.xlane.xlu0 %6801 }
 0x407   : > { %v3551_v53 = vadd.f32 %v3485_v36, %v3257_v45  ;;  %v5678_v34 = vmul.f32 %v15194_v62, %v15142_v11  ;;  %v971_v57 = vmul.f32 %v15164_v26, %v17302_v7  ;;  %v5543_v59 = vrot.slane %v5385_v3, 2  ;;  %v17333_v36 = vld [vmem:[#allocation115_spill] sm:$0xff]  ;;  %v17334_v3 = vld [vmem:[#allocation49_spill] sm:$0xff] }
 0x408   : > { %v5679_v55 = vmul.f32 %v15237_v51, %v15142_v11  ;;  %v933_v42 = vadd.f32 %v17304_v22, %v901_v38  ;;  %v1041_v63 = vmul.f32 %v15305_v49, %v17305_v14  ;;  %v4368_v27 = vsel %vm4275_vm3, %v4366_v35, %v4367_v16  ;;  %v17332_v22 = vld [vmem:[#allocation96_spill] sm:$0xff] }
 0x409   : > { %v3845_v40 = vadd.f32 %v3779_v10, %v3551_v53  ;;  %v4662_v2 = vsel %vm4275_vm3, %v4660_v5, %v4661_v4  ;;  %v5972_v50 = vmul.f32 %v15153_v39, %v14850_v48  ;;  %v4956_v7 = vsel %vm4275_vm3, %v4954_v28, %v4955_v47  ;;  %v17335_v28 = vld [vmem:[#allocation112_spill] sm:$0xff] }
 0x40a   : > { %v5973_v43 = vmul.f32 %v15153_v39, %v17331_v18  ;;  %v1003_v21 = vadd.f32 %v971_v57, %v933_v42  ;;  %v1111_v32 = vmul.f32 %v15002_v52, %v17332_v22  ;;  %v5250_v14 = vsel %vm4275_vm3, %v5248_v41, %v5249_v20  ;;  %v17336_v47 = vld [vmem:[#allocation92_spill] sm:$0xff]  ;;  %v17338_v42 = vld [vmem:[#allocation105_spill] sm:$0xff] }
 0x40b   : > { %v4139_v24 = vadd.f32 %v4073_v15, %v3845_v40  ;;  %v5836_v37 = vrot.slane %v5678_v34, 2  ;;  %v6266_v10 = vmul.f32 %v17333_v36, %v15025_v17  ;;  %v5544_v48 = vsel %vm4275_vm3, %v5542_v29, %v5543_v59  ;;  %v15332_v34 = vld [vmem:[#allocation2 + $0x310] sm:$0xff]  ;;  %v17337_v29 = vld [vmem:[#allocation108_spill] sm:$0xff] }
 0x40c   : > { %v5837_v35 = vrot.slane %v5679_v55, 2  ;;  %v1073_v16 = vadd.f32 %v1041_v63, %v1003_v21  ;;  %v1181_v45 = vmul.f32 %v15194_v62, %v17334_v3  ;;  %v6130_v4 = vrot.slane %v5972_v50, 2  ;;  %v17339_v18 = vld [vmem:[#allocation109_spill] sm:$0xff]  ;;  %v17340_v21 = vld [vmem:[#allocation110_spill] sm:$0xff]  ;;  %v15349_v3 = vpop.xlane.xlu0 %6807 }
 0x40d   : > { %v4434_v5 = vadd.f32 %v4368_v27, %v4139_v24  ;;  %v6267_v15 = vmul.f32 %v17333_v36, %v17335_v28  ;;  %v6560_v41 = vmul.f32 %v17336_v47, %v15192_v33  ;;  %v6131_v20 = vrot.slane %v5973_v43, 2  ;;  %v15340_v27 = vld [vmem:[#allocation2 + $0x3b0] sm:$0xff]  ;;  %v17346_v36 = vld [vmem:[#allocation38_spill] sm:$0xff] }
 0x40e   : > { %v6561_v38 = vmul.f32 %v17336_v47, %v15233_v31  ;;  %v1143_v53 = vadd.f32 %v1111_v32, %v1073_v16  ;;  %v1251_v57 = vmul.f32 %v15332_v34, %v17337_v29  ;;  %v6424_v55 = vrot.slane %v6266_v10, 2 }
 0x40f   : > { %v4728_v59 = vadd.f32 %v4662_v2, %v4434_v5  ;;  %v1562_v63 = vmul.f32 %v14977_v61, %v17338_v42  ;;  %v1563_v40 = vmul.f32 %v15021_v25, %v17338_v42  ;;  %v1321_v43 = vmul.f32 %v17339_v18, %v15025_v17  ;;  %v17342_v42 = vld [vmem:[#allocation102_spill] sm:$0xff] }
 0x410   : > { %v1213_v50 = vadd.f32 %v1181_v45, %v1143_v53  ;;  %v1857_v22 = vmul.f32 %v15164_v26, %v17340_v21  ;;  %v1858_v32 = vmul.f32 %v15214_v46, %v17340_v21  ;;  %v5838_v24 = vsel %vm4275_vm3, %v5836_v37, %v5837_v35  ;;  %v17341_v45 = vld [vmem:[#allocation36_spill] sm:$0xff] }
 0x411   : > { %v5022_v2 = vadd.f32 %v4956_v7, %v4728_v59  ;;  %v6425_v10 = vrot.slane %v6267_v15, 2  ;;  %v6718_v16 = vrot.slane %v6560_v41, 2  ;;  %v6719_v5 = vrot.slane %v6561_v38, 2  ;;  %v17344_v15 = vld [vmem:[#allocation18_spill] sm:$0xff] }
 0x412   : > { %v1283_v29 = vadd.f32 %v1251_v57, %v1213_v50  ;;  %v1391_v53 = vmul.f32 %v17341_v45, %v15192_v33  ;;  %v2151_v18 = vmul.f32 %v15305_v49, %v17342_v42  ;;  %v1461_v47 = vmul.f32 %v17343_v1, %v15340_v27  ;;  %v17345_v50 = vld [vmem:[#allocation107_spill] sm:$0xff] }
 0x413   : > { %v5316_v58 = vadd.f32 %v5250_v14, %v5022_v2  ;;  %v1722_v21 = vrot.slane %v1562_v63, 1  ;;  %v1723_v7 = vrot.slane %v1563_v40, 1  ;;  %v2016_v37 = vrot.slane %v1857_v22, 1 }
 0x414   : > { %v1353_v59 = vadd.f32 %v1321_v43, %v1283_v29  ;;  %v2017_v35 = vrot.slane %v1858_v32, 1  ;;  %v2445_v41 = vmul.f32 %v17344_v15, %v15002_v52  ;;  %v6132_v57 = vsel %vm4275_vm3, %v6130_v4, %v6131_v20  ;;  %v6796_v4 = vpop.xlane.xlu1 %6795  ;;  %v15371_v20 = vpop.xlane.xlu0 %6813  ;;  %v15374_v32 = vld [vmem:[#allocation2 + $0x3b8] sm:$0x3] }
 0x415   : > { %v5610_v38 = vadd.f32 %v5544_v48, %v5316_v58  ;;  %v2311_v45 = vrot.slane %v17345_v50, 1  ;;  %v2446_v42 = vmul.f32 %v15058_v56, %v17344_v15  ;;  %v2310_v2 = vrot.slane %v2151_v18, 1 }
 0x416   : > { %v1423_v14 = vadd.f32 %v1391_v53, %v1353_v59  ;;  %v2739_v1 = vmul.f32 %v15194_v62, %v17346_v36  ;;  %v2740_v63 = vmul.f32 %v15237_v51, %v17346_v36  ;;  %v3622_v40 = vmul.f32 %v17326_v8, %v15233_v31 }
 0x417   : > { %v5904_v43 = vadd.f32 %v5838_v24, %v5610_v38  ;;  %v6426_v58 = vsel %vm4275_vm3, %v6424_v55, %v6425_v10  ;;  %v1724_v48 = vsel %vm1628_vm2, %v1722_v21, %v1723_v7  ;;  %v6720_v22 = vsel %vm4275_vm3, %v6718_v16, %v6719_v5 }
 0x418   : > { %v1493_v29 = vadd.f32 %v1461_v47, %v1423_v14  ;;  %v2018_v53 = vsel %vm1628_vm2, %v2016_v37, %v2017_v35  ;;  %v2604_v18 = vrot.slane %v2445_v41, 1  ;;  %v2605_v59 = vrot.slane %v2446_v42, 1  ;;  %v17347_v35 = vld [vmem:[#allocation72_spill] sm:$0xff] }
 0x419   : > { %v6198_v36 = vadd.f32 %v6132_v57, %v5904_v43  ;;  %v3327_v24 = vmul.f32 %v15244_v60, %v15025_v17  ;;  %v3328_v55 = vmul.f32 %v15244_v60, %v17335_v28  ;;  %v2312_v21 = vsel %vm1628_vm2, %v2310_v2, %v2311_v45  ;;  %v15393_v2 = vpop.xlane.xlu1 %6798 }
 0x41a   : > { %v1788_v10 = vadd.f32 %v1724_v48, %v1493_v29  ;;  %v2898_v7 = vrot.slane %v2739_v1, 1  ;;  %v2899_v15 = vrot.slane %v2740_v63, 1  ;;  %v3621_v47 = vmul.f32 %v17326_v8, %v15192_v33  ;;  %v15395_v8 = vpop.xlane.xlu0 %6819 }
 0x41b   : > { %v6492_v16 = vadd.f32 %v6426_v58, %v6198_v36  ;;  %v3915_v5 = vmul.f32 %v15071_v30, %v15340_v27  ;;  %v3916_v37 = vmul.f32 %v15071_v30, %v15374_v32  ;;  %v3192_v41 = vrot.slane %v17347_v35, 1 }
 0x41c   : > { %v3193_v38 = vrot.slane %v15256_v54, 1  ;;  %v3781_v60 = vrot.slane %v3622_v40, 1  ;;  %v2082_v57 = vadd.f32 %v2018_v53, %v1788_v10  ;;  %v2606_v45 = vsel %vm1628_vm2, %v2604_v18, %v2605_v59 }
 0x41d   : > { %v15390_v50 = vadd.f32 %v6720_v22, %v6492_v16  ;;  %v3486_v42 = vrot.slane %v3327_v24, 1  ;;  %v3487_v14 = vrot.slane %v3328_v55, 1  ;;  %v2900_v63 = vsel %vm1628_vm2, %v2898_v7, %v2899_v15  ;;  %v15414_v10 = vpop.xlane.xlu1 %6804  ;;  %v9152_v7 = vld [vmem:[#allocation2 + $0x278] sm:$0x3] }
 0x41e   : > { %v2376_v1 = vadd.f32 %v2312_v21, %v2082_v57  ;;  %v4209_v30 = vmul.f32 %v15093_v12, %v14977_v61  ;;  %v4210_v54 = vmul.f32 %v15093_v12, %v15021_v25  ;;  %v3780_v43 = vrot.slane %v3621_v47, 1  ;;  %v15416_v21 = vpop.xlane.xlu0 %6825 }
 0x41f   : > { %v6878_v40 = vsel %vm586_vm0, %v15390_v50, 0.0  ;;  %v4074_v58 = vrot.slane %v3915_v5, 1  ;;  %v4075_v48 = vrot.slane %v3916_v37, 1  ;;  %v3194_v29 = vsel %vm1628_vm2, %v3192_v41, %v3193_v38  ;;  %v17348_v38 = vld [vmem:[#allocation17_spill] sm:$0xff] }
 0x420   : > { %6879 = vadd.xlane.f32.xlu0 %v6878_v40  ;;  %v2670_v22 = vadd.f32 %v2606_v45, %v2376_v1  ;;  %v4504_v53 = vmul.f32 %v15164_v26, %v15102_v19  ;;  %v4505_v18 = vmul.f32 %v15214_v46, %v15102_v19  ;;  %v4369_v36 = vrot.slane %v4209_v30, 2  ;;  %v17350_v1 = vld [vmem:[#allocation57_spill] sm:$0xff] }
 0x421   : > { %v4370_v59 = vrot.slane %v4210_v54, 2  ;;  %v4798_v25 = vmul.f32 %v15305_v49, %v15111_v6  ;;  %v3488_v12 = vsel %vm1628_vm2, %v3486_v42, %v3487_v14  ;;  %v3782_v24 = vsel %vm1628_vm2, %v3780_v43, %v3781_v60 }
 0x422   : > { %v2964_v61 = vadd.f32 %v2900_v63, %v2670_v22  ;;  %v4076_v55 = vsel %vm1628_vm2, %v4074_v58, %v4075_v48  ;;  %v4799_v46 = vmul.f32 %v9152_v7, %v15111_v6  ;;  %v5092_v19 = vmul.f32 %v15123_v0, %v15002_v52  ;;  %v6832_v30 = vpop.xlane.xlu0 %6831 }
 0x423   : > { %v6885_v15 = vmul.f32 0.125, %v15266_v13  ;;  %v4663_v49 = vrot.slane %v4504_v53, 2  ;;  %v4664_v16 = vrot.slane %v4505_v18, 2  ;;  %v5093_v47 = vmul.f32 %v15123_v0, %v15058_v56  ;;  %v17349_v13 = vld [vmem:[#allocation22_spill] sm:$0xff] }
 0x424   : > { %v3258_v26 = vadd.f32 %v3194_v29, %v2964_v61  ;;  %v6887_v5 = vmul.f32 0.125, %v6796_v4  ;;  %v4371_v35 = vsel %vm4275_vm3, %v4369_v36, %v4370_v59  ;;  %v4957_v41 = vrot.slane %v4798_v25, 2 }
 0x425   : > { %v15426_v60 = vsub.f32 %v17348_v38, %v6885_v15  ;;  %v5386_v6 = vmul.f32 %v15194_v62, %v15132_v9  ;;  %v5387_v52 = vmul.f32 %v15237_v51, %v15132_v9  ;;  %v6889_v45 = vmul.f32 0.125, %v15321_v23  ;;  %v15444_v51 = vpop.xlane.xlu1 %6810  ;;  %v17353_v15 = vld [vmem:[#allocation75_spill] sm:$0xff] }
 0x426   : > { %v3552_v37 = vadd.f32 %v3488_v12, %v3258_v26  ;;  %v15433_v57 = vsub.f32 %v17349_v13, %v6887_v5  ;;  %v4958_v0 = vrot.slane %v4799_v46, 2  ;;  %v5251_v4 = vrot.slane %v5092_v19, 2  ;;  %v17352_v26 = vld [vmem:[#allocation115_spill] sm:$0xff]  ;;  %v6838_v19 = vpop.xlane.xlu0 %6837  ;;  %v17354_v5 = vld [vmem:[#allocation92_spill] sm:$0xff] }
 0x427   : > { %v6949_v42 = vmul.f32 %v15426_v60, %v15426_v60  ;;  %v5252_v14 = vrot.slane %v5093_v47, 2  ;;  %v15439_v63 = vsub.f32 %v17350_v1, %v6889_v45  ;;  %v6891_v62 = vmul.f32 0.125, %v15349_v3  ;;  %v17351_v3 = vld [vmem:[#allocation67_spill] sm:$0xff] }
 0x428   : > { %v3846_v56 = vadd.f32 %v3782_v24, %v3552_v37  ;;  %v6951_v9 = vmul.f32 %v15433_v57, %v15433_v57  ;;  %v5680_v23 = vmul.f32 %v15332_v34, %v15142_v11  ;;  %v5681_v40 = vmul.f32 %v15252_v44, %v15142_v11  ;;  %v17356_v13 = vld [vmem:[#allocation83_spill] sm:$0xff] }
 0x429   : > { %v6981_v43 = vsel %vm586_vm0, %v6949_v42, 0.0  ;;  %v4665_v58 = vsel %vm4275_vm3, %v4663_v49, %v4664_v16  ;;  %v5545_v48 = vrot.slane %v5386_v6, 2  ;;  %v5546_v22 = vrot.slane %v5387_v52, 2  ;;  %v15470_v46 = vpop.xlane.xlu1 %6816  ;;  %v17355_v6 = vld [vmem:[#allocation99_spill] sm:$0xff] }
 0x42a   : > { %v4140_v54 = vadd.f32 %v4076_v55, %v3846_v56  ;;  %6982 = vadd.xlane.f32.xlu0 %v6981_v43  ;;  %v15453_v29 = vsub.f32 %v17351_v3, %v6891_v62  ;;  %v6987_v18 = vsel %vm586_vm0, %v6951_v9, 0.0  ;;  %v6953_v61 = vmul.f32 %v15439_v63, %v15439_v63  ;;  %v6844_v62 = vpop.xlane.xlu0 %6843 }
 0x42b   : > { %v6893_v34 = vmul.f32 0.125, %v15371_v20  ;;  %v4959_v11 = vsel %vm4275_vm3, %v4957_v41, %v4958_v0  ;;  %v5974_v44 = vmul.f32 %v15153_v39, %v15025_v17  ;;  %v5975_v36 = vmul.f32 %v15153_v39, %v17335_v28 }
 0x42c   : > { %v4435_v53 = vadd.f32 %v4371_v35, %v4140_v54  ;;  %v5253_v25 = vsel %vm4275_vm3, %v5251_v4, %v5252_v14  ;;  %v5839_v12 = vrot.slane %v5680_v23, 2  ;;  %v5840_v24 = vrot.slane %v5681_v40, 2  ;;  %v17357_v23 = vld [vmem:[#allocation63_spill] sm:$0xff] }
 0x42d   : > { %v5547_v55 = vsel %vm4275_vm3, %v5545_v48, %v5546_v22  ;;  %v6268_v7 = vmul.f32 %v17352_v26, %v15192_v33  ;;  %v6269_v20 = vmul.f32 %v17352_v26, %v15233_v31  ;;  %v6895_v17 = vmul.f32 0.125, %v15395_v8  ;;  %v6823_v1 = vpop.xlane.xlu1 %6822  ;;  %v17358_v22 = vld [vmem:[#allocation59_spill] sm:$0xff] }
 0x42e   : > { %v4729_v59 = vadd.f32 %v4665_v58, %v4435_v53  ;;  %6988 = vadd.xlane.f32.xlu0 %v6987_v18  ;;  %v6993_v28 = vsel %vm586_vm0, %v6953_v61, 0.0  ;;  %v15475_v49 = vsub.f32 %v17353_v15, %v6893_v34  ;;  %v6955_v16 = vmul.f32 %v15453_v29, %v15453_v29  ;;  %v17359_v34 = vld [vmem:[#allocation73_spill] sm:$0xff] }
 0x42f   : > { %v6133_v47 = vrot.slane %v5974_v44, 2  ;;  %v6134_v33 = vrot.slane %v5975_v36, 2  ;;  %v6562_v31 = vmul.f32 %v17354_v5, %v15340_v27  ;;  %v6563_v37 = vmul.f32 %v17354_v5, %v15374_v32 }
 0x430   : > { %v5023_v39 = vadd.f32 %v4959_v11, %v4729_v59  ;;  %v5841_v8 = vsel %vm4275_vm3, %v5839_v12, %v5840_v24  ;;  %v6427_v41 = vrot.slane %v6268_v7, 2  ;;  %v6428_v38 = vrot.slane %v6269_v20, 2  ;;  %v17360_v24 = vld [vmem:[#allocation24_spill] sm:$0xff] }
 0x431   : > { %v6886_v52 = vmul.f32 0.125, %v17355_v6  ;;  %v15486_v45 = vsub.f32 %v17356_v13, %v6895_v17  ;;  %v6999_v0 = vsel %vm586_vm0, %v6955_v16, 0.0  ;;  %v6957_v27 = vmul.f32 %v15475_v49, %v15475_v49  ;;  %v6829_v36 = vpop.xlane.xlu1 %6828  ;;  %v17361_v7 = vld [vmem:[#allocation48_spill] sm:$0xff]  ;;  %v17364_v6 = vld [vmem:[#allocation19_spill] sm:$0xff] }
 0x432   : > { %v5317_v35 = vadd.f32 %v5253_v25, %v5023_v39  ;;  %6994 = vadd.xlane.f32.xlu0 %v6993_v28  ;;  %v6897_v4 = vmul.f32 0.125, %v15416_v21  ;;  %v6135_v32 = vsel %vm4275_vm3, %v6133_v47, %v6134_v33  ;;  %v6721_v42 = vrot.slane %v6562_v31, 2  ;;  %v6850_v25 = vpop.xlane.xlu0 %6849  ;;  %v17362_v16 = vld [vmem:[#allocation104_spill] sm:$0xff] }
 0x433   : > { %v6722_v14 = vrot.slane %v6563_v37, 2  ;;  %v6429_v54 = vsel %vm4275_vm3, %v6427_v41, %v6428_v38  ;;  %v15495_v40 = vsub.f32 %v17357_v23, %v6886_v52  ;;  %v6888_v43 = vmul.f32 0.125, %v15393_v2  ;;  %v17363_v37 = vld [vmem:[#allocation71_spill] sm:$0xff] }
 0x434   : > { %v5611_v56 = vadd.f32 %v5547_v55, %v5317_v35  ;;  %v6959_v58 = vmul.f32 %v15486_v45, %v15486_v45  ;;  %v7005_v21 = vsel %vm586_vm0, %v6957_v27, 0.0  ;;  %v15502_v3 = vsub.f32 %v17358_v22, %v6897_v4 }
 0x435   : > { %v6899_v53 = vmul.f32 0.125, %v6832_v30  ;;  %v6723_v18 = vsel %vm4275_vm3, %v6721_v42, %v6722_v14  ;;  %v15506_v11 = vsub.f32 %v17359_v34, %v6888_v43  ;;  %v6890_v44 = vmul.f32 0.125, %v15414_v10  ;;  %v6835_v5 = vpop.xlane.xlu1 %6834 }
 0x436   : > { %v5905_v9 = vadd.f32 %v5841_v8, %v5611_v56  ;;  %7000 = vadd.xlane.f32.xlu0 %v6999_v0  ;;  %v6950_v2 = vmul.f32 %v15495_v40, %v15495_v40  ;;  %v7011_v59 = vsel %vm586_vm0, %v6959_v58, 0.0  ;;  %v6961_v55 = vmul.f32 %v15502_v3, %v15502_v3  ;;  %v6856_v31 = vpop.xlane.xlu0 %6855  ;;  %v17365_v0 = vld [vmem:[#allocation56_spill] sm:$0xff]  ;;  %v17367_v58 = vld [vmem:[#allocation85_spill] sm:$0xff] }
 0x437   : > { %v15515_v30 = vsub.f32 %v17360_v24, %v6899_v53  ;;  %v6901_v26 = vmul.f32 0.125, %v6838_v19  ;;  %v15522_v20 = vsub.f32 %v17361_v7, %v6890_v44  ;;  %v6892_v39 = vmul.f32 0.125, %v15444_v51  ;;  %v17370_v7 = vld [vmem:[#allocation34_spill] sm:$0xff] }
 0x438   : > { %v6199_v48 = vadd.f32 %v6135_v32, %v5905_v9  ;;  %v6984_v17 = vsel %vm586_vm0, %v6950_v2, 0.0  ;;  %v6952_v28 = vmul.f32 %v15506_v11, %v15506_v11  ;;  %v7017_v15 = vsel %vm586_vm0, %v6961_v55, 0.0  ;;  %v17366_v9 = vld [vmem:[#allocation111_spill] sm:$0xff] }
 0x439   : > { %v15530_v47 = vsub.f32 %v17362_v16, %v6901_v26  ;;  %v6963_v19 = vmul.f32 %v15515_v30, %v15515_v30  ;;  %v6903_v33 = vmul.f32 0.125, %v6844_v62  ;;  %v15535_v35 = vsub.f32 %v17363_v37, %v6892_v39  ;;  %v6841_v42 = vpop.xlane.xlu1 %6840 }
 0x43a   : > { %v6493_v61 = vadd.f32 %v6429_v54, %v6199_v48  ;;  %7006 = vadd.xlane.f32.xlu0 %v7005_v21  ;;  %v6990_v51 = vsel %vm586_vm0, %v6952_v28, 0.0  ;;  %v6894_v8 = vmul.f32 0.125, %v15470_v46  ;;  %v6954_v41 = vmul.f32 %v15522_v20, %v15522_v20  ;;  %v6862_v14 = vpop.xlane.xlu0 %6861 }
 0x43b   : > { %v7023_v38 = vsel %vm586_vm0, %v6963_v19, 0.0  ;;  %v15543_v52 = vsub.f32 %v17364_v6, %v6903_v33  ;;  %v6965_v13 = vmul.f32 %v15530_v47, %v15530_v47  ;;  %v6905_v56 = vmul.f32 0.125, %v6850_v25  ;;  %v17369_v25 = vld [vmem:[#allocation88_spill] sm:$0xff] }
 0x43c   : > { %v15512_v12 = vadd.f32 %v6723_v18, %v6493_v61  ;;  %v15548_v27 = vsub.f32 %v17365_v0, %v6894_v8  ;;  %v6996_v4 = vsel %vm586_vm0, %v6954_v41, 0.0  ;;  %v6896_v46 = vmul.f32 0.125, %v6823_v1  ;;  %v17368_v18 = vld [vmem:[#allocation95_spill] sm:$0xff] }
 0x43d   : > { %v6956_v32 = vmul.f32 %v15535_v35, %v15535_v35  ;;  %v7029_v62 = vsel %vm586_vm0, %v6965_v13, 0.0  ;;  %v15555_v54 = vsub.f32 %v17366_v9, %v6905_v56  ;;  %v6967_v23 = vmul.f32 %v15543_v52, %v15543_v52  ;;  %v6847_v2 = vpop.xlane.xlu1 %6846 }
 0x43e   : > { %v6881_v10 = vsel %vm586_vm0, %v15512_v12, 0.0  ;;  %7012 = vadd.xlane.f32.xlu0 %v7011_v59  ;;  %v6907_v43 = vmul.f32 0.125, %v6856_v31  ;;  %v15560_v48 = vsub.f32 %v17367_v58, %v6896_v46  ;;  %v6898_v21 = vmul.f32 0.125, %v6829_v36  ;;  %v6868_v59 = vpop.xlane.xlu0 %6867 }
 0x43f   : > { %6882 = vadd.xlane.f32.xlu1 %v6881_v10  ;;  %v7002_v1 = vsel %vm586_vm0, %v6956_v32, 0.0  ;;  %v6958_v22 = vmul.f32 %v15548_v27, %v15548_v27  ;;  %v7035_v53 = vsel %vm586_vm0, %v6967_v23, 0.0  ;;  %v6969_v34 = vmul.f32 %v15555_v54, %v15555_v54 }
 0x440   : > { %v15567_v61 = vsub.f32 %v17368_v18, %v6907_v43  ;;  %v6909_v44 = vmul.f32 0.125, %v6862_v14  ;;  %v15572_v24 = vsub.f32 %v17369_v25, %v6898_v21  ;;  %v6900_v55 = vmul.f32 0.125, %v6835_v5 }
 0x441   : > { %v7008_v36 = vsel %vm586_vm0, %v6958_v22, 0.0  ;;  %v6960_v26 = vmul.f32 %v15560_v48, %v15560_v48  ;;  %v7041_v10 = vsel %vm586_vm0, %v6969_v34, 0.0  ;;  %v6911_v28 = vmul.f32 0.125, %v6868_v59  ;;  %v6853_v5 = vpop.xlane.xlu1 %6852  ;;  %v17376_v34 = vld [vmem:[#allocation101_spill] sm:$0xff] }
 0x442   : > { %7018 = vadd.xlane.f32.xlu0 %v7017_v15  ;;  %v6971_v39 = vmul.f32 %v15567_v61, %v15567_v61  ;;  %v17371_v15 = vld [vmem:[#allocation94_spill] sm:$0xff]  ;;  %v6902_v33 = vmul.f32 0.125, %v6841_v42  ;;  %v6962_v31 = vmul.f32 %v15572_v24, %v15572_v24  ;;  %v6904_v13 = vmul.f32 0.125, %v6847_v2 }
 0x443   : > { %6985 = vadd.xlane.f32.xlu1 %v6984_v17  ;;  %v15579_v17 = vsub.f32 %v17370_v7, %v6909_v44  ;;  %v15584_v16 = vsub.f32 %v17371_v15, %v6900_v55  ;;  %v7014_v19 = vsel %vm586_vm0, %v6960_v26, 0.0  ;;  %v17374_v42 = vld [vmem:[#allocation106_spill] sm:$0xff]  ;;  %v6906_v9 = vmul.f32 0.125, %v6853_v5  ;;  %v17377_v55 = vld [vmem:[#allocation84_spill] sm:$0xff] }
 0x444   : > { %v7047_v37 = vsel %vm586_vm0, %v6971_v39, 0.0  ;;  %v7020_v56 = vsel %vm586_vm0, %v6962_v31, 0.0  ;;  %v15605_v14 = vsub.f32 %v17374_v42, %v6904_v13 }
 0x445   : > { %v6973_v41 = vmul.f32 %v15579_v17, %v15579_v17  ;;  %v6964_v0 = vmul.f32 %v15584_v16, %v15584_v16  ;;  %v6859_v32 = vpop.xlane.xlu1 %6858 }
 0x446   : > { %7024 = vadd.xlane.f32.xlu0 %v7023_v38  ;;  %v17373_v38 = vld [vmem:[#allocation93_spill] sm:$0xff]  ;;  %v6968_v18 = vmul.f32 %v15605_v14, %v15605_v14 }
 0x447   : > { %6991 = vadd.xlane.f32.xlu1 %v6990_v51  ;;  %v17372_v51 = vld [vmem:[#allocation69_spill] sm:$0xff]  ;;  %v15596_v6 = vsub.f32 %v17373_v38, %v6902_v33 }
 0x448   : > { %v15591_v8 = vsub.f32 %v17372_v51, %v6911_v28  ;;  %v7038_v2 = vsel %vm586_vm0, %v6968_v18, 0.0  ;;  %v17378_v28 = vld [vmem:[#allocation68_spill] sm:$0xff] }
 0x449   : > { %v6966_v23 = vmul.f32 %v15596_v6, %v15596_v6  ;;  %v6865_v58 = vpop.xlane.xlu1 %6864 }
 0x44a   : > { %7030 = vadd.xlane.f32.xlu0 %v7029_v62  ;;  %v6975_v46 = vmul.f32 %v15591_v8, %v15591_v8  ;;  %v7026_v62 = vsel %vm586_vm0, %v6964_v0, 0.0  ;;  %v6910_v59 = vmul.f32 0.125, %v6865_v58  ;;  %v7299_v0 = vld [vmem:[%s16302_s6] sm:$0xf] }
 0x44b   : > { %6997 = vadd.xlane.f32.xlu1 %v6996_v4  ;;  %v7053_v4 = vsel %vm586_vm0, %v6973_v41, 0.0  ;;  %v7032_v22 = vsel %vm586_vm0, %v6966_v23, 0.0  ;;  %v17379_v41 = vld [vmem:[#allocation114_spill] sm:$0xff]  ;;  %8652 = vmatprep.subr.msk.bf16.mxu0 %vm7355_vm4, %v7299_v0 }
 0x44c   : > { %v7059_v43 = vsel %vm586_vm0, %v6975_v46, 0.0  ;;  %v15624_v26 = vsub.f32 %v17377_v55, %v6910_v59  ;;  %v7357_v46 = vsel %vm7355_vm4, %v7299_v0, 0 }
 0x44d   : > { %8583 = vmatpush3.bf16.msra.mxu0 %v7357_v46 }
 0x44e   : > { %7036 = vadd.xlane.f32.xlu0 %v7035_v53  ;;  %v6908_v53 = vmul.f32 0.125, %v6859_v32  ;;  %v6974_v33 = vmul.f32 %v15624_v26, %v15624_v26 }
 0x44f   : > { %7003 = vadd.xlane.f32.xlu1 %v7002_v1  ;;  %v17375_v1 = vld [vmem:[#allocation97_spill] sm:$0xff] }
 0x450   : > { %v15612_v21 = vsub.f32 %v17375_v1, %v6906_v9  ;;  %v15618_v44 = vsub.f32 %v17376_v34, %v6908_v53 }
 0x452   : > { %7042 = vadd.xlane.f32.xlu0 %v7041_v10  ;;  %v6970_v25 = vmul.f32 %v15612_v21, %v15612_v21  ;;  %v6972_v39 = vmul.f32 %v15618_v44, %v15618_v44 }
 0x453   : > { %7009 = vadd.xlane.f32.xlu1 %v7008_v36  ;;  %v6871_v36 = vpop.xlane.xlu1 %6870 }
 0x454   : > { %v7044_v10 = vsel %vm586_vm0, %v6970_v25, 0.0  ;;  %v6912_v7 = vmul.f32 0.125, %v6871_v36 }
 0x456   : > { %7048 = vadd.xlane.f32.xlu0 %v7047_v37  ;;  %v15630_v15 = vsub.f32 %v17378_v28, %v6912_v7  ;;  %v7056_v37 = vsel %vm586_vm0, %v6974_v33, 0.0 }
 0x457   : > { %7015 = vadd.xlane.f32.xlu1 %v7014_v19  ;;  %v7050_v19 = vsel %vm586_vm0, %v6972_v39, 0.0 }
 0x458   : > { %v6976_v51 = vmul.f32 %v15630_v15, %v15630_v15 }
 0x45a   : > { %7054 = vadd.xlane.f32.xlu0 %v7053_v4 }
 0x45b   : > { %7021 = vadd.xlane.f32.xlu1 %v7020_v56  ;;  %v7062_v56 = vsel %vm586_vm0, %v6976_v51, 0.0 }
 0x45e   : > { %7060 = vadd.xlane.f32.xlu0 %v7059_v43 }
 0x45f   : > { %7027 = vadd.xlane.f32.xlu1 %v7026_v62  ;;  %v17380_v62 = vld [vmem:[#allocation82_spill] sm:$0xff] }
 0x463   : > { %7033 = vadd.xlane.f32.xlu1 %v7032_v22 }
 0x467   : > { %7039 = vadd.xlane.f32.xlu1 %v7038_v2 }
 0x46b   : > { %7045 = vadd.xlane.f32.xlu1 %v7044_v10 }
 0x46e   : > { %v6874_v5 = vpop.xlane.xlu0 %6873 }
 0x46f   : > { %7051 = vadd.xlane.f32.xlu1 %v7050_v19  ;;  %v6913_v31 = vmul.f32 0.125, %v6874_v5 }
 0x471   : > { %v15639_v38 = vsub.f32 %v17379_v41, %v6913_v31 }
 0x473   : > { %7057 = vadd.xlane.f32.xlu1 %v7056_v37  ;;  %v6977_v13 = vmul.f32 %v15639_v38, %v15639_v38 }
 0x475   : > { %v7065_v4 = vsel %vm586_vm0, %v6977_v13, 0.0 }
 0x476   : > { %7066 = vadd.xlane.f32.xlu0 %v7065_v4 }
 0x477   : > { %7063 = vadd.xlane.f32.xlu1 %v7062_v56 }
 0x48e   : > { %v6877_v32 = vpop.xlane.xlu1 %6876 }
 0x48f   : > { %v6914_v42 = vmul.f32 0.125, %v6877_v32 }
 0x491   : > { %v15649_v9 = vsub.f32 %v17380_v62, %v6914_v42 }
 0x493   : > { %v6978_v23 = vmul.f32 %v15649_v9, %v15649_v9 }
 0x495   : > { %v7068_v43 = vsel %vm586_vm0, %v6978_v23, 0.0 }
 0x496   : > { %7069 = vadd.xlane.f32.xlu1 %v7068_v43 }
 0x4ad   : > { %v6880_v58 = vpop.xlane.xlu0 %6879 }
 0x4ae   : > { %v6915_v1 = vmul.f32 0.125, %v6880_v58 }
 0x4b0   : > { %v15655_v22 = vsub.f32 %v15390_v50, %v6915_v1 }
 0x4b2   : > { %v6979_v53 = vmul.f32 %v15655_v22, %v15655_v22 }
 0x4b4   : > { %v7071_v18 = vsel %vm586_vm0, %v6979_v53, 0.0 }
 0x4b5   : > { %7072 = vadd.xlane.f32.xlu0 %v7071_v18 }
 0x4b7   : > { %v6983_v34 = vpop.xlane.xlu0 %6982 }
 0x4b8   : > { %v7077_v36 = vmul.f32 0.125, %v6983_v34 }
 0x4ba   : > { %v7109_v10 = vadd.f32 1e-06, %v7077_v36 }
 0x4bb   : > { %v6989_v2 = vpop.xlane.xlu0 %6988 }
 0x4bc   : > { %v7079_v7 = vmul.f32 0.125, %v6989_v2  ;;  %8698 = vrsqrt.f32 %v7109_v10 }
 0x4be   : > { %v7111_v5 = vadd.f32 1e-06, %v7079_v7  ;;  %v15670_v7 = vld [vmem:[%s16300_s4] ss:$0 sm:$0xff] }
 0x4bf   : > { %v6995_v59 = vpop.xlane.xlu0 %6994 }
 0x4c0   : > { %v7081_v33 = vmul.f32 0.125, %v6995_v59  ;;  %8700 = vrsqrt.f32 %v7111_v5 }
 0x4c2   : > { %v7113_v13 = vadd.f32 1e-06, %v7081_v33 }
 0x4c3   : > { %v7001_v25 = vpop.xlane.xlu0 %7000 }
 0x4c4   : > { %v7083_v4 = vmul.f32 0.125, %v7001_v25 }
 0x4c6   : > { %v7115_v62 = vadd.f32 1e-06, %v7083_v4  ;;  %v8699_v58 = vpop.eup %8698 }
 0x4c7   : > { %v7007_v55 = vpop.xlane.xlu0 %7006  ;;  %v7173_v25 = vmul.f32 %v8699_v58, %v15426_v60 }
 0x4c8   : > { %v7085_v23 = vmul.f32 0.125, %v7007_v55 }
 0x4c9   : > { %v7212_v60 = vmul.f32 %v15670_v7, %v7173_v25 }
 0x4ca   : > { %v7117_v2 = vadd.f32 1e-06, %v7085_v23  ;;  %v8701_v36 = vpop.eup %8700 }
 0x4cb   : > { %v7013_v28 = vpop.xlane.xlu0 %7012  ;;  %v7175_v5 = vmul.f32 %v8701_v36, %v15433_v57 }
 0x4cc   : > { %v6883_v39 = vpop.xlane.xlu1 %6882  ;;  %v7087_v53 = vmul.f32 0.125, %v7013_v28 }
 0x4cd   : > { %v6916_v19 = vmul.f32 0.125, %v6883_v39 }
 0x4ce   : > { %v7119_v55 = vadd.f32 1e-06, %v7087_v53 }
 0x4cf   : > { %v15661_v50 = vsub.f32 %v15512_v12, %v6916_v19  ;;  %v7019_v37 = vpop.xlane.xlu0 %7018 }
 0x4d0   : > { %v6986_v31 = vpop.xlane.xlu1 %6985  ;;  %v7089_v28 = vmul.f32 0.125, %v7019_v37 }
 0x4d1   : > { %v6980_v51 = vmul.f32 %v15661_v50, %v15661_v50  ;;  %v7078_v41 = vmul.f32 0.125, %v6986_v31 }
 0x4d3   : > { %v7074_v56 = vsel %vm586_vm0, %v6980_v51, 0.0  ;;  %v7110_v0 = vadd.f32 1e-06, %v7078_v41  ;;  %v7025_v32 = vpop.xlane.xlu0 %7024 }
 0x4d4   : > { %7075 = vadd.xlane.f32.xlu1 %v7074_v56  ;;  %v6992_v46 = vpop.xlane.xlu1 %6991  ;;  %v15678_v56 = vld [vmem:[%s16301_s5] ss:$0 sm:$0xff] }
 0x4d5   : > { %8702 = vrsqrt.f32 %v7110_v0  ;;  %v7080_v12 = vmul.f32 0.125, %v6992_v46  ;;  %v7121_v46 = vadd.f32 1e-06, %v7089_v28 }
 0x4d6   : > { %8704 = vrsqrt.f32 %v7113_v13 }
 0x4d7   : > { %v7112_v42 = vadd.f32 1e-06, %v7080_v12  ;;  %v7031_v18 = vpop.xlane.xlu0 %7030  ;;  %v7091_v12 = vmul.f32 0.125, %v7025_v32 }
 0x4d8   : > { %v6998_v43 = vpop.xlane.xlu1 %6997 }
 0x4d9   : > { %8706 = vrsqrt.f32 %v7112_v42  ;;  %v7082_v1 = vmul.f32 0.125, %v6998_v43  ;;  %v7214_v43 = vmul.f32 %v15670_v7, %v7175_v5  ;;  %v7123_v32 = vadd.f32 1e-06, %v7091_v12 }
 0x4da   : > { %8708 = vrsqrt.f32 %v7115_v62  ;;  %v7251_v62 = vadd.f32 %v15678_v56, %v7212_v60 }
 0x4db   : > { %v7114_v34 = vadd.f32 1e-06, %v7082_v1  ;;  %v7037_v41 = vpop.xlane.xlu0 %7036 }
 0x4dc   : > { %v7004_v59 = vpop.xlane.xlu1 %7003 }
 0x4dd   : > { %8710 = vrsqrt.f32 %v7114_v34  ;;  %v7084_v10 = vmul.f32 0.125, %v7004_v59 }
 0x4de   : > { %8712 = vrsqrt.f32 %v7117_v2  ;;  %v7093_v2 = vmul.f32 0.125, %v7031_v18 }
 0x4df   : > { %v8703_v39 = vpop.eup %8702  ;;  %v7116_v19 = vadd.f32 1e-06, %v7084_v10 }
 0x4e0   : > { %v8705_v33 = vpop.eup %8704  ;;  %v7010_v31 = vpop.xlane.xlu1 %7009  ;;  %v7174_v51 = vmul.f32 %v8703_v39, %v15495_v40  ;;  %v7253_v39 = vadd.f32 %v15678_v56, %v7214_v43  ;;  %v7125_v5 = vadd.f32 1e-06, %v7093_v2 }
 0x4e1   : > { %8714 = vrsqrt.f32 %v7116_v19  ;;  %v7086_v13 = vmul.f32 0.125, %v7010_v31  ;;  %v7177_v4 = vmul.f32 %v8705_v33, %v15439_v63  ;;  %v7043_v63 = vpop.xlane.xlu0 %7042 }
 0x4e2   : > { %8716 = vrsqrt.f32 %v7119_v55  ;;  %v7213_v0 = vmul.f32 %v15670_v7, %v7174_v51 }
 0x4e3   : > { %v8707_v37 = vpop.eup %8706  ;;  %v7118_v57 = vadd.f32 1e-06, %v7086_v13 }
 0x4e4   : > { %v7176_v40 = vmul.f32 %v8707_v37, %v15506_v11  ;;  %v7016_v42 = vpop.xlane.xlu1 %7015  ;;  %v7252_v23 = vadd.f32 %v15678_v56, %v7213_v0  ;;  %v8709_v58 = vpop.eup %8708  ;;  %v7216_v11 = vmul.f32 %v15670_v7, %v7177_v4 }
 0x4e5   : > { %8718 = vrsqrt.f32 %v7118_v57  ;;  %v7088_v1 = vmul.f32 0.125, %v7016_v42  ;;  %v7179_v10 = vmul.f32 %v8709_v58, %v15453_v29  ;;  %v7095_v29 = vmul.f32 0.125, %v7037_v41  ;;  %v7049_v12 = vpop.xlane.xlu0 %7048 }
 0x4e6   : > { %v7283_v53 = vpack.c.bf16 %v7252_v23, %v7251_v62  ;;  %v7215_v34 = vmul.f32 %v15670_v7, %v7176_v40  ;;  %8720 = vrsqrt.f32 %v7121_v46 }
 0x4e7   : > { %v8711_v59 = vpop.eup %8710  ;;  %v7120_v25 = vadd.f32 1e-06, %v7088_v1  ;;  %v7218_v46 = vmul.f32 %v15670_v7, %v7179_v10  ;;  %v7127_v43 = vadd.f32 1e-06, %v7095_v29 }
 0x4e8   : > { %v7178_v36 = vmul.f32 %v8711_v59, %v15522_v20  ;;  %v7022_v55 = vpop.xlane.xlu1 %7021  ;;  %8584 = vmatprep.mubr.msk.bf16.mxu0 %vm586_vm0, %v7283_v53  ;;  %v7254_v19 = vadd.f32 %v15678_v56, %v7215_v34  ;;  %v8713_v28 = vpop.eup %8712  ;;  %v7255_v20 = vadd.f32 %v15678_v56, %v7216_v11  ;;  %v7099_v11 = vmul.f32 0.125, %v7049_v12 }
 0x4e9   : > { %8722 = vrsqrt.f32 %v7120_v25  ;;  %v7090_v18 = vmul.f32 0.125, %v7022_v55  ;;  %v7181_v37 = vmul.f32 %v8713_v28, %v15475_v49  ;;  %v7097_v49 = vmul.f32 0.125, %v7043_v63 }
 0x4ea   : > { %v7284_v33 = vpack.c.bf16 %v7254_v19, %v7253_v39  ;;  %v7217_v31 = vmul.f32 %v15670_v7, %v7178_v36  ;;  %8724 = vrsqrt.f32 %v7123_v32  ;;  %v7257_v53 = vadd.f32 %v15678_v56, %v7218_v46  ;;  %v7055_v36 = vpop.xlane.xlu0 %7054 }
 0x4eb   : > { %v8715_v51 = vpop.eup %8714  ;;  %v7122_v60 = vadd.f32 1e-06, %v7090_v18  ;;  %v7220_v2 = vmul.f32 %v15670_v7, %v7181_v37 }
 0x4ec   : > { %v8717_v13 = vpop.eup %8716  ;;  %v7180_v0 = vmul.f32 %v8715_v51, %v15535_v35  ;;  %v7028_v4 = vpop.xlane.xlu1 %7027  ;;  %8585 = vmatmul.mubr.msk.bf16.vlgmr.msra.gmra.mrb[0].mxu0 %vm586_vm0, %v7284_v33  ;;  %v7256_v57 = vadd.f32 %v15678_v56, %v7217_v31 }
 0x4ed   : > { %8726 = vrsqrt.f32 %v7122_v60  ;;  %v7092_v40 = vmul.f32 0.125, %v7028_v4  ;;  %v7183_v23 = vmul.f32 %v8717_v13, %v15486_v45  ;;  %v7259_v18 = vadd.f32 %v15678_v56, %v7220_v2 }
 0x4ee   : > { %8728 = vrsqrt.f32 %v7125_v5  ;;  %v7285_v42 = vpack.c.bf16 %v7256_v57, %v7255_v20  ;;  %v7219_v62 = vmul.f32 %v15670_v7, %v7180_v0  ;;  %v7131_v60 = vadd.f32 1e-06, %v7099_v11 }
 0x4ef   : > { %v8719_v41 = vpop.eup %8718  ;;  %v7124_v35 = vadd.f32 1e-06, %v7092_v40  ;;  %v7222_v55 = vmul.f32 %v15670_v7, %v7183_v23  ;;  %v7061_v40 = vpop.xlane.xlu0 %7060 }
 0x4f0   : > { %v7182_v58 = vmul.f32 %v8719_v41, %v15548_v27  ;;  %v7034_v1 = vpop.xlane.xlu1 %7033  ;;  %8588 = vmatprep.mubr.msk.bf16.mxu0 %vm586_vm0, %v7285_v42  ;;  %v7258_v34 = vadd.f32 %v15678_v56, %v7219_v62  ;;  %v8721_v59 = vpop.eup %8720  ;;  %v7129_v27 = vadd.f32 1e-06, %v7097_v49 }
 0x4f1   : > { %8730 = vrsqrt.f32 %v7124_v35  ;;  %v7094_v25 = vmul.f32 0.125, %v7034_v1  ;;  %v7185_v19 = vmul.f32 %v8721_v59, %v15502_v3  ;;  %v7101_v3 = vmul.f32 0.125, %v7055_v36 }
 0x4f2   : > { %v7286_v32 = vpack.c.bf16 %v7258_v34, %v7257_v53  ;;  %v7221_v45 = vmul.f32 %v15670_v7, %v7182_v58  ;;  %8732 = vrsqrt.f32 %v7127_v43 }
 0x4f3   : > { %v8723_v63 = vpop.eup %8722  ;;  %v7126_v10 = vadd.f32 1e-06, %v7094_v25  ;;  %v7224_v12 = vmul.f32 %v15670_v7, %v7185_v19  ;;  %v7133_v43 = vadd.f32 1e-06, %v7101_v3 }
 0x4f4   : > { %v7184_v39 = vmul.f32 %v8723_v63, %v15560_v48  ;;  %v7040_v28 = vpop.xlane.xlu1 %7039  ;;  %8589 = vmatmul.mubr.msk.bf16.gmra.mrb[4].mxu0 %vm586_vm0, %v7286_v32  ;;  %v7260_v33 = vadd.f32 %v15678_v56, %v7221_v45  ;;  %v8725_v5 = vpop.eup %8724  ;;  %v7261_v48 = vadd.f32 %v15678_v56, %v7222_v55 }
 0x4f5   : > { %8734 = vrsqrt.f32 %v7126_v10  ;;  %v7096_v31 = vmul.f32 0.125, %v7040_v28  ;;  %v7187_v4 = vmul.f32 %v8725_v5, %v15515_v30  ;;  %v7103_v30 = vmul.f32 0.125, %v7061_v40 }
 0x4f6   : > { %v7287_v51 = vpack.c.bf16 %v7260_v33, %v7259_v18  ;;  %v7223_v20 = vmul.f32 %v15670_v7, %v7184_v39  ;;  %8736 = vrsqrt.f32 %v7129_v27  ;;  %v7263_v1 = vadd.f32 %v15678_v56, %v7224_v12 }
 0x4f7   : > { %v8727_v29 = vpop.eup %8726  ;;  %v7128_v13 = vadd.f32 1e-06, %v7096_v31  ;;  %v7226_v34 = vmul.f32 %v15670_v7, %v7187_v4  ;;  %v7135_v11 = vadd.f32 1e-06, %v7103_v30 }
 0x4f8   : > { %v8729_v0 = vpop.eup %8728  ;;  %v7186_v37 = vmul.f32 %v8727_v29, %v15572_v24  ;;  %v7046_v57 = vpop.xlane.xlu1 %7045  ;;  %8592 = vmatprep.mubr.msk.bf16.mxu0 %vm586_vm0, %v7287_v51  ;;  %v7262_v46 = vadd.f32 %v15678_v56, %v7223_v20 }
 0x4f9   : > { %8738 = vrsqrt.f32 %v7128_v13  ;;  %v7098_v42 = vmul.f32 0.125, %v7046_v57  ;;  %v7189_v35 = vmul.f32 %v8729_v0, %v15530_v47  ;;  %v7265_v27 = vadd.f32 %v15678_v56, %v7226_v34 }
 0x4fa   : > { %8740 = vrsqrt.f32 %v7131_v60  ;;  %v7288_v62 = vpack.c.bf16 %v7262_v46, %v7261_v48  ;;  %v7225_v41 = vmul.f32 %v15670_v7, %v7186_v37 }
 0x4fb   : > { %v8731_v23 = vpop.eup %8730  ;;  %v7130_v24 = vadd.f32 1e-06, %v7098_v42 }
 0x4fc   : > { %v7188_v49 = vmul.f32 %v8731_v23, %v15584_v16  ;;  %v7052_v58 = vpop.xlane.xlu1 %7051  ;;  %8593 = vmatmul.mubr.msk.bf16.gmra.mrb[8].mxu0 %vm586_vm0, %v7288_v62  ;;  %v7264_v53 = vadd.f32 %v15678_v56, %v7225_v41  ;;  %v8733_v2 = vpop.eup %8732  ;;  %v7228_v16 = vmul.f32 %v15670_v7, %v7189_v35 }
 0x4fd   : > { %8742 = vrsqrt.f32 %v7130_v24  ;;  %v7100_v59 = vmul.f32 0.125, %v7052_v58  ;;  %v7191_v63 = vmul.f32 %v8733_v2, %v15543_v52 }
 0x4fe   : > { %v7289_v25 = vpack.c.bf16 %v7264_v53, %v7263_v1  ;;  %v7227_v47 = vmul.f32 %v15670_v7, %v7188_v49  ;;  %8744 = vrsqrt.f32 %v7133_v43 }
 0x4ff   : > { %v8735_v32 = vpop.eup %8734  ;;  %v7132_v45 = vadd.f32 1e-06, %v7100_v59  ;;  %v7230_v29 = vmul.f32 %v15670_v7, %v7191_v63 }
 0x500   : > { %v7190_v36 = vmul.f32 %v8735_v32, %v15596_v6  ;;  %v7058_v10 = vpop.xlane.xlu1 %7057  ;;  %8596 = vmatprep.mubr.msk.bf16.mxu0 %vm586_vm0, %v7289_v25  ;;  %v7266_v55 = vadd.f32 %v15678_v56, %v7227_v47  ;;  %v8737_v39 = vpop.eup %8736  ;;  %v7267_v6 = vadd.f32 %v15678_v56, %v7228_v16 }
 0x501   : > { %8746 = vrsqrt.f32 %v7132_v45  ;;  %v7102_v19 = vmul.f32 0.125, %v7058_v10  ;;  %v7193_v51 = vmul.f32 %v8737_v39, %v15555_v54  ;;  %v7269_v54 = vadd.f32 %v15678_v56, %v7230_v29 }
 0x502   : > { %v7290_v28 = vpack.c.bf16 %v7266_v55, %v7265_v27  ;;  %v7229_v18 = vmul.f32 %v15670_v7, %v7190_v36  ;;  %8748 = vrsqrt.f32 %v7135_v11 }
 0x503   : > { %v8739_v33 = vpop.eup %8738  ;;  %v7134_v5 = vadd.f32 1e-06, %v7102_v19  ;;  %v7232_v46 = vmul.f32 %v15670_v7, %v7193_v51  ;;  %v7067_v11 = vpop.xlane.xlu0 %7066 }
 0x504   : > { %v8741_v31 = vpop.eup %8740  ;;  %v7192_v52 = vmul.f32 %v8739_v33, %v15605_v14  ;;  %v7064_v60 = vpop.xlane.xlu1 %7063  ;;  %8597 = vmatmul.mubr.msk.bf16.gmra.mrb[12].mxu0 %vm586_vm0, %v7290_v28  ;;  %v7268_v20 = vadd.f32 %v15678_v56, %v7229_v18  ;;  %v7105_v63 = vmul.f32 0.125, %v7067_v11 }
 0x505   : > { %8750 = vrsqrt.f32 %v7134_v5  ;;  %v7104_v13 = vmul.f32 0.125, %v7064_v60  ;;  %v7195_v37 = vmul.f32 %v8741_v31, %v15567_v61  ;;  %v7271_v23 = vadd.f32 %v15678_v56, %v7232_v46 }
 0x506   : > { %v7291_v48 = vpack.c.bf16 %v7268_v20, %v7267_v6  ;;  %v7231_v3 = vmul.f32 %v15670_v7, %v7192_v52  ;;  %v7137_v10 = vadd.f32 1e-06, %v7105_v63 }
 0x507   : > { %v8743_v0 = vpop.eup %8742  ;;  %v7136_v4 = vadd.f32 1e-06, %v7104_v13  ;;  %v7234_v41 = vmul.f32 %v15670_v7, %v7195_v37 }
 0x508   : > { %v7194_v14 = vmul.f32 %v8743_v0, %v15612_v21  ;;  %8600 = vmatprep.mubr.msk.bf16.mxu0 %vm586_vm0, %v7291_v48  ;;  %v7270_v57 = vadd.f32 %v15678_v56, %v7231_v3  ;;  %v8745_v12 = vpop.eup %8744  ;;  %v8697_v3 = vld [vmem:[%s16304_s8 + $0x8] sm:$0xff]  }
 0x509   : > { %8752 = vrsqrt.f32 %v7136_v4  ;;  %v7197_v21 = vmul.f32 %v8745_v12, %v15579_v17  ;;  %v7273_v58 = vadd.f32 %v15678_v56, %v7234_v41 }
 0x50a   : > { %v7292_v40 = vpack.c.bf16 %v7270_v57, %v7269_v54  ;;  %v7233_v42 = vmul.f32 %v15670_v7, %v7194_v14  ;;  %8754 = vrsqrt.f32 %v7137_v10 }
 0x50b   : > { %v8747_v62 = vpop.eup %8746 }
 0x50c   : > { %v7196_v61 = vmul.f32 %v8747_v62, %v15618_v44  ;;  %8601 = vmatmul.mubr.msk.bf16.gmra.mrb[16].mxu0 %vm586_vm0, %v7292_v40  ;;  %v7272_v35 = vadd.f32 %v15678_v56, %v7233_v42  ;;  %v8749_v24 = vpop.eup %8748  ;;  %v7236_v44 = vmul.f32 %v15670_v7, %v7197_v21  ;;  %v15797_v42 = vld [vmem:[%s16303_s7] ss:$0 sm:$0xff] }
 0x50d   : > { %v7199_v53 = vmul.f32 %v8749_v24, %v15591_v8 }
 0x50e   : > { %v7293_v43 = vpack.c.bf16 %v7272_v35, %v7271_v23  ;;  %v7235_v30 = vmul.f32 %v15670_v7, %v7196_v61  ;;  %v7275_v47 = vadd.f32 %v15678_v56, %v7236_v44 }
 0x50f   : > { %v8751_v49 = vpop.eup %8750  ;;  %v7238_v8 = vmul.f32 %v15670_v7, %v7199_v53 }
 0x510   : > { %v7198_v1 = vmul.f32 %v8751_v49, %v15624_v26  ;;  %8604 = vmatprep.mubr.msk.bf16.mxu0 %vm586_vm0, %v7293_v43  ;;  %v7274_v17 = vadd.f32 %v15678_v56, %v7235_v30 }
 0x511   : > { %v7277_v16 = vadd.f32 %v15678_v56, %v7238_v8 }
 0x512   : > { %v7294_v34 = vpack.c.bf16 %v7274_v17, %v7273_v58  ;;  %v7237_v2 = vmul.f32 %v15670_v7, %v7198_v1 }
 0x513   : > { %v8753_v59 = vpop.eup %8752 }
 0x514   : > { %v7200_v25 = vmul.f32 %v8753_v59, %v15630_v15  ;;  %8605 = vmatmul.mubr.msk.bf16.gmra.mrb[20].mxu0 %vm586_vm0, %v7294_v34  ;;  %v7276_v26 = vadd.f32 %v15678_v56, %v7237_v2  ;;  %v8755_v19 = vpop.eup %8754 }
 0x515   : > { %v7201_v28 = vmul.f32 %v8755_v19, %v15639_v38 }
 0x516   : > { %v7295_v32 = vpack.c.bf16 %v7276_v26, %v7275_v47  ;;  %v7239_v45 = vmul.f32 %v15670_v7, %v7200_v25 }
 0x517   : > { %v7240_v5 = vmul.f32 %v15670_v7, %v7201_v28 }
 0x518   : > { %8608 = vmatprep.mubr.msk.bf16.mxu0 %vm586_vm0, %v7295_v32  ;;  %v7278_v36 = vadd.f32 %v15678_v56, %v7239_v45 }
 0x519   : > { %v7279_v31 = vadd.f32 %v15678_v56, %v7240_v5 }
 0x51a   : > { %v7296_v15 = vpack.c.bf16 %v7278_v36, %v7277_v16 }
 0x51c   : > { %8609 = vmatmul.mubr.msk.bf16.gmra.mrb[24].mxu0 %vm586_vm0, %v7296_v15 }
 0x523   : > { %v7070_v27 = vpop.xlane.xlu1 %7069 }
 0x524   : > { %v7106_v55 = vmul.f32 0.125, %v7070_v27 }
 0x526   : > { %v7138_v39 = vadd.f32 1e-06, %v7106_v55 }
 0x528   : > { %8756 = vrsqrt.f32 %v7138_v39 }
 0x532   : > { %v8757_v18 = vpop.eup %8756 }
 0x533   : > { %v7202_v33 = vmul.f32 %v8757_v18, %v15649_v9  ;;  %v8696_v9 = vld [vmem:[%s16304_s8] sm:$0xff]  }
 0x534   : > { %8616 = vmatprep.subr.bf16.mxu1 %v8696_v9 }
 0x535   : > { %v7241_v6 = vmul.f32 %v15670_v7, %v7202_v33  ;;  %8617 = vmatpush3.bf16.msra.mxu1 %v8696_v9 }
 0x536   : > { %8618 = vmatprep.subr.bf16.mxu1 %v8697_v3 }
 0x537   : > { %v7280_v52 = vadd.f32 %v15678_v56, %v7241_v6 }
 0x539   : > { %v7297_v51 = vpack.c.bf16 %v7280_v52, %v7279_v31  ;;  %8619 = vmatpush3.bf16.msra.mxu1 %v8697_v3 }
 0x53b   : > { %8612 = vmatprep.mubr.msk.bf16.mxu0 %vm586_vm0, %v7297_v51 }
 0x542   : > { %v7073_v60 = vpop.xlane.xlu0 %7072 }
 0x543   : > { %v7107_v20 = vmul.f32 0.125, %v7073_v60 }
 0x545   : > { %v7139_v29 = vadd.f32 1e-06, %v7107_v20 }
 0x547   : > { %8758 = vrsqrt.f32 %v7139_v29 }
 0x551   : > { %v8759_v0 = vpop.eup %8758 }
 0x552   : > { %v7203_v37 = vmul.f32 %v8759_v0, %v15655_v22 }
 0x554   : > { %v7242_v54 = vmul.f32 %v15670_v7, %v7203_v37 }
 0x556   : > { %v7281_v46 = vadd.f32 %v15678_v56, %v7242_v54 }
 0x561   : > { %v7076_v13 = vpop.xlane.xlu1 %7075 }
 0x562   : > { %v7108_v38 = vmul.f32 0.125, %v7076_v13 }
 0x564   : > { %v7140_v48 = vadd.f32 1e-06, %v7108_v38 }
 0x566   : > { %8760 = vrsqrt.f32 %v7140_v48 }
 0x570   : > { %v8761_v4 = vpop.eup %8760 }
 0x571   : > { %v7204_v14 = vmul.f32 %v8761_v4, %v15661_v50 }
 0x573   : > { %v7243_v57 = vmul.f32 %v15670_v7, %v7204_v14 }
 0x575   : > { %v7282_v12 = vadd.f32 %v15678_v56, %v7243_v57 }
 0x577   : > { %v7298_v40 = vpack.c.bf16 %v7282_v12, %v7281_v46 }
 0x579   : > { %8613 = vmatmul.mubr.msk.bf16.gmra.mrb[28].mxu0 %vm586_vm0, %v7298_v40 }
 0x5bf   : > { %v8586_v22 = vpop.f32.mrb[0].mxu0 }
 0x5c0   : > { %v7402_v62 = vadd.f32 %v8586_v22, %v15797_v42  ;;  %v7393_v50 = vpop.f32.mrb[1].mxu0 }
 0x5c1   : > { %v7394_v41 = vadd.f32 %v15797_v42, %v7393_v50  ;;  %v8587_v61 = vpop.f32.mrb[2].mxu0 }
 0x5c2   : > { %v7554_v7 = vmul.f32 0.044715, %v7402_v62  ;;  %v7405_v21 = vadd.f32 %v8587_v61, %v15797_v42  ;;  %v7396_v23 = vpop.f32.mrb[3].mxu0  ;;  %v15805_v2 = vmul.f32 0.5, %v7402_v62 }
 0x5c3   : > { %v7552_v56 = vmul.f32 0.044715, %v7394_v41  ;;  %v7397_v35 = vadd.f32 %v15797_v42, %v7396_v23  ;;  %v15803_v44 = vmul.f32 0.5, %v7394_v41 }
 0x5c4   : > { %v7586_v24 = vmul.f32 %v7554_v7, %v7402_v62  ;;  %v7555_v43 = vmul.f32 0.044715, %v7405_v21  ;;  %v15808_v8 = vmul.f32 0.5, %v7405_v21 }
 0x5c5   : > { %v7584_v30 = vmul.f32 %v7552_v56, %v7394_v41  ;;  %v7553_v49 = vmul.f32 0.044715, %v7397_v35  ;;  %v15811_v11 = vmul.f32 0.5, %v7397_v35 }
 0x5c6   : > { %v7618_v58 = vmul.f32 %v7586_v24, %v7402_v62  ;;  %v7587_v1 = vmul.f32 %v7555_v43, %v7405_v21 }
 0x5c7   : > { %v7585_v53 = vmul.f32 %v7553_v49, %v7397_v35  ;;  %v8590_v17 = vpop.f32.mrb[4].mxu0  ;;  %v7616_v34 = vmul.f32 %v7584_v30, %v7394_v41 }
 0x5c8   : > { %v7650_v59 = vadd.f32 %v7618_v58, %v7402_v62  ;;  %v7619_v25 = vmul.f32 %v7587_v1, %v7405_v21  ;;  %v7418_v47 = vadd.f32 %v8590_v17, %v15797_v42  ;;  %v7409_v26 = vpop.f32.mrb[5].mxu0 }
 0x5c9   : > { %v7410_v32 = vadd.f32 %v15797_v42, %v7409_v26  ;;  %v8591_v45 = vpop.f32.mrb[6].mxu0  ;;  %v7617_v16 = vmul.f32 %v7585_v53, %v7397_v35  ;;  %v7648_v36 = vadd.f32 %v7616_v34, %v7394_v41 }
 0x5ca   : > { %v7682_v63 = vmul.f32 0.7978846, %v7650_v59  ;;  %v7651_v15 = vadd.f32 %v7619_v25, %v7405_v21  ;;  %v7558_v10 = vmul.f32 0.044715, %v7418_v47  ;;  %v7421_v27 = vadd.f32 %v8591_v45, %v15797_v42  ;;  %v7412_v55 = vpop.f32.mrb[7].mxu0 }
 0x5cb   : > { %v7556_v39 = vmul.f32 0.044715, %v7410_v32  ;;  %v7413_v19 = vadd.f32 %v15797_v42, %v7412_v55  ;;  %v7649_v28 = vadd.f32 %v7617_v16, %v7397_v35  ;;  %v7680_v18 = vmul.f32 0.7978846, %v7648_v36 }
 0x5cc   : > { %8762 = vtanh.f32 %v7682_v63  ;;  %v7683_v33 = vmul.f32 0.7978846, %v7651_v15  ;;  %v7590_v5 = vmul.f32 %v7558_v10, %v7418_v47  ;;  %v7559_v6 = vmul.f32 0.044715, %v7421_v27 }
 0x5cd   : > { %v7588_v31 = vmul.f32 %v7556_v39, %v7410_v32  ;;  %v7557_v52 = vmul.f32 0.044715, %v7413_v19  ;;  %v7681_v51 = vmul.f32 0.7978846, %v7649_v28  ;;  %8764 = vtanh.f32 %v7680_v18 }
 0x5ce   : > { %8766 = vtanh.f32 %v7683_v33  ;;  %v7622_v60 = vmul.f32 %v7590_v5, %v7418_v47  ;;  %v7591_v20 = vmul.f32 %v7559_v6, %v7421_v27  ;;  %v15815_v29 = vmul.f32 0.5, %v7410_v32 }
 0x5cf   : > { %v7620_v13 = vmul.f32 %v7588_v31, %v7410_v32  ;;  %v7589_v38 = vmul.f32 %v7557_v52, %v7413_v19  ;;  %v8594_v48 = vpop.f32.mrb[8].mxu0  ;;  %8768 = vtanh.f32 %v7681_v51  ;;  %v15817_v9 = vmul.f32 0.5, %v7413_v19 }
 0x5d0   : > { %v7654_v3 = vadd.f32 %v7622_v60, %v7418_v47  ;;  %v7623_v0 = vmul.f32 %v7591_v20, %v7421_v27  ;;  %v15820_v37 = vadd.f32 %v8594_v48, %v15797_v42  ;;  %v7425_v4 = vpop.f32.mrb[9].mxu0  ;;  %v15822_v14 = vmul.f32 0.5, %v7418_v47 }
 0x5d1   : > { %v7652_v54 = vadd.f32 %v7620_v13, %v7410_v32  ;;  %v7621_v57 = vmul.f32 %v7589_v38, %v7413_v19  ;;  %v7426_v46 = vadd.f32 %v15797_v42, %v7425_v4  ;;  %v8595_v12 = vpop.f32.mrb[10].mxu0  ;;  %v15825_v40 = vmul.f32 0.5, %v7421_v27 }
 0x5d2   : > { %v7686_v22 = vmul.f32 0.7978846, %v7654_v3  ;;  %v7655_v62 = vadd.f32 %v7623_v0, %v7421_v27  ;;  %v7562_v50 = vmul.f32 0.044715, %v15820_v37  ;;  %v15829_v41 = vadd.f32 %v8595_v12, %v15797_v42  ;;  %v7428_v61 = vpop.f32.mrb[11].mxu0 }
 0x5d3   : > { %v7684_v7 = vmul.f32 0.7978846, %v7652_v54  ;;  %v7653_v21 = vadd.f32 %v7621_v57, %v7413_v19  ;;  %v7560_v23 = vmul.f32 0.044715, %v7426_v46  ;;  %v15832_v56 = vadd.f32 %v15797_v42, %v7428_v61 }
 0x5d4   : > { %8770 = vtanh.f32 %v7686_v22  ;;  %v7687_v35 = vmul.f32 0.7978846, %v7655_v62  ;;  %v7594_v24 = vmul.f32 %v7562_v50, %v15820_v37  ;;  %v7563_v43 = vmul.f32 0.044715, %v15829_v41 }
 0x5d5   : > { %8772 = vtanh.f32 %v7684_v7  ;;  %v7685_v30 = vmul.f32 0.7978846, %v7653_v21  ;;  %v7592_v49 = vmul.f32 %v7560_v23, %v7426_v46  ;;  %v7561_v58 = vmul.f32 0.044715, %v15832_v56 }
 0x5d6   : > { %v8763_v1 = vpop.eup %8762  ;;  %8774 = vtanh.f32 %v7687_v35  ;;  %v7626_v53 = vmul.f32 %v7594_v24, %v15820_v37  ;;  %v7595_v17 = vmul.f32 %v7563_v43, %v15829_v41  ;;  %v15839_v34 = vmul.f32 0.5, %v7426_v46 }
 0x5d7   : > { %v8765_v59 = vpop.eup %8764  ;;  %8776 = vtanh.f32 %v7685_v30  ;;  %v7624_v25 = vmul.f32 %v7592_v49, %v7426_v46  ;;  %v7593_v47 = vmul.f32 %v7561_v58, %v15832_v56  ;;  %v8598_v26 = vpop.f32.mrb[12].mxu0  ;;  %v7746_v32 = vadd.f32 1.0, %v8763_v1 }
 0x5d8   : > { %v8767_v45 = vpop.eup %8766  ;;  %v7658_v16 = vadd.f32 %v7626_v53, %v15820_v37  ;;  %v7627_v36 = vmul.f32 %v7595_v17, %v15829_v41  ;;  %v15845_v63 = vadd.f32 %v8598_v26, %v15797_v42  ;;  %v7441_v15 = vpop.f32.mrb[13].mxu0  ;;  %v7744_v10 = vadd.f32 1.0, %v8765_v59 }
 0x5d9   : > { %v8769_v27 = vpop.eup %8768  ;;  %v7656_v55 = vadd.f32 %v7624_v25, %v7426_v46  ;;  %v7625_v39 = vmul.f32 %v7593_v47, %v15832_v56  ;;  %v15849_v19 = vadd.f32 %v15797_v42, %v7441_v15  ;;  %v8599_v28 = vpop.f32.mrb[14].mxu0  ;;  %v7747_v18 = vadd.f32 1.0, %v8767_v45 }
 0x5da   : > { %v7690_v33 = vmul.f32 0.7978846, %v7658_v16  ;;  %v7659_v5 = vadd.f32 %v7627_v36, %v15829_v41  ;;  %v7566_v6 = vmul.f32 0.044715, %v15845_v63  ;;  %v15854_v31 = vadd.f32 %v8599_v28, %v15797_v42  ;;  %v7444_v52 = vpop.f32.mrb[15].mxu0 }
 0x5db   : > { %v7688_v51 = vmul.f32 0.7978846, %v7656_v55  ;;  %v7657_v60 = vadd.f32 %v7625_v39, %v15832_v56  ;;  %v7564_v20 = vmul.f32 0.044715, %v15849_v19  ;;  %v15859_v13 = vadd.f32 %v15797_v42, %v7444_v52 }
 0x5dc   : > { %8778 = vtanh.f32 %v7690_v33  ;;  %v7691_v38 = vmul.f32 0.7978846, %v7659_v5  ;;  %v7598_v48 = vmul.f32 %v7566_v6, %v15845_v63  ;;  %v7567_v3 = vmul.f32 0.044715, %v15854_v31 }
 0x5dd   : > { %8780 = vtanh.f32 %v7688_v51  ;;  %v7689_v0 = vmul.f32 0.7978846, %v7657_v60  ;;  %v7596_v4 = vmul.f32 %v7564_v20, %v15849_v19  ;;  %v7565_v54 = vmul.f32 0.044715, %v15859_v13 }
 0x5de   : > { %v15865_v57 = vpop.eup %8770  ;;  %8782 = vtanh.f32 %v7691_v38  ;;  %v7630_v46 = vmul.f32 %v7598_v48, %v15845_v63  ;;  %v7599_v12 = vmul.f32 %v7567_v3, %v15854_v31  ;;  %v7745_v22 = vadd.f32 1.0, %v8769_v27 }
 0x5df   : > { %v8773_v62 = vpop.eup %8772  ;;  %8784 = vtanh.f32 %v7689_v0  ;;  %v7628_v50 = vmul.f32 %v7596_v4, %v15849_v19  ;;  %v7597_v61 = vmul.f32 %v7565_v54, %v15859_v13  ;;  %v8602_v7 = vpop.f32.mrb[16].mxu0  ;;  %v7776_v21 = vmul.f32 %v7744_v10, %v15803_v44 }
 0x5e0   : > { %v15872_v23 = vpop.eup %8774  ;;  %v7662_v35 = vadd.f32 %v7630_v46, %v15845_v63  ;;  %v7631_v24 = vmul.f32 %v7599_v12, %v15854_v31  ;;  %v15877_v43 = vadd.f32 %v8602_v7, %v15797_v42  ;;  %v7457_v30 = vpop.f32.mrb[17].mxu0  ;;  %v7777_v49 = vmul.f32 %v7745_v22, %v15811_v11 }
 0x5e1   : > { %v8777_v58 = vpop.eup %8776  ;;  %v7660_v1 = vadd.f32 %v7628_v50, %v15849_v19  ;;  %v7629_v53 = vmul.f32 %v7597_v61, %v15859_v13  ;;  %v15883_v17 = vadd.f32 %v15797_v42, %v7457_v30  ;;  %v8603_v44 = vpop.f32.mrb[18].mxu0  ;;  %v7778_v59 = vmul.f32 %v7746_v32, %v15805_v2 }
 0x5e2   : > { %v7694_v25 = vmul.f32 0.7978846, %v7662_v35  ;;  %v7663_v47 = vadd.f32 %v7631_v24, %v15854_v31  ;;  %v7570_v26 = vmul.f32 0.044715, %v15877_v43  ;;  %v7808_v45 = vpack.c.bf16 %v7777_v49, %v7776_v21  ;;  %v7460_v16 = vpop.f32.mrb[19].mxu0 }
 0x5e3   : > { %v7692_v36 = vmul.f32 0.7978846, %v7660_v1  ;;  %v7661_v11 = vadd.f32 %v7629_v53, %v15859_v13  ;;  %v7568_v15 = vmul.f32 0.044715, %v15883_v17  ;;  %v15891_v10 = vadd.f32 %v8603_v44, %v15797_v42 }
 0x5e4   : > { %8786 = vtanh.f32 %v7694_v25  ;;  %v7695_v27 = vmul.f32 0.7978846, %v7663_v47  ;;  %v7602_v55 = vmul.f32 %v7570_v26, %v15877_v43  ;;  %8620 = vmatprep.mubr.msk.bf16.mxu1 %vm7847_vm5, %v7808_v45  ;;  %v7779_v2 = vmul.f32 %v7747_v18, %v15808_v8 }
 0x5e5   : > { %8788 = vtanh.f32 %v7692_v36  ;;  %v7693_v32 = vmul.f32 0.7978846, %v7661_v11  ;;  %v7600_v39 = vmul.f32 %v7568_v15, %v15883_v17  ;;  %v7571_v28 = vmul.f32 0.044715, %v15891_v10 }
 0x5e6   : > { %v15898_v33 = vpop.eup %8778  ;;  %8790 = vtanh.f32 %v7695_v27  ;;  %v7634_v5 = vmul.f32 %v7602_v55, %v15877_v43  ;;  %v7809_v6 = vpack.c.bf16 %v7779_v2, %v7778_v59  ;;  %v15902_v52 = vadd.f32 %v15797_v42, %v7460_v16 }
 0x5e7   : > { %v15904_v51 = vpop.eup %8780  ;;  %8792 = vtanh.f32 %v7693_v32  ;;  %v7632_v8 = vmul.f32 %v7600_v39, %v15883_v17  ;;  %v7603_v18 = vmul.f32 %v7571_v28, %v15891_v10  ;;  %v8606_v60 = vpop.f32.mrb[20].mxu0  ;;  %v7748_v20 = vadd.f32 1.0, %v8773_v62 }
 0x5e8   : > { %v15908_v38 = vpop.eup %8782  ;;  %v7666_v48 = vadd.f32 %v7634_v5, %v15877_v43  ;;  %8621 = vmatmul.mubr.msk.bf16.vlgmr.msra.gmra.mrb[0].mxu1 %vm7847_vm5, %v7809_v6  ;;  %v7569_v3 = vmul.f32 0.044715, %v15902_v52  ;;  %v15914_v0 = vadd.f32 %v8606_v60, %v15797_v42  ;;  %v7473_v4 = vpop.f32.mrb[21].mxu0  ;;  %v7749_v54 = vadd.f32 1.0, %v8777_v58 }
 0x5e9   : > { %v15916_v46 = vpop.eup %8784  ;;  %v7664_v12 = vadd.f32 %v7632_v8, %v15883_v17  ;;  %v7635_v22 = vmul.f32 %v7603_v18, %v15891_v10  ;;  %v15921_v62 = vadd.f32 %v15797_v42, %v7473_v4  ;;  %v7780_v50 = vmul.f32 %v7748_v20, %v15815_v29  ;;  %v8607_v61 = vpop.f32.mrb[22].mxu0 }
 0x5ea   : > { %v7698_v7 = vmul.f32 0.7978846, %v7666_v48  ;;  %v7601_v21 = vmul.f32 %v7569_v3, %v15902_v52  ;;  %v7574_v35 = vmul.f32 0.044715, %v15914_v0  ;;  %v7781_v24 = vmul.f32 %v7749_v54, %v15817_v9  ;;  %v7476_v30 = vpop.f32.mrb[23].mxu0 }
 0x5eb   : > { %v7696_v49 = vmul.f32 0.7978846, %v7664_v12  ;;  %v7667_v58 = vadd.f32 %v7635_v22, %v15891_v10  ;;  %v7572_v1 = vmul.f32 0.044715, %v15921_v62  ;;  %v15930_v53 = vadd.f32 %v8607_v61, %v15797_v42 }
 0x5ec   : > { %8794 = vtanh.f32 %v7698_v7  ;;  %v7633_v29 = vmul.f32 %v7601_v21, %v15902_v52  ;;  %v7606_v44 = vmul.f32 %v7574_v35, %v15914_v0  ;;  %v7810_v59 = vpack.c.bf16 %v7781_v24, %v7780_v50 }
 0x5ed   : > { %8796 = vtanh.f32 %v7696_v49  ;;  %v7699_v25 = vmul.f32 0.7978846, %v7667_v58  ;;  %v7604_v47 = vmul.f32 %v7572_v1, %v15921_v62  ;;  %v7575_v9 = vmul.f32 0.044715, %v15930_v53 }
 0x5ee   : > { %v15936_v26 = vpop.eup %8786  ;;  %v7665_v45 = vadd.f32 %v7633_v29, %v15902_v52  ;;  %v7638_v16 = vmul.f32 %v7606_v44, %v15914_v0  ;;  %8624 = vmatprep.mubr.msk.bf16.mxu1 %vm7847_vm5, %v7810_v59  ;;  %v7750_v36 = vadd.f32 1.0, %v15865_v57  ;;  %v7751_v11 = vadd.f32 1.0, %v15872_v23 }
 0x5ef   : > { %v15943_v15 = vpop.eup %8788  ;;  %8798 = vtanh.f32 %v7699_v25  ;;  %v7636_v27 = vmul.f32 %v7604_v47, %v15921_v62  ;;  %v7607_v55 = vmul.f32 %v7575_v9, %v15930_v53  ;;  %v15948_v2 = vadd.f32 %v15797_v42, %v7476_v30  ;;  %v8610_v32 = vpop.f32.mrb[24].mxu0 }
 0x5f0   : > { %v15950_v39 = vpop.eup %8790  ;;  %v7697_v28 = vmul.f32 0.7978846, %v7665_v45  ;;  %v7670_v5 = vadd.f32 %v7638_v16, %v15914_v0  ;;  %v7782_v57 = vmul.f32 %v7750_v36, %v15822_v14  ;;  %v7783_v23 = vmul.f32 %v7751_v11, %v15825_v40  ;;  %v7489_v6 = vpop.f32.mrb[25].mxu0 }
 0x5f1   : > { %v15955_v8 = vpop.eup %8792  ;;  %v7668_v18 = vadd.f32 %v7636_v27, %v15921_v62  ;;  %v7639_v60 = vmul.f32 %v7607_v55, %v15930_v53  ;;  %v7573_v20 = vmul.f32 0.044715, %v15948_v2  ;;  %v15961_v48 = vadd.f32 %v8610_v32, %v15797_v42  ;;  %v8611_v3 = vpop.f32.mrb[26].mxu0 }
 0x5f2   : > { %8800 = vtanh.f32 %v7697_v28  ;;  %v7702_v4 = vmul.f32 0.7978846, %v7670_v5  ;;  %v7811_v54 = vpack.c.bf16 %v7783_v23, %v7782_v57  ;;  %v15964_v14 = vadd.f32 %v15797_v42, %v7489_v6  ;;  %v7492_v40 = vpop.f32.mrb[27].mxu0 }
 0x5f3   : > { %v7700_v12 = vmul.f32 0.7978846, %v7668_v18  ;;  %v7671_v22 = vadd.f32 %v7639_v60, %v15930_v53  ;;  %v7605_v50 = vmul.f32 %v7573_v20, %v15948_v2  ;;  %v7578_v61 = vmul.f32 0.044715, %v15961_v48 }
 0x5f4   : > { %8802 = vtanh.f32 %v7702_v4  ;;  %8625 = vmatmul.mubr.msk.bf16.gmra.mrb[4].mxu1 %vm7847_vm5, %v7811_v54  ;;  %v7576_v7 = vmul.f32 0.044715, %v15964_v14  ;;  %v7529_v21 = vmul.f32 0.5, %v15832_v56  ;;  %v7752_v35 = vadd.f32 1.0, %v15904_v51 }
 0x5f5   : > { %8804 = vtanh.f32 %v7700_v12  ;;  %v7703_v24 = vmul.f32 0.7978846, %v7671_v22  ;;  %v7637_v30 = vmul.f32 %v7605_v50, %v15948_v2  ;;  %v7610_v49 = vmul.f32 %v7578_v61, %v15961_v48 }
 0x5f6   : > { %v15975_v58 = vpop.eup %8794  ;;  %v7608_v1 = vmul.f32 %v7576_v7, %v15964_v14  ;;  %v7753_v29 = vadd.f32 1.0, %v15916_v46  ;;  %v7784_v44 = vmul.f32 %v7752_v35, %v15839_v34  ;;  %v15981_v59 = vadd.f32 %v8611_v3, %v15797_v42 }
 0x5f7   : > { %v8797_v56 = vpop.eup %8796  ;;  %8806 = vtanh.f32 %v7703_v24  ;;  %v7669_v51 = vadd.f32 %v7637_v30, %v15948_v2  ;;  %v7642_v25 = vmul.f32 %v7610_v49, %v15961_v48  ;;  %v7530_v47 = vmul.f32 0.5, %v15820_v37 }
 0x5f8   : > { %v7640_v9 = vmul.f32 %v7608_v1, %v15964_v14  ;;  %v7785_v45 = vmul.f32 %v7753_v29, %v7529_v21  ;;  %v7579_v16 = vmul.f32 0.044715, %v15981_v59  ;;  %v7531_v46 = vmul.f32 0.5, %v15829_v41 }
 0x5f9   : > { %v8799_v36 = vpop.eup %8798  ;;  %v7701_v34 = vmul.f32 0.7978846, %v7669_v51  ;;  %v7674_v11 = vadd.f32 %v7642_v25, %v15961_v48  ;;  %v7754_v27 = vadd.f32 1.0, %v15898_v33  ;;  %v7755_v55 = vadd.f32 1.0, %v15908_v38 }
 0x5fa   : > { %v7672_v32 = vadd.f32 %v7640_v9, %v15964_v14  ;;  %v7812_v28 = vpack.c.bf16 %v7785_v45, %v7784_v44  ;;  %v7611_v37 = vmul.f32 %v7579_v16, %v15981_v59  ;;  %v15995_v5 = vadd.f32 %v15797_v42, %v7492_v40 }
 0x5fb   : > { %8808 = vtanh.f32 %v7701_v34  ;;  %v7706_v57 = vmul.f32 0.7978846, %v7674_v11  ;;  %v7786_v23 = vmul.f32 %v7754_v27, %v7530_v47  ;;  %v7787_v41 = vmul.f32 %v7755_v55, %v7531_v46 }
 0x5fc   : > { %v8801_v6 = vpop.eup %8800  ;;  %v7704_v18 = vmul.f32 0.7978846, %v7672_v32  ;;  %8628 = vmatprep.mubr.msk.bf16.mxu1 %vm7847_vm5, %v7812_v28  ;;  %v7643_v33 = vmul.f32 %v7611_v37, %v15981_v59  ;;  %v7577_v38 = vmul.f32 0.044715, %v15995_v5  ;;  %v7532_v60 = vmul.f32 0.5, %v15849_v19 }
 0x5fd   : > { %8810 = vtanh.f32 %v7706_v57  ;;  %v7813_v20 = vpack.c.bf16 %v7787_v41, %v7786_v23  ;;  %v7533_v3 = vmul.f32 0.5, %v15859_v13  ;;  %v7756_v4 = vadd.f32 1.0, %v15943_v15 }
 0x5fe   : > { %v8803_v54 = vpop.eup %8802  ;;  %8812 = vtanh.f32 %v7704_v18  ;;  %v7675_v40 = vadd.f32 %v7643_v33, %v15981_v59  ;;  %v7609_v12 = vmul.f32 %v7577_v38, %v15995_v5  ;;  %v7757_v22 = vadd.f32 1.0, %v15955_v8 }
 0x5ff   : > { %v8805_v50 = vpop.eup %8804  ;;  %8629 = vmatmul.mubr.msk.bf16.gmra.mrb[8].mxu1 %vm7847_vm5, %v7813_v20  ;;  %v7788_v61 = vmul.f32 %v7756_v4, %v7532_v60  ;;  %v7534_v19 = vmul.f32 0.5, %v15845_v63  ;;  %v7535_v7 = vmul.f32 0.5, %v15854_v31  ;;  %v7758_v13 = vadd.f32 1.0, %v15936_v26 }
 0x600   : > { %v7707_v21 = vmul.f32 0.7978846, %v7675_v40  ;;  %v7641_v15 = vmul.f32 %v7609_v12, %v15995_v5  ;;  %v7789_v35 = vmul.f32 %v7757_v22, %v7533_v3  ;;  %v7759_v24 = vadd.f32 1.0, %v15950_v39 }
 0x601   : > { %v8807_v30 = vpop.eup %8806  ;;  %v7790_v49 = vmul.f32 %v7758_v13, %v7534_v19  ;;  %v7536_v8 = vmul.f32 0.5, %v15883_v17  ;;  %v7537_v1 = vmul.f32 0.5, %v15902_v52  ;;  %v7760_v29 = vadd.f32 1.0, %v8797_v56 }
 0x602   : > { %8814 = vtanh.f32 %v7707_v21  ;;  %v7673_v63 = vadd.f32 %v7641_v15, %v15995_v5  ;;  %v7814_v44 = vpack.c.bf16 %v7789_v35, %v7788_v61  ;;  %v7791_v31 = vmul.f32 %v7759_v24, %v7535_v7 }
 0x603   : > { %v7761_v51 = vadd.f32 1.0, %v8801_v6  ;;  %v7792_v26 = vmul.f32 %v7760_v29, %v7536_v8  ;;  %v7538_v25 = vmul.f32 0.5, %v15877_v43  ;;  %v7539_v47 = vmul.f32 0.5, %v15891_v10 }
 0x604   : > { %v7705_v9 = vmul.f32 0.7978846, %v7673_v63  ;;  %8632 = vmatprep.mubr.msk.bf16.mxu1 %vm7847_vm5, %v7814_v44  ;;  %v7815_v39 = vpack.c.bf16 %v7791_v31, %v7790_v49  ;;  %v7762_v17 = vadd.f32 1.0, %v15975_v58  ;;  %v7763_v45 = vadd.f32 1.0, %v8799_v36 }
 0x605   : > { %v8809_v52 = vpop.eup %8808  ;;  %v7793_v56 = vmul.f32 %v7761_v51, %v7537_v1  ;;  %v7540_v16 = vmul.f32 0.5, %v15921_v62  ;;  %v7541_v46 = vmul.f32 0.5, %v15948_v2  ;;  %v7764_v34 = vadd.f32 1.0, %v8805_v50 }
 0x606   : > { %8816 = vtanh.f32 %v7705_v9  ;;  %v7794_v11 = vmul.f32 %v7762_v17, %v7538_v25  ;;  %v7795_v27 = vmul.f32 %v7763_v45, %v7539_v47  ;;  %v7765_v43 = vadd.f32 1.0, %v8809_v52 }
 0x607   : > { %v8811_v55 = vpop.eup %8810  ;;  %8633 = vmatmul.mubr.msk.bf16.gmra.mrb[12].mxu1 %vm7847_vm5, %v7815_v39  ;;  %v7816_v10 = vpack.c.bf16 %v7793_v56, %v7792_v26  ;;  %v7796_v32 = vmul.f32 %v7764_v34, %v7540_v16  ;;  %v7542_v28 = vmul.f32 0.5, %v15914_v0  ;;  %v7543_v58 = vmul.f32 0.5, %v15930_v53 }
 0x608   : > { %v8813_v36 = vpop.eup %8812  ;;  %v7817_v37 = vpack.c.bf16 %v7795_v27, %v7794_v11  ;;  %v7797_v57 = vmul.f32 %v7765_v43, %v7541_v46  ;;  %v7766_v62 = vadd.f32 1.0, %v8803_v54  ;;  %v7767_v23 = vadd.f32 1.0, %v8807_v30 }
 0x609   : > { %8636 = vmatprep.mubr.msk.bf16.mxu1 %vm7847_vm5, %v7816_v10  ;;  %v7770_v18 = vadd.f32 1.0, %v8811_v55  ;;  %v7546_v60 = vmul.f32 0.5, %v15961_v48  ;;  %v7547_v20 = vmul.f32 0.5, %v15981_v59  ;;  %v7768_v53 = vadd.f32 1.0, %v8813_v36 }
 0x60a   : > { %v7818_v2 = vpack.c.bf16 %v7797_v57, %v7796_v32  ;;  %v7798_v41 = vmul.f32 %v7766_v62, %v7542_v28  ;;  %v7799_v6 = vmul.f32 %v7767_v23, %v7543_v58  ;;  %v7544_v40 = vmul.f32 0.5, %v15964_v14 }
 0x60b   : > { %v7802_v3 = vmul.f32 %v7770_v18, %v7546_v60  ;;  %v7545_v12 = vmul.f32 0.5, %v15995_v5  ;;  %v17381_v18 = vld [vmem:[#allocation7_spill] sm:$0xff] }
 0x60c   : > { %v8815_v33 = vpop.eup %8814  ;;  %v7819_v38 = vpack.c.bf16 %v7799_v6, %v7798_v41  ;;  %v7800_v61 = vmul.f32 %v7768_v53, %v7544_v40  ;;  %v16045_v6 = vld [vmem:[%s16305_s9] ss:$0 sm:$0xff]  ;;  %v17384_v53 = vld [vmem:[#allocation4_spill] sm:$0xff]  ;;  %v17385_v40 = vld [vmem:[#allocation26_spill] sm:$0xff] }
 0x60d   : > { %v7771_v0 = vadd.f32 1.0, %v8815_v33  ;;  %v8166_v33 = vrot.slane %v17381_v18, 1 }
 0x60f   : > { %8637 = vmatmul.mubr.msk.bf16.gmra.mrb[16].mxu1 %vm7847_vm5, %v7817_v37  ;;  %v7803_v4 = vmul.f32 %v7771_v0, %v7547_v20  ;;  %v17383_v20 = vld [vmem:[#allocation3_spill] sm:$0xff] }
 0x610   : > { %v8817_v54 = vpop.eup %8816  ;;  %8640 = vmatprep.mubr.msk.bf16.mxu1 %vm7847_vm5, %v7818_v2  ;;  %v8160_v0 = vrot.slane %v17383_v20, 1 }
 0x611   : > { %v7769_v22 = vadd.f32 1.0, %v8817_v54  ;;  %v7821_v50 = vpack.c.bf16 %v7803_v4, %v7802_v3  ;;  %v8161_v3 = vrot.slane %v17384_v53, 1  ;;  %v16054_v54 = vld [vmem:[%s16306_s10] ss:$0 sm:$0xff] }
 0x613   : > { %v7801_v19 = vmul.f32 %v7769_v22, %v7545_v12  ;;  %v8169_v12 = vrot.slane %v17385_v40, 1  ;;  %v17386_v22 = vld [vmem:[#allocation29_spill] sm:$0xff] }
 0x615   : > { %v7820_v48 = vpack.c.bf16 %v7801_v19, %v7800_v61 }
 0x617   : > { %8641 = vmatmul.mubr.msk.bf16.gmra.mrb[20].mxu1 %vm7847_vm5, %v7819_v38  ;;  %v17382_v38 = vld [vmem:[#allocation25_spill] sm:$0xff] }
 0x618   : > { %8644 = vmatprep.mubr.msk.bf16.mxu1 %vm7847_vm5, %v7820_v48  ;;  %v8167_v60 = vrot.slane %v17382_v38, 1  ;;  %v17387_v48 = vld [vmem:[#allocation5_spill] sm:$0xff] }
 0x61f   : > { %8645 = vmatmul.mubr.msk.bf16.gmra.mrb[24].mxu1 %vm7847_vm5, %v7821_v50  ;;  %v8170_v50 = vrot.slane %v17386_v22, 1 }
 0x64c   : > { %v8614_v59 = vpop.f32.mrb[28].mxu0 }
 0x64d   : > { %v7514_v7 = vadd.f32 %v8614_v59, %v15797_v42  ;;  %v7505_v13 = vpop.f32.mrb[29].mxu0  ;;  %v8163_v59 = vrot.slane %v17387_v48, 1 }
 0x64e   : > { %v7506_v21 = vadd.f32 %v15797_v42, %v7505_v13  ;;  %v8615_v14 = vpop.f32.mrb[30].mxu0 }
 0x64f   : > { %v7582_v15 = vmul.f32 0.044715, %v7514_v7  ;;  %v7517_v5 = vadd.f32 %v8615_v14, %v15797_v42  ;;  %v7508_v35 = vpop.f32.mrb[31].mxu0  ;;  %v7550_v55 = vmul.f32 0.5, %v7514_v7 }
 0x650   : > { %v7580_v24 = vmul.f32 0.044715, %v7506_v21  ;;  %v7509_v30 = vadd.f32 %v15797_v42, %v7508_v35  ;;  %v7548_v28 = vmul.f32 0.5, %v7506_v21  ;;  %v8162_v35 = vsel %vm1628_vm2, %v8160_v0, %v8161_v3 }
 0x651   : > { %v7614_v49 = vmul.f32 %v7582_v15, %v7514_v7  ;;  %v7583_v8 = vmul.f32 0.044715, %v7517_v5  ;;  %v7551_v10 = vmul.f32 0.5, %v7517_v5 }
 0x652   : > { %v7612_v1 = vmul.f32 %v7580_v24, %v7506_v21  ;;  %v7581_v29 = vmul.f32 0.044715, %v7509_v30  ;;  %v7549_v58 = vmul.f32 0.5, %v7509_v30 }
 0x653   : > { %v7646_v63 = vmul.f32 %v7614_v49, %v7514_v7  ;;  %v7615_v44 = vmul.f32 %v7583_v8, %v7517_v5  ;;  %v8171_v8 = vsel %vm1628_vm2, %v8169_v12, %v8170_v50  ;;  %v17397_v12 = vld [vmem:[#allocation12_spill] sm:$0xff]  ;;  %v17398_v50 = vld [vmem:[#allocation31_spill] sm:$0xff] }
 0x654   : > { %v7644_v31 = vmul.f32 %v7612_v1, %v7506_v21  ;;  %v7613_v51 = vmul.f32 %v7581_v29, %v7509_v30  ;;  %v8190_v22 = vrot.slane %v17397_v12, 1 }
 0x655   : > { %v7678_v26 = vadd.f32 %v7646_v63, %v7514_v7  ;;  %v7647_v25 = vmul.f32 %v7615_v44, %v7517_v5  ;;  %v17388_v7 = vld [vmem:[#allocation6_spill] sm:$0xff] }
 0x656   : > { %v7676_v47 = vadd.f32 %v7644_v31, %v7506_v21  ;;  %v7645_v9 = vmul.f32 %v7613_v51, %v7509_v30  ;;  %v8164_v13 = vrot.slane %v17388_v7, 1  ;;  %v8168_v21 = vsel %vm1628_vm2, %v8166_v33, %v8167_v60 }
 0x657   : > { %v7710_v39 = vmul.f32 0.7978846, %v7678_v26  ;;  %v7679_v17 = vadd.f32 %v7647_v25, %v7517_v5 }
 0x658   : > { %v7708_v45 = vmul.f32 0.7978846, %v7676_v47  ;;  %v7677_v52 = vadd.f32 %v7645_v9, %v7509_v30  ;;  %v8165_v44 = vsel %vm1628_vm2, %v8163_v59, %v8164_v13  ;;  %v17389_v47 = vld [vmem:[#allocation50_spill] sm:$0xff]  ;;  %v17400_v59 = vld [vmem:[#allocation9_spill] sm:$0xff] }
 0x659   : > { %8818 = vtanh.f32 %v7710_v39  ;;  %v7711_v56 = vmul.f32 0.7978846, %v7679_v17  ;;  %v8178_v9 = vrot.slane %v17389_v47, 1  ;;  %v17390_v39 = vld [vmem:[#allocation58_spill] sm:$0xff]  ;;  %v8185_v7 = vrot.slane %v17400_v59, 1 }
 0x65a   : > { %8820 = vtanh.f32 %v7708_v45  ;;  %v7709_v42 = vmul.f32 0.7978846, %v7677_v52  ;;  %v8179_v17 = vrot.slane %v17390_v39, 1  ;;  %v17391_v45 = vld [vmem:[#allocation35_spill] sm:$0xff] }
 0x65b   : > { %8822 = vtanh.f32 %v7711_v56  ;;  %v8172_v52 = vrot.slane %v17391_v45, 1  ;;  %v17392_v56 = vld [vmem:[#allocation39_spill] sm:$0xff] }
 0x65c   : > { %8824 = vtanh.f32 %v7709_v42  ;;  %v8173_v42 = vrot.slane %v17392_v56, 1 }
 0x663   : > { %v8819_v16 = vpop.eup %8818 }
 0x664   : > { %v8821_v46 = vpop.eup %8820  ;;  %v7774_v34 = vadd.f32 1.0, %v8819_v16 }
 0x665   : > { %v8823_v11 = vpop.eup %8822  ;;  %v7772_v27 = vadd.f32 1.0, %v8821_v46  ;;  %v17393_v46 = vld [vmem:[#allocation62_spill] sm:$0xff] }
 0x666   : > { %v8825_v43 = vpop.eup %8824  ;;  %v7775_v32 = vadd.f32 1.0, %v8823_v11  ;;  %v7806_v37 = vmul.f32 %v7774_v34, %v7550_v55  ;;  %v8181_v34 = vrot.slane %v17393_v46, 1  ;;  %v17394_v11 = vld [vmem:[#allocation15_spill] sm:$0xff] }
 0x667   : > { %v7773_v36 = vadd.f32 1.0, %v8825_v43  ;;  %v7804_v62 = vmul.f32 %v7772_v27, %v7548_v28  ;;  %v8182_v27 = vrot.slane %v17394_v11, 1  ;;  %v17396_v28 = vld [vmem:[#allocation44_spill] sm:$0xff] }
 0x668   : > { %v7807_v57 = vmul.f32 %v7775_v32, %v7551_v10  ;;  %v17395_v10 = vld [vmem:[#allocation43_spill] sm:$0xff] }
 0x669   : > { %v7805_v23 = vmul.f32 %v7773_v36, %v7549_v58  ;;  %v8175_v32 = vrot.slane %v17395_v10, 1  ;;  %v8176_v58 = vrot.slane %v17396_v28, 1  ;;  %v8180_v36 = vsel %vm1628_vm2, %v8178_v9, %v8179_v17  ;;  %v17408_v10 = vld [vmem:[#allocation41_spill] sm:$0xff] }
 0x66a   : > { %v7823_v2 = vpack.c.bf16 %v7807_v57, %v7806_v37  ;;  %v8183_v33 = vsel %vm1628_vm2, %v8181_v34, %v8182_v27  ;;  %v17406_v34 = vld [vmem:[#allocation60_spill] sm:$0xff] }
 0x66b   : > { %v7822_v41 = vpack.c.bf16 %v7805_v23, %v7804_v62  ;;  %v8174_v23 = vsel %vm1628_vm2, %v8172_v52, %v8173_v42  ;;  %v8177_v0 = vsel %vm1628_vm2, %v8175_v32, %v8176_v58  ;;  %v8203_v11 = vrot.slane %v17406_v34, 1 }
 0x66c   : > { %v8197_v32 = vrot.slane %v17408_v10, 1 }
 0x66d   : > { %8648 = vmatprep.mubr.msk.bf16.mxu1 %vm7847_vm5, %v7822_v41 }
 0x66e   : > { %8649 = vmatmul.mubr.msk.bf16.gmra.mrb[28].mxu1 %vm7847_vm5, %v7823_v2 }
 0x6bb   : > { %v8622_v4 = vpop.f32.mrb[0].mxu1 }
 0x6bc   : > { %v7939_v61 = vadd.f32 %v8622_v4, %v16045_v6  ;;  %v7930_v19 = vpop.f32.mrb[1].mxu1 }
 0x6bd   : > { %v7931_v14 = vadd.f32 %v16045_v6, %v7930_v19  ;;  %v8623_v15 = vpop.f32.mrb[2].mxu1  ;;  %v17399_v19 = vld [vmem:[#allocation8_spill] sm:$0xff] }
 0x6be   : > { %v8066_v5 = vmul.f32 %v16054_v54, %v7939_v61  ;;  %v7942_v24 = vadd.f32 %v8623_v15, %v16045_v6  ;;  %v7933_v30 = vpop.f32.mrb[3].mxu1  ;;  %v8191_v61 = vrot.slane %v17398_v50, 1  ;;  %v8184_v48 = vrot.slane %v17399_v19, 1  ;;  %v17402_v15 = vld [vmem:[#allocation32_spill] sm:$0xff] }
 0x6bf   : > { %v8064_v49 = vmul.f32 %v16054_v54, %v7931_v14  ;;  %v7934_v1 = vadd.f32 %v16045_v6, %v7933_v30  ;;  %v17403_v30 = vld [vmem:[#allocation10_spill] sm:$0xff] }
 0x6c0   : > { %v8290_v29 = vadd.f32 %v8168_v21, %v8066_v5  ;;  %v8067_v63 = vmul.f32 %v16054_v54, %v7942_v24  ;;  %v17401_v21 = vld [vmem:[#allocation27_spill] sm:$0xff]  ;;  %v8194_v5 = vrot.slane %v17402_v15, 1 }
 0x6c1   : > { %v8288_v31 = vadd.f32 %v8162_v35, %v8064_v49  ;;  %v8065_v51 = vmul.f32 %v16054_v54, %v7934_v1  ;;  %v8193_v14 = vrot.slane %v17401_v21, 1  ;;  %v8187_v49 = vrot.slane %v17403_v30, 1  ;;  %v17416_v30 = vld [vmem:[#allocation65_spill] sm:$0xff] }
 0x6c2   : > { %8322 = vst.msk [vmem:[%s16069_s30 + $0x10] sm:$0xff] %vm586_vm0, %v8290_v29  ;;  %v8291_v26 = vadd.f32 %v8171_v8, %v8067_v63  ;;  %v17404_v8 = vld [vmem:[#allocation11_spill] sm:$0xff]  ;;  %v8192_v29 = vsel %vm1628_vm2, %v8190_v22, %v8191_v61 }
 0x6c3   : > { %8320 = vst.msk [vmem:[%s16069_s30] sm:$0xff] %vm586_vm0, %v8288_v31  ;;  %v8289_v25 = vadd.f32 %v8165_v44, %v8065_v51  ;;  %v8188_v1 = vrot.slane %v17404_v8, 1  ;;  %v8186_v51 = vsel %vm1628_vm2, %v8184_v48, %v8185_v7  ;;  %v8195_v9 = vsel %vm1628_vm2, %v8193_v14, %v8194_v5  ;;  %v17414_v14 = vld [vmem:[#allocation70_spill] sm:$0xff] }
 0x6c4   : > { %8323 = vst.msk [vmem:[%s16069_s30 + $0x18] sm:$0xff] %vm586_vm0, %v8291_v26  ;;  %v8215_v15 = vrot.slane %v17414_v14, 1 }
 0x6c5   : > { %8321 = vst.msk [vmem:[%s16069_s30 + $0x8] sm:$0xff] %vm586_vm0, %v8289_v25  ;;  %v8189_v52 = vsel %vm1628_vm2, %v8187_v49, %v8188_v1  ;;  %v8209_v49 = vrot.slane %v17416_v30, 1 }
 0x6c7   : > { %v8626_v16 = vpop.f32.mrb[4].mxu1 }
 0x6c8   : > { %v7955_v43 = vadd.f32 %v8626_v16, %v16045_v6  ;;  %v7946_v55 = vpop.f32.mrb[5].mxu1  ;;  %v17405_v16 = vld [vmem:[#allocation51_spill] sm:$0xff] }
 0x6c9   : > { %v7947_v37 = vadd.f32 %v16045_v6, %v7946_v55  ;;  %v8627_v57 = vpop.f32.mrb[6].mxu1  ;;  %v8202_v46 = vrot.slane %v17405_v16, 1 }
 0x6ca   : > { %v8070_v62 = vmul.f32 %v16054_v54, %v7955_v43  ;;  %v7958_v2 = vadd.f32 %v8627_v57, %v16045_v6  ;;  %v7949_v41 = vpop.f32.mrb[7].mxu1  ;;  %v17407_v43 = vld [vmem:[#allocation40_spill] sm:$0xff] }
 0x6cb   : > { %v8068_v18 = vmul.f32 %v16054_v54, %v7947_v37  ;;  %v7950_v38 = vadd.f32 %v16045_v6, %v7949_v41  ;;  %v8196_v55 = vrot.slane %v17407_v43, 1  ;;  %v17410_v57 = vld [vmem:[#allocation16_spill] sm:$0xff]  ;;  %v17411_v41 = vld [vmem:[#allocation45_spill] sm:$0xff] }
 0x6cc   : > { %v8294_v60 = vadd.f32 %v8180_v36, %v8070_v62  ;;  %v8071_v20 = vmul.f32 %v16054_v54, %v7958_v2  ;;  %v17409_v36 = vld [vmem:[#allocation64_spill] sm:$0xff]  ;;  %v8206_v62 = vrot.slane %v17410_v57, 1 }
 0x6cd   : > { %v8292_v53 = vadd.f32 %v8174_v23, %v8068_v18  ;;  %v8069_v3 = vmul.f32 %v16054_v54, %v7950_v38  ;;  %v8205_v37 = vrot.slane %v17409_v36, 1  ;;  %v8199_v18 = vrot.slane %v17411_v41, 1  ;;  %v17424_v41 = vld [vmem:[#allocation23_spill] sm:$0xff] }
 0x6ce   : > { %8326 = vst.msk [vmem:[%s16069_s30 + $0x30] sm:$0xff] %vm586_vm0, %v8294_v60  ;;  %v8295_v4 = vadd.f32 %v8183_v33, %v8071_v20  ;;  %v17412_v33 = vld [vmem:[#allocation47_spill] sm:$0xff]  ;;  %v8204_v60 = vsel %vm1628_vm2, %v8202_v46, %v8203_v11 }
 0x6cf   : > { %8324 = vst.msk [vmem:[%s16069_s30 + $0x20] sm:$0xff] %vm586_vm0, %v8292_v53  ;;  %v8293_v40 = vadd.f32 %v8177_v0, %v8069_v3  ;;  %v8200_v38 = vrot.slane %v17412_v33, 1  ;;  %v8198_v3 = vsel %vm1628_vm2, %v8196_v55, %v8197_v32  ;;  %v8207_v22 = vsel %vm1628_vm2, %v8205_v37, %v8206_v62  ;;  %v17422_v37 = vld [vmem:[#allocation54_spill] sm:$0xff] }
 0x6d0   : > { %8327 = vst.msk [vmem:[%s16069_s30 + $0x38] sm:$0xff] %vm586_vm0, %v8295_v4  ;;  %v8227_v57 = vrot.slane %v17422_v37, 1 }
 0x6d1   : > { %8325 = vst.msk [vmem:[%s16069_s30 + $0x28] sm:$0xff] %vm586_vm0, %v8293_v40  ;;  %v8201_v48 = vsel %vm1628_vm2, %v8199_v18, %v8200_v38  ;;  %v8221_v18 = vrot.slane %v17424_v41, 1 }
 0x6d2   : > { %v8630_v13 = vpop.f32.mrb[8].mxu1 }
 0x6d3   : > { %v7971_v35 = vadd.f32 %v8630_v13, %v16045_v6  ;;  %v7962_v24 = vpop.f32.mrb[9].mxu1  ;;  %v17413_v13 = vld [vmem:[#allocation66_spill] sm:$0xff] }
 0x6d4   : > { %v7963_v63 = vadd.f32 %v16045_v6, %v7962_v24  ;;  %v8631_v44 = vpop.f32.mrb[10].mxu1  ;;  %v8214_v21 = vrot.slane %v17413_v13, 1 }
 0x6d5   : > { %v8074_v31 = vmul.f32 %v16054_v54, %v7971_v35  ;;  %v7974_v26 = vadd.f32 %v8631_v44, %v16045_v6  ;;  %v7965_v25 = vpop.f32.mrb[11].mxu1  ;;  %v17415_v35 = vld [vmem:[#allocation13_spill] sm:$0xff] }
 0x6d6   : > { %v8072_v47 = vmul.f32 %v16054_v54, %v7963_v63  ;;  %v7966_v39 = vadd.f32 %v16045_v6, %v7965_v25  ;;  %v8208_v24 = vrot.slane %v17415_v35, 1  ;;  %v17418_v44 = vld [vmem:[#allocation81_spill] sm:$0xff]  ;;  %v17419_v25 = vld [vmem:[#allocation14_spill] sm:$0xff] }
 0x6d7   : > { %v8298_v17 = vadd.f32 %v8192_v29, %v8074_v31  ;;  %v8075_v45 = vmul.f32 %v16054_v54, %v7974_v26  ;;  %v17417_v29 = vld [vmem:[#allocation80_spill] sm:$0xff]  ;;  %v8218_v31 = vrot.slane %v17418_v44, 1 }
 0x6d8   : > { %v8296_v56 = vadd.f32 %v8186_v51, %v8072_v47  ;;  %v8073_v42 = vmul.f32 %v16054_v54, %v7966_v39  ;;  %v8217_v63 = vrot.slane %v17417_v29, 1  ;;  %v8211_v47 = vrot.slane %v17419_v25, 1  ;;  %v17432_v25 = vld [vmem:[#allocation53_spill] sm:$0xff] }
 0x6d9   : > { %8330 = vst.msk [vmem:[%s16069_s30 + $0x50] sm:$0xff] %vm586_vm0, %v8298_v17  ;;  %v8299_v27 = vadd.f32 %v8195_v9, %v8075_v45  ;;  %v17420_v9 = vld [vmem:[#allocation46_spill] sm:$0xff]  ;;  %v8216_v17 = vsel %vm1628_vm2, %v8214_v21, %v8215_v15 }
 0x6da   : > { %8328 = vst.msk [vmem:[%s16069_s30 + $0x40] sm:$0xff] %vm586_vm0, %v8296_v56  ;;  %v8297_v28 = vadd.f32 %v8189_v52, %v8073_v42  ;;  %v8634_v58 = vpop.f32.mrb[12].mxu1  ;;  %v8212_v39 = vrot.slane %v17420_v9, 1  ;;  %v8210_v42 = vsel %vm1628_vm2, %v8208_v24, %v8209_v49  ;;  %v8219_v11 = vsel %vm1628_vm2, %v8217_v63, %v8218_v31  ;;  %v17430_v63 = vld [vmem:[#allocation42_spill] sm:$0xff] }
 0x6db   : > { %8331 = vst.msk [vmem:[%s16069_s30 + $0x58] sm:$0xff] %vm586_vm0, %v8299_v27  ;;  %v7987_v23 = vadd.f32 %v8634_v58, %v16045_v6  ;;  %v7978_v2 = vpop.f32.mrb[13].mxu1  ;;  %v17421_v58 = vld [vmem:[#allocation21_spill] sm:$0xff]  ;;  %v8239_v44 = vrot.slane %v17430_v63, 1 }
 0x6dc   : > { %8329 = vst.msk [vmem:[%s16069_s30 + $0x48] sm:$0xff] %vm586_vm0, %v8297_v28  ;;  %v7979_v20 = vadd.f32 %v16045_v6, %v7978_v2  ;;  %v8635_v0 = vpop.f32.mrb[14].mxu1  ;;  %v8213_v10 = vsel %vm1628_vm2, %v8211_v47, %v8212_v39  ;;  %v8226_v36 = vrot.slane %v17421_v58, 1  ;;  %v8233_v47 = vrot.slane %v17432_v25, 1 }
 0x6dd   : > { %v8078_v53 = vmul.f32 %v16054_v54, %v7987_v23  ;;  %v7990_v4 = vadd.f32 %v8635_v0, %v16045_v6  ;;  %v7981_v40 = vpop.f32.mrb[15].mxu1  ;;  %v17423_v23 = vld [vmem:[#allocation28_spill] sm:$0xff] }
 0x6de   : > { %v8076_v12 = vmul.f32 %v16054_v54, %v7979_v20  ;;  %v7982_v50 = vadd.f32 %v16045_v6, %v7981_v40  ;;  %v8220_v2 = vrot.slane %v17423_v23, 1  ;;  %v17426_v0 = vld [vmem:[#allocation76_spill] sm:$0xff] }
 0x6df   : > { %v8302_v61 = vadd.f32 %v8204_v60, %v8078_v53  ;;  %v8079_v19 = vmul.f32 %v16054_v54, %v7990_v4  ;;  %v17425_v60 = vld [vmem:[#allocation33_spill] sm:$0xff]  ;;  %v8230_v53 = vrot.slane %v17426_v0, 1  ;;  %v17427_v40 = vld [vmem:[#allocation20_spill] sm:$0xff] }
 0x6e0   : > { %v8300_v59 = vadd.f32 %v8198_v3, %v8076_v12  ;;  %v8077_v7 = vmul.f32 %v16054_v54, %v7982_v50  ;;  %v8229_v20 = vrot.slane %v17425_v60, 1  ;;  %v8223_v12 = vrot.slane %v17427_v40, 1 }
 0x6e1   : > { %8334 = vst.msk [vmem:[%s16069_s30 + $0x70] sm:$0xff] %vm586_vm0, %v8302_v61  ;;  %v8303_v5 = vadd.f32 %v8207_v22, %v8079_v19  ;;  %v17428_v22 = vld [vmem:[#allocation79_spill] sm:$0xff]  ;;  %v8228_v61 = vsel %vm1628_vm2, %v8226_v36, %v8227_v57 }
 0x6e2   : > { %8332 = vst.msk [vmem:[%s16069_s30 + $0x60] sm:$0xff] %vm586_vm0, %v8300_v59  ;;  %v8301_v8 = vadd.f32 %v8201_v48, %v8077_v7  ;;  %v8638_v1 = vpop.f32.mrb[16].mxu1  ;;  %v8224_v50 = vrot.slane %v17428_v22, 1  ;;  %v8222_v7 = vsel %vm1628_vm2, %v8220_v2, %v8221_v18  ;;  %v8231_v15 = vsel %vm1628_vm2, %v8229_v20, %v8230_v53  ;;  %v17437_v20 = vld [vmem:[#allocation61_spill] sm:$0xff]  ;;  %v17438_v53 = vld [vmem:[#allocation98_spill] sm:$0xff] }
 0x6e3   : > { %8335 = vst.msk [vmem:[%s16069_s30 + $0x78] sm:$0xff] %vm586_vm0, %v8303_v5  ;;  %v8003_v51 = vadd.f32 %v8638_v1, %v16045_v6  ;;  %v7994_v26 = vpop.f32.mrb[17].mxu1  ;;  %v17429_v1 = vld [vmem:[#allocation52_spill] sm:$0xff]  ;;  %v8250_v0 = vrot.slane %v17437_v20, 1 }
 0x6e4   : > { %8333 = vst.msk [vmem:[%s16069_s30 + $0x68] sm:$0xff] %vm586_vm0, %v8301_v8  ;;  %v7995_v45 = vadd.f32 %v16045_v6, %v7994_v26  ;;  %v8639_v52 = vpop.f32.mrb[18].mxu1  ;;  %v8225_v30 = vsel %vm1628_vm2, %v8223_v12, %v8224_v50  ;;  %v8238_v29 = vrot.slane %v17429_v1, 1  ;;  %v17440_v12 = vld [vmem:[#allocation87_spill] sm:$0xff] }
 0x6e5   : > { %v8082_v56 = vmul.f32 %v16054_v54, %v8003_v51  ;;  %v8006_v16 = vadd.f32 %v8639_v52, %v16045_v6  ;;  %v7997_v46 = vpop.f32.mrb[19].mxu1  ;;  %v17431_v51 = vld [vmem:[#allocation77_spill] sm:$0xff]  ;;  %v17434_v52 = vld [vmem:[#allocation55_spill] sm:$0xff]  ;;  %v8245_v22 = vrot.slane %v17440_v12, 1 }
 0x6e6   : > { %v8080_v34 = vmul.f32 %v16054_v54, %v7995_v45  ;;  %v7998_v27 = vadd.f32 %v16045_v6, %v7997_v46  ;;  %v8232_v26 = vrot.slane %v17431_v51, 1  ;;  %v17435_v46 = vld [vmem:[#allocation78_spill] sm:$0xff] }
 0x6e7   : > { %v8306_v43 = vadd.f32 %v8216_v17, %v8082_v56  ;;  %v8083_v55 = vmul.f32 %v16054_v54, %v8006_v16  ;;  %v17433_v17 = vld [vmem:[#allocation89_spill] sm:$0xff]  ;;  %v8242_v56 = vrot.slane %v17434_v52, 1 }
 0x6e8   : > { %v8304_v32 = vadd.f32 %v8210_v42, %v8080_v34  ;;  %v8081_v28 = vmul.f32 %v16054_v54, %v7998_v27  ;;  %v8241_v45 = vrot.slane %v17433_v17, 1  ;;  %v8235_v34 = vrot.slane %v17435_v46, 1 }
 0x6e9   : > { %8338 = vst.msk [vmem:[%s16069_s30 + $0x90] sm:$0xff] %vm586_vm0, %v8306_v43  ;;  %v8307_v62 = vadd.f32 %v8219_v11, %v8083_v55  ;;  %v17436_v11 = vld [vmem:[#allocation37_spill] sm:$0xff]  ;;  %v8240_v43 = vsel %vm1628_vm2, %v8238_v29, %v8239_v44 }
 0x6ea   : > { %8336 = vst.msk [vmem:[%s16069_s30 + $0x80] sm:$0xff] %vm586_vm0, %v8304_v32  ;;  %v8305_v33 = vadd.f32 %v8213_v10, %v8081_v28  ;;  %v8642_v38 = vpop.f32.mrb[20].mxu1  ;;  %v8236_v27 = vrot.slane %v17436_v11, 1  ;;  %v8234_v28 = vsel %vm1628_vm2, %v8232_v26, %v8233_v47  ;;  %v8243_v57 = vsel %vm1628_vm2, %v8241_v45, %v8242_v56 }
 0x6eb   : > { %8339 = vst.msk [vmem:[%s16069_s30 + $0x98] sm:$0xff] %vm586_vm0, %v8307_v62  ;;  %v8019_v3 = vadd.f32 %v8642_v38, %v16045_v6  ;;  %v8010_v4 = vpop.f32.mrb[21].mxu1 }
 0x6ec   : > { %8337 = vst.msk [vmem:[%s16069_s30 + $0x88] sm:$0xff] %vm586_vm0, %v8305_v33  ;;  %v8011_v19 = vadd.f32 %v16045_v6, %v8010_v4  ;;  %v8643_v48 = vpop.f32.mrb[22].mxu1  ;;  %v8237_v41 = vsel %vm1628_vm2, %v8235_v34, %v8236_v27  ;;  %v17439_v4 = vld [vmem:[#allocation86_spill] sm:$0xff] }
 0x6ed   : > { %v8086_v59 = vmul.f32 %v16054_v54, %v8019_v3  ;;  %v8022_v13 = vadd.f32 %v8643_v48, %v16045_v6  ;;  %v8013_v21 = vpop.f32.mrb[23].mxu1  ;;  %v8251_v3 = vrot.slane %v17438_v53, 1  ;;  %v8244_v40 = vrot.slane %v17439_v4, 1  ;;  %v17442_v48 = vld [vmem:[#allocation103_spill] sm:$0xff] }
 0x6ee   : > { %v8084_v14 = vmul.f32 %v16054_v54, %v8011_v19  ;;  %v8014_v5 = vadd.f32 %v16045_v6, %v8013_v21  ;;  %v17443_v21 = vld [vmem:[#allocation90_spill] sm:$0xff] }
 0x6ef   : > { %v8310_v35 = vadd.f32 %v8228_v61, %v8086_v59  ;;  %v8087_v24 = vmul.f32 %v16054_v54, %v8022_v13  ;;  %v17441_v61 = vld [vmem:[#allocation100_spill] sm:$0xff]  ;;  %v8254_v59 = vrot.slane %v17442_v48, 1 }
 0x6f0   : > { %v8308_v49 = vadd.f32 %v8222_v7, %v8084_v14  ;;  %v8085_v8 = vmul.f32 %v16054_v54, %v8014_v5  ;;  %v8253_v19 = vrot.slane %v17441_v61, 1  ;;  %v8247_v14 = vrot.slane %v17443_v21, 1 }
 0x6f1   : > { %8342 = vst.msk [vmem:[%s16069_s30 + $0xb0] sm:$0xff] %vm586_vm0, %v8310_v35  ;;  %v8311_v31 = vadd.f32 %v8231_v15, %v8087_v24  ;;  %v17444_v15 = vld [vmem:[#allocation91_spill] sm:$0xff]  ;;  %v8252_v35 = vsel %vm1628_vm2, %v8250_v0, %v8251_v3 }
 0x6f2   : > { %8340 = vst.msk [vmem:[%s16069_s30 + $0xa0] sm:$0xff] %vm586_vm0, %v8308_v49  ;;  %v8309_v9 = vadd.f32 %v8225_v30, %v8085_v8  ;;  %v8646_v39 = vpop.f32.mrb[24].mxu1  ;;  %v8248_v5 = vrot.slane %v17444_v15, 1  ;;  %v8246_v8 = vsel %vm1628_vm2, %v8244_v40, %v8245_v22  ;;  %v8255_v44 = vsel %vm1628_vm2, %v8253_v19, %v8254_v59 }
 0x6f3   : > { %8343 = vst.msk [vmem:[%s16069_s30 + $0xb8] sm:$0xff] %vm586_vm0, %v8311_v31  ;;  %v8035_v42 = vadd.f32 %v8646_v39, %v16045_v6  ;;  %v8026_v16 = vpop.f32.mrb[25].mxu1 }
 0x6f4   : > { %8341 = vst.msk [vmem:[%s16069_s30 + $0xa8] sm:$0xff] %vm586_vm0, %v8309_v9  ;;  %v8027_v55 = vadd.f32 %v16045_v6, %v8026_v16  ;;  %v8647_v10 = vpop.f32.mrb[26].mxu1  ;;  %v8249_v25 = vsel %vm1628_vm2, %v8247_v14, %v8248_v5 }
 0x6f5   : > { %v8090_v32 = vmul.f32 %v16054_v54, %v8035_v42  ;;  %v8038_v58 = vadd.f32 %v8647_v10, %v16045_v6  ;;  %v8029_v36 = vpop.f32.mrb[27].mxu1 }
 0x6f6   : > { %v8088_v37 = vmul.f32 %v16054_v54, %v8027_v55  ;;  %v8030_v62 = vadd.f32 %v16045_v6, %v8029_v36 }
 0x6f7   : > { %v8314_v23 = vadd.f32 %v8240_v43, %v8090_v32  ;;  %v8091_v2 = vmul.f32 %v16054_v54, %v8038_v58 }
 0x6f8   : > { %v8312_v18 = vadd.f32 %v8234_v28, %v8088_v37  ;;  %v8089_v33 = vmul.f32 %v16054_v54, %v8030_v62 }
 0x6f9   : > { %8346 = vst.msk [vmem:[%s16069_s30 + $0xd0] sm:$0xff] %vm586_vm0, %v8314_v23  ;;  %v8315_v38 = vadd.f32 %v8243_v57, %v8091_v2 }
 0x6fa   : > { %8344 = vst.msk [vmem:[%s16069_s30 + $0xc0] sm:$0xff] %vm586_vm0, %v8312_v18  ;;  %v8313_v60 = vadd.f32 %v8237_v41, %v8089_v33 }
 0x6fb   : > { %8347 = vst.msk [vmem:[%s16069_s30 + $0xd8] sm:$0xff] %vm586_vm0, %v8315_v38 }
 0x6fc   : > { %8345 = vst.msk [vmem:[%s16069_s30 + $0xc8] sm:$0xff] %vm586_vm0, %v8313_v60 }
 0x741   : > { %v8650_v50 = vpop.f32.mrb[28].mxu1 }
 0x742   : > { %v8051_v7 = vadd.f32 %v8650_v50, %v16045_v6  ;;  %v8042_v13 = vpop.f32.mrb[29].mxu1 }
 0x743   : > { %v8043_v24 = vadd.f32 %v16045_v6, %v8042_v13  ;;  %v8651_v30 = vpop.f32.mrb[30].mxu1 }
 0x744   : > { %v8094_v49 = vmul.f32 %v16054_v54, %v8051_v7  ;;  %v8054_v1 = vadd.f32 %v8651_v30, %v16045_v6  ;;  %v8045_v29 = vpop.f32.mrb[31].mxu1 }
 0x745   : > { %v8092_v63 = vmul.f32 %v16054_v54, %v8043_v24  ;;  %v8046_v31 = vadd.f32 %v16045_v6, %v8045_v29 }
 0x746   : > { %v8318_v51 = vadd.f32 %v8252_v35, %v8094_v49  ;;  %v8095_v26 = vmul.f32 %v16054_v54, %v8054_v1 }
 0x747   : > { %v8316_v47 = vadd.f32 %v8246_v8, %v8092_v63  ;;  %v8093_v9 = vmul.f32 %v16054_v54, %v8046_v31 }
 0x748   : > { %8350 = vst.msk [vmem:[%s16069_s30 + $0xf0] sm:$0xff] %vm586_vm0, %v8318_v51  ;;  %v8319_v39 = vadd.f32 %v8255_v44, %v8095_v26 }
 0x749   : > { %8348 = vst.msk [vmem:[%s16069_s30 + $0xe0] sm:$0xff] %vm586_vm0, %v8316_v47  ;;  %v8317_v17 = vadd.f32 %v8249_v25, %v8093_v9 }
 0x74a   : > { %8351 = vst.msk [vmem:[%s16069_s30 + $0xf8] sm:$0xff] %vm586_vm0, %v8319_v39 }
 0x74b   : > { %8349 = vst.msk [vmem:[%s16069_s30 + $0xe8] sm:$0xff] %vm586_vm0, %v8317_v17 }
 0x74c PF: > { %s21_s21 = sadd.s32 1, %s9191_s21   ;;  %s17445_s17 = smov %s9183_s19 }
 0x74d   : > { %p18_p8 = scmp.ge.s32.totalorder %s21_s21, 6   ;;  %s17446_s18 = smov %s9187_s20 }
 0x74e   : > { %s17447_s19 = smov %s17450_s22  ;;  %s17448_s20 = smov %s17454_s23 }
 0x74f   :  { %20 = sbr.rel (!%p18_p8) target bundleno = 3 (0x3), region = 99 }

</bundles_post_ra>
